<compile_context>
chip_gen: v5e
topology: v5e:2x2
jax: 0.10.0
libtpu: 0.0.40
codegen_flags: <defaults>
</compile_context>

<pallas_src>
import math
import numpy as np
import jax
import jax.numpy as jnp
from jax import lax
from jax.experimental import pallas as pl
from jax.experimental.pallas import tpu as pltpu

LANE = 128
SUBLANE = 8


def _rup(n, m):
    return ((n + m - 1) // m) * m


# ----------------------------------------------------------------------------
# Diffusion schedule ("vp" beta schedule) + precomputed per-timestep scalars
# ----------------------------------------------------------------------------
def vp_beta_schedule(n_timesteps):
    t = np.arange(1, n_timesteps + 1, dtype=np.float64)
    T = float(n_timesteps)
    b_max, b_min = 10.0, 0.1
    alpha = np.exp(-b_min / T - 0.5 * (b_max - b_min) * (2.0 * t - 1.0) / T ** 2)
    return 1.0 - alpha


def make_schedule(n_timesteps, noise_ratio):
    betas = vp_beta_schedule(n_timesteps)
    alphas = 1.0 - betas
    ac = np.cumprod(alphas)
    ac_prev = np.concatenate([[1.0], ac[:-1]])

    sqrt_recip_ac = np.sqrt(1.0 / ac)
    sqrt_recipm1_ac = np.sqrt(1.0 / ac - 1.0)
    post_var = betas * (1.0 - ac_prev) / (1.0 - ac)
    post_logvar = np.log(np.clip(post_var, 1e-20, None))
    coef1 = betas * np.sqrt(ac_prev) / (1.0 - ac)
    coef2 = (1.0 - ac_prev) * np.sqrt(alphas) / (1.0 - ac)
    nonzero = (np.arange(n_timesteps) != 0).astype(np.float64)
    # sigma_t = nonzero_mask * exp(0.5 * log_var) * noise_ratio
    sigma = nonzero * np.exp(0.5 * post_logvar) * noise_ratio

    coefs = np.stack(
        [sqrt_recip_ac, sqrt_recipm1_ac, coef1, coef2, sigma], axis=1
    ).astype(np.float32)                       # (T, 5)
    # Flattened 1-D for SMEM scalar prefetch (avoids 2-D SMEM (T,5)->(24,128) padding).
    return jnp.asarray(coefs.reshape(-1))      # (T*5,)


def make_sin_table(n_timesteps, t_dim):
    half = t_dim // 2
    scale = math.log(10000.0) / (half - 1)
    freqs = np.exp(-scale * np.arange(half, dtype=np.float64))
    args = np.arange(n_timesteps, dtype=np.float64)[:, None] * freqs[None, :]
    tab = np.concatenate([np.sin(args), np.cos(args)], axis=1).astype(np.float32)
    return jnp.asarray(tab)                    # (T, TD)


# ----------------------------------------------------------------------------
# Model (noise-prediction MLP) parameters — deterministic init
# ----------------------------------------------------------------------------
def make_model_params(key, state_dim, action_dim, t_dim, hidden):
    def linear(k, fan_in, fan_out):
        k1, k2 = jax.random.split(k)
        bound = 1.0 / math.sqrt(fan_in)
        w = jax.random.uniform(k1, (fan_in, fan_out), jnp.float32, -bound, bound)
        b = jax.random.uniform(k2, (1, fan_out), jnp.float32, -bound, bound)
        return w, b

    ks = jax.random.split(key, 6)
    wt1, bt1 = linear(ks[0], t_dim, 2 * t_dim)
    wt2, bt2 = linear(ks[1], 2 * t_dim, t_dim)
    in_dim = action_dim + t_dim + state_dim
    w1, b1 = linear(ks[2], in_dim, hidden)
    # split the first layer so the kernel avoids an in-kernel concat:
    wx = w1[:action_dim]
    wte = w1[action_dim:action_dim + t_dim]
    ws = w1[action_dim + t_dim:]
    w2, b2 = linear(ks[3], hidden, hidden)
    w3, b3 = linear(ks[4], hidden, hidden)
    wf, bf = linear(ks[5], hidden, action_dim)
    return dict(wt1=wt1, bt1=bt1, wt2=wt2, bt2=bt2,
                wx=wx, wte=wte, ws=ws, b1=b1,
                w2=w2, b2=b2, w3=w3, b3=b3, wf=wf, bf=bf)


def make_q_params(key, state_dim, action_dim):
    def linear(k, fan_in, fan_out):
        k1, k2 = jax.random.split(k)
        bound = 1.0 / math.sqrt(fan_in)
        w = jax.random.uniform(k1, (fan_in, fan_out), jnp.float32, -bound, bound)
        b = jax.random.uniform(k2, (1, fan_out), jnp.float32, -bound, bound)
        return w, b
    k1, k2 = jax.random.split(key)
    wq1, bq1 = linear(k1, state_dim + action_dim, 1)
    wq2, bq2 = linear(k2, state_dim + action_dim, 1)
    return dict(wq1=wq1, bq1=bq1, wq2=wq2, bq2=bq2)


# ----------------------------------------------------------------------------
# Pallas kernel: full reverse-diffusion loop (all T steps) in one invocation.
# Grid is only over batch blocks ("parallel").
# ----------------------------------------------------------------------------
def _denoise_kernel(coef_ref,                       # SMEM (T*5,) scalar prefetch
                    x0_ref, state_ref, noise_ref, teh1_ref,
                    wx_ref, ws_ref, b1_ref,
                    w2_ref, b2_ref, w3_ref, b3_ref,
                    wf_ref, bf_ref,
                    out_ref):
    T = noise_ref.shape[0]

    def mish(v):
        # x * tanh(softplus(x)) rewritten with a single transcendental (exp):
        # tanh(log(1+e^x)) = ((1+e^x)^2 - 1) / ((1+e^x)^2 + 1).
        # Clamp the exp argument: for x >= 20 the ratio is 1.0 to f32 precision,
        # so the clamp is exact and avoids inf/inf -> NaN.
        e = jnp.exp(jnp.minimum(v, 20.0))
        n = (1.0 + e) * (1.0 + e)
        return v * ((n - 1.0) / (n + 1.0))

    def dot(a, b):
        return jnp.dot(a, b, preferred_element_type=jnp.float32)

    # Load loop-invariant operands once (hoisted out of the timestep loop).
    wx = wx_ref[...]
    w2 = w2_ref[...]
    b2 = b2_ref[...]
    w3 = w3_ref[...]
    b3 = b3_ref[...]
    wf = wf_ref[...]
    bf = bf_ref[...]

    # Hoisted loop-invariant state projection: s @ Ws + b1  (one matmul total).
    sb = dot(state_ref[...], ws_ref[...]) + b1_ref[...]        # (B, H)

    def step(k, x):
        t = T - 1 - k                                          # reversed timestep

        # ---- noise-prediction MLP: eps = model(x, t, s) ----------------------
        te_h1 = teh1_ref[t]                                    # (1, H) precomputed te @ Wte
        h1 = mish(dot(x, wx) + te_h1 + sb)
        h2 = mish(dot(h1, w2) + b2)
        h3 = mish(dot(h2, w3) + b3)
        eps = dot(h3, wf) + bf                                 # (B, A_pad)

        # ---- p_sample update (scalars from flat SMEM schedule table) ---------
        src = coef_ref[5 * t + 0]                              # sqrt(1/alphas_cumprod)
        srm1 = coef_ref[5 * t + 1]                             # sqrt(1/alphas_cumprod - 1)
        c1 = coef_ref[5 * t + 2]                               # posterior_mean_coef1
        c2 = coef_ref[5 * t + 3]                               # posterior_mean_coef2
        sigma = coef_ref[5 * t + 4]                            # nonzero*exp(.5*logvar)*noise_ratio

        x_recon = jnp.clip(src * x - srm1 * eps, -1.0, 1.0)    # clip_denoised
        mean = c1 * x_recon + c2 * x
        return mean + sigma * noise_ref[t]                     # (B, A_pad)

    x_final = lax.fori_loop(0, T, step, x0_ref[...], unroll=(T <= 64))
    out_ref[...] = jnp.clip(x_final, -1.0, 1.0)                # final action.clamp_(-1, 1)


def p_sample_loop_pallas(coefs_flat, te_h1, noise, x0, state, params):
    T = noise.shape[0]
    Bp, Ap = x0.shape
    Sp = state.shape[1]
    Hp = params["w2"].shape[0]

    B_BLK = SUBLANE                                   # 8-row batch blocks ("parallel")
    nb = Bp // B_BLK

    def const(shape):
        return pl.BlockSpec(shape, lambda i, c, _n=len(shape): (0,) * _n)

    in_specs = [
        pl.BlockSpec((B_BLK, Ap), lambda i, c: (i, 0)),          # x0
        pl.BlockSpec((B_BLK, Sp), lambda i, c: (i, 0)),          # state
        pl.BlockSpec((T, B_BLK, Ap), lambda i, c: (0, i, 0)),    # noise table (all T steps)
        const((T, 1, Hp)),                                       # te_h1 table (time MLP @ Wte)
        const((Ap, Hp)), const((Sp, Hp)), const((1, Hp)),        # wx, ws, b1
        const((Hp, Hp)), const((1, Hp)),                         # w2, b2
        const((Hp, Hp)), const((1, Hp)),                         # w3, b3
        const((Hp, Ap)), const((1, Ap)),                         # wf, bf
    ]

    grid_spec = pltpu.PrefetchScalarGridSpec(
        num_scalar_prefetch=1,
        grid=(nb,),
        in_specs=in_specs,
        out_specs=pl.BlockSpec((B_BLK, Ap), lambda i, c: (i, 0)),
    )

    return pl.pallas_call(
        _denoise_kernel,
        out_shape=jax.ShapeDtypeStruct((Bp, Ap), jnp.float32),
        grid_spec=grid_spec,
        compiler_params=pltpu.CompilerParams(dimension_semantics=("parallel",)),
    )(coefs_flat, x0, state, noise, te_h1,
      params["wx"], params["ws"], params["b1"],
      params["w2"], params["b2"], params["w3"], params["b3"],
      params["wf"], params["bf"])


# ----------------------------------------------------------------------------
# Forward == Diffusion.sample(state, eval=False, q_func=..., normal=False)
# ----------------------------------------------------------------------------
def diffusion_forward(state, model_params, q_params, coefs_flat, sin_table,
                      key, action_dim, behavior_sample):
    raw_B, S = state.shape
    A = action_dim
    T = coefs_flat.shape[0] // 5
    H = model_params["w2"].shape[0]

    state_rep = jnp.tile(state, (behavior_sample, 1))            # state.repeat(N, 1)
    B = state_rep.shape[0]

    k1, k2 = jax.random.split(key)
    x0 = jax.random.normal(k1, (B, A), jnp.float32)              # x_T ~ N(0, I)
    noise = jax.random.normal(k2, (T, B, A), jnp.float32)        # per-step p_sample noise
    # TODO(synk): noise could be drawn in-kernel via pltpu.prng_seed/stateful_normal
    # to drop the (T,B,A) HBM table; kept as a single up-front DMA for robustness.

    # ---- precompute the full time-embedding path for all T steps (loop-invariant),
    #      folded through Wte so the kernel only adds a (1,H) row per step ----------
    def mish(v):
        return v * jnp.tanh(jax.nn.softplus(v))
    ht = mish(sin_table @ model_params["wt1"] + model_params["bt1"])
    te = ht @ model_params["wt2"] + model_params["bt2"]          # (T, TD)
    te_h1 = te @ model_params["wte"]                             # (T, H)

    # ---- zero-pad everything to lane-dense (128) feature dims --------------------
    Ap = _rup(A, LANE)
    Sp = _rup(S, LANE)
    Hp = _rup(H, LANE)
    Bp = _rup(B, SUBLANE)

    def pad2(a, r, c):
        return jnp.pad(a, ((0, r - a.shape[0]), (0, c - a.shape[1])))

    params_p = dict(
        wx=pad2(model_params["wx"], Ap, Hp),
        ws=pad2(model_params["ws"], Sp, Hp),
        b1=pad2(model_params["b1"], 1, Hp),
        w2=pad2(model_params["w2"], Hp, Hp),
        b2=pad2(model_params["b2"], 1, Hp),
        w3=pad2(model_params["w3"], Hp, Hp),
        b3=pad2(model_params["b3"], 1, Hp),
        wf=pad2(model_params["wf"], Hp, Ap),
        bf=pad2(model_params["bf"], 1, Ap),
    )
    te_h1_p = pad2(te_h1, T, Hp).reshape(T, 1, Hp)
    x0_p = pad2(x0, Bp, Ap)
    state_p = pad2(state_rep, Bp, Sp)
    noise_p = jnp.pad(noise, ((0, 0), (0, Bp - B), (0, Ap - A)))

    action_p = p_sample_loop_pallas(coefs_flat, te_h1_p, noise_p, x0_p,
                                    state_p, params_p)           # clamped in kernel
    action = action_p[:B, :A]

    # q_func glue (external critic; plain JAX). Concat is split into two matmuls.
    wq1, wq2 = q_params["wq1"], q_params["wq2"]
    q1 = state_rep @ wq1[:S] + action @ wq1[S:] + q_params["bq1"]
    q2 = state_rep @ wq2[:S] + action @ wq2[S:] + q_params["bq2"]
    q = jnp.minimum(q1, q2)

    action_r = action.reshape(behavior_sample, raw_B, A).transpose(1, 0, 2)
    q_r = q.reshape(behavior_sample, raw_B, 1).transpose(1, 0, 2)
    idx = jnp.argmax(q_r, axis=1)                                # (raw_B, 1)
    best = jnp.take_along_axis(
        action_r, jnp.broadcast_to(idx[:, :, None], (raw_B, 1, A)), axis=1)
    return best.reshape(raw_B, A)


diffusion_forward_jit = jax.jit(
    diffusion_forward, static_argnames=("action_dim", "behavior_sample"))


if __name__ == "__main__":
    # Small shapes consistent with the module
    STATE_DIM = 16
    ACTION_DIM = 8
    T_DIM = 16
    HIDDEN = 64
    N_TIMESTEPS = 20
    NOISE_RATIO = 0.5
    BEHAVIOR_SAMPLE = 4
    RAW_BATCH = 2

    root = jax.random.PRNGKey(0)
    k_state, k_model, k_q, k_sample = jax.random.split(root, 4)

    state = jax.random.normal(k_state, (RAW_BATCH, STATE_DIM), jnp.float32)
    model_params = make_model_params(k_model, STATE_DIM, ACTION_DIM, T_DIM, HIDDEN)
    q_params = make_q_params(k_q, STATE_DIM, ACTION_DIM)
    coefs_flat = make_schedule(N_TIMESTEPS, NOISE_RATIO)
    sin_table = make_sin_table(N_TIMESTEPS, T_DIM)

    out = diffusion_forward_jit(state, model_params, q_params, coefs_flat,
                                sin_table, k_sample, ACTION_DIM, BEHAVIOR_SAMPLE)
    out = jax.block_until_ready(out)
    assert out.shape == (RAW_BATCH, ACTION_DIM)
    assert bool(jnp.all(jnp.isfinite(out)))
    assert bool(jnp.all(jnp.abs(out) <= 1.0 + 1e-6))
    # TODO(synk): eval/sample_training paths (eval_sample=512, topk chosen>1) reuse the
    # same Pallas p_sample_loop; only the plain-JAX selection glue differs, not ported here.
    print("KERNEL_OK")
</pallas_src>

<mosaic_0001>
module attributes {stable_mosaic.version = 11 : i64} {
  func.func @_denoise_kernel(%arg0: i32, %arg1: memref<100xf32, #tpu.memory_space<smem>>, %arg2: memref<8x128xf32, #tpu.memory_space<vmem>>, %arg3: memref<8x128xf32, #tpu.memory_space<vmem>>, %arg4: memref<20x8x128xf32, #tpu.memory_space<vmem>>, %arg5: memref<20x1x128xf32, #tpu.memory_space<vmem>>, %arg6: memref<128x128xf32, #tpu.memory_space<vmem>>, %arg7: memref<128x128xf32, #tpu.memory_space<vmem>>, %arg8: memref<1x128xf32, #tpu.memory_space<vmem>>, %arg9: memref<128x128xf32, #tpu.memory_space<vmem>>, %arg10: memref<1x128xf32, #tpu.memory_space<vmem>>, %arg11: memref<128x128xf32, #tpu.memory_space<vmem>>, %arg12: memref<1x128xf32, #tpu.memory_space<vmem>>, %arg13: memref<128x128xf32, #tpu.memory_space<vmem>>, %arg14: memref<1x128xf32, #tpu.memory_space<vmem>>, %arg15: memref<8x128xf32, #tpu.memory_space<vmem>>) attributes {dimension_semantics = [#tpu.dimension_semantics<parallel>], iteration_bounds = array<i64: 1>, scalar_prefetch = 1 : i64, scratch_operands = 0 : i64, tpu.core_type = #tpu.core_type<tc>, window_params = [{transform_indices = @transform_0, window_bounds = array<i64: 8, 128>}, {transform_indices = @transform_1, window_bounds = array<i64: 8, 128>}, {transform_indices = @transform_2, window_bounds = array<i64: 20, 8, 128>}, {pipeline_mode = #tpu.pipeline_mode<synchronous>, transform_indices = @transform_3, window_bounds = array<i64: 20, 1, 128>}, {pipeline_mode = #tpu.pipeline_mode<synchronous>, transform_indices = @transform_4, window_bounds = array<i64: 128, 128>}, {pipeline_mode = #tpu.pipeline_mode<synchronous>, transform_indices = @transform_5, window_bounds = array<i64: 128, 128>}, {pipeline_mode = #tpu.pipeline_mode<synchronous>, transform_indices = @transform_6, window_bounds = array<i64: 1, 128>}, {pipeline_mode = #tpu.pipeline_mode<synchronous>, transform_indices = @transform_7, window_bounds = array<i64: 128, 128>}, {pipeline_mode = #tpu.pipeline_mode<synchronous>, transform_indices = @transform_8, window_bounds = array<i64: 1, 128>}, {pipeline_mode = #tpu.pipeline_mode<synchronous>, transform_indices = @transform_9, window_bounds = array<i64: 128, 128>}, {pipeline_mode = #tpu.pipeline_mode<synchronous>, transform_indices = @transform_10, window_bounds = array<i64: 1, 128>}, {pipeline_mode = #tpu.pipeline_mode<synchronous>, transform_indices = @transform_11, window_bounds = array<i64: 128, 128>}, {pipeline_mode = #tpu.pipeline_mode<synchronous>, transform_indices = @transform_12, window_bounds = array<i64: 1, 128>}, {transform_indices = @transform_13, window_bounds = array<i64: 8, 128>}]} {
    %c0 = arith.constant 0 : index
    %c0_0 = arith.constant 0 : index
    %0 = vector.load %arg6[%c0, %c0_0] : memref<128x128xf32, #tpu.memory_space<vmem>>, vector<128x128xf32>
    %c0_1 = arith.constant 0 : index
    %c0_2 = arith.constant 0 : index
    %1 = vector.load %arg9[%c0_1, %c0_2] : memref<128x128xf32, #tpu.memory_space<vmem>>, vector<128x128xf32>
    %c0_3 = arith.constant 0 : index
    %c0_4 = arith.constant 0 : index
    %2 = vector.load %arg10[%c0_3, %c0_4] : memref<1x128xf32, #tpu.memory_space<vmem>>, vector<1x128xf32>
    %c0_5 = arith.constant 0 : index
    %c0_6 = arith.constant 0 : index
    %3 = vector.load %arg11[%c0_5, %c0_6] : memref<128x128xf32, #tpu.memory_space<vmem>>, vector<128x128xf32>
    %c0_7 = arith.constant 0 : index
    %c0_8 = arith.constant 0 : index
    %4 = vector.load %arg12[%c0_7, %c0_8] : memref<1x128xf32, #tpu.memory_space<vmem>>, vector<1x128xf32>
    %c0_9 = arith.constant 0 : index
    %c0_10 = arith.constant 0 : index
    %5 = vector.load %arg13[%c0_9, %c0_10] : memref<128x128xf32, #tpu.memory_space<vmem>>, vector<128x128xf32>
    %c0_11 = arith.constant 0 : index
    %c0_12 = arith.constant 0 : index
    %6 = vector.load %arg14[%c0_11, %c0_12] : memref<1x128xf32, #tpu.memory_space<vmem>>, vector<1x128xf32>
    %c0_13 = arith.constant 0 : index
    %c0_14 = arith.constant 0 : index
    %7 = vector.load %arg3[%c0_13, %c0_14] : memref<8x128xf32, #tpu.memory_space<vmem>>, vector<8x128xf32>
    %c0_15 = arith.constant 0 : index
    %c0_16 = arith.constant 0 : index
    %8 = vector.load %arg7[%c0_15, %c0_16] : memref<128x128xf32, #tpu.memory_space<vmem>>, vector<128x128xf32>
    %cst = arith.constant dense<0.000000e+00> : vector<8x128xf32>
    %9 = tpu.matmul %7, %8, %cst {dimension_numbers = #tpu.dot_dimension_numbers<[1], [0], [0], [1], [0, 0, 1, 1], [], []>} : vector<8x128xf32>, vector<128x128xf32>, vector<8x128xf32> -> vector<8x128xf32>
    %c0_17 = arith.constant 0 : index
    %c0_18 = arith.constant 0 : index
    %10 = vector.load %arg8[%c0_17, %c0_18] : memref<1x128xf32, #tpu.memory_space<vmem>>, vector<1x128xf32>
    %11 = vector.broadcast %10 : vector<1x128xf32> to vector<8x128xf32>
    %12 = arith.addf %9, %11 : vector<8x128xf32>
    %c0_19 = arith.constant 0 : index
    %c0_20 = arith.constant 0 : index
    %13 = vector.load %arg2[%c0_19, %c0_20] : memref<8x128xf32, #tpu.memory_space<vmem>>, vector<8x128xf32>
    %c0_i32 = arith.constant 0 : i32
    %c19_i32 = arith.constant 19 : i32
    %14 = arith.subi %c19_i32, %c0_i32 : i32
    %15 = arith.index_cast %14 : i32 to index
    %c0_21 = arith.constant 0 : index
    %c0_22 = arith.constant 0 : index
    %16 = vector.load %arg5[%15, %c0_21, %c0_22] : memref<20x1x128xf32, #tpu.memory_space<vmem>>, vector<1x1x128xf32>
    %17 = vector.shape_cast %16 : vector<1x1x128xf32> to vector<1x128xf32>
    %cst_23 = arith.constant dense<0.000000e+00> : vector<8x128xf32>
    %18 = tpu.matmul %13, %0, %cst_23 {dimension_numbers = #tpu.dot_dimension_numbers<[1], [0], [0], [1], [0, 0, 1, 1], [], []>} : vector<8x128xf32>, vector<128x128xf32>, vector<8x128xf32> -> vector<8x128xf32>
    %19 = vector.broadcast %17 : vector<1x128xf32> to vector<8x128xf32>
    %20 = arith.addf %18, %19 : vector<8x128xf32>
    %21 = arith.addf %20, %12 : vector<8x128xf32>
    %cst_24 = arith.constant 2.000000e+01 : f32
    %22 = vector.broadcast %cst_24 : f32 to vector<8x128xf32>
    %23 = arith.minimumf %21, %22 : vector<8x128xf32>
    %24 = math.exp %23 : vector<8x128xf32>
    %cst_25 = arith.constant 1.000000e+00 : f32
    %25 = vector.broadcast %cst_25 : f32 to vector<8x128xf32>
    %26 = arith.addf %25, %24 : vector<8x128xf32>
    %cst_26 = arith.constant 1.000000e+00 : f32
    %27 = vector.broadcast %cst_26 : f32 to vector<8x128xf32>
    %28 = arith.addf %27, %24 : vector<8x128xf32>
    %29 = arith.mulf %26, %28 : vector<8x128xf32>
    %cst_27 = arith.constant 1.000000e+00 : f32
    %30 = vector.broadcast %cst_27 : f32 to vector<8x128xf32>
    %31 = arith.subf %29, %30 : vector<8x128xf32>
    %cst_28 = arith.constant 1.000000e+00 : f32
    %32 = vector.broadcast %cst_28 : f32 to vector<8x128xf32>
    %33 = arith.addf %29, %32 : vector<8x128xf32>
    %34 = arith.divf %31, %33 : vector<8x128xf32>
    %35 = arith.mulf %21, %34 : vector<8x128xf32>
    %cst_29 = arith.constant dense<0.000000e+00> : vector<8x128xf32>
    %36 = tpu.matmul %35, %1, %cst_29 {dimension_numbers = #tpu.dot_dimension_numbers<[1], [0], [0], [1], [0, 0, 1, 1], [], []>} : vector<8x128xf32>, vector<128x128xf32>, vector<8x128xf32> -> vector<8x128xf32>
    %37 = vector.broadcast %2 : vector<1x128xf32> to vector<8x128xf32>
    %38 = arith.addf %36, %37 : vector<8x128xf32>
    %cst_30 = arith.constant 2.000000e+01 : f32
    %39 = vector.broadcast %cst_30 : f32 to vector<8x128xf32>
    %40 = arith.minimumf %38, %39 : vector<8x128xf32>
    %41 = math.exp %40 : vector<8x128xf32>
    %cst_31 = arith.constant 1.000000e+00 : f32
    %42 = vector.broadcast %cst_31 : f32 to vector<8x128xf32>
    %43 = arith.addf %42, %41 : vector<8x128xf32>
    %cst_32 = arith.constant 1.000000e+00 : f32
    %44 = vector.broadcast %cst_32 : f32 to vector<8x128xf32>
    %45 = arith.addf %44, %41 : vector<8x128xf32>
    %46 = arith.mulf %43, %45 : vector<8x128xf32>
    %cst_33 = arith.constant 1.000000e+00 : f32
    %47 = vector.broadcast %cst_33 : f32 to vector<8x128xf32>
    %48 = arith.subf %46, %47 : vector<8x128xf32>
    %cst_34 = arith.constant 1.000000e+00 : f32
    %49 = vector.broadcast %cst_34 : f32 to vector<8x128xf32>
    %50 = arith.addf %46, %49 : vector<8x128xf32>
    %51 = arith.divf %48, %50 : vector<8x128xf32>
    %52 = arith.mulf %38, %51 : vector<8x128xf32>
    %cst_35 = arith.constant dense<0.000000e+00> : vector<8x128xf32>
    %53 = tpu.matmul %52, %3, %cst_35 {dimension_numbers = #tpu.dot_dimension_numbers<[1], [0], [0], [1], [0, 0, 1, 1], [], []>} : vector<8x128xf32>, vector<128x128xf32>, vector<8x128xf32> -> vector<8x128xf32>
    %54 = vector.broadcast %4 : vector<1x128xf32> to vector<8x128xf32>
    %55 = arith.addf %53, %54 : vector<8x128xf32>
    %cst_36 = arith.constant 2.000000e+01 : f32
    %56 = vector.broadcast %cst_36 : f32 to vector<8x128xf32>
    %57 = arith.minimumf %55, %56 : vector<8x128xf32>
    %58 = math.exp %57 : vector<8x128xf32>
    %cst_37 = arith.constant 1.000000e+00 : f32
    %59 = vector.broadcast %cst_37 : f32 to vector<8x128xf32>
    %60 = arith.addf %59, %58 : vector<8x128xf32>
    %cst_38 = arith.constant 1.000000e+00 : f32
    %61 = vector.broadcast %cst_38 : f32 to vector<8x128xf32>
    %62 = arith.addf %61, %58 : vector<8x128xf32>
    %63 = arith.mulf %60, %62 : vector<8x128xf32>
    %cst_39 = arith.constant 1.000000e+00 : f32
    %64 = vector.broadcast %cst_39 : f32 to vector<8x128xf32>
    %65 = arith.subf %63, %64 : vector<8x128xf32>
    %cst_40 = arith.constant 1.000000e+00 : f32
    %66 = vector.broadcast %cst_40 : f32 to vector<8x128xf32>
    %67 = arith.addf %63, %66 : vector<8x128xf32>
    %68 = arith.divf %65, %67 : vector<8x128xf32>
    %69 = arith.mulf %55, %68 : vector<8x128xf32>
    %cst_41 = arith.constant dense<0.000000e+00> : vector<8x128xf32>
    %70 = tpu.matmul %69, %5, %cst_41 {dimension_numbers = #tpu.dot_dimension_numbers<[1], [0], [0], [1], [0, 0, 1, 1], [], []>} : vector<8x128xf32>, vector<128x128xf32>, vector<8x128xf32> -> vector<8x128xf32>
    %71 = vector.broadcast %6 : vector<1x128xf32> to vector<8x128xf32>
    %72 = arith.addf %70, %71 : vector<8x128xf32>
    %c5_i32 = arith.constant 5 : i32
    %73 = arith.muli %c5_i32, %14 : i32
    %c0_i32_42 = arith.constant 0 : i32
    %74 = arith.addi %73, %c0_i32_42 : i32
    %75 = arith.index_cast %74 : i32 to index
    %76 = memref.load %arg1[%75] : memref<100xf32, #tpu.memory_space<smem>>
    %c5_i32_43 = arith.constant 5 : i32
    %77 = arith.muli %c5_i32_43, %14 : i32
    %c1_i32 = arith.constant 1 : i32
    %78 = arith.addi %77, %c1_i32 : i32
    %79 = arith.index_cast %78 : i32 to index
    %80 = memref.load %arg1[%79] : memref<100xf32, #tpu.memory_space<smem>>
    %c5_i32_44 = arith.constant 5 : i32
    %81 = arith.muli %c5_i32_44, %14 : i32
    %c2_i32 = arith.constant 2 : i32
    %82 = arith.addi %81, %c2_i32 : i32
    %83 = arith.index_cast %82 : i32 to index
    %84 = memref.load %arg1[%83] : memref<100xf32, #tpu.memory_space<smem>>
    %c5_i32_45 = arith.constant 5 : i32
    %85 = arith.muli %c5_i32_45, %14 : i32
    %c3_i32 = arith.constant 3 : i32
    %86 = arith.addi %85, %c3_i32 : i32
    %87 = arith.index_cast %86 : i32 to index
    %88 = memref.load %arg1[%87] : memref<100xf32, #tpu.memory_space<smem>>
    %c5_i32_46 = arith.constant 5 : i32
    %89 = arith.muli %c5_i32_46, %14 : i32
    %c4_i32 = arith.constant 4 : i32
    %90 = arith.addi %89, %c4_i32 : i32
    %91 = arith.index_cast %90 : i32 to index
    %92 = memref.load %arg1[%91] : memref<100xf32, #tpu.memory_space<smem>>
    %93 = vector.broadcast %76 : f32 to vector<8x128xf32>
    %94 = arith.mulf %93, %13 : vector<8x128xf32>
    %95 = vector.broadcast %80 : f32 to vector<8x128xf32>
    %96 = arith.mulf %95, %72 : vector<8x128xf32>
    %97 = arith.subf %94, %96 : vector<8x128xf32>
    %cst_47 = arith.constant -1.000000e+00 : f32
    %cst_48 = arith.constant 1.000000e+00 : f32
    %98 = vector.broadcast %cst_47 : f32 to vector<8x128xf32>
    %99 = arith.maximumf %98, %97 : vector<8x128xf32>
    %100 = vector.broadcast %cst_48 : f32 to vector<8x128xf32>
    %101 = arith.minimumf %100, %99 : vector<8x128xf32>
    %102 = vector.broadcast %84 : f32 to vector<8x128xf32>
    %103 = arith.mulf %102, %101 : vector<8x128xf32>
    %104 = vector.broadcast %88 : f32 to vector<8x128xf32>
    %105 = arith.mulf %104, %13 : vector<8x128xf32>
    %106 = arith.addf %103, %105 : vector<8x128xf32>
    %107 = arith.index_cast %14 : i32 to index
    %c0_49 = arith.constant 0 : index
    %c0_50 = arith.constant 0 : index
    %108 = vector.load %arg4[%107, %c0_49, %c0_50] : memref<20x8x128xf32, #tpu.memory_space<vmem>>, vector<1x8x128xf32>
    %109 = vector.shape_cast %108 : vector<1x8x128xf32> to vector<8x128xf32>
    %110 = vector.broadcast %92 : f32 to vector<8x128xf32>
    %111 = arith.mulf %110, %109 : vector<8x128xf32>
    %112 = arith.addf %106, %111 : vector<8x128xf32>
    %c1_i32_51 = arith.constant 1 : i32
    %c19_i32_52 = arith.constant 19 : i32
    %113 = arith.subi %c19_i32_52, %c1_i32_51 : i32
    %114 = arith.index_cast %113 : i32 to index
    %c0_53 = arith.constant 0 : index
    %c0_54 = arith.constant 0 : index
    %115 = vector.load %arg5[%114, %c0_53, %c0_54] : memref<20x1x128xf32, #tpu.memory_space<vmem>>, vector<1x1x128xf32>
    %116 = vector.shape_cast %115 : vector<1x1x128xf32> to vector<1x128xf32>
    %cst_55 = arith.constant dense<0.000000e+00> : vector<8x128xf32>
    %117 = tpu.matmul %112, %0, %cst_55 {dimension_numbers = #tpu.dot_dimension_numbers<[1], [0], [0], [1], [0, 0, 1, 1], [], []>} : vector<8x128xf32>, vector<128x128xf32>, vector<8x128xf32> -> vector<8x128xf32>
    %118 = vector.broadcast %116 : vector<1x128xf32> to vector<8x128xf32>
    %119 = arith.addf %117, %118 : vector<8x128xf32>
    %120 = arith.addf %119, %12 : vector<8x128xf32>
    %cst_56 = arith.constant 2.000000e+01 : f32
    %121 = vector.broadcast %cst_56 : f32 to vector<8x128xf32>
    %122 = arith.minimumf %120, %121 : vector<8x128xf32>
    %123 = math.exp %122 : vector<8x128xf32>
    %cst_57 = arith.constant 1.000000e+00 : f32
    %124 = vector.broadcast %cst_57 : f32 to vector<8x128xf32>
    %125 = arith.addf %124, %123 : vector<8x128xf32>
    %cst_58 = arith.constant 1.000000e+00 : f32
    %126 = vector.broadcast %cst_58 : f32 to vector<8x128xf32>
    %127 = arith.addf %126, %123 : vector<8x128xf32>
    %128 = arith.mulf %125, %127 : vector<8x128xf32>
    %cst_59 = arith.constant 1.000000e+00 : f32
    %129 = vector.broadcast %cst_59 : f32 to vector<8x128xf32>
    %130 = arith.subf %128, %129 : vector<8x128xf32>
    %cst_60 = arith.constant 1.000000e+00 : f32
    %131 = vector.broadcast %cst_60 : f32 to vector<8x128xf32>
    %132 = arith.addf %128, %131 : vector<8x128xf32>
    %133 = arith.divf %130, %132 : vector<8x128xf32>
    %134 = arith.mulf %120, %133 : vector<8x128xf32>
    %cst_61 = arith.constant dense<0.000000e+00> : vector<8x128xf32>
    %135 = tpu.matmul %134, %1, %cst_61 {dimension_numbers = #tpu.dot_dimension_numbers<[1], [0], [0], [1], [0, 0, 1, 1], [], []>} : vector<8x128xf32>, vector<128x128xf32>, vector<8x128xf32> -> vector<8x128xf32>
    %136 = vector.broadcast %2 : vector<1x128xf32> to vector<8x128xf32>
    %137 = arith.addf %135, %136 : vector<8x128xf32>
    %cst_62 = arith.constant 2.000000e+01 : f32
    %138 = vector.broadcast %cst_62 : f32 to vector<8x128xf32>
    %139 = arith.minimumf %137, %138 : vector<8x128xf32>
    %140 = math.exp %139 : vector<8x128xf32>
    %cst_63 = arith.constant 1.000000e+00 : f32
    %141 = vector.broadcast %cst_63 : f32 to vector<8x128xf32>
    %142 = arith.addf %141, %140 : vector<8x128xf32>
    %cst_64 = arith.constant 1.000000e+00 : f32
    %143 = vector.broadcast %cst_64 : f32 to vector<8x128xf32>
    %144 = arith.addf %143, %140 : vector<8x128xf32>
    %145 = arith.mulf %142, %144 : vector<8x128xf32>
    %cst_65 = arith.constant 1.000000e+00 : f32
    %146 = vector.broadcast %cst_65 : f32 to vector<8x128xf32>
    %147 = arith.subf %145, %146 : vector<8x128xf32>
    %cst_66 = arith.constant 1.000000e+00 : f32
    %148 = vector.broadcast %cst_66 : f32 to vector<8x128xf32>
    %149 = arith.addf %145, %148 : vector<8x128xf32>
    %150 = arith.divf %147, %149 : vector<8x128xf32>
    %151 = arith.mulf %137, %150 : vector<8x128xf32>
    %cst_67 = arith.constant dense<0.000000e+00> : vector<8x128xf32>
    %152 = tpu.matmul %151, %3, %cst_67 {dimension_numbers = #tpu.dot_dimension_numbers<[1], [0], [0], [1], [0, 0, 1, 1], [], []>} : vector<8x128xf32>, vector<128x128xf32>, vector<8x128xf32> -> vector<8x128xf32>
    %153 = vector.broadcast %4 : vector<1x128xf32> to vector<8x128xf32>
    %154 = arith.addf %152, %153 : vector<8x128xf32>
    %cst_68 = arith.constant 2.000000e+01 : f32
    %155 = vector.broadcast %cst_68 : f32 to vector<8x128xf32>
    %156 = arith.minimumf %154, %155 : vector<8x128xf32>
    %157 = math.exp %156 : vector<8x128xf32>
    %cst_69 = arith.constant 1.000000e+00 : f32
    %158 = vector.broadcast %cst_69 : f32 to vector<8x128xf32>
    %159 = arith.addf %158, %157 : vector<8x128xf32>
    %cst_70 = arith.constant 1.000000e+00 : f32
    %160 = vector.broadcast %cst_70 : f32 to vector<8x128xf32>
    %161 = arith.addf %160, %157 : vector<8x128xf32>
    %162 = arith.mulf %159, %161 : vector<8x128xf32>
    %cst_71 = arith.constant 1.000000e+00 : f32
    %163 = vector.broadcast %cst_71 : f32 to vector<8x128xf32>
    %164 = arith.subf %162, %163 : vector<8x128xf32>
    %cst_72 = arith.constant 1.000000e+00 : f32
    %165 = vector.broadcast %cst_72 : f32 to vector<8x128xf32>
    %166 = arith.addf %162, %165 : vector<8x128xf32>
    %167 = arith.divf %164, %166 : vector<8x128xf32>
    %168 = arith.mulf %154, %167 : vector<8x128xf32>
    %cst_73 = arith.constant dense<0.000000e+00> : vector<8x128xf32>
    %169 = tpu.matmul %168, %5, %cst_73 {dimension_numbers = #tpu.dot_dimension_numbers<[1], [0], [0], [1], [0, 0, 1, 1], [], []>} : vector<8x128xf32>, vector<128x128xf32>, vector<8x128xf32> -> vector<8x128xf32>
    %170 = vector.broadcast %6 : vector<1x128xf32> to vector<8x128xf32>
    %171 = arith.addf %169, %170 : vector<8x128xf32>
    %c5_i32_74 = arith.constant 5 : i32
    %172 = arith.muli %c5_i32_74, %113 : i32
    %c0_i32_75 = arith.constant 0 : i32
    %173 = arith.addi %172, %c0_i32_75 : i32
    %174 = arith.index_cast %173 : i32 to index
    %175 = memref.load %arg1[%174] : memref<100xf32, #tpu.memory_space<smem>>
    %c5_i32_76 = arith.constant 5 : i32
    %176 = arith.muli %c5_i32_76, %113 : i32
    %c1_i32_77 = arith.constant 1 : i32
    %177 = arith.addi %176, %c1_i32_77 : i32
    %178 = arith.index_cast %177 : i32 to index
    %179 = memref.load %arg1[%178] : memref<100xf32, #tpu.memory_space<smem>>
    %c5_i32_78 = arith.constant 5 : i32
    %180 = arith.muli %c5_i32_78, %113 : i32
    %c2_i32_79 = arith.constant 2 : i32
    %181 = arith.addi %180, %c2_i32_79 : i32
    %182 = arith.index_cast %181 : i32 to index
    %183 = memref.load %arg1[%182] : memref<100xf32, #tpu.memory_space<smem>>
    %c5_i32_80 = arith.constant 5 : i32
    %184 = arith.muli %c5_i32_80, %113 : i32
    %c3_i32_81 = arith.constant 3 : i32
    %185 = arith.addi %184, %c3_i32_81 : i32
    %186 = arith.index_cast %185 : i32 to index
    %187 = memref.load %arg1[%186] : memref<100xf32, #tpu.memory_space<smem>>
    %c5_i32_82 = arith.constant 5 : i32
    %188 = arith.muli %c5_i32_82, %113 : i32
    %c4_i32_83 = arith.constant 4 : i32
    %189 = arith.addi %188, %c4_i32_83 : i32
    %190 = arith.index_cast %189 : i32 to index
    %191 = memref.load %arg1[%190] : memref<100xf32, #tpu.memory_space<smem>>
    %192 = vector.broadcast %175 : f32 to vector<8x128xf32>
    %193 = arith.mulf %192, %112 : vector<8x128xf32>
    %194 = vector.broadcast %179 : f32 to vector<8x128xf32>
    %195 = arith.mulf %194, %171 : vector<8x128xf32>
    %196 = arith.subf %193, %195 : vector<8x128xf32>
    %cst_84 = arith.constant -1.000000e+00 : f32
    %cst_85 = arith.constant 1.000000e+00 : f32
    %197 = vector.broadcast %cst_84 : f32 to vector<8x128xf32>
    %198 = arith.maximumf %197, %196 : vector<8x128xf32>
    %199 = vector.broadcast %cst_85 : f32 to vector<8x128xf32>
    %200 = arith.minimumf %199, %198 : vector<8x128xf32>
    %201 = vector.broadcast %183 : f32 to vector<8x128xf32>
    %202 = arith.mulf %201, %200 : vector<8x128xf32>
    %203 = vector.broadcast %187 : f32 to vector<8x128xf32>
    %204 = arith.mulf %203, %112 : vector<8x128xf32>
    %205 = arith.addf %202, %204 : vector<8x128xf32>
    %206 = arith.index_cast %113 : i32 to index
    %c0_86 = arith.constant 0 : index
    %c0_87 = arith.constant 0 : index
    %207 = vector.load %arg4[%206, %c0_86, %c0_87] : memref<20x8x128xf32, #tpu.memory_space<vmem>>, vector<1x8x128xf32>
    %208 = vector.shape_cast %207 : vector<1x8x128xf32> to vector<8x128xf32>
    %209 = vector.broadcast %191 : f32 to vector<8x128xf32>
    %210 = arith.mulf %209, %208 : vector<8x128xf32>
    %211 = arith.addf %205, %210 : vector<8x128xf32>
    %c2_i32_88 = arith.constant 2 : i32
    %c19_i32_89 = arith.constant 19 : i32
    %212 = arith.subi %c19_i32_89, %c2_i32_88 : i32
    %213 = arith.index_cast %212 : i32 to index
    %c0_90 = arith.constant 0 : index
    %c0_91 = arith.constant 0 : index
    %214 = vector.load %arg5[%213, %c0_90, %c0_91] : memref<20x1x128xf32, #tpu.memory_space<vmem>>, vector<1x1x128xf32>
    %215 = vector.shape_cast %214 : vector<1x1x128xf32> to vector<1x128xf32>
    %cst_92 = arith.constant dense<0.000000e+00> : vector<8x128xf32>
    %216 = tpu.matmul %211, %0, %cst_92 {dimension_numbers = #tpu.dot_dimension_numbers<[1], [0], [0], [1], [0, 0, 1, 1], [], []>} : vector<8x128xf32>, vector<128x128xf32>, vector<8x128xf32> -> vector<8x128xf32>
    %217 = vector.broadcast %215 : vector<1x128xf32> to vector<8x128xf32>
    %218 = arith.addf %216, %217 : vector<8x128xf32>
    %219 = arith.addf %218, %12 : vector<8x128xf32>
    %cst_93 = arith.constant 2.000000e+01 : f32
    %220 = vector.broadcast %cst_93 : f32 to vector<8x128xf32>
    %221 = arith.minimumf %219, %220 : vector<8x128xf32>
    %222 = math.exp %221 : vector<8x128xf32>
    %cst_94 = arith.constant 1.000000e+00 : f32
    %223 = vector.broadcast %cst_94 : f32 to vector<8x128xf32>
    %224 = arith.addf %223, %222 : vector<8x128xf32>
    %cst_95 = arith.constant 1.000000e+00 : f32
    %225 = vector.broadcast %cst_95 : f32 to vector<8x128xf32>
    %226 = arith.addf %225, %222 : vector<8x128xf32>
    %227 = arith.mulf %224, %226 : vector<8x128xf32>
    %cst_96 = arith.constant 1.000000e+00 : f32
    %228 = vector.broadcast %cst_96 : f32 to vector<8x128xf32>
    %229 = arith.subf %227, %228 : vector<8x128xf32>
    %cst_97 = arith.constant 1.000000e+00 : f32
    %230 = vector.broadcast %cst_97 : f32 to vector<8x128xf32>
    %231 = arith.addf %227, %230 : vector<8x128xf32>
    %232 = arith.divf %229, %231 : vector<8x128xf32>
    %233 = arith.mulf %219, %232 : vector<8x128xf32>
    %cst_98 = arith.constant dense<0.000000e+00> : vector<8x128xf32>
    %234 = tpu.matmul %233, %1, %cst_98 {dimension_numbers = #tpu.dot_dimension_numbers<[1], [0], [0], [1], [0, 0, 1, 1], [], []>} : vector<8x128xf32>, vector<128x128xf32>, vector<8x128xf32> -> vector<8x128xf32>
    %235 = vector.broadcast %2 : vector<1x128xf32> to vector<8x128xf32>
    %236 = arith.addf %234, %235 : vector<8x128xf32>
    %cst_99 = arith.constant 2.000000e+01 : f32
    %237 = vector.broadcast %cst_99 : f32 to vector<8x128xf32>
    %238 = arith.minimumf %236, %237 : vector<8x128xf32>
    %239 = math.exp %238 : vector<8x128xf32>
    %cst_100 = arith.constant 1.000000e+00 : f32
    %240 = vector.broadcast %cst_100 : f32 to vector<8x128xf32>
    %241 = arith.addf %240, %239 : vector<8x128xf32>
    %cst_101 = arith.constant 1.000000e+00 : f32
    %242 = vector.broadcast %cst_101 : f32 to vector<8x128xf32>
    %243 = arith.addf %242, %239 : vector<8x128xf32>
    %244 = arith.mulf %241, %243 : vector<8x128xf32>
    %cst_102 = arith.constant 1.000000e+00 : f32
    %245 = vector.broadcast %cst_102 : f32 to vector<8x128xf32>
    %246 = arith.subf %244, %245 : vector<8x128xf32>
    %cst_103 = arith.constant 1.000000e+00 : f32
    %247 = vector.broadcast %cst_103 : f32 to vector<8x128xf32>
    %248 = arith.addf %244, %247 : vector<8x128xf32>
    %249 = arith.divf %246, %248 : vector<8x128xf32>
    %250 = arith.mulf %236, %249 : vector<8x128xf32>
    %cst_104 = arith.constant dense<0.000000e+00> : vector<8x128xf32>
    %251 = tpu.matmul %250, %3, %cst_104 {dimension_numbers = #tpu.dot_dimension_numbers<[1], [0], [0], [1], [0, 0, 1, 1], [], []>} : vector<8x128xf32>, vector<128x128xf32>, vector<8x128xf32> -> vector<8x128xf32>
    %252 = vector.broadcast %4 : vector<1x128xf32> to vector<8x128xf32>
    %253 = arith.addf %251, %252 : vector<8x128xf32>
    %cst_105 = arith.constant 2.000000e+01 : f32
    %254 = vector.broadcast %cst_105 : f32 to vector<8x128xf32>
    %255 = arith.minimumf %253, %254 : vector<8x128xf32>
    %256 = math.exp %255 : vector<8x128xf32>
    %cst_106 = arith.constant 1.000000e+00 : f32
    %257 = vector.broadcast %cst_106 : f32 to vector<8x128xf32>
    %258 = arith.addf %257, %256 : vector<8x128xf32>
    %cst_107 = arith.constant 1.000000e+00 : f32
    %259 = vector.broadcast %cst_107 : f32 to vector<8x128xf32>
    %260 = arith.addf %259, %256 : vector<8x128xf32>
    %261 = arith.mulf %258, %260 : vector<8x128xf32>
    %cst_108 = arith.constant 1.000000e+00 : f32
    %262 = vector.broadcast %cst_108 : f32 to vector<8x128xf32>
    %263 = arith.subf %261, %262 : vector<8x128xf32>
    %cst_109 = arith.constant 1.000000e+00 : f32
    %264 = vector.broadcast %cst_109 : f32 to vector<8x128xf32>
    %265 = arith.addf %261, %264 : vector<8x128xf32>
    %266 = arith.divf %263, %265 : vector<8x128xf32>
    %267 = arith.mulf %253, %266 : vector<8x128xf32>
    %cst_110 = arith.constant dense<0.000000e+00> : vector<8x128xf32>
    %268 = tpu.matmul %267, %5, %cst_110 {dimension_numbers = #tpu.dot_dimension_numbers<[1], [0], [0], [1], [0, 0, 1, 1], [], []>} : vector<8x128xf32>, vector<128x128xf32>, vector<8x128xf32> -> vector<8x128xf32>
    %269 = vector.broadcast %6 : vector<1x128xf32> to vector<8x128xf32>
    %270 = arith.addf %268, %269 : vector<8x128xf32>
    %c5_i32_111 = arith.constant 5 : i32
    %271 = arith.muli %c5_i32_111, %212 : i32
    %c0_i32_112 = arith.constant 0 : i32
    %272 = arith.addi %271, %c0_i32_112 : i32
    %273 = arith.index_cast %272 : i32 to index
    %274 = memref.load %arg1[%273] : memref<100xf32, #tpu.memory_space<smem>>
    %c5_i32_113 = arith.constant 5 : i32
    %275 = arith.muli %c5_i32_113, %212 : i32
    %c1_i32_114 = arith.constant 1 : i32
    %276 = arith.addi %275, %c1_i32_114 : i32
    %277 = arith.index_cast %276 : i32 to index
    %278 = memref.load %arg1[%277] : memref<100xf32, #tpu.memory_space<smem>>
    %c5_i32_115 = arith.constant 5 : i32
    %279 = arith.muli %c5_i32_115, %212 : i32
    %c2_i32_116 = arith.constant 2 : i32
    %280 = arith.addi %279, %c2_i32_116 : i32
    %281 = arith.index_cast %280 : i32 to index
    %282 = memref.load %arg1[%281] : memref<100xf32, #tpu.memory_space<smem>>
    %c5_i32_117 = arith.constant 5 : i32
    %283 = arith.muli %c5_i32_117, %212 : i32
    %c3_i32_118 = arith.constant 3 : i32
    %284 = arith.addi %283, %c3_i32_118 : i32
    %285 = arith.index_cast %284 : i32 to index
    %286 = memref.load %arg1[%285] : memref<100xf32, #tpu.memory_space<smem>>
    %c5_i32_119 = arith.constant 5 : i32
    %287 = arith.muli %c5_i32_119, %212 : i32
    %c4_i32_120 = arith.constant 4 : i32
    %288 = arith.addi %287, %c4_i32_120 : i32
    %289 = arith.index_cast %288 : i32 to index
    %290 = memref.load %arg1[%289] : memref<100xf32, #tpu.memory_space<smem>>
    %291 = vector.broadcast %274 : f32 to vector<8x128xf32>
    %292 = arith.mulf %291, %211 : vector<8x128xf32>
    %293 = vector.broadcast %278 : f32 to vector<8x128xf32>
    %294 = arith.mulf %293, %270 : vector<8x128xf32>
    %295 = arith.subf %292, %294 : vector<8x128xf32>
    %cst_121 = arith.constant -1.000000e+00 : f32
    %cst_122 = arith.constant 1.000000e+00 : f32
    %296 = vector.broadcast %cst_121 : f32 to vector<8x128xf32>
    %297 = arith.maximumf %296, %295 : vector<8x128xf32>
    %298 = vector.broadcast %cst_122 : f32 to vector<8x128xf32>
    %299 = arith.minimumf %298, %297 : vector<8x128xf32>
    %300 = vector.broadcast %282 : f32 to vector<8x128xf32>
    %301 = arith.mulf %300, %299 : vector<8x128xf32>
    %302 = vector.broadcast %286 : f32 to vector<8x128xf32>
    %303 = arith.mulf %302, %211 : vector<8x128xf32>
    %304 = arith.addf %301, %303 : vector<8x128xf32>
    %305 = arith.index_cast %212 : i32 to index
    %c0_123 = arith.constant 0 : index
    %c0_124 = arith.constant 0 : index
    %306 = vector.load %arg4[%305, %c0_123, %c0_124] : memref<20x8x128xf32, #tpu.memory_space<vmem>>, vector<1x8x128xf32>
    %307 = vector.shape_cast %306 : vector<1x8x128xf32> to vector<8x128xf32>
    %308 = vector.broadcast %290 : f32 to vector<8x128xf32>
    %309 = arith.mulf %308, %307 : vector<8x128xf32>
    %310 = arith.addf %304, %309 : vector<8x128xf32>
    %c3_i32_125 = arith.constant 3 : i32
    %c19_i32_126 = arith.constant 19 : i32
    %311 = arith.subi %c19_i32_126, %c3_i32_125 : i32
    %312 = arith.index_cast %311 : i32 to index
    %c0_127 = arith.constant 0 : index
    %c0_128 = arith.constant 0 : index
    %313 = vector.load %arg5[%312, %c0_127, %c0_128] : memref<20x1x128xf32, #tpu.memory_space<vmem>>, vector<1x1x128xf32>
    %314 = vector.shape_cast %313 : vector<1x1x128xf32> to vector<1x128xf32>
    %cst_129 = arith.constant dense<0.000000e+00> : vector<8x128xf32>
    %315 = tpu.matmul %310, %0, %cst_129 {dimension_numbers = #tpu.dot_dimension_numbers<[1], [0], [0], [1], [0, 0, 1, 1], [], []>} : vector<8x128xf32>, vector<128x128xf32>, vector<8x128xf32> -> vector<8x128xf32>
    %316 = vector.broadcast %314 : vector<1x128xf32> to vector<8x128xf32>
    %317 = arith.addf %315, %316 : vector<8x128xf32>
    %318 = arith.addf %317, %12 : vector<8x128xf32>
    %cst_130 = arith.constant 2.000000e+01 : f32
    %319 = vector.broadcast %cst_130 : f32 to vector<8x128xf32>
    %320 = arith.minimumf %318, %319 : vector<8x128xf32>
    %321 = math.exp %320 : vector<8x128xf32>
    %cst_131 = arith.constant 1.000000e+00 : f32
    %322 = vector.broadcast %cst_131 : f32 to vector<8x128xf32>
    %323 = arith.addf %322, %321 : vector<8x128xf32>
    %cst_132 = arith.constant 1.000000e+00 : f32
    %324 = vector.broadcast %cst_132 : f32 to vector<8x128xf32>
    %325 = arith.addf %324, %321 : vector<8x128xf32>
    %326 = arith.mulf %323, %325 : vector<8x128xf32>
    %cst_133 = arith.constant 1.000000e+00 : f32
    %327 = vector.broadcast %cst_133 : f32 to vector<8x128xf32>
    %328 = arith.subf %326, %327 : vector<8x128xf32>
    %cst_134 = arith.constant 1.000000e+00 : f32
    %329 = vector.broadcast %cst_134 : f32 to vector<8x128xf32>
    %330 = arith.addf %326, %329 : vector<8x128xf32>
    %331 = arith.divf %328, %330 : vector<8x128xf32>
    %332 = arith.mulf %318, %331 : vector<8x128xf32>
    %cst_135 = arith.constant dense<0.000000e+00> : vector<8x128xf32>
    %333 = tpu.matmul %332, %1, %cst_135 {dimension_numbers = #tpu.dot_dimension_numbers<[1], [0], [0], [1], [0, 0, 1, 1], [], []>} : vector<8x128xf32>, vector<128x128xf32>, vector<8x128xf32> -> vector<8x128xf32>
    %334 = vector.broadcast %2 : vector<1x128xf32> to vector<8x128xf32>
    %335 = arith.addf %333, %334 : vector<8x128xf32>
    %cst_136 = arith.constant 2.000000e+01 : f32
    %336 = vector.broadcast %cst_136 : f32 to vector<8x128xf32>
    %337 = arith.minimumf %335, %336 : vector<8x128xf32>
    %338 = math.exp %337 : vector<8x128xf32>
    %cst_137 = arith.constant 1.000000e+00 : f32
    %339 = vector.broadcast %cst_137 : f32 to vector<8x128xf32>
    %340 = arith.addf %339, %338 : vector<8x128xf32>
    %cst_138 = arith.constant 1.000000e+00 : f32
    %341 = vector.broadcast %cst_138 : f32 to vector<8x128xf32>
    %342 = arith.addf %341, %338 : vector<8x128xf32>
    %343 = arith.mulf %340, %342 : vector<8x128xf32>
    %cst_139 = arith.constant 1.000000e+00 : f32
    %344 = vector.broadcast %cst_139 : f32 to vector<8x128xf32>
    %345 = arith.subf %343, %344 : vector<8x128xf32>
    %cst_140 = arith.constant 1.000000e+00 : f32
    %346 = vector.broadcast %cst_140 : f32 to vector<8x128xf32>
    %347 = arith.addf %343, %346 : vector<8x128xf32>
    %348 = arith.divf %345, %347 : vector<8x128xf32>
    %349 = arith.mulf %335, %348 : vector<8x128xf32>
    %cst_141 = arith.constant dense<0.000000e+00> : vector<8x128xf32>
    %350 = tpu.matmul %349, %3, %cst_141 {dimension_numbers = #tpu.dot_dimension_numbers<[1], [0], [0], [1], [0, 0, 1, 1], [], []>} : vector<8x128xf32>, vector<128x128xf32>, vector<8x128xf32> -> vector<8x128xf32>
    %351 = vector.broadcast %4 : vector<1x128xf32> to vector<8x128xf32>
    %352 = arith.addf %350, %351 : vector<8x128xf32>
    %cst_142 = arith.constant 2.000000e+01 : f32
    %353 = vector.broadcast %cst_142 : f32 to vector<8x128xf32>
    %354 = arith.minimumf %352, %353 : vector<8x128xf32>
    %355 = math.exp %354 : vector<8x128xf32>
    %cst_143 = arith.constant 1.000000e+00 : f32
    %356 = vector.broadcast %cst_143 : f32 to vector<8x128xf32>
    %357 = arith.addf %356, %355 : vector<8x128xf32>
    %cst_144 = arith.constant 1.000000e+00 : f32
    %358 = vector.broadcast %cst_144 : f32 to vector<8x128xf32>
    %359 = arith.addf %358, %355 : vector<8x128xf32>
    %360 = arith.mulf %357, %359 : vector<8x128xf32>
    %cst_145 = arith.constant 1.000000e+00 : f32
    %361 = vector.broadcast %cst_145 : f32 to vector<8x128xf32>
    %362 = arith.subf %360, %361 : vector<8x128xf32>
    %cst_146 = arith.constant 1.000000e+00 : f32
    %363 = vector.broadcast %cst_146 : f32 to vector<8x128xf32>
    %364 = arith.addf %360, %363 : vector<8x128xf32>
    %365 = arith.divf %362, %364 : vector<8x128xf32>
    %366 = arith.mulf %352, %365 : vector<8x128xf32>
    %cst_147 = arith.constant dense<0.000000e+00> : vector<8x128xf32>
    %367 = tpu.matmul %366, %5, %cst_147 {dimension_numbers = #tpu.dot_dimension_numbers<[1], [0], [0], [1], [0, 0, 1, 1], [], []>} : vector<8x128xf32>, vector<128x128xf32>, vector<8x128xf32> -> vector<8x128xf32>
    %368 = vector.broadcast %6 : vector<1x128xf32> to vector<8x128xf32>
    %369 = arith.addf %367, %368 : vector<8x128xf32>
    %c5_i32_148 = arith.constant 5 : i32
    %370 = arith.muli %c5_i32_148, %311 : i32
    %c0_i32_149 = arith.constant 0 : i32
    %371 = arith.addi %370, %c0_i32_149 : i32
    %372 = arith.index_cast %371 : i32 to index
    %373 = memref.load %arg1[%372] : memref<100xf32, #tpu.memory_space<smem>>
    %c5_i32_150 = arith.constant 5 : i32
    %374 = arith.muli %c5_i32_150, %311 : i32
    %c1_i32_151 = arith.constant 1 : i32
    %375 = arith.addi %374, %c1_i32_151 : i32
    %376 = arith.index_cast %375 : i32 to index
    %377 = memref.load %arg1[%376] : memref<100xf32, #tpu.memory_space<smem>>
    %c5_i32_152 = arith.constant 5 : i32
    %378 = arith.muli %c5_i32_152, %311 : i32
    %c2_i32_153 = arith.constant 2 : i32
    %379 = arith.addi %378, %c2_i32_153 : i32
    %380 = arith.index_cast %379 : i32 to index
    %381 = memref.load %arg1[%380] : memref<100xf32, #tpu.memory_space<smem>>
    %c5_i32_154 = arith.constant 5 : i32
    %382 = arith.muli %c5_i32_154, %311 : i32
    %c3_i32_155 = arith.constant 3 : i32
    %383 = arith.addi %382, %c3_i32_155 : i32
    %384 = arith.index_cast %383 : i32 to index
    %385 = memref.load %arg1[%384] : memref<100xf32, #tpu.memory_space<smem>>
    %c5_i32_156 = arith.constant 5 : i32
    %386 = arith.muli %c5_i32_156, %311 : i32
    %c4_i32_157 = arith.constant 4 : i32
    %387 = arith.addi %386, %c4_i32_157 : i32
    %388 = arith.index_cast %387 : i32 to index
    %389 = memref.load %arg1[%388] : memref<100xf32, #tpu.memory_space<smem>>
    %390 = vector.broadcast %373 : f32 to vector<8x128xf32>
    %391 = arith.mulf %390, %310 : vector<8x128xf32>
    %392 = vector.broadcast %377 : f32 to vector<8x128xf32>
    %393 = arith.mulf %392, %369 : vector<8x128xf32>
    %394 = arith.subf %391, %393 : vector<8x128xf32>
    %cst_158 = arith.constant -1.000000e+00 : f32
    %cst_159 = arith.constant 1.000000e+00 : f32
    %395 = vector.broadcast %cst_158 : f32 to vector<8x128xf32>
    %396 = arith.maximumf %395, %394 : vector<8x128xf32>
    %397 = vector.broadcast %cst_159 : f32 to vector<8x128xf32>
    %398 = arith.minimumf %397, %396 : vector<8x128xf32>
    %399 = vector.broadcast %381 : f32 to vector<8x128xf32>
    %400 = arith.mulf %399, %398 : vector<8x128xf32>
    %401 = vector.broadcast %385 : f32 to vector<8x128xf32>
    %402 = arith.mulf %401, %310 : vector<8x128xf32>
    %403 = arith.addf %400, %402 : vector<8x128xf32>
    %404 = arith.index_cast %311 : i32 to index
    %c0_160 = arith.constant 0 : index
    %c0_161 = arith.constant 0 : index
    %405 = vector.load %arg4[%404, %c0_160, %c0_161] : memref<20x8x128xf32, #tpu.memory_space<vmem>>, vector<1x8x128xf32>
    %406 = vector.shape_cast %405 : vector<1x8x128xf32> to vector<8x128xf32>
    %407 = vector.broadcast %389 : f32 to vector<8x128xf32>
    %408 = arith.mulf %407, %406 : vector<8x128xf32>
    %409 = arith.addf %403, %408 : vector<8x128xf32>
    %c4_i32_162 = arith.constant 4 : i32
    %c19_i32_163 = arith.constant 19 : i32
    %410 = arith.subi %c19_i32_163, %c4_i32_162 : i32
    %411 = arith.index_cast %410 : i32 to index
    %c0_164 = arith.constant 0 : index
    %c0_165 = arith.constant 0 : index
    %412 = vector.load %arg5[%411, %c0_164, %c0_165] : memref<20x1x128xf32, #tpu.memory_space<vmem>>, vector<1x1x128xf32>
    %413 = vector.shape_cast %412 : vector<1x1x128xf32> to vector<1x128xf32>
    %cst_166 = arith.constant dense<0.000000e+00> : vector<8x128xf32>
    %414 = tpu.matmul %409, %0, %cst_166 {dimension_numbers = #tpu.dot_dimension_numbers<[1], [0], [0], [1], [0, 0, 1, 1], [], []>} : vector<8x128xf32>, vector<128x128xf32>, vector<8x128xf32> -> vector<8x128xf32>
    %415 = vector.broadcast %413 : vector<1x128xf32> to vector<8x128xf32>
    %416 = arith.addf %414, %415 : vector<8x128xf32>
    %417 = arith.addf %416, %12 : vector<8x128xf32>
    %cst_167 = arith.constant 2.000000e+01 : f32
    %418 = vector.broadcast %cst_167 : f32 to vector<8x128xf32>
    %419 = arith.minimumf %417, %418 : vector<8x128xf32>
    %420 = math.exp %419 : vector<8x128xf32>
    %cst_168 = arith.constant 1.000000e+00 : f32
    %421 = vector.broadcast %cst_168 : f32 to vector<8x128xf32>
    %422 = arith.addf %421, %420 : vector<8x128xf32>
    %cst_169 = arith.constant 1.000000e+00 : f32
    %423 = vector.broadcast %cst_169 : f32 to vector<8x128xf32>
    %424 = arith.addf %423, %420 : vector<8x128xf32>
    %425 = arith.mulf %422, %424 : vector<8x128xf32>
    %cst_170 = arith.constant 1.000000e+00 : f32
    %426 = vector.broadcast %cst_170 : f32 to vector<8x128xf32>
    %427 = arith.subf %425, %426 : vector<8x128xf32>
    %cst_171 = arith.constant 1.000000e+00 : f32
    %428 = vector.broadcast %cst_171 : f32 to vector<8x128xf32>
    %429 = arith.addf %425, %428 : vector<8x128xf32>
    %430 = arith.divf %427, %429 : vector<8x128xf32>
    %431 = arith.mulf %417, %430 : vector<8x128xf32>
    %cst_172 = arith.constant dense<0.000000e+00> : vector<8x128xf32>
    %432 = tpu.matmul %431, %1, %cst_172 {dimension_numbers = #tpu.dot_dimension_numbers<[1], [0], [0], [1], [0, 0, 1, 1], [], []>} : vector<8x128xf32>, vector<128x128xf32>, vector<8x128xf32> -> vector<8x128xf32>
    %433 = vector.broadcast %2 : vector<1x128xf32> to vector<8x128xf32>
    %434 = arith.addf %432, %433 : vector<8x128xf32>
    %cst_173 = arith.constant 2.000000e+01 : f32
    %435 = vector.broadcast %cst_173 : f32 to vector<8x128xf32>
    %436 = arith.minimumf %434, %435 : vector<8x128xf32>
    %437 = math.exp %436 : vector<8x128xf32>
    %cst_174 = arith.constant 1.000000e+00 : f32
    %438 = vector.broadcast %cst_174 : f32 to vector<8x128xf32>
    %439 = arith.addf %438, %437 : vector<8x128xf32>
    %cst_175 = arith.constant 1.000000e+00 : f32
    %440 = vector.broadcast %cst_175 : f32 to vector<8x128xf32>
    %441 = arith.addf %440, %437 : vector<8x128xf32>
    %442 = arith.mulf %439, %441 : vector<8x128xf32>
    %cst_176 = arith.constant 1.000000e+00 : f32
    %443 = vector.broadcast %cst_176 : f32 to vector<8x128xf32>
    %444 = arith.subf %442, %443 : vector<8x128xf32>
    %cst_177 = arith.constant 1.000000e+00 : f32
    %445 = vector.broadcast %cst_177 : f32 to vector<8x128xf32>
    %446 = arith.addf %442, %445 : vector<8x128xf32>
    %447 = arith.divf %444, %446 : vector<8x128xf32>
    %448 = arith.mulf %434, %447 : vector<8x128xf32>
    %cst_178 = arith.constant dense<0.000000e+00> : vector<8x128xf32>
    %449 = tpu.matmul %448, %3, %cst_178 {dimension_numbers = #tpu.dot_dimension_numbers<[1], [0], [0], [1], [0, 0, 1, 1], [], []>} : vector<8x128xf32>, vector<128x128xf32>, vector<8x128xf32> -> vector<8x128xf32>
    %450 = vector.broadcast %4 : vector<1x128xf32> to vector<8x128xf32>
    %451 = arith.addf %449, %450 : vector<8x128xf32>
    %cst_179 = arith.constant 2.000000e+01 : f32
    %452 = vector.broadcast %cst_179 : f32 to vector<8x128xf32>
    %453 = arith.minimumf %451, %452 : vector<8x128xf32>
    %454 = math.exp %453 : vector<8x128xf32>
    %cst_180 = arith.constant 1.000000e+00 : f32
    %455 = vector.broadcast %cst_180 : f32 to vector<8x128xf32>
    %456 = arith.addf %455, %454 : vector<8x128xf32>
    %cst_181 = arith.constant 1.000000e+00 : f32
    %457 = vector.broadcast %cst_181 : f32 to vector<8x128xf32>
    %458 = arith.addf %457, %454 : vector<8x128xf32>
    %459 = arith.mulf %456, %458 : vector<8x128xf32>
    %cst_182 = arith.constant 1.000000e+00 : f32
    %460 = vector.broadcast %cst_182 : f32 to vector<8x128xf32>
    %461 = arith.subf %459, %460 : vector<8x128xf32>
    %cst_183 = arith.constant 1.000000e+00 : f32
    %462 = vector.broadcast %cst_183 : f32 to vector<8x128xf32>
    %463 = arith.addf %459, %462 : vector<8x128xf32>
    %464 = arith.divf %461, %463 : vector<8x128xf32>
    %465 = arith.mulf %451, %464 : vector<8x128xf32>
    %cst_184 = arith.constant dense<0.000000e+00> : vector<8x128xf32>
    %466 = tpu.matmul %465, %5, %cst_184 {dimension_numbers = #tpu.dot_dimension_numbers<[1], [0], [0], [1], [0, 0, 1, 1], [], []>} : vector<8x128xf32>, vector<128x128xf32>, vector<8x128xf32> -> vector<8x128xf32>
    %467 = vector.broadcast %6 : vector<1x128xf32> to vector<8x128xf32>
    %468 = arith.addf %466, %467 : vector<8x128xf32>
    %c5_i32_185 = arith.constant 5 : i32
    %469 = arith.muli %c5_i32_185, %410 : i32
    %c0_i32_186 = arith.constant 0 : i32
    %470 = arith.addi %469, %c0_i32_186 : i32
    %471 = arith.index_cast %470 : i32 to index
    %472 = memref.load %arg1[%471] : memref<100xf32, #tpu.memory_space<smem>>
    %c5_i32_187 = arith.constant 5 : i32
    %473 = arith.muli %c5_i32_187, %410 : i32
    %c1_i32_188 = arith.constant 1 : i32
    %474 = arith.addi %473, %c1_i32_188 : i32
    %475 = arith.index_cast %474 : i32 to index
    %476 = memref.load %arg1[%475] : memref<100xf32, #tpu.memory_space<smem>>
    %c5_i32_189 = arith.constant 5 : i32
    %477 = arith.muli %c5_i32_189, %410 : i32
    %c2_i32_190 = arith.constant 2 : i32
    %478 = arith.addi %477, %c2_i32_190 : i32
    %479 = arith.index_cast %478 : i32 to index
    %480 = memref.load %arg1[%479] : memref<100xf32, #tpu.memory_space<smem>>
    %c5_i32_191 = arith.constant 5 : i32
    %481 = arith.muli %c5_i32_191, %410 : i32
    %c3_i32_192 = arith.constant 3 : i32
    %482 = arith.addi %481, %c3_i32_192 : i32
    %483 = arith.index_cast %482 : i32 to index
    %484 = memref.load %arg1[%483] : memref<100xf32, #tpu.memory_space<smem>>
    %c5_i32_193 = arith.constant 5 : i32
    %485 = arith.muli %c5_i32_193, %410 : i32
    %c4_i32_194 = arith.constant 4 : i32
    %486 = arith.addi %485, %c4_i32_194 : i32
    %487 = arith.index_cast %486 : i32 to index
    %488 = memref.load %arg1[%487] : memref<100xf32, #tpu.memory_space<smem>>
    %489 = vector.broadcast %472 : f32 to vector<8x128xf32>
    %490 = arith.mulf %489, %409 : vector<8x128xf32>
    %491 = vector.broadcast %476 : f32 to vector<8x128xf32>
    %492 = arith.mulf %491, %468 : vector<8x128xf32>
    %493 = arith.subf %490, %492 : vector<8x128xf32>
    %cst_195 = arith.constant -1.000000e+00 : f32
    %cst_196 = arith.constant 1.000000e+00 : f32
    %494 = vector.broadcast %cst_195 : f32 to vector<8x128xf32>
    %495 = arith.maximumf %494, %493 : vector<8x128xf32>
    %496 = vector.broadcast %cst_196 : f32 to vector<8x128xf32>
    %497 = arith.minimumf %496, %495 : vector<8x128xf32>
    %498 = vector.broadcast %480 : f32 to vector<8x128xf32>
    %499 = arith.mulf %498, %497 : vector<8x128xf32>
    %500 = vector.broadcast %484 : f32 to vector<8x128xf32>
    %501 = arith.mulf %500, %409 : vector<8x128xf32>
    %502 = arith.addf %499, %501 : vector<8x128xf32>
    %503 = arith.index_cast %410 : i32 to index
    %c0_197 = arith.constant 0 : index
    %c0_198 = arith.constant 0 : index
    %504 = vector.load %arg4[%503, %c0_197, %c0_198] : memref<20x8x128xf32, #tpu.memory_space<vmem>>, vector<1x8x128xf32>
    %505 = vector.shape_cast %504 : vector<1x8x128xf32> to vector<8x128xf32>
    %506 = vector.broadcast %488 : f32 to vector<8x128xf32>
    %507 = arith.mulf %506, %505 : vector<8x128xf32>
    %508 = arith.addf %502, %507 : vector<8x128xf32>
    %c5_i32_199 = arith.constant 5 : i32
    %c19_i32_200 = arith.constant 19 : i32
    %509 = arith.subi %c19_i32_200, %c5_i32_199 : i32
    %510 = arith.index_cast %509 : i32 to index
    %c0_201 = arith.constant 0 : index
    %c0_202 = arith.constant 0 : index
    %511 = vector.load %arg5[%510, %c0_201, %c0_202] : memref<20x1x128xf32, #tpu.memory_space<vmem>>, vector<1x1x128xf32>
    %512 = vector.shape_cast %511 : vector<1x1x128xf32> to vector<1x128xf32>
    %cst_203 = arith.constant dense<0.000000e+00> : vector<8x128xf32>
    %513 = tpu.matmul %508, %0, %cst_203 {dimension_numbers = #tpu.dot_dimension_numbers<[1], [0], [0], [1], [0, 0, 1, 1], [], []>} : vector<8x128xf32>, vector<128x128xf32>, vector<8x128xf32> -> vector<8x128xf32>
    %514 = vector.broadcast %512 : vector<1x128xf32> to vector<8x128xf32>
    %515 = arith.addf %513, %514 : vector<8x128xf32>
    %516 = arith.addf %515, %12 : vector<8x128xf32>
    %cst_204 = arith.constant 2.000000e+01 : f32
    %517 = vector.broadcast %cst_204 : f32 to vector<8x128xf32>
    %518 = arith.minimumf %516, %517 : vector<8x128xf32>
    %519 = math.exp %518 : vector<8x128xf32>
    %cst_205 = arith.constant 1.000000e+00 : f32
    %520 = vector.broadcast %cst_205 : f32 to vector<8x128xf32>
    %521 = arith.addf %520, %519 : vector<8x128xf32>
    %cst_206 = arith.constant 1.000000e+00 : f32
    %522 = vector.broadcast %cst_206 : f32 to vector<8x128xf32>
    %523 = arith.addf %522, %519 : vector<8x128xf32>
    %524 = arith.mulf %521, %523 : vector<8x128xf32>
    %cst_207 = arith.constant 1.000000e+00 : f32
    %525 = vector.broadcast %cst_207 : f32 to vector<8x128xf32>
    %526 = arith.subf %524, %525 : vector<8x128xf32>
    %cst_208 = arith.constant 1.000000e+00 : f32
    %527 = vector.broadcast %cst_208 : f32 to vector<8x128xf32>
    %528 = arith.addf %524, %527 : vector<8x128xf32>
    %529 = arith.divf %526, %528 : vector<8x128xf32>
    %530 = arith.mulf %516, %529 : vector<8x128xf32>
    %cst_209 = arith.constant dense<0.000000e+00> : vector<8x128xf32>
    %531 = tpu.matmul %530, %1, %cst_209 {dimension_numbers = #tpu.dot_dimension_numbers<[1], [0], [0], [1], [0, 0, 1, 1], [], []>} : vector<8x128xf32>, vector<128x128xf32>, vector<8x128xf32> -> vector<8x128xf32>
    %532 = vector.broadcast %2 : vector<1x128xf32> to vector<8x128xf32>
    %533 = arith.addf %531, %532 : vector<8x128xf32>
    %cst_210 = arith.constant 2.000000e+01 : f32
    %534 = vector.broadcast %cst_210 : f32 to vector<8x128xf32>
    %535 = arith.minimumf %533, %534 : vector<8x128xf32>
    %536 = math.exp %535 : vector<8x128xf32>
    %cst_211 = arith.constant 1.000000e+00 : f32
    %537 = vector.broadcast %cst_211 : f32 to vector<8x128xf32>
    %538 = arith.addf %537, %536 : vector<8x128xf32>
    %cst_212 = arith.constant 1.000000e+00 : f32
    %539 = vector.broadcast %cst_212 : f32 to vector<8x128xf32>
    %540 = arith.addf %539, %536 : vector<8x128xf32>
    %541 = arith.mulf %538, %540 : vector<8x128xf32>
    %cst_213 = arith.constant 1.000000e+00 : f32
    %542 = vector.broadcast %cst_213 : f32 to vector<8x128xf32>
    %543 = arith.subf %541, %542 : vector<8x128xf32>
    %cst_214 = arith.constant 1.000000e+00 : f32
    %544 = vector.broadcast %cst_214 : f32 to vector<8x128xf32>
    %545 = arith.addf %541, %544 : vector<8x128xf32>
    %546 = arith.divf %543, %545 : vector<8x128xf32>
    %547 = arith.mulf %533, %546 : vector<8x128xf32>
    %cst_215 = arith.constant dense<0.000000e+00> : vector<8x128xf32>
    %548 = tpu.matmul %547, %3, %cst_215 {dimension_numbers = #tpu.dot_dimension_numbers<[1], [0], [0], [1], [0, 0, 1, 1], [], []>} : vector<8x128xf32>, vector<128x128xf32>, vector<8x128xf32> -> vector<8x128xf32>
    %549 = vector.broadcast %4 : vector<1x128xf32> to vector<8x128xf32>
    %550 = arith.addf %548, %549 : vector<8x128xf32>
    %cst_216 = arith.constant 2.000000e+01 : f32
    %551 = vector.broadcast %cst_216 : f32 to vector<8x128xf32>
    %552 = arith.minimumf %550, %551 : vector<8x128xf32>
    %553 = math.exp %552 : vector<8x128xf32>
    %cst_217 = arith.constant 1.000000e+00 : f32
    %554 = vector.broadcast %cst_217 : f32 to vector<8x128xf32>
    %555 = arith.addf %554, %553 : vector<8x128xf32>
    %cst_218 = arith.constant 1.000000e+00 : f32
    %556 = vector.broadcast %cst_218 : f32 to vector<8x128xf32>
    %557 = arith.addf %556, %553 : vector<8x128xf32>
    %558 = arith.mulf %555, %557 : vector<8x128xf32>
    %cst_219 = arith.constant 1.000000e+00 : f32
    %559 = vector.broadcast %cst_219 : f32 to vector<8x128xf32>
    %560 = arith.subf %558, %559 : vector<8x128xf32>
    %cst_220 = arith.constant 1.000000e+00 : f32
    %561 = vector.broadcast %cst_220 : f32 to vector<8x128xf32>
    %562 = arith.addf %558, %561 : vector<8x128xf32>
    %563 = arith.divf %560, %562 : vector<8x128xf32>
    %564 = arith.mulf %550, %563 : vector<8x128xf32>
    %cst_221 = arith.constant dense<0.000000e+00> : vector<8x128xf32>
    %565 = tpu.matmul %564, %5, %cst_221 {dimension_numbers = #tpu.dot_dimension_numbers<[1], [0], [0], [1], [0, 0, 1, 1], [], []>} : vector<8x128xf32>, vector<128x128xf32>, vector<8x128xf32> -> vector<8x128xf32>
    %566 = vector.broadcast %6 : vector<1x128xf32> to vector<8x128xf32>
    %567 = arith.addf %565, %566 : vector<8x128xf32>
    %c5_i32_222 = arith.constant 5 : i32
    %568 = arith.muli %c5_i32_222, %509 : i32
    %c0_i32_223 = arith.constant 0 : i32
    %569 = arith.addi %568, %c0_i32_223 : i32
    %570 = arith.index_cast %569 : i32 to index
    %571 = memref.load %arg1[%570] : memref<100xf32, #tpu.memory_space<smem>>
    %c5_i32_224 = arith.constant 5 : i32
    %572 = arith.muli %c5_i32_224, %509 : i32
    %c1_i32_225 = arith.constant 1 : i32
    %573 = arith.addi %572, %c1_i32_225 : i32
    %574 = arith.index_cast %573 : i32 to index
    %575 = memref.load %arg1[%574] : memref<100xf32, #tpu.memory_space<smem>>
    %c5_i32_226 = arith.constant 5 : i32
    %576 = arith.muli %c5_i32_226, %509 : i32
    %c2_i32_227 = arith.constant 2 : i32
    %577 = arith.addi %576, %c2_i32_227 : i32
    %578 = arith.index_cast %577 : i32 to index
    %579 = memref.load %arg1[%578] : memref<100xf32, #tpu.memory_space<smem>>
    %c5_i32_228 = arith.constant 5 : i32
    %580 = arith.muli %c5_i32_228, %509 : i32
    %c3_i32_229 = arith.constant 3 : i32
    %581 = arith.addi %580, %c3_i32_229 : i32
    %582 = arith.index_cast %581 : i32 to index
    %583 = memref.load %arg1[%582] : memref<100xf32, #tpu.memory_space<smem>>
    %c5_i32_230 = arith.constant 5 : i32
    %584 = arith.muli %c5_i32_230, %509 : i32
    %c4_i32_231 = arith.constant 4 : i32
    %585 = arith.addi %584, %c4_i32_231 : i32
    %586 = arith.index_cast %585 : i32 to index
    %587 = memref.load %arg1[%586] : memref<100xf32, #tpu.memory_space<smem>>
    %588 = vector.broadcast %571 : f32 to vector<8x128xf32>
    %589 = arith.mulf %588, %508 : vector<8x128xf32>
    %590 = vector.broadcast %575 : f32 to vector<8x128xf32>
    %591 = arith.mulf %590, %567 : vector<8x128xf32>
    %592 = arith.subf %589, %591 : vector<8x128xf32>
    %cst_232 = arith.constant -1.000000e+00 : f32
    %cst_233 = arith.constant 1.000000e+00 : f32
    %593 = vector.broadcast %cst_232 : f32 to vector<8x128xf32>
    %594 = arith.maximumf %593, %592 : vector<8x128xf32>
    %595 = vector.broadcast %cst_233 : f32 to vector<8x128xf32>
    %596 = arith.minimumf %595, %594 : vector<8x128xf32>
    %597 = vector.broadcast %579 : f32 to vector<8x128xf32>
    %598 = arith.mulf %597, %596 : vector<8x128xf32>
    %599 = vector.broadcast %583 : f32 to vector<8x128xf32>
    %600 = arith.mulf %599, %508 : vector<8x128xf32>
    %601 = arith.addf %598, %600 : vector<8x128xf32>
    %602 = arith.index_cast %509 : i32 to index
    %c0_234 = arith.constant 0 : index
    %c0_235 = arith.constant 0 : index
    %603 = vector.load %arg4[%602, %c0_234, %c0_235] : memref<20x8x128xf32, #tpu.memory_space<vmem>>, vector<1x8x128xf32>
    %604 = vector.shape_cast %603 : vector<1x8x128xf32> to vector<8x128xf32>
    %605 = vector.broadcast %587 : f32 to vector<8x128xf32>
    %606 = arith.mulf %605, %604 : vector<8x128xf32>
    %607 = arith.addf %601, %606 : vector<8x128xf32>
    %c6_i32 = arith.constant 6 : i32
    %c19_i32_236 = arith.constant 19 : i32
    %608 = arith.subi %c19_i32_236, %c6_i32 : i32
    %609 = arith.index_cast %608 : i32 to index
    %c0_237 = arith.constant 0 : index
    %c0_238 = arith.constant 0 : index
    %610 = vector.load %arg5[%609, %c0_237, %c0_238] : memref<20x1x128xf32, #tpu.memory_space<vmem>>, vector<1x1x128xf32>
    %611 = vector.shape_cast %610 : vector<1x1x128xf32> to vector<1x128xf32>
    %cst_239 = arith.constant dense<0.000000e+00> : vector<8x128xf32>
    %612 = tpu.matmul %607, %0, %cst_239 {dimension_numbers = #tpu.dot_dimension_numbers<[1], [0], [0], [1], [0, 0, 1, 1], [], []>} : vector<8x128xf32>, vector<128x128xf32>, vector<8x128xf32> -> vector<8x128xf32>
    %613 = vector.broadcast %611 : vector<1x128xf32> to vector<8x128xf32>
    %614 = arith.addf %612, %613 : vector<8x128xf32>
    %615 = arith.addf %614, %12 : vector<8x128xf32>
    %cst_240 = arith.constant 2.000000e+01 : f32
    %616 = vector.broadcast %cst_240 : f32 to vector<8x128xf32>
    %617 = arith.minimumf %615, %616 : vector<8x128xf32>
    %618 = math.exp %617 : vector<8x128xf32>
    %cst_241 = arith.constant 1.000000e+00 : f32
    %619 = vector.broadcast %cst_241 : f32 to vector<8x128xf32>
    %620 = arith.addf %619, %618 : vector<8x128xf32>
    %cst_242 = arith.constant 1.000000e+00 : f32
    %621 = vector.broadcast %cst_242 : f32 to vector<8x128xf32>
    %622 = arith.addf %621, %618 : vector<8x128xf32>
    %623 = arith.mulf %620, %622 : vector<8x128xf32>
    %cst_243 = arith.constant 1.000000e+00 : f32
    %624 = vector.broadcast %cst_243 : f32 to vector<8x128xf32>
    %625 = arith.subf %623, %624 : vector<8x128xf32>
    %cst_244 = arith.constant 1.000000e+00 : f32
    %626 = vector.broadcast %cst_244 : f32 to vector<8x128xf32>
    %627 = arith.addf %623, %626 : vector<8x128xf32>
    %628 = arith.divf %625, %627 : vector<8x128xf32>
    %629 = arith.mulf %615, %628 : vector<8x128xf32>
    %cst_245 = arith.constant dense<0.000000e+00> : vector<8x128xf32>
    %630 = tpu.matmul %629, %1, %cst_245 {dimension_numbers = #tpu.dot_dimension_numbers<[1], [0], [0], [1], [0, 0, 1, 1], [], []>} : vector<8x128xf32>, vector<128x128xf32>, vector<8x128xf32> -> vector<8x128xf32>
    %631 = vector.broadcast %2 : vector<1x128xf32> to vector<8x128xf32>
    %632 = arith.addf %630, %631 : vector<8x128xf32>
    %cst_246 = arith.constant 2.000000e+01 : f32
    %633 = vector.broadcast %cst_246 : f32 to vector<8x128xf32>
    %634 = arith.minimumf %632, %633 : vector<8x128xf32>
    %635 = math.exp %634 : vector<8x128xf32>
    %cst_247 = arith.constant 1.000000e+00 : f32
    %636 = vector.broadcast %cst_247 : f32 to vector<8x128xf32>
    %637 = arith.addf %636, %635 : vector<8x128xf32>
    %cst_248 = arith.constant 1.000000e+00 : f32
    %638 = vector.broadcast %cst_248 : f32 to vector<8x128xf32>
    %639 = arith.addf %638, %635 : vector<8x128xf32>
    %640 = arith.mulf %637, %639 : vector<8x128xf32>
    %cst_249 = arith.constant 1.000000e+00 : f32
    %641 = vector.broadcast %cst_249 : f32 to vector<8x128xf32>
    %642 = arith.subf %640, %641 : vector<8x128xf32>
    %cst_250 = arith.constant 1.000000e+00 : f32
    %643 = vector.broadcast %cst_250 : f32 to vector<8x128xf32>
    %644 = arith.addf %640, %643 : vector<8x128xf32>
    %645 = arith.divf %642, %644 : vector<8x128xf32>
    %646 = arith.mulf %632, %645 : vector<8x128xf32>
    %cst_251 = arith.constant dense<0.000000e+00> : vector<8x128xf32>
    %647 = tpu.matmul %646, %3, %cst_251 {dimension_numbers = #tpu.dot_dimension_numbers<[1], [0], [0], [1], [0, 0, 1, 1], [], []>} : vector<8x128xf32>, vector<128x128xf32>, vector<8x128xf32> -> vector<8x128xf32>
    %648 = vector.broadcast %4 : vector<1x128xf32> to vector<8x128xf32>
    %649 = arith.addf %647, %648 : vector<8x128xf32>
    %cst_252 = arith.constant 2.000000e+01 : f32
    %650 = vector.broadcast %cst_252 : f32 to vector<8x128xf32>
    %651 = arith.minimumf %649, %650 : vector<8x128xf32>
    %652 = math.exp %651 : vector<8x128xf32>
    %cst_253 = arith.constant 1.000000e+00 : f32
    %653 = vector.broadcast %cst_253 : f32 to vector<8x128xf32>
    %654 = arith.addf %653, %652 : vector<8x128xf32>
    %cst_254 = arith.constant 1.000000e+00 : f32
    %655 = vector.broadcast %cst_254 : f32 to vector<8x128xf32>
    %656 = arith.addf %655, %652 : vector<8x128xf32>
    %657 = arith.mulf %654, %656 : vector<8x128xf32>
    %cst_255 = arith.constant 1.000000e+00 : f32
    %658 = vector.broadcast %cst_255 : f32 to vector<8x128xf32>
    %659 = arith.subf %657, %658 : vector<8x128xf32>
    %cst_256 = arith.constant 1.000000e+00 : f32
    %660 = vector.broadcast %cst_256 : f32 to vector<8x128xf32>
    %661 = arith.addf %657, %660 : vector<8x128xf32>
    %662 = arith.divf %659, %661 : vector<8x128xf32>
    %663 = arith.mulf %649, %662 : vector<8x128xf32>
    %cst_257 = arith.constant dense<0.000000e+00> : vector<8x128xf32>
    %664 = tpu.matmul %663, %5, %cst_257 {dimension_numbers = #tpu.dot_dimension_numbers<[1], [0], [0], [1], [0, 0, 1, 1], [], []>} : vector<8x128xf32>, vector<128x128xf32>, vector<8x128xf32> -> vector<8x128xf32>
    %665 = vector.broadcast %6 : vector<1x128xf32> to vector<8x128xf32>
    %666 = arith.addf %664, %665 : vector<8x128xf32>
    %c5_i32_258 = arith.constant 5 : i32
    %667 = arith.muli %c5_i32_258, %608 : i32
    %c0_i32_259 = arith.constant 0 : i32
    %668 = arith.addi %667, %c0_i32_259 : i32
    %669 = arith.index_cast %668 : i32 to index
    %670 = memref.load %arg1[%669] : memref<100xf32, #tpu.memory_space<smem>>
    %c5_i32_260 = arith.constant 5 : i32
    %671 = arith.muli %c5_i32_260, %608 : i32
    %c1_i32_261 = arith.constant 1 : i32
    %672 = arith.addi %671, %c1_i32_261 : i32
    %673 = arith.index_cast %672 : i32 to index
    %674 = memref.load %arg1[%673] : memref<100xf32, #tpu.memory_space<smem>>
    %c5_i32_262 = arith.constant 5 : i32
    %675 = arith.muli %c5_i32_262, %608 : i32
    %c2_i32_263 = arith.constant 2 : i32
    %676 = arith.addi %675, %c2_i32_263 : i32
    %677 = arith.index_cast %676 : i32 to index
    %678 = memref.load %arg1[%677] : memref<100xf32, #tpu.memory_space<smem>>
    %c5_i32_264 = arith.constant 5 : i32
    %679 = arith.muli %c5_i32_264, %608 : i32
    %c3_i32_265 = arith.constant 3 : i32
    %680 = arith.addi %679, %c3_i32_265 : i32
    %681 = arith.index_cast %680 : i32 to index
    %682 = memref.load %arg1[%681] : memref<100xf32, #tpu.memory_space<smem>>
    %c5_i32_266 = arith.constant 5 : i32
    %683 = arith.muli %c5_i32_266, %608 : i32
    %c4_i32_267 = arith.constant 4 : i32
    %684 = arith.addi %683, %c4_i32_267 : i32
    %685 = arith.index_cast %684 : i32 to index
    %686 = memref.load %arg1[%685] : memref<100xf32, #tpu.memory_space<smem>>
    %687 = vector.broadcast %670 : f32 to vector<8x128xf32>
    %688 = arith.mulf %687, %607 : vector<8x128xf32>
    %689 = vector.broadcast %674 : f32 to vector<8x128xf32>
    %690 = arith.mulf %689, %666 : vector<8x128xf32>
    %691 = arith.subf %688, %690 : vector<8x128xf32>
    %cst_268 = arith.constant -1.000000e+00 : f32
    %cst_269 = arith.constant 1.000000e+00 : f32
    %692 = vector.broadcast %cst_268 : f32 to vector<8x128xf32>
    %693 = arith.maximumf %692, %691 : vector<8x128xf32>
    %694 = vector.broadcast %cst_269 : f32 to vector<8x128xf32>
    %695 = arith.minimumf %694, %693 : vector<8x128xf32>
    %696 = vector.broadcast %678 : f32 to vector<8x128xf32>
    %697 = arith.mulf %696, %695 : vector<8x128xf32>
    %698 = vector.broadcast %682 : f32 to vector<8x128xf32>
    %699 = arith.mulf %698, %607 : vector<8x128xf32>
    %700 = arith.addf %697, %699 : vector<8x128xf32>
    %701 = arith.index_cast %608 : i32 to index
    %c0_270 = arith.constant 0 : index
    %c0_271 = arith.constant 0 : index
    %702 = vector.load %arg4[%701, %c0_270, %c0_271] : memref<20x8x128xf32, #tpu.memory_space<vmem>>, vector<1x8x128xf32>
    %703 = vector.shape_cast %702 : vector<1x8x128xf32> to vector<8x128xf32>
    %704 = vector.broadcast %686 : f32 to vector<8x128xf32>
    %705 = arith.mulf %704, %703 : vector<8x128xf32>
    %706 = arith.addf %700, %705 : vector<8x128xf32>
    %c7_i32 = arith.constant 7 : i32
    %c19_i32_272 = arith.constant 19 : i32
    %707 = arith.subi %c19_i32_272, %c7_i32 : i32
    %708 = arith.index_cast %707 : i32 to index
    %c0_273 = arith.constant 0 : index
    %c0_274 = arith.constant 0 : index
    %709 = vector.load %arg5[%708, %c0_273, %c0_274] : memref<20x1x128xf32, #tpu.memory_space<vmem>>, vector<1x1x128xf32>
    %710 = vector.shape_cast %709 : vector<1x1x128xf32> to vector<1x128xf32>
    %cst_275 = arith.constant dense<0.000000e+00> : vector<8x128xf32>
    %711 = tpu.matmul %706, %0, %cst_275 {dimension_numbers = #tpu.dot_dimension_numbers<[1], [0], [0], [1], [0, 0, 1, 1], [], []>} : vector<8x128xf32>, vector<128x128xf32>, vector<8x128xf32> -> vector<8x128xf32>
    %712 = vector.broadcast %710 : vector<1x128xf32> to vector<8x128xf32>
    %713 = arith.addf %711, %712 : vector<8x128xf32>
    %714 = arith.addf %713, %12 : vector<8x128xf32>
    %cst_276 = arith.constant 2.000000e+01 : f32
    %715 = vector.broadcast %cst_276 : f32 to vector<8x128xf32>
    %716 = arith.minimumf %714, %715 : vector<8x128xf32>
    %717 = math.exp %716 : vector<8x128xf32>
    %cst_277 = arith.constant 1.000000e+00 : f32
    %718 = vector.broadcast %cst_277 : f32 to vector<8x128xf32>
    %719 = arith.addf %718, %717 : vector<8x128xf32>
    %cst_278 = arith.constant 1.000000e+00 : f32
    %720 = vector.broadcast %cst_278 : f32 to vector<8x128xf32>
    %721 = arith.addf %720, %717 : vector<8x128xf32>
    %722 = arith.mulf %719, %721 : vector<8x128xf32>
    %cst_279 = arith.constant 1.000000e+00 : f32
    %723 = vector.broadcast %cst_279 : f32 to vector<8x128xf32>
    %724 = arith.subf %722, %723 : vector<8x128xf32>
    %cst_280 = arith.constant 1.000000e+00 : f32
    %725 = vector.broadcast %cst_280 : f32 to vector<8x128xf32>
    %726 = arith.addf %722, %725 : vector<8x128xf32>
    %727 = arith.divf %724, %726 : vector<8x128xf32>
    %728 = arith.mulf %714, %727 : vector<8x128xf32>
    %cst_281 = arith.constant dense<0.000000e+00> : vector<8x128xf32>
    %729 = tpu.matmul %728, %1, %cst_281 {dimension_numbers = #tpu.dot_dimension_numbers<[1], [0], [0], [1], [0, 0, 1, 1], [], []>} : vector<8x128xf32>, vector<128x128xf32>, vector<8x128xf32> -> vector<8x128xf32>
    %730 = vector.broadcast %2 : vector<1x128xf32> to vector<8x128xf32>
    %731 = arith.addf %729, %730 : vector<8x128xf32>
    %cst_282 = arith.constant 2.000000e+01 : f32
    %732 = vector.broadcast %cst_282 : f32 to vector<8x128xf32>
    %733 = arith.minimumf %731, %732 : vector<8x128xf32>
    %734 = math.exp %733 : vector<8x128xf32>
    %cst_283 = arith.constant 1.000000e+00 : f32
    %735 = vector.broadcast %cst_283 : f32 to vector<8x128xf32>
    %736 = arith.addf %735, %734 : vector<8x128xf32>
    %cst_284 = arith.constant 1.000000e+00 : f32
    %737 = vector.broadcast %cst_284 : f32 to vector<8x128xf32>
    %738 = arith.addf %737, %734 : vector<8x128xf32>
    %739 = arith.mulf %736, %738 : vector<8x128xf32>
    %cst_285 = arith.constant 1.000000e+00 : f32
    %740 = vector.broadcast %cst_285 : f32 to vector<8x128xf32>
    %741 = arith.subf %739, %740 : vector<8x128xf32>
    %cst_286 = arith.constant 1.000000e+00 : f32
    %742 = vector.broadcast %cst_286 : f32 to vector<8x128xf32>
    %743 = arith.addf %739, %742 : vector<8x128xf32>
    %744 = arith.divf %741, %743 : vector<8x128xf32>
    %745 = arith.mulf %731, %744 : vector<8x128xf32>
    %cst_287 = arith.constant dense<0.000000e+00> : vector<8x128xf32>
    %746 = tpu.matmul %745, %3, %cst_287 {dimension_numbers = #tpu.dot_dimension_numbers<[1], [0], [0], [1], [0, 0, 1, 1], [], []>} : vector<8x128xf32>, vector<128x128xf32>, vector<8x128xf32> -> vector<8x128xf32>
    %747 = vector.broadcast %4 : vector<1x128xf32> to vector<8x128xf32>
    %748 = arith.addf %746, %747 : vector<8x128xf32>
    %cst_288 = arith.constant 2.000000e+01 : f32
    %749 = vector.broadcast %cst_288 : f32 to vector<8x128xf32>
    %750 = arith.minimumf %748, %749 : vector<8x128xf32>
    %751 = math.exp %750 : vector<8x128xf32>
    %cst_289 = arith.constant 1.000000e+00 : f32
    %752 = vector.broadcast %cst_289 : f32 to vector<8x128xf32>
    %753 = arith.addf %752, %751 : vector<8x128xf32>
    %cst_290 = arith.constant 1.000000e+00 : f32
    %754 = vector.broadcast %cst_290 : f32 to vector<8x128xf32>
    %755 = arith.addf %754, %751 : vector<8x128xf32>
    %756 = arith.mulf %753, %755 : vector<8x128xf32>
    %cst_291 = arith.constant 1.000000e+00 : f32
    %757 = vector.broadcast %cst_291 : f32 to vector<8x128xf32>
    %758 = arith.subf %756, %757 : vector<8x128xf32>
    %cst_292 = arith.constant 1.000000e+00 : f32
    %759 = vector.broadcast %cst_292 : f32 to vector<8x128xf32>
    %760 = arith.addf %756, %759 : vector<8x128xf32>
    %761 = arith.divf %758, %760 : vector<8x128xf32>
    %762 = arith.mulf %748, %761 : vector<8x128xf32>
    %cst_293 = arith.constant dense<0.000000e+00> : vector<8x128xf32>
    %763 = tpu.matmul %762, %5, %cst_293 {dimension_numbers = #tpu.dot_dimension_numbers<[1], [0], [0], [1], [0, 0, 1, 1], [], []>} : vector<8x128xf32>, vector<128x128xf32>, vector<8x128xf32> -> vector<8x128xf32>
    %764 = vector.broadcast %6 : vector<1x128xf32> to vector<8x128xf32>
    %765 = arith.addf %763, %764 : vector<8x128xf32>
    %c5_i32_294 = arith.constant 5 : i32
    %766 = arith.muli %c5_i32_294, %707 : i32
    %c0_i32_295 = arith.constant 0 : i32
    %767 = arith.addi %766, %c0_i32_295 : i32
    %768 = arith.index_cast %767 : i32 to index
    %769 = memref.load %arg1[%768] : memref<100xf32, #tpu.memory_space<smem>>
    %c5_i32_296 = arith.constant 5 : i32
    %770 = arith.muli %c5_i32_296, %707 : i32
    %c1_i32_297 = arith.constant 1 : i32
    %771 = arith.addi %770, %c1_i32_297 : i32
    %772 = arith.index_cast %771 : i32 to index
    %773 = memref.load %arg1[%772] : memref<100xf32, #tpu.memory_space<smem>>
    %c5_i32_298 = arith.constant 5 : i32
    %774 = arith.muli %c5_i32_298, %707 : i32
    %c2_i32_299 = arith.constant 2 : i32
    %775 = arith.addi %774, %c2_i32_299 : i32
    %776 = arith.index_cast %775 : i32 to index
    %777 = memref.load %arg1[%776] : memref<100xf32, #tpu.memory_space<smem>>
    %c5_i32_300 = arith.constant 5 : i32
    %778 = arith.muli %c5_i32_300, %707 : i32
    %c3_i32_301 = arith.constant 3 : i32
    %779 = arith.addi %778, %c3_i32_301 : i32
    %780 = arith.index_cast %779 : i32 to index
    %781 = memref.load %arg1[%780] : memref<100xf32, #tpu.memory_space<smem>>
    %c5_i32_302 = arith.constant 5 : i32
    %782 = arith.muli %c5_i32_302, %707 : i32
    %c4_i32_303 = arith.constant 4 : i32
    %783 = arith.addi %782, %c4_i32_303 : i32
    %784 = arith.index_cast %783 : i32 to index
    %785 = memref.load %arg1[%784] : memref<100xf32, #tpu.memory_space<smem>>
    %786 = vector.broadcast %769 : f32 to vector<8x128xf32>
    %787 = arith.mulf %786, %706 : vector<8x128xf32>
    %788 = vector.broadcast %773 : f32 to vector<8x128xf32>
    %789 = arith.mulf %788, %765 : vector<8x128xf32>
    %790 = arith.subf %787, %789 : vector<8x128xf32>
    %cst_304 = arith.constant -1.000000e+00 : f32
    %cst_305 = arith.constant 1.000000e+00 : f32
    %791 = vector.broadcast %cst_304 : f32 to vector<8x128xf32>
    %792 = arith.maximumf %791, %790 : vector<8x128xf32>
    %793 = vector.broadcast %cst_305 : f32 to vector<8x128xf32>
    %794 = arith.minimumf %793, %792 : vector<8x128xf32>
    %795 = vector.broadcast %777 : f32 to vector<8x128xf32>
    %796 = arith.mulf %795, %794 : vector<8x128xf32>
    %797 = vector.broadcast %781 : f32 to vector<8x128xf32>
    %798 = arith.mulf %797, %706 : vector<8x128xf32>
    %799 = arith.addf %796, %798 : vector<8x128xf32>
    %800 = arith.index_cast %707 : i32 to index
    %c0_306 = arith.constant 0 : index
    %c0_307 = arith.constant 0 : index
    %801 = vector.load %arg4[%800, %c0_306, %c0_307] : memref<20x8x128xf32, #tpu.memory_space<vmem>>, vector<1x8x128xf32>
    %802 = vector.shape_cast %801 : vector<1x8x128xf32> to vector<8x128xf32>
    %803 = vector.broadcast %785 : f32 to vector<8x128xf32>
    %804 = arith.mulf %803, %802 : vector<8x128xf32>
    %805 = arith.addf %799, %804 : vector<8x128xf32>
    %c8_i32 = arith.constant 8 : i32
    %c19_i32_308 = arith.constant 19 : i32
    %806 = arith.subi %c19_i32_308, %c8_i32 : i32
    %807 = arith.index_cast %806 : i32 to index
    %c0_309 = arith.constant 0 : index
    %c0_310 = arith.constant 0 : index
    %808 = vector.load %arg5[%807, %c0_309, %c0_310] : memref<20x1x128xf32, #tpu.memory_space<vmem>>, vector<1x1x128xf32>
    %809 = vector.shape_cast %808 : vector<1x1x128xf32> to vector<1x128xf32>
    %cst_311 = arith.constant dense<0.000000e+00> : vector<8x128xf32>
    %810 = tpu.matmul %805, %0, %cst_311 {dimension_numbers = #tpu.dot_dimension_numbers<[1], [0], [0], [1], [0, 0, 1, 1], [], []>} : vector<8x128xf32>, vector<128x128xf32>, vector<8x128xf32> -> vector<8x128xf32>
    %811 = vector.broadcast %809 : vector<1x128xf32> to vector<8x128xf32>
    %812 = arith.addf %810, %811 : vector<8x128xf32>
    %813 = arith.addf %812, %12 : vector<8x128xf32>
    %cst_312 = arith.constant 2.000000e+01 : f32
    %814 = vector.broadcast %cst_312 : f32 to vector<8x128xf32>
    %815 = arith.minimumf %813, %814 : vector<8x128xf32>
    %816 = math.exp %815 : vector<8x128xf32>
    %cst_313 = arith.constant 1.000000e+00 : f32
    %817 = vector.broadcast %cst_313 : f32 to vector<8x128xf32>
    %818 = arith.addf %817, %816 : vector<8x128xf32>
    %cst_314 = arith.constant 1.000000e+00 : f32
    %819 = vector.broadcast %cst_314 : f32 to vector<8x128xf32>
    %820 = arith.addf %819, %816 : vector<8x128xf32>
    %821 = arith.mulf %818, %820 : vector<8x128xf32>
    %cst_315 = arith.constant 1.000000e+00 : f32
    %822 = vector.broadcast %cst_315 : f32 to vector<8x128xf32>
    %823 = arith.subf %821, %822 : vector<8x128xf32>
    %cst_316 = arith.constant 1.000000e+00 : f32
    %824 = vector.broadcast %cst_316 : f32 to vector<8x128xf32>
    %825 = arith.addf %821, %824 : vector<8x128xf32>
    %826 = arith.divf %823, %825 : vector<8x128xf32>
    %827 = arith.mulf %813, %826 : vector<8x128xf32>
    %cst_317 = arith.constant dense<0.000000e+00> : vector<8x128xf32>
    %828 = tpu.matmul %827, %1, %cst_317 {dimension_numbers = #tpu.dot_dimension_numbers<[1], [0], [0], [1], [0, 0, 1, 1], [], []>} : vector<8x128xf32>, vector<128x128xf32>, vector<8x128xf32> -> vector<8x128xf32>
    %829 = vector.broadcast %2 : vector<1x128xf32> to vector<8x128xf32>
    %830 = arith.addf %828, %829 : vector<8x128xf32>
    %cst_318 = arith.constant 2.000000e+01 : f32
    %831 = vector.broadcast %cst_318 : f32 to vector<8x128xf32>
    %832 = arith.minimumf %830, %831 : vector<8x128xf32>
    %833 = math.exp %832 : vector<8x128xf32>
    %cst_319 = arith.constant 1.000000e+00 : f32
    %834 = vector.broadcast %cst_319 : f32 to vector<8x128xf32>
    %835 = arith.addf %834, %833 : vector<8x128xf32>
    %cst_320 = arith.constant 1.000000e+00 : f32
    %836 = vector.broadcast %cst_320 : f32 to vector<8x128xf32>
    %837 = arith.addf %836, %833 : vector<8x128xf32>
    %838 = arith.mulf %835, %837 : vector<8x128xf32>
    %cst_321 = arith.constant 1.000000e+00 : f32
    %839 = vector.broadcast %cst_321 : f32 to vector<8x128xf32>
    %840 = arith.subf %838, %839 : vector<8x128xf32>
    %cst_322 = arith.constant 1.000000e+00 : f32
    %841 = vector.broadcast %cst_322 : f32 to vector<8x128xf32>
    %842 = arith.addf %838, %841 : vector<8x128xf32>
    %843 = arith.divf %840, %842 : vector<8x128xf32>
    %844 = arith.mulf %830, %843 : vector<8x128xf32>
    %cst_323 = arith.constant dense<0.000000e+00> : vector<8x128xf32>
    %845 = tpu.matmul %844, %3, %cst_323 {dimension_numbers = #tpu.dot_dimension_numbers<[1], [0], [0], [1], [0, 0, 1, 1], [], []>} : vector<8x128xf32>, vector<128x128xf32>, vector<8x128xf32> -> vector<8x128xf32>
    %846 = vector.broadcast %4 : vector<1x128xf32> to vector<8x128xf32>
    %847 = arith.addf %845, %846 : vector<8x128xf32>
    %cst_324 = arith.constant 2.000000e+01 : f32
    %848 = vector.broadcast %cst_324 : f32 to vector<8x128xf32>
    %849 = arith.minimumf %847, %848 : vector<8x128xf32>
    %850 = math.exp %849 : vector<8x128xf32>
    %cst_325 = arith.constant 1.000000e+00 : f32
    %851 = vector.broadcast %cst_325 : f32 to vector<8x128xf32>
    %852 = arith.addf %851, %850 : vector<8x128xf32>
    %cst_326 = arith.constant 1.000000e+00 : f32
    %853 = vector.broadcast %cst_326 : f32 to vector<8x128xf32>
    %854 = arith.addf %853, %850 : vector<8x128xf32>
    %855 = arith.mulf %852, %854 : vector<8x128xf32>
    %cst_327 = arith.constant 1.000000e+00 : f32
    %856 = vector.broadcast %cst_327 : f32 to vector<8x128xf32>
    %857 = arith.subf %855, %856 : vector<8x128xf32>
    %cst_328 = arith.constant 1.000000e+00 : f32
    %858 = vector.broadcast %cst_328 : f32 to vector<8x128xf32>
    %859 = arith.addf %855, %858 : vector<8x128xf32>
    %860 = arith.divf %857, %859 : vector<8x128xf32>
    %861 = arith.mulf %847, %860 : vector<8x128xf32>
    %cst_329 = arith.constant dense<0.000000e+00> : vector<8x128xf32>
    %862 = tpu.matmul %861, %5, %cst_329 {dimension_numbers = #tpu.dot_dimension_numbers<[1], [0], [0], [1], [0, 0, 1, 1], [], []>} : vector<8x128xf32>, vector<128x128xf32>, vector<8x128xf32> -> vector<8x128xf32>
    %863 = vector.broadcast %6 : vector<1x128xf32> to vector<8x128xf32>
    %864 = arith.addf %862, %863 : vector<8x128xf32>
    %c5_i32_330 = arith.constant 5 : i32
    %865 = arith.muli %c5_i32_330, %806 : i32
    %c0_i32_331 = arith.constant 0 : i32
    %866 = arith.addi %865, %c0_i32_331 : i32
    %867 = arith.index_cast %866 : i32 to index
    %868 = memref.load %arg1[%867] : memref<100xf32, #tpu.memory_space<smem>>
    %c5_i32_332 = arith.constant 5 : i32
    %869 = arith.muli %c5_i32_332, %806 : i32
    %c1_i32_333 = arith.constant 1 : i32
    %870 = arith.addi %869, %c1_i32_333 : i32
    %871 = arith.index_cast %870 : i32 to index
    %872 = memref.load %arg1[%871] : memref<100xf32, #tpu.memory_space<smem>>
    %c5_i32_334 = arith.constant 5 : i32
    %873 = arith.muli %c5_i32_334, %806 : i32
    %c2_i32_335 = arith.constant 2 : i32
    %874 = arith.addi %873, %c2_i32_335 : i32
    %875 = arith.index_cast %874 : i32 to index
    %876 = memref.load %arg1[%875] : memref<100xf32, #tpu.memory_space<smem>>
    %c5_i32_336 = arith.constant 5 : i32
    %877 = arith.muli %c5_i32_336, %806 : i32
    %c3_i32_337 = arith.constant 3 : i32
    %878 = arith.addi %877, %c3_i32_337 : i32
    %879 = arith.index_cast %878 : i32 to index
    %880 = memref.load %arg1[%879] : memref<100xf32, #tpu.memory_space<smem>>
    %c5_i32_338 = arith.constant 5 : i32
    %881 = arith.muli %c5_i32_338, %806 : i32
    %c4_i32_339 = arith.constant 4 : i32
    %882 = arith.addi %881, %c4_i32_339 : i32
    %883 = arith.index_cast %882 : i32 to index
    %884 = memref.load %arg1[%883] : memref<100xf32, #tpu.memory_space<smem>>
    %885 = vector.broadcast %868 : f32 to vector<8x128xf32>
    %886 = arith.mulf %885, %805 : vector<8x128xf32>
    %887 = vector.broadcast %872 : f32 to vector<8x128xf32>
    %888 = arith.mulf %887, %864 : vector<8x128xf32>
    %889 = arith.subf %886, %888 : vector<8x128xf32>
    %cst_340 = arith.constant -1.000000e+00 : f32
    %cst_341 = arith.constant 1.000000e+00 : f32
    %890 = vector.broadcast %cst_340 : f32 to vector<8x128xf32>
    %891 = arith.maximumf %890, %889 : vector<8x128xf32>
    %892 = vector.broadcast %cst_341 : f32 to vector<8x128xf32>
    %893 = arith.minimumf %892, %891 : vector<8x128xf32>
    %894 = vector.broadcast %876 : f32 to vector<8x128xf32>
    %895 = arith.mulf %894, %893 : vector<8x128xf32>
    %896 = vector.broadcast %880 : f32 to vector<8x128xf32>
    %897 = arith.mulf %896, %805 : vector<8x128xf32>
    %898 = arith.addf %895, %897 : vector<8x128xf32>
    %899 = arith.index_cast %806 : i32 to index
    %c0_342 = arith.constant 0 : index
    %c0_343 = arith.constant 0 : index
    %900 = vector.load %arg4[%899, %c0_342, %c0_343] : memref<20x8x128xf32, #tpu.memory_space<vmem>>, vector<1x8x128xf32>
    %901 = vector.shape_cast %900 : vector<1x8x128xf32> to vector<8x128xf32>
    %902 = vector.broadcast %884 : f32 to vector<8x128xf32>
    %903 = arith.mulf %902, %901 : vector<8x128xf32>
    %904 = arith.addf %898, %903 : vector<8x128xf32>
    %c9_i32 = arith.constant 9 : i32
    %c19_i32_344 = arith.constant 19 : i32
    %905 = arith.subi %c19_i32_344, %c9_i32 : i32
    %906 = arith.index_cast %905 : i32 to index
    %c0_345 = arith.constant 0 : index
    %c0_346 = arith.constant 0 : index
    %907 = vector.load %arg5[%906, %c0_345, %c0_346] : memref<20x1x128xf32, #tpu.memory_space<vmem>>, vector<1x1x128xf32>
    %908 = vector.shape_cast %907 : vector<1x1x128xf32> to vector<1x128xf32>
    %cst_347 = arith.constant dense<0.000000e+00> : vector<8x128xf32>
    %909 = tpu.matmul %904, %0, %cst_347 {dimension_numbers = #tpu.dot_dimension_numbers<[1], [0], [0], [1], [0, 0, 1, 1], [], []>} : vector<8x128xf32>, vector<128x128xf32>, vector<8x128xf32> -> vector<8x128xf32>
    %910 = vector.broadcast %908 : vector<1x128xf32> to vector<8x128xf32>
    %911 = arith.addf %909, %910 : vector<8x128xf32>
    %912 = arith.addf %911, %12 : vector<8x128xf32>
    %cst_348 = arith.constant 2.000000e+01 : f32
    %913 = vector.broadcast %cst_348 : f32 to vector<8x128xf32>
    %914 = arith.minimumf %912, %913 : vector<8x128xf32>
    %915 = math.exp %914 : vector<8x128xf32>
    %cst_349 = arith.constant 1.000000e+00 : f32
    %916 = vector.broadcast %cst_349 : f32 to vector<8x128xf32>
    %917 = arith.addf %916, %915 : vector<8x128xf32>
    %cst_350 = arith.constant 1.000000e+00 : f32
    %918 = vector.broadcast %cst_350 : f32 to vector<8x128xf32>
    %919 = arith.addf %918, %915 : vector<8x128xf32>
    %920 = arith.mulf %917, %919 : vector<8x128xf32>
    %cst_351 = arith.constant 1.000000e+00 : f32
    %921 = vector.broadcast %cst_351 : f32 to vector<8x128xf32>
    %922 = arith.subf %920, %921 : vector<8x128xf32>
    %cst_352 = arith.constant 1.000000e+00 : f32
    %923 = vector.broadcast %cst_352 : f32 to vector<8x128xf32>
    %924 = arith.addf %920, %923 : vector<8x128xf32>
    %925 = arith.divf %922, %924 : vector<8x128xf32>
    %926 = arith.mulf %912, %925 : vector<8x128xf32>
    %cst_353 = arith.constant dense<0.000000e+00> : vector<8x128xf32>
    %927 = tpu.matmul %926, %1, %cst_353 {dimension_numbers = #tpu.dot_dimension_numbers<[1], [0], [0], [1], [0, 0, 1, 1], [], []>} : vector<8x128xf32>, vector<128x128xf32>, vector<8x128xf32> -> vector<8x128xf32>
    %928 = vector.broadcast %2 : vector<1x128xf32> to vector<8x128xf32>
    %929 = arith.addf %927, %928 : vector<8x128xf32>
    %cst_354 = arith.constant 2.000000e+01 : f32
    %930 = vector.broadcast %cst_354 : f32 to vector<8x128xf32>
    %931 = arith.minimumf %929, %930 : vector<8x128xf32>
    %932 = math.exp %931 : vector<8x128xf32>
    %cst_355 = arith.constant 1.000000e+00 : f32
    %933 = vector.broadcast %cst_355 : f32 to vector<8x128xf32>
    %934 = arith.addf %933, %932 : vector<8x128xf32>
    %cst_356 = arith.constant 1.000000e+00 : f32
    %935 = vector.broadcast %cst_356 : f32 to vector<8x128xf32>
    %936 = arith.addf %935, %932 : vector<8x128xf32>
    %937 = arith.mulf %934, %936 : vector<8x128xf32>
    %cst_357 = arith.constant 1.000000e+00 : f32
    %938 = vector.broadcast %cst_357 : f32 to vector<8x128xf32>
    %939 = arith.subf %937, %938 : vector<8x128xf32>
    %cst_358 = arith.constant 1.000000e+00 : f32
    %940 = vector.broadcast %cst_358 : f32 to vector<8x128xf32>
    %941 = arith.addf %937, %940 : vector<8x128xf32>
    %942 = arith.divf %939, %941 : vector<8x128xf32>
    %943 = arith.mulf %929, %942 : vector<8x128xf32>
    %cst_359 = arith.constant dense<0.000000e+00> : vector<8x128xf32>
    %944 = tpu.matmul %943, %3, %cst_359 {dimension_numbers = #tpu.dot_dimension_numbers<[1], [0], [0], [1], [0, 0, 1, 1], [], []>} : vector<8x128xf32>, vector<128x128xf32>, vector<8x128xf32> -> vector<8x128xf32>
    %945 = vector.broadcast %4 : vector<1x128xf32> to vector<8x128xf32>
    %946 = arith.addf %944, %945 : vector<8x128xf32>
    %cst_360 = arith.constant 2.000000e+01 : f32
    %947 = vector.broadcast %cst_360 : f32 to vector<8x128xf32>
    %948 = arith.minimumf %946, %947 : vector<8x128xf32>
    %949 = math.exp %948 : vector<8x128xf32>
    %cst_361 = arith.constant 1.000000e+00 : f32
    %950 = vector.broadcast %cst_361 : f32 to vector<8x128xf32>
    %951 = arith.addf %950, %949 : vector<8x128xf32>
    %cst_362 = arith.constant 1.000000e+00 : f32
    %952 = vector.broadcast %cst_362 : f32 to vector<8x128xf32>
    %953 = arith.addf %952, %949 : vector<8x128xf32>
    %954 = arith.mulf %951, %953 : vector<8x128xf32>
    %cst_363 = arith.constant 1.000000e+00 : f32
    %955 = vector.broadcast %cst_363 : f32 to vector<8x128xf32>
    %956 = arith.subf %954, %955 : vector<8x128xf32>
    %cst_364 = arith.constant 1.000000e+00 : f32
    %957 = vector.broadcast %cst_364 : f32 to vector<8x128xf32>
    %958 = arith.addf %954, %957 : vector<8x128xf32>
    %959 = arith.divf %956, %958 : vector<8x128xf32>
    %960 = arith.mulf %946, %959 : vector<8x128xf32>
    %cst_365 = arith.constant dense<0.000000e+00> : vector<8x128xf32>
    %961 = tpu.matmul %960, %5, %cst_365 {dimension_numbers = #tpu.dot_dimension_numbers<[1], [0], [0], [1], [0, 0, 1, 1], [], []>} : vector<8x128xf32>, vector<128x128xf32>, vector<8x128xf32> -> vector<8x128xf32>
    %962 = vector.broadcast %6 : vector<1x128xf32> to vector<8x128xf32>
    %963 = arith.addf %961, %962 : vector<8x128xf32>
    %c5_i32_366 = arith.constant 5 : i32
    %964 = arith.muli %c5_i32_366, %905 : i32
    %c0_i32_367 = arith.constant 0 : i32
    %965 = arith.addi %964, %c0_i32_367 : i32
    %966 = arith.index_cast %965 : i32 to index
    %967 = memref.load %arg1[%966] : memref<100xf32, #tpu.memory_space<smem>>
    %c5_i32_368 = arith.constant 5 : i32
    %968 = arith.muli %c5_i32_368, %905 : i32
    %c1_i32_369 = arith.constant 1 : i32
    %969 = arith.addi %968, %c1_i32_369 : i32
    %970 = arith.index_cast %969 : i32 to index
    %971 = memref.load %arg1[%970] : memref<100xf32, #tpu.memory_space<smem>>
    %c5_i32_370 = arith.constant 5 : i32
    %972 = arith.muli %c5_i32_370, %905 : i32
    %c2_i32_371 = arith.constant 2 : i32
    %973 = arith.addi %972, %c2_i32_371 : i32
    %974 = arith.index_cast %973 : i32 to index
    %975 = memref.load %arg1[%974] : memref<100xf32, #tpu.memory_space<smem>>
    %c5_i32_372 = arith.constant 5 : i32
    %976 = arith.muli %c5_i32_372, %905 : i32
    %c3_i32_373 = arith.constant 3 : i32
    %977 = arith.addi %976, %c3_i32_373 : i32
    %978 = arith.index_cast %977 : i32 to index
    %979 = memref.load %arg1[%978] : memref<100xf32, #tpu.memory_space<smem>>
    %c5_i32_374 = arith.constant 5 : i32
    %980 = arith.muli %c5_i32_374, %905 : i32
    %c4_i32_375 = arith.constant 4 : i32
    %981 = arith.addi %980, %c4_i32_375 : i32
    %982 = arith.index_cast %981 : i32 to index
    %983 = memref.load %arg1[%982] : memref<100xf32, #tpu.memory_space<smem>>
    %984 = vector.broadcast %967 : f32 to vector<8x128xf32>
    %985 = arith.mulf %984, %904 : vector<8x128xf32>
    %986 = vector.broadcast %971 : f32 to vector<8x128xf32>
    %987 = arith.mulf %986, %963 : vector<8x128xf32>
    %988 = arith.subf %985, %987 : vector<8x128xf32>
    %cst_376 = arith.constant -1.000000e+00 : f32
    %cst_377 = arith.constant 1.000000e+00 : f32
    %989 = vector.broadcast %cst_376 : f32 to vector<8x128xf32>
    %990 = arith.maximumf %989, %988 : vector<8x128xf32>
    %991 = vector.broadcast %cst_377 : f32 to vector<8x128xf32>
    %992 = arith.minimumf %991, %990 : vector<8x128xf32>
    %993 = vector.broadcast %975 : f32 to vector<8x128xf32>
    %994 = arith.mulf %993, %992 : vector<8x128xf32>
    %995 = vector.broadcast %979 : f32 to vector<8x128xf32>
    %996 = arith.mulf %995, %904 : vector<8x128xf32>
    %997 = arith.addf %994, %996 : vector<8x128xf32>
    %998 = arith.index_cast %905 : i32 to index
    %c0_378 = arith.constant 0 : index
    %c0_379 = arith.constant 0 : index
    %999 = vector.load %arg4[%998, %c0_378, %c0_379] : memref<20x8x128xf32, #tpu.memory_space<vmem>>, vector<1x8x128xf32>
    %1000 = vector.shape_cast %999 : vector<1x8x128xf32> to vector<8x128xf32>
    %1001 = vector.broadcast %983 : f32 to vector<8x128xf32>
    %1002 = arith.mulf %1001, %1000 : vector<8x128xf32>
    %1003 = arith.addf %997, %1002 : vector<8x128xf32>
    %c10_i32 = arith.constant 10 : i32
    %c19_i32_380 = arith.constant 19 : i32
    %1004 = arith.subi %c19_i32_380, %c10_i32 : i32
    %1005 = arith.index_cast %1004 : i32 to index
    %c0_381 = arith.constant 0 : index
    %c0_382 = arith.constant 0 : index
    %1006 = vector.load %arg5[%1005, %c0_381, %c0_382] : memref<20x1x128xf32, #tpu.memory_space<vmem>>, vector<1x1x128xf32>
    %1007 = vector.shape_cast %1006 : vector<1x1x128xf32> to vector<1x128xf32>
    %cst_383 = arith.constant dense<0.000000e+00> : vector<8x128xf32>
    %1008 = tpu.matmul %1003, %0, %cst_383 {dimension_numbers = #tpu.dot_dimension_numbers<[1], [0], [0], [1], [0, 0, 1, 1], [], []>} : vector<8x128xf32>, vector<128x128xf32>, vector<8x128xf32> -> vector<8x128xf32>
    %1009 = vector.broadcast %1007 : vector<1x128xf32> to vector<8x128xf32>
    %1010 = arith.addf %1008, %1009 : vector<8x128xf32>
    %1011 = arith.addf %1010, %12 : vector<8x128xf32>
    %cst_384 = arith.constant 2.000000e+01 : f32
    %1012 = vector.broadcast %cst_384 : f32 to vector<8x128xf32>
    %1013 = arith.minimumf %1011, %1012 : vector<8x128xf32>
    %1014 = math.exp %1013 : vector<8x128xf32>
    %cst_385 = arith.constant 1.000000e+00 : f32
    %1015 = vector.broadcast %cst_385 : f32 to vector<8x128xf32>
    %1016 = arith.addf %1015, %1014 : vector<8x128xf32>
    %cst_386 = arith.constant 1.000000e+00 : f32
    %1017 = vector.broadcast %cst_386 : f32 to vector<8x128xf32>
    %1018 = arith.addf %1017, %1014 : vector<8x128xf32>
    %1019 = arith.mulf %1016, %1018 : vector<8x128xf32>
    %cst_387 = arith.constant 1.000000e+00 : f32
    %1020 = vector.broadcast %cst_387 : f32 to vector<8x128xf32>
    %1021 = arith.subf %1019, %1020 : vector<8x128xf32>
    %cst_388 = arith.constant 1.000000e+00 : f32
    %1022 = vector.broadcast %cst_388 : f32 to vector<8x128xf32>
    %1023 = arith.addf %1019, %1022 : vector<8x128xf32>
    %1024 = arith.divf %1021, %1023 : vector<8x128xf32>
    %1025 = arith.mulf %1011, %1024 : vector<8x128xf32>
    %cst_389 = arith.constant dense<0.000000e+00> : vector<8x128xf32>
    %1026 = tpu.matmul %1025, %1, %cst_389 {dimension_numbers = #tpu.dot_dimension_numbers<[1], [0], [0], [1], [0, 0, 1, 1], [], []>} : vector<8x128xf32>, vector<128x128xf32>, vector<8x128xf32> -> vector<8x128xf32>
    %1027 = vector.broadcast %2 : vector<1x128xf32> to vector<8x128xf32>
    %1028 = arith.addf %1026, %1027 : vector<8x128xf32>
    %cst_390 = arith.constant 2.000000e+01 : f32
    %1029 = vector.broadcast %cst_390 : f32 to vector<8x128xf32>
    %1030 = arith.minimumf %1028, %1029 : vector<8x128xf32>
    %1031 = math.exp %1030 : vector<8x128xf32>
    %cst_391 = arith.constant 1.000000e+00 : f32
    %1032 = vector.broadcast %cst_391 : f32 to vector<8x128xf32>
    %1033 = arith.addf %1032, %1031 : vector<8x128xf32>
    %cst_392 = arith.constant 1.000000e+00 : f32
    %1034 = vector.broadcast %cst_392 : f32 to vector<8x128xf32>
    %1035 = arith.addf %1034, %1031 : vector<8x128xf32>
    %1036 = arith.mulf %1033, %1035 : vector<8x128xf32>
    %cst_393 = arith.constant 1.000000e+00 : f32
    %1037 = vector.broadcast %cst_393 : f32 to vector<8x128xf32>
    %1038 = arith.subf %1036, %1037 : vector<8x128xf32>
    %cst_394 = arith.constant 1.000000e+00 : f32
    %1039 = vector.broadcast %cst_394 : f32 to vector<8x128xf32>
    %1040 = arith.addf %1036, %1039 : vector<8x128xf32>
    %1041 = arith.divf %1038, %1040 : vector<8x128xf32>
    %1042 = arith.mulf %1028, %1041 : vector<8x128xf32>
    %cst_395 = arith.constant dense<0.000000e+00> : vector<8x128xf32>
    %1043 = tpu.matmul %1042, %3, %cst_395 {dimension_numbers = #tpu.dot_dimension_numbers<[1], [0], [0], [1], [0, 0, 1, 1], [], []>} : vector<8x128xf32>, vector<128x128xf32>, vector<8x128xf32> -> vector<8x128xf32>
    %1044 = vector.broadcast %4 : vector<1x128xf32> to vector<8x128xf32>
    %1045 = arith.addf %1043, %1044 : vector<8x128xf32>
    %cst_396 = arith.constant 2.000000e+01 : f32
    %1046 = vector.broadcast %cst_396 : f32 to vector<8x128xf32>
    %1047 = arith.minimumf %1045, %1046 : vector<8x128xf32>
    %1048 = math.exp %1047 : vector<8x128xf32>
    %cst_397 = arith.constant 1.000000e+00 : f32
    %1049 = vector.broadcast %cst_397 : f32 to vector<8x128xf32>
    %1050 = arith.addf %1049, %1048 : vector<8x128xf32>
    %cst_398 = arith.constant 1.000000e+00 : f32
    %1051 = vector.broadcast %cst_398 : f32 to vector<8x128xf32>
    %1052 = arith.addf %1051, %1048 : vector<8x128xf32>
    %1053 = arith.mulf %1050, %1052 : vector<8x128xf32>
    %cst_399 = arith.constant 1.000000e+00 : f32
    %1054 = vector.broadcast %cst_399 : f32 to vector<8x128xf32>
    %1055 = arith.subf %1053, %1054 : vector<8x128xf32>
    %cst_400 = arith.constant 1.000000e+00 : f32
    %1056 = vector.broadcast %cst_400 : f32 to vector<8x128xf32>
    %1057 = arith.addf %1053, %1056 : vector<8x128xf32>
    %1058 = arith.divf %1055, %1057 : vector<8x128xf32>
    %1059 = arith.mulf %1045, %1058 : vector<8x128xf32>
    %cst_401 = arith.constant dense<0.000000e+00> : vector<8x128xf32>
    %1060 = tpu.matmul %1059, %5, %cst_401 {dimension_numbers = #tpu.dot_dimension_numbers<[1], [0], [0], [1], [0, 0, 1, 1], [], []>} : vector<8x128xf32>, vector<128x128xf32>, vector<8x128xf32> -> vector<8x128xf32>
    %1061 = vector.broadcast %6 : vector<1x128xf32> to vector<8x128xf32>
    %1062 = arith.addf %1060, %1061 : vector<8x128xf32>
    %c5_i32_402 = arith.constant 5 : i32
    %1063 = arith.muli %c5_i32_402, %1004 : i32
    %c0_i32_403 = arith.constant 0 : i32
    %1064 = arith.addi %1063, %c0_i32_403 : i32
    %1065 = arith.index_cast %1064 : i32 to index
    %1066 = memref.load %arg1[%1065] : memref<100xf32, #tpu.memory_space<smem>>
    %c5_i32_404 = arith.constant 5 : i32
    %1067 = arith.muli %c5_i32_404, %1004 : i32
    %c1_i32_405 = arith.constant 1 : i32
    %1068 = arith.addi %1067, %c1_i32_405 : i32
    %1069 = arith.index_cast %1068 : i32 to index
    %1070 = memref.load %arg1[%1069] : memref<100xf32, #tpu.memory_space<smem>>
    %c5_i32_406 = arith.constant 5 : i32
    %1071 = arith.muli %c5_i32_406, %1004 : i32
    %c2_i32_407 = arith.constant 2 : i32
    %1072 = arith.addi %1071, %c2_i32_407 : i32
    %1073 = arith.index_cast %1072 : i32 to index
    %1074 = memref.load %arg1[%1073] : memref<100xf32, #tpu.memory_space<smem>>
    %c5_i32_408 = arith.constant 5 : i32
    %1075 = arith.muli %c5_i32_408, %1004 : i32
    %c3_i32_409 = arith.constant 3 : i32
    %1076 = arith.addi %1075, %c3_i32_409 : i32
    %1077 = arith.index_cast %1076 : i32 to index
    %1078 = memref.load %arg1[%1077] : memref<100xf32, #tpu.memory_space<smem>>
    %c5_i32_410 = arith.constant 5 : i32
    %1079 = arith.muli %c5_i32_410, %1004 : i32
    %c4_i32_411 = arith.constant 4 : i32
    %1080 = arith.addi %1079, %c4_i32_411 : i32
    %1081 = arith.index_cast %1080 : i32 to index
    %1082 = memref.load %arg1[%1081] : memref<100xf32, #tpu.memory_space<smem>>
    %1083 = vector.broadcast %1066 : f32 to vector<8x128xf32>
    %1084 = arith.mulf %1083, %1003 : vector<8x128xf32>
    %1085 = vector.broadcast %1070 : f32 to vector<8x128xf32>
    %1086 = arith.mulf %1085, %1062 : vector<8x128xf32>
    %1087 = arith.subf %1084, %1086 : vector<8x128xf32>
    %cst_412 = arith.constant -1.000000e+00 : f32
    %cst_413 = arith.constant 1.000000e+00 : f32
    %1088 = vector.broadcast %cst_412 : f32 to vector<8x128xf32>
    %1089 = arith.maximumf %1088, %1087 : vector<8x128xf32>
    %1090 = vector.broadcast %cst_413 : f32 to vector<8x128xf32>
    %1091 = arith.minimumf %1090, %1089 : vector<8x128xf32>
    %1092 = vector.broadcast %1074 : f32 to vector<8x128xf32>
    %1093 = arith.mulf %1092, %1091 : vector<8x128xf32>
    %1094 = vector.broadcast %1078 : f32 to vector<8x128xf32>
    %1095 = arith.mulf %1094, %1003 : vector<8x128xf32>
    %1096 = arith.addf %1093, %1095 : vector<8x128xf32>
    %1097 = arith.index_cast %1004 : i32 to index
    %c0_414 = arith.constant 0 : index
    %c0_415 = arith.constant 0 : index
    %1098 = vector.load %arg4[%1097, %c0_414, %c0_415] : memref<20x8x128xf32, #tpu.memory_space<vmem>>, vector<1x8x128xf32>
    %1099 = vector.shape_cast %1098 : vector<1x8x128xf32> to vector<8x128xf32>
    %1100 = vector.broadcast %1082 : f32 to vector<8x128xf32>
    %1101 = arith.mulf %1100, %1099 : vector<8x128xf32>
    %1102 = arith.addf %1096, %1101 : vector<8x128xf32>
    %c11_i32 = arith.constant 11 : i32
    %c19_i32_416 = arith.constant 19 : i32
    %1103 = arith.subi %c19_i32_416, %c11_i32 : i32
    %1104 = arith.index_cast %1103 : i32 to index
    %c0_417 = arith.constant 0 : index
    %c0_418 = arith.constant 0 : index
    %1105 = vector.load %arg5[%1104, %c0_417, %c0_418] : memref<20x1x128xf32, #tpu.memory_space<vmem>>, vector<1x1x128xf32>
    %1106 = vector.shape_cast %1105 : vector<1x1x128xf32> to vector<1x128xf32>
    %cst_419 = arith.constant dense<0.000000e+00> : vector<8x128xf32>
    %1107 = tpu.matmul %1102, %0, %cst_419 {dimension_numbers = #tpu.dot_dimension_numbers<[1], [0], [0], [1], [0, 0, 1, 1], [], []>} : vector<8x128xf32>, vector<128x128xf32>, vector<8x128xf32> -> vector<8x128xf32>
    %1108 = vector.broadcast %1106 : vector<1x128xf32> to vector<8x128xf32>
    %1109 = arith.addf %1107, %1108 : vector<8x128xf32>
    %1110 = arith.addf %1109, %12 : vector<8x128xf32>
    %cst_420 = arith.constant 2.000000e+01 : f32
    %1111 = vector.broadcast %cst_420 : f32 to vector<8x128xf32>
    %1112 = arith.minimumf %1110, %1111 : vector<8x128xf32>
    %1113 = math.exp %1112 : vector<8x128xf32>
    %cst_421 = arith.constant 1.000000e+00 : f32
    %1114 = vector.broadcast %cst_421 : f32 to vector<8x128xf32>
    %1115 = arith.addf %1114, %1113 : vector<8x128xf32>
    %cst_422 = arith.constant 1.000000e+00 : f32
    %1116 = vector.broadcast %cst_422 : f32 to vector<8x128xf32>
    %1117 = arith.addf %1116, %1113 : vector<8x128xf32>
    %1118 = arith.mulf %1115, %1117 : vector<8x128xf32>
    %cst_423 = arith.constant 1.000000e+00 : f32
    %1119 = vector.broadcast %cst_423 : f32 to vector<8x128xf32>
    %1120 = arith.subf %1118, %1119 : vector<8x128xf32>
    %cst_424 = arith.constant 1.000000e+00 : f32
    %1121 = vector.broadcast %cst_424 : f32 to vector<8x128xf32>
    %1122 = arith.addf %1118, %1121 : vector<8x128xf32>
    %1123 = arith.divf %1120, %1122 : vector<8x128xf32>
    %1124 = arith.mulf %1110, %1123 : vector<8x128xf32>
    %cst_425 = arith.constant dense<0.000000e+00> : vector<8x128xf32>
    %1125 = tpu.matmul %1124, %1, %cst_425 {dimension_numbers = #tpu.dot_dimension_numbers<[1], [0], [0], [1], [0, 0, 1, 1], [], []>} : vector<8x128xf32>, vector<128x128xf32>, vector<8x128xf32> -> vector<8x128xf32>
    %1126 = vector.broadcast %2 : vector<1x128xf32> to vector<8x128xf32>
    %1127 = arith.addf %1125, %1126 : vector<8x128xf32>
    %cst_426 = arith.constant 2.000000e+01 : f32
    %1128 = vector.broadcast %cst_426 : f32 to vector<8x128xf32>
    %1129 = arith.minimumf %1127, %1128 : vector<8x128xf32>
    %1130 = math.exp %1129 : vector<8x128xf32>
    %cst_427 = arith.constant 1.000000e+00 : f32
    %1131 = vector.broadcast %cst_427 : f32 to vector<8x128xf32>
    %1132 = arith.addf %1131, %1130 : vector<8x128xf32>
    %cst_428 = arith.constant 1.000000e+00 : f32
    %1133 = vector.broadcast %cst_428 : f32 to vector<8x128xf32>
    %1134 = arith.addf %1133, %1130 : vector<8x128xf32>
    %1135 = arith.mulf %1132, %1134 : vector<8x128xf32>
    %cst_429 = arith.constant 1.000000e+00 : f32
    %1136 = vector.broadcast %cst_429 : f32 to vector<8x128xf32>
    %1137 = arith.subf %1135, %1136 : vector<8x128xf32>
    %cst_430 = arith.constant 1.000000e+00 : f32
    %1138 = vector.broadcast %cst_430 : f32 to vector<8x128xf32>
    %1139 = arith.addf %1135, %1138 : vector<8x128xf32>
    %1140 = arith.divf %1137, %1139 : vector<8x128xf32>
    %1141 = arith.mulf %1127, %1140 : vector<8x128xf32>
    %cst_431 = arith.constant dense<0.000000e+00> : vector<8x128xf32>
    %1142 = tpu.matmul %1141, %3, %cst_431 {dimension_numbers = #tpu.dot_dimension_numbers<[1], [0], [0], [1], [0, 0, 1, 1], [], []>} : vector<8x128xf32>, vector<128x128xf32>, vector<8x128xf32> -> vector<8x128xf32>
    %1143 = vector.broadcast %4 : vector<1x128xf32> to vector<8x128xf32>
    %1144 = arith.addf %1142, %1143 : vector<8x128xf32>
    %cst_432 = arith.constant 2.000000e+01 : f32
    %1145 = vector.broadcast %cst_432 : f32 to vector<8x128xf32>
    %1146 = arith.minimumf %1144, %1145 : vector<8x128xf32>
    %1147 = math.exp %1146 : vector<8x128xf32>
    %cst_433 = arith.constant 1.000000e+00 : f32
    %1148 = vector.broadcast %cst_433 : f32 to vector<8x128xf32>
    %1149 = arith.addf %1148, %1147 : vector<8x128xf32>
    %cst_434 = arith.constant 1.000000e+00 : f32
    %1150 = vector.broadcast %cst_434 : f32 to vector<8x128xf32>
    %1151 = arith.addf %1150, %1147 : vector<8x128xf32>
    %1152 = arith.mulf %1149, %1151 : vector<8x128xf32>
    %cst_435 = arith.constant 1.000000e+00 : f32
    %1153 = vector.broadcast %cst_435 : f32 to vector<8x128xf32>
    %1154 = arith.subf %1152, %1153 : vector<8x128xf32>
    %cst_436 = arith.constant 1.000000e+00 : f32
    %1155 = vector.broadcast %cst_436 : f32 to vector<8x128xf32>
    %1156 = arith.addf %1152, %1155 : vector<8x128xf32>
    %1157 = arith.divf %1154, %1156 : vector<8x128xf32>
    %1158 = arith.mulf %1144, %1157 : vector<8x128xf32>
    %cst_437 = arith.constant dense<0.000000e+00> : vector<8x128xf32>
    %1159 = tpu.matmul %1158, %5, %cst_437 {dimension_numbers = #tpu.dot_dimension_numbers<[1], [0], [0], [1], [0, 0, 1, 1], [], []>} : vector<8x128xf32>, vector<128x128xf32>, vector<8x128xf32> -> vector<8x128xf32>
    %1160 = vector.broadcast %6 : vector<1x128xf32> to vector<8x128xf32>
    %1161 = arith.addf %1159, %1160 : vector<8x128xf32>
    %c5_i32_438 = arith.constant 5 : i32
    %1162 = arith.muli %c5_i32_438, %1103 : i32
    %c0_i32_439 = arith.constant 0 : i32
    %1163 = arith.addi %1162, %c0_i32_439 : i32
    %1164 = arith.index_cast %1163 : i32 to index
    %1165 = memref.load %arg1[%1164] : memref<100xf32, #tpu.memory_space<smem>>
    %c5_i32_440 = arith.constant 5 : i32
    %1166 = arith.muli %c5_i32_440, %1103 : i32
    %c1_i32_441 = arith.constant 1 : i32
    %1167 = arith.addi %1166, %c1_i32_441 : i32
    %1168 = arith.index_cast %1167 : i32 to index
    %1169 = memref.load %arg1[%1168] : memref<100xf32, #tpu.memory_space<smem>>
    %c5_i32_442 = arith.constant 5 : i32
    %1170 = arith.muli %c5_i32_442, %1103 : i32
    %c2_i32_443 = arith.constant 2 : i32
    %1171 = arith.addi %1170, %c2_i32_443 : i32
    %1172 = arith.index_cast %1171 : i32 to index
    %1173 = memref.load %arg1[%1172] : memref<100xf32, #tpu.memory_space<smem>>
    %c5_i32_444 = arith.constant 5 : i32
    %1174 = arith.muli %c5_i32_444, %1103 : i32
    %c3_i32_445 = arith.constant 3 : i32
    %1175 = arith.addi %1174, %c3_i32_445 : i32
    %1176 = arith.index_cast %1175 : i32 to index
    %1177 = memref.load %arg1[%1176] : memref<100xf32, #tpu.memory_space<smem>>
    %c5_i32_446 = arith.constant 5 : i32
    %1178 = arith.muli %c5_i32_446, %1103 : i32
    %c4_i32_447 = arith.constant 4 : i32
    %1179 = arith.addi %1178, %c4_i32_447 : i32
    %1180 = arith.index_cast %1179 : i32 to index
    %1181 = memref.load %arg1[%1180] : memref<100xf32, #tpu.memory_space<smem>>
    %1182 = vector.broadcast %1165 : f32 to vector<8x128xf32>
    %1183 = arith.mulf %1182, %1102 : vector<8x128xf32>
    %1184 = vector.broadcast %1169 : f32 to vector<8x128xf32>
    %1185 = arith.mulf %1184, %1161 : vector<8x128xf32>
    %1186 = arith.subf %1183, %1185 : vector<8x128xf32>
    %cst_448 = arith.constant -1.000000e+00 : f32
    %cst_449 = arith.constant 1.000000e+00 : f32
    %1187 = vector.broadcast %cst_448 : f32 to vector<8x128xf32>
    %1188 = arith.maximumf %1187, %1186 : vector<8x128xf32>
    %1189 = vector.broadcast %cst_449 : f32 to vector<8x128xf32>
    %1190 = arith.minimumf %1189, %1188 : vector<8x128xf32>
    %1191 = vector.broadcast %1173 : f32 to vector<8x128xf32>
    %1192 = arith.mulf %1191, %1190 : vector<8x128xf32>
    %1193 = vector.broadcast %1177 : f32 to vector<8x128xf32>
    %1194 = arith.mulf %1193, %1102 : vector<8x128xf32>
    %1195 = arith.addf %1192, %1194 : vector<8x128xf32>
    %1196 = arith.index_cast %1103 : i32 to index
    %c0_450 = arith.constant 0 : index
    %c0_451 = arith.constant 0 : index
    %1197 = vector.load %arg4[%1196, %c0_450, %c0_451] : memref<20x8x128xf32, #tpu.memory_space<vmem>>, vector<1x8x128xf32>
    %1198 = vector.shape_cast %1197 : vector<1x8x128xf32> to vector<8x128xf32>
    %1199 = vector.broadcast %1181 : f32 to vector<8x128xf32>
    %1200 = arith.mulf %1199, %1198 : vector<8x128xf32>
    %1201 = arith.addf %1195, %1200 : vector<8x128xf32>
    %c12_i32 = arith.constant 12 : i32
    %c19_i32_452 = arith.constant 19 : i32
    %1202 = arith.subi %c19_i32_452, %c12_i32 : i32
    %1203 = arith.index_cast %1202 : i32 to index
    %c0_453 = arith.constant 0 : index
    %c0_454 = arith.constant 0 : index
    %1204 = vector.load %arg5[%1203, %c0_453, %c0_454] : memref<20x1x128xf32, #tpu.memory_space<vmem>>, vector<1x1x128xf32>
    %1205 = vector.shape_cast %1204 : vector<1x1x128xf32> to vector<1x128xf32>
    %cst_455 = arith.constant dense<0.000000e+00> : vector<8x128xf32>
    %1206 = tpu.matmul %1201, %0, %cst_455 {dimension_numbers = #tpu.dot_dimension_numbers<[1], [0], [0], [1], [0, 0, 1, 1], [], []>} : vector<8x128xf32>, vector<128x128xf32>, vector<8x128xf32> -> vector<8x128xf32>
    %1207 = vector.broadcast %1205 : vector<1x128xf32> to vector<8x128xf32>
    %1208 = arith.addf %1206, %1207 : vector<8x128xf32>
    %1209 = arith.addf %1208, %12 : vector<8x128xf32>
    %cst_456 = arith.constant 2.000000e+01 : f32
    %1210 = vector.broadcast %cst_456 : f32 to vector<8x128xf32>
    %1211 = arith.minimumf %1209, %1210 : vector<8x128xf32>
    %1212 = math.exp %1211 : vector<8x128xf32>
    %cst_457 = arith.constant 1.000000e+00 : f32
    %1213 = vector.broadcast %cst_457 : f32 to vector<8x128xf32>
    %1214 = arith.addf %1213, %1212 : vector<8x128xf32>
    %cst_458 = arith.constant 1.000000e+00 : f32
    %1215 = vector.broadcast %cst_458 : f32 to vector<8x128xf32>
    %1216 = arith.addf %1215, %1212 : vector<8x128xf32>
    %1217 = arith.mulf %1214, %1216 : vector<8x128xf32>
    %cst_459 = arith.constant 1.000000e+00 : f32
    %1218 = vector.broadcast %cst_459 : f32 to vector<8x128xf32>
    %1219 = arith.subf %1217, %1218 : vector<8x128xf32>
    %cst_460 = arith.constant 1.000000e+00 : f32
    %1220 = vector.broadcast %cst_460 : f32 to vector<8x128xf32>
    %1221 = arith.addf %1217, %1220 : vector<8x128xf32>
    %1222 = arith.divf %1219, %1221 : vector<8x128xf32>
    %1223 = arith.mulf %1209, %1222 : vector<8x128xf32>
    %cst_461 = arith.constant dense<0.000000e+00> : vector<8x128xf32>
    %1224 = tpu.matmul %1223, %1, %cst_461 {dimension_numbers = #tpu.dot_dimension_numbers<[1], [0], [0], [1], [0, 0, 1, 1], [], []>} : vector<8x128xf32>, vector<128x128xf32>, vector<8x128xf32> -> vector<8x128xf32>
    %1225 = vector.broadcast %2 : vector<1x128xf32> to vector<8x128xf32>
    %1226 = arith.addf %1224, %1225 : vector<8x128xf32>
    %cst_462 = arith.constant 2.000000e+01 : f32
    %1227 = vector.broadcast %cst_462 : f32 to vector<8x128xf32>
    %1228 = arith.minimumf %1226, %1227 : vector<8x128xf32>
    %1229 = math.exp %1228 : vector<8x128xf32>
    %cst_463 = arith.constant 1.000000e+00 : f32
    %1230 = vector.broadcast %cst_463 : f32 to vector<8x128xf32>
    %1231 = arith.addf %1230, %1229 : vector<8x128xf32>
    %cst_464 = arith.constant 1.000000e+00 : f32
    %1232 = vector.broadcast %cst_464 : f32 to vector<8x128xf32>
    %1233 = arith.addf %1232, %1229 : vector<8x128xf32>
    %1234 = arith.mulf %1231, %1233 : vector<8x128xf32>
    %cst_465 = arith.constant 1.000000e+00 : f32
    %1235 = vector.broadcast %cst_465 : f32 to vector<8x128xf32>
    %1236 = arith.subf %1234, %1235 : vector<8x128xf32>
    %cst_466 = arith.constant 1.000000e+00 : f32
    %1237 = vector.broadcast %cst_466 : f32 to vector<8x128xf32>
    %1238 = arith.addf %1234, %1237 : vector<8x128xf32>
    %1239 = arith.divf %1236, %1238 : vector<8x128xf32>
    %1240 = arith.mulf %1226, %1239 : vector<8x128xf32>
    %cst_467 = arith.constant dense<0.000000e+00> : vector<8x128xf32>
    %1241 = tpu.matmul %1240, %3, %cst_467 {dimension_numbers = #tpu.dot_dimension_numbers<[1], [0], [0], [1], [0, 0, 1, 1], [], []>} : vector<8x128xf32>, vector<128x128xf32>, vector<8x128xf32> -> vector<8x128xf32>
    %1242 = vector.broadcast %4 : vector<1x128xf32> to vector<8x128xf32>
    %1243 = arith.addf %1241, %1242 : vector<8x128xf32>
    %cst_468 = arith.constant 2.000000e+01 : f32
    %1244 = vector.broadcast %cst_468 : f32 to vector<8x128xf32>
    %1245 = arith.minimumf %1243, %1244 : vector<8x128xf32>
    %1246 = math.exp %1245 : vector<8x128xf32>
    %cst_469 = arith.constant 1.000000e+00 : f32
    %1247 = vector.broadcast %cst_469 : f32 to vector<8x128xf32>
    %1248 = arith.addf %1247, %1246 : vector<8x128xf32>
    %cst_470 = arith.constant 1.000000e+00 : f32
    %1249 = vector.broadcast %cst_470 : f32 to vector<8x128xf32>
    %1250 = arith.addf %1249, %1246 : vector<8x128xf32>
    %1251 = arith.mulf %1248, %1250 : vector<8x128xf32>
    %cst_471 = arith.constant 1.000000e+00 : f32
    %1252 = vector.broadcast %cst_471 : f32 to vector<8x128xf32>
    %1253 = arith.subf %1251, %1252 : vector<8x128xf32>
    %cst_472 = arith.constant 1.000000e+00 : f32
    %1254 = vector.broadcast %cst_472 : f32 to vector<8x128xf32>
    %1255 = arith.addf %1251, %1254 : vector<8x128xf32>
    %1256 = arith.divf %1253, %1255 : vector<8x128xf32>
    %1257 = arith.mulf %1243, %1256 : vector<8x128xf32>
    %cst_473 = arith.constant dense<0.000000e+00> : vector<8x128xf32>
    %1258 = tpu.matmul %1257, %5, %cst_473 {dimension_numbers = #tpu.dot_dimension_numbers<[1], [0], [0], [1], [0, 0, 1, 1], [], []>} : vector<8x128xf32>, vector<128x128xf32>, vector<8x128xf32> -> vector<8x128xf32>
    %1259 = vector.broadcast %6 : vector<1x128xf32> to vector<8x128xf32>
    %1260 = arith.addf %1258, %1259 : vector<8x128xf32>
    %c5_i32_474 = arith.constant 5 : i32
    %1261 = arith.muli %c5_i32_474, %1202 : i32
    %c0_i32_475 = arith.constant 0 : i32
    %1262 = arith.addi %1261, %c0_i32_475 : i32
    %1263 = arith.index_cast %1262 : i32 to index
    %1264 = memref.load %arg1[%1263] : memref<100xf32, #tpu.memory_space<smem>>
    %c5_i32_476 = arith.constant 5 : i32
    %1265 = arith.muli %c5_i32_476, %1202 : i32
    %c1_i32_477 = arith.constant 1 : i32
    %1266 = arith.addi %1265, %c1_i32_477 : i32
    %1267 = arith.index_cast %1266 : i32 to index
    %1268 = memref.load %arg1[%1267] : memref<100xf32, #tpu.memory_space<smem>>
    %c5_i32_478 = arith.constant 5 : i32
    %1269 = arith.muli %c5_i32_478, %1202 : i32
    %c2_i32_479 = arith.constant 2 : i32
    %1270 = arith.addi %1269, %c2_i32_479 : i32
    %1271 = arith.index_cast %1270 : i32 to index
    %1272 = memref.load %arg1[%1271] : memref<100xf32, #tpu.memory_space<smem>>
    %c5_i32_480 = arith.constant 5 : i32
    %1273 = arith.muli %c5_i32_480, %1202 : i32
    %c3_i32_481 = arith.constant 3 : i32
    %1274 = arith.addi %1273, %c3_i32_481 : i32
    %1275 = arith.index_cast %1274 : i32 to index
    %1276 = memref.load %arg1[%1275] : memref<100xf32, #tpu.memory_space<smem>>
    %c5_i32_482 = arith.constant 5 : i32
    %1277 = arith.muli %c5_i32_482, %1202 : i32
    %c4_i32_483 = arith.constant 4 : i32
    %1278 = arith.addi %1277, %c4_i32_483 : i32
    %1279 = arith.index_cast %1278 : i32 to index
    %1280 = memref.load %arg1[%1279] : memref<100xf32, #tpu.memory_space<smem>>
    %1281 = vector.broadcast %1264 : f32 to vector<8x128xf32>
    %1282 = arith.mulf %1281, %1201 : vector<8x128xf32>
    %1283 = vector.broadcast %1268 : f32 to vector<8x128xf32>
    %1284 = arith.mulf %1283, %1260 : vector<8x128xf32>
    %1285 = arith.subf %1282, %1284 : vector<8x128xf32>
    %cst_484 = arith.constant -1.000000e+00 : f32
    %cst_485 = arith.constant 1.000000e+00 : f32
    %1286 = vector.broadcast %cst_484 : f32 to vector<8x128xf32>
    %1287 = arith.maximumf %1286, %1285 : vector<8x128xf32>
    %1288 = vector.broadcast %cst_485 : f32 to vector<8x128xf32>
    %1289 = arith.minimumf %1288, %1287 : vector<8x128xf32>
    %1290 = vector.broadcast %1272 : f32 to vector<8x128xf32>
    %1291 = arith.mulf %1290, %1289 : vector<8x128xf32>
    %1292 = vector.broadcast %1276 : f32 to vector<8x128xf32>
    %1293 = arith.mulf %1292, %1201 : vector<8x128xf32>
    %1294 = arith.addf %1291, %1293 : vector<8x128xf32>
    %1295 = arith.index_cast %1202 : i32 to index
    %c0_486 = arith.constant 0 : index
    %c0_487 = arith.constant 0 : index
    %1296 = vector.load %arg4[%1295, %c0_486, %c0_487] : memref<20x8x128xf32, #tpu.memory_space<vmem>>, vector<1x8x128xf32>
    %1297 = vector.shape_cast %1296 : vector<1x8x128xf32> to vector<8x128xf32>
    %1298 = vector.broadcast %1280 : f32 to vector<8x128xf32>
    %1299 = arith.mulf %1298, %1297 : vector<8x128xf32>
    %1300 = arith.addf %1294, %1299 : vector<8x128xf32>
    %c13_i32 = arith.constant 13 : i32
    %c19_i32_488 = arith.constant 19 : i32
    %1301 = arith.subi %c19_i32_488, %c13_i32 : i32
    %1302 = arith.index_cast %1301 : i32 to index
    %c0_489 = arith.constant 0 : index
    %c0_490 = arith.constant 0 : index
    %1303 = vector.load %arg5[%1302, %c0_489, %c0_490] : memref<20x1x128xf32, #tpu.memory_space<vmem>>, vector<1x1x128xf32>
    %1304 = vector.shape_cast %1303 : vector<1x1x128xf32> to vector<1x128xf32>
    %cst_491 = arith.constant dense<0.000000e+00> : vector<8x128xf32>
    %1305 = tpu.matmul %1300, %0, %cst_491 {dimension_numbers = #tpu.dot_dimension_numbers<[1], [0], [0], [1], [0, 0, 1, 1], [], []>} : vector<8x128xf32>, vector<128x128xf32>, vector<8x128xf32> -> vector<8x128xf32>
    %1306 = vector.broadcast %1304 : vector<1x128xf32> to vector<8x128xf32>
    %1307 = arith.addf %1305, %1306 : vector<8x128xf32>
    %1308 = arith.addf %1307, %12 : vector<8x128xf32>
    %cst_492 = arith.constant 2.000000e+01 : f32
    %1309 = vector.broadcast %cst_492 : f32 to vector<8x128xf32>
    %1310 = arith.minimumf %1308, %1309 : vector<8x128xf32>
    %1311 = math.exp %1310 : vector<8x128xf32>
    %cst_493 = arith.constant 1.000000e+00 : f32
    %1312 = vector.broadcast %cst_493 : f32 to vector<8x128xf32>
    %1313 = arith.addf %1312, %1311 : vector<8x128xf32>
    %cst_494 = arith.constant 1.000000e+00 : f32
    %1314 = vector.broadcast %cst_494 : f32 to vector<8x128xf32>
    %1315 = arith.addf %1314, %1311 : vector<8x128xf32>
    %1316 = arith.mulf %1313, %1315 : vector<8x128xf32>
    %cst_495 = arith.constant 1.000000e+00 : f32
    %1317 = vector.broadcast %cst_495 : f32 to vector<8x128xf32>
    %1318 = arith.subf %1316, %1317 : vector<8x128xf32>
    %cst_496 = arith.constant 1.000000e+00 : f32
    %1319 = vector.broadcast %cst_496 : f32 to vector<8x128xf32>
    %1320 = arith.addf %1316, %1319 : vector<8x128xf32>
    %1321 = arith.divf %1318, %1320 : vector<8x128xf32>
    %1322 = arith.mulf %1308, %1321 : vector<8x128xf32>
    %cst_497 = arith.constant dense<0.000000e+00> : vector<8x128xf32>
    %1323 = tpu.matmul %1322, %1, %cst_497 {dimension_numbers = #tpu.dot_dimension_numbers<[1], [0], [0], [1], [0, 0, 1, 1], [], []>} : vector<8x128xf32>, vector<128x128xf32>, vector<8x128xf32> -> vector<8x128xf32>
    %1324 = vector.broadcast %2 : vector<1x128xf32> to vector<8x128xf32>
    %1325 = arith.addf %1323, %1324 : vector<8x128xf32>
    %cst_498 = arith.constant 2.000000e+01 : f32
    %1326 = vector.broadcast %cst_498 : f32 to vector<8x128xf32>
    %1327 = arith.minimumf %1325, %1326 : vector<8x128xf32>
    %1328 = math.exp %1327 : vector<8x128xf32>
    %cst_499 = arith.constant 1.000000e+00 : f32
    %1329 = vector.broadcast %cst_499 : f32 to vector<8x128xf32>
    %1330 = arith.addf %1329, %1328 : vector<8x128xf32>
    %cst_500 = arith.constant 1.000000e+00 : f32
    %1331 = vector.broadcast %cst_500 : f32 to vector<8x128xf32>
    %1332 = arith.addf %1331, %1328 : vector<8x128xf32>
    %1333 = arith.mulf %1330, %1332 : vector<8x128xf32>
    %cst_501 = arith.constant 1.000000e+00 : f32
    %1334 = vector.broadcast %cst_501 : f32 to vector<8x128xf32>
    %1335 = arith.subf %1333, %1334 : vector<8x128xf32>
    %cst_502 = arith.constant 1.000000e+00 : f32
    %1336 = vector.broadcast %cst_502 : f32 to vector<8x128xf32>
    %1337 = arith.addf %1333, %1336 : vector<8x128xf32>
    %1338 = arith.divf %1335, %1337 : vector<8x128xf32>
    %1339 = arith.mulf %1325, %1338 : vector<8x128xf32>
    %cst_503 = arith.constant dense<0.000000e+00> : vector<8x128xf32>
    %1340 = tpu.matmul %1339, %3, %cst_503 {dimension_numbers = #tpu.dot_dimension_numbers<[1], [0], [0], [1], [0, 0, 1, 1], [], []>} : vector<8x128xf32>, vector<128x128xf32>, vector<8x128xf32> -> vector<8x128xf32>
    %1341 = vector.broadcast %4 : vector<1x128xf32> to vector<8x128xf32>
    %1342 = arith.addf %1340, %1341 : vector<8x128xf32>
    %cst_504 = arith.constant 2.000000e+01 : f32
    %1343 = vector.broadcast %cst_504 : f32 to vector<8x128xf32>
    %1344 = arith.minimumf %1342, %1343 : vector<8x128xf32>
    %1345 = math.exp %1344 : vector<8x128xf32>
    %cst_505 = arith.constant 1.000000e+00 : f32
    %1346 = vector.broadcast %cst_505 : f32 to vector<8x128xf32>
    %1347 = arith.addf %1346, %1345 : vector<8x128xf32>
    %cst_506 = arith.constant 1.000000e+00 : f32
    %1348 = vector.broadcast %cst_506 : f32 to vector<8x128xf32>
    %1349 = arith.addf %1348, %1345 : vector<8x128xf32>
    %1350 = arith.mulf %1347, %1349 : vector<8x128xf32>
    %cst_507 = arith.constant 1.000000e+00 : f32
    %1351 = vector.broadcast %cst_507 : f32 to vector<8x128xf32>
    %1352 = arith.subf %1350, %1351 : vector<8x128xf32>
    %cst_508 = arith.constant 1.000000e+00 : f32
    %1353 = vector.broadcast %cst_508 : f32 to vector<8x128xf32>
    %1354 = arith.addf %1350, %1353 : vector<8x128xf32>
    %1355 = arith.divf %1352, %1354 : vector<8x128xf32>
    %1356 = arith.mulf %1342, %1355 : vector<8x128xf32>
    %cst_509 = arith.constant dense<0.000000e+00> : vector<8x128xf32>
    %1357 = tpu.matmul %1356, %5, %cst_509 {dimension_numbers = #tpu.dot_dimension_numbers<[1], [0], [0], [1], [0, 0, 1, 1], [], []>} : vector<8x128xf32>, vector<128x128xf32>, vector<8x128xf32> -> vector<8x128xf32>
    %1358 = vector.broadcast %6 : vector<1x128xf32> to vector<8x128xf32>
    %1359 = arith.addf %1357, %1358 : vector<8x128xf32>
    %c5_i32_510 = arith.constant 5 : i32
    %1360 = arith.muli %c5_i32_510, %1301 : i32
    %c0_i32_511 = arith.constant 0 : i32
    %1361 = arith.addi %1360, %c0_i32_511 : i32
    %1362 = arith.index_cast %1361 : i32 to index
    %1363 = memref.load %arg1[%1362] : memref<100xf32, #tpu.memory_space<smem>>
    %c5_i32_512 = arith.constant 5 : i32
    %1364 = arith.muli %c5_i32_512, %1301 : i32
    %c1_i32_513 = arith.constant 1 : i32
    %1365 = arith.addi %1364, %c1_i32_513 : i32
    %1366 = arith.index_cast %1365 : i32 to index
    %1367 = memref.load %arg1[%1366] : memref<100xf32, #tpu.memory_space<smem>>
    %c5_i32_514 = arith.constant 5 : i32
    %1368 = arith.muli %c5_i32_514, %1301 : i32
    %c2_i32_515 = arith.constant 2 : i32
    %1369 = arith.addi %1368, %c2_i32_515 : i32
    %1370 = arith.index_cast %1369 : i32 to index
    %1371 = memref.load %arg1[%1370] : memref<100xf32, #tpu.memory_space<smem>>
    %c5_i32_516 = arith.constant 5 : i32
    %1372 = arith.muli %c5_i32_516, %1301 : i32
    %c3_i32_517 = arith.constant 3 : i32
    %1373 = arith.addi %1372, %c3_i32_517 : i32
    %1374 = arith.index_cast %1373 : i32 to index
    %1375 = memref.load %arg1[%1374] : memref<100xf32, #tpu.memory_space<smem>>
    %c5_i32_518 = arith.constant 5 : i32
    %1376 = arith.muli %c5_i32_518, %1301 : i32
    %c4_i32_519 = arith.constant 4 : i32
    %1377 = arith.addi %1376, %c4_i32_519 : i32
    %1378 = arith.index_cast %1377 : i32 to index
    %1379 = memref.load %arg1[%1378] : memref<100xf32, #tpu.memory_space<smem>>
    %1380 = vector.broadcast %1363 : f32 to vector<8x128xf32>
    %1381 = arith.mulf %1380, %1300 : vector<8x128xf32>
    %1382 = vector.broadcast %1367 : f32 to vector<8x128xf32>
    %1383 = arith.mulf %1382, %1359 : vector<8x128xf32>
    %1384 = arith.subf %1381, %1383 : vector<8x128xf32>
    %cst_520 = arith.constant -1.000000e+00 : f32
    %cst_521 = arith.constant 1.000000e+00 : f32
    %1385 = vector.broadcast %cst_520 : f32 to vector<8x128xf32>
    %1386 = arith.maximumf %1385, %1384 : vector<8x128xf32>
    %1387 = vector.broadcast %cst_521 : f32 to vector<8x128xf32>
    %1388 = arith.minimumf %1387, %1386 : vector<8x128xf32>
    %1389 = vector.broadcast %1371 : f32 to vector<8x128xf32>
    %1390 = arith.mulf %1389, %1388 : vector<8x128xf32>
    %1391 = vector.broadcast %1375 : f32 to vector<8x128xf32>
    %1392 = arith.mulf %1391, %1300 : vector<8x128xf32>
    %1393 = arith.addf %1390, %1392 : vector<8x128xf32>
    %1394 = arith.index_cast %1301 : i32 to index
    %c0_522 = arith.constant 0 : index
    %c0_523 = arith.constant 0 : index
    %1395 = vector.load %arg4[%1394, %c0_522, %c0_523] : memref<20x8x128xf32, #tpu.memory_space<vmem>>, vector<1x8x128xf32>
    %1396 = vector.shape_cast %1395 : vector<1x8x128xf32> to vector<8x128xf32>
    %1397 = vector.broadcast %1379 : f32 to vector<8x128xf32>
    %1398 = arith.mulf %1397, %1396 : vector<8x128xf32>
    %1399 = arith.addf %1393, %1398 : vector<8x128xf32>
    %c14_i32 = arith.constant 14 : i32
    %c19_i32_524 = arith.constant 19 : i32
    %1400 = arith.subi %c19_i32_524, %c14_i32 : i32
    %1401 = arith.index_cast %1400 : i32 to index
    %c0_525 = arith.constant 0 : index
    %c0_526 = arith.constant 0 : index
    %1402 = vector.load %arg5[%1401, %c0_525, %c0_526] : memref<20x1x128xf32, #tpu.memory_space<vmem>>, vector<1x1x128xf32>
    %1403 = vector.shape_cast %1402 : vector<1x1x128xf32> to vector<1x128xf32>
    %cst_527 = arith.constant dense<0.000000e+00> : vector<8x128xf32>
    %1404 = tpu.matmul %1399, %0, %cst_527 {dimension_numbers = #tpu.dot_dimension_numbers<[1], [0], [0], [1], [0, 0, 1, 1], [], []>} : vector<8x128xf32>, vector<128x128xf32>, vector<8x128xf32> -> vector<8x128xf32>
    %1405 = vector.broadcast %1403 : vector<1x128xf32> to vector<8x128xf32>
    %1406 = arith.addf %1404, %1405 : vector<8x128xf32>
    %1407 = arith.addf %1406, %12 : vector<8x128xf32>
    %cst_528 = arith.constant 2.000000e+01 : f32
    %1408 = vector.broadcast %cst_528 : f32 to vector<8x128xf32>
    %1409 = arith.minimumf %1407, %1408 : vector<8x128xf32>
    %1410 = math.exp %1409 : vector<8x128xf32>
    %cst_529 = arith.constant 1.000000e+00 : f32
    %1411 = vector.broadcast %cst_529 : f32 to vector<8x128xf32>
    %1412 = arith.addf %1411, %1410 : vector<8x128xf32>
    %cst_530 = arith.constant 1.000000e+00 : f32
    %1413 = vector.broadcast %cst_530 : f32 to vector<8x128xf32>
    %1414 = arith.addf %1413, %1410 : vector<8x128xf32>
    %1415 = arith.mulf %1412, %1414 : vector<8x128xf32>
    %cst_531 = arith.constant 1.000000e+00 : f32
    %1416 = vector.broadcast %cst_531 : f32 to vector<8x128xf32>
    %1417 = arith.subf %1415, %1416 : vector<8x128xf32>
    %cst_532 = arith.constant 1.000000e+00 : f32
    %1418 = vector.broadcast %cst_532 : f32 to vector<8x128xf32>
    %1419 = arith.addf %1415, %1418 : vector<8x128xf32>
    %1420 = arith.divf %1417, %1419 : vector<8x128xf32>
    %1421 = arith.mulf %1407, %1420 : vector<8x128xf32>
    %cst_533 = arith.constant dense<0.000000e+00> : vector<8x128xf32>
    %1422 = tpu.matmul %1421, %1, %cst_533 {dimension_numbers = #tpu.dot_dimension_numbers<[1], [0], [0], [1], [0, 0, 1, 1], [], []>} : vector<8x128xf32>, vector<128x128xf32>, vector<8x128xf32> -> vector<8x128xf32>
    %1423 = vector.broadcast %2 : vector<1x128xf32> to vector<8x128xf32>
    %1424 = arith.addf %1422, %1423 : vector<8x128xf32>
    %cst_534 = arith.constant 2.000000e+01 : f32
    %1425 = vector.broadcast %cst_534 : f32 to vector<8x128xf32>
    %1426 = arith.minimumf %1424, %1425 : vector<8x128xf32>
    %1427 = math.exp %1426 : vector<8x128xf32>
    %cst_535 = arith.constant 1.000000e+00 : f32
    %1428 = vector.broadcast %cst_535 : f32 to vector<8x128xf32>
    %1429 = arith.addf %1428, %1427 : vector<8x128xf32>
    %cst_536 = arith.constant 1.000000e+00 : f32
    %1430 = vector.broadcast %cst_536 : f32 to vector<8x128xf32>
    %1431 = arith.addf %1430, %1427 : vector<8x128xf32>
    %1432 = arith.mulf %1429, %1431 : vector<8x128xf32>
    %cst_537 = arith.constant 1.000000e+00 : f32
    %1433 = vector.broadcast %cst_537 : f32 to vector<8x128xf32>
    %1434 = arith.subf %1432, %1433 : vector<8x128xf32>
    %cst_538 = arith.constant 1.000000e+00 : f32
    %1435 = vector.broadcast %cst_538 : f32 to vector<8x128xf32>
    %1436 = arith.addf %1432, %1435 : vector<8x128xf32>
    %1437 = arith.divf %1434, %1436 : vector<8x128xf32>
    %1438 = arith.mulf %1424, %1437 : vector<8x128xf32>
    %cst_539 = arith.constant dense<0.000000e+00> : vector<8x128xf32>
    %1439 = tpu.matmul %1438, %3, %cst_539 {dimension_numbers = #tpu.dot_dimension_numbers<[1], [0], [0], [1], [0, 0, 1, 1], [], []>} : vector<8x128xf32>, vector<128x128xf32>, vector<8x128xf32> -> vector<8x128xf32>
    %1440 = vector.broadcast %4 : vector<1x128xf32> to vector<8x128xf32>
    %1441 = arith.addf %1439, %1440 : vector<8x128xf32>
    %cst_540 = arith.constant 2.000000e+01 : f32
    %1442 = vector.broadcast %cst_540 : f32 to vector<8x128xf32>
    %1443 = arith.minimumf %1441, %1442 : vector<8x128xf32>
    %1444 = math.exp %1443 : vector<8x128xf32>
    %cst_541 = arith.constant 1.000000e+00 : f32
    %1445 = vector.broadcast %cst_541 : f32 to vector<8x128xf32>
    %1446 = arith.addf %1445, %1444 : vector<8x128xf32>
    %cst_542 = arith.constant 1.000000e+00 : f32
    %1447 = vector.broadcast %cst_542 : f32 to vector<8x128xf32>
    %1448 = arith.addf %1447, %1444 : vector<8x128xf32>
    %1449 = arith.mulf %1446, %1448 : vector<8x128xf32>
    %cst_543 = arith.constant 1.000000e+00 : f32
    %1450 = vector.broadcast %cst_543 : f32 to vector<8x128xf32>
    %1451 = arith.subf %1449, %1450 : vector<8x128xf32>
    %cst_544 = arith.constant 1.000000e+00 : f32
    %1452 = vector.broadcast %cst_544 : f32 to vector<8x128xf32>
    %1453 = arith.addf %1449, %1452 : vector<8x128xf32>
    %1454 = arith.divf %1451, %1453 : vector<8x128xf32>
    %1455 = arith.mulf %1441, %1454 : vector<8x128xf32>
    %cst_545 = arith.constant dense<0.000000e+00> : vector<8x128xf32>
    %1456 = tpu.matmul %1455, %5, %cst_545 {dimension_numbers = #tpu.dot_dimension_numbers<[1], [0], [0], [1], [0, 0, 1, 1], [], []>} : vector<8x128xf32>, vector<128x128xf32>, vector<8x128xf32> -> vector<8x128xf32>
    %1457 = vector.broadcast %6 : vector<1x128xf32> to vector<8x128xf32>
    %1458 = arith.addf %1456, %1457 : vector<8x128xf32>
    %c5_i32_546 = arith.constant 5 : i32
    %1459 = arith.muli %c5_i32_546, %1400 : i32
    %c0_i32_547 = arith.constant 0 : i32
    %1460 = arith.addi %1459, %c0_i32_547 : i32
    %1461 = arith.index_cast %1460 : i32 to index
    %1462 = memref.load %arg1[%1461] : memref<100xf32, #tpu.memory_space<smem>>
    %c5_i32_548 = arith.constant 5 : i32
    %1463 = arith.muli %c5_i32_548, %1400 : i32
    %c1_i32_549 = arith.constant 1 : i32
    %1464 = arith.addi %1463, %c1_i32_549 : i32
    %1465 = arith.index_cast %1464 : i32 to index
    %1466 = memref.load %arg1[%1465] : memref<100xf32, #tpu.memory_space<smem>>
    %c5_i32_550 = arith.constant 5 : i32
    %1467 = arith.muli %c5_i32_550, %1400 : i32
    %c2_i32_551 = arith.constant 2 : i32
    %1468 = arith.addi %1467, %c2_i32_551 : i32
    %1469 = arith.index_cast %1468 : i32 to index
    %1470 = memref.load %arg1[%1469] : memref<100xf32, #tpu.memory_space<smem>>
    %c5_i32_552 = arith.constant 5 : i32
    %1471 = arith.muli %c5_i32_552, %1400 : i32
    %c3_i32_553 = arith.constant 3 : i32
    %1472 = arith.addi %1471, %c3_i32_553 : i32
    %1473 = arith.index_cast %1472 : i32 to index
    %1474 = memref.load %arg1[%1473] : memref<100xf32, #tpu.memory_space<smem>>
    %c5_i32_554 = arith.constant 5 : i32
    %1475 = arith.muli %c5_i32_554, %1400 : i32
    %c4_i32_555 = arith.constant 4 : i32
    %1476 = arith.addi %1475, %c4_i32_555 : i32
    %1477 = arith.index_cast %1476 : i32 to index
    %1478 = memref.load %arg1[%1477] : memref<100xf32, #tpu.memory_space<smem>>
    %1479 = vector.broadcast %1462 : f32 to vector<8x128xf32>
    %1480 = arith.mulf %1479, %1399 : vector<8x128xf32>
    %1481 = vector.broadcast %1466 : f32 to vector<8x128xf32>
    %1482 = arith.mulf %1481, %1458 : vector<8x128xf32>
    %1483 = arith.subf %1480, %1482 : vector<8x128xf32>
    %cst_556 = arith.constant -1.000000e+00 : f32
    %cst_557 = arith.constant 1.000000e+00 : f32
    %1484 = vector.broadcast %cst_556 : f32 to vector<8x128xf32>
    %1485 = arith.maximumf %1484, %1483 : vector<8x128xf32>
    %1486 = vector.broadcast %cst_557 : f32 to vector<8x128xf32>
    %1487 = arith.minimumf %1486, %1485 : vector<8x128xf32>
    %1488 = vector.broadcast %1470 : f32 to vector<8x128xf32>
    %1489 = arith.mulf %1488, %1487 : vector<8x128xf32>
    %1490 = vector.broadcast %1474 : f32 to vector<8x128xf32>
    %1491 = arith.mulf %1490, %1399 : vector<8x128xf32>
    %1492 = arith.addf %1489, %1491 : vector<8x128xf32>
    %1493 = arith.index_cast %1400 : i32 to index
    %c0_558 = arith.constant 0 : index
    %c0_559 = arith.constant 0 : index
    %1494 = vector.load %arg4[%1493, %c0_558, %c0_559] : memref<20x8x128xf32, #tpu.memory_space<vmem>>, vector<1x8x128xf32>
    %1495 = vector.shape_cast %1494 : vector<1x8x128xf32> to vector<8x128xf32>
    %1496 = vector.broadcast %1478 : f32 to vector<8x128xf32>
    %1497 = arith.mulf %1496, %1495 : vector<8x128xf32>
    %1498 = arith.addf %1492, %1497 : vector<8x128xf32>
    %c15_i32 = arith.constant 15 : i32
    %c19_i32_560 = arith.constant 19 : i32
    %1499 = arith.subi %c19_i32_560, %c15_i32 : i32
    %1500 = arith.index_cast %1499 : i32 to index
    %c0_561 = arith.constant 0 : index
    %c0_562 = arith.constant 0 : index
    %1501 = vector.load %arg5[%1500, %c0_561, %c0_562] : memref<20x1x128xf32, #tpu.memory_space<vmem>>, vector<1x1x128xf32>
    %1502 = vector.shape_cast %1501 : vector<1x1x128xf32> to vector<1x128xf32>
    %cst_563 = arith.constant dense<0.000000e+00> : vector<8x128xf32>
    %1503 = tpu.matmul %1498, %0, %cst_563 {dimension_numbers = #tpu.dot_dimension_numbers<[1], [0], [0], [1], [0, 0, 1, 1], [], []>} : vector<8x128xf32>, vector<128x128xf32>, vector<8x128xf32> -> vector<8x128xf32>
    %1504 = vector.broadcast %1502 : vector<1x128xf32> to vector<8x128xf32>
    %1505 = arith.addf %1503, %1504 : vector<8x128xf32>
    %1506 = arith.addf %1505, %12 : vector<8x128xf32>
    %cst_564 = arith.constant 2.000000e+01 : f32
    %1507 = vector.broadcast %cst_564 : f32 to vector<8x128xf32>
    %1508 = arith.minimumf %1506, %1507 : vector<8x128xf32>
    %1509 = math.exp %1508 : vector<8x128xf32>
    %cst_565 = arith.constant 1.000000e+00 : f32
    %1510 = vector.broadcast %cst_565 : f32 to vector<8x128xf32>
    %1511 = arith.addf %1510, %1509 : vector<8x128xf32>
    %cst_566 = arith.constant 1.000000e+00 : f32
    %1512 = vector.broadcast %cst_566 : f32 to vector<8x128xf32>
    %1513 = arith.addf %1512, %1509 : vector<8x128xf32>
    %1514 = arith.mulf %1511, %1513 : vector<8x128xf32>
    %cst_567 = arith.constant 1.000000e+00 : f32
    %1515 = vector.broadcast %cst_567 : f32 to vector<8x128xf32>
    %1516 = arith.subf %1514, %1515 : vector<8x128xf32>
    %cst_568 = arith.constant 1.000000e+00 : f32
    %1517 = vector.broadcast %cst_568 : f32 to vector<8x128xf32>
    %1518 = arith.addf %1514, %1517 : vector<8x128xf32>
    %1519 = arith.divf %1516, %1518 : vector<8x128xf32>
    %1520 = arith.mulf %1506, %1519 : vector<8x128xf32>
    %cst_569 = arith.constant dense<0.000000e+00> : vector<8x128xf32>
    %1521 = tpu.matmul %1520, %1, %cst_569 {dimension_numbers = #tpu.dot_dimension_numbers<[1], [0], [0], [1], [0, 0, 1, 1], [], []>} : vector<8x128xf32>, vector<128x128xf32>, vector<8x128xf32> -> vector<8x128xf32>
    %1522 = vector.broadcast %2 : vector<1x128xf32> to vector<8x128xf32>
    %1523 = arith.addf %1521, %1522 : vector<8x128xf32>
    %cst_570 = arith.constant 2.000000e+01 : f32
    %1524 = vector.broadcast %cst_570 : f32 to vector<8x128xf32>
    %1525 = arith.minimumf %1523, %1524 : vector<8x128xf32>
    %1526 = math.exp %1525 : vector<8x128xf32>
    %cst_571 = arith.constant 1.000000e+00 : f32
    %1527 = vector.broadcast %cst_571 : f32 to vector<8x128xf32>
    %1528 = arith.addf %1527, %1526 : vector<8x128xf32>
    %cst_572 = arith.constant 1.000000e+00 : f32
    %1529 = vector.broadcast %cst_572 : f32 to vector<8x128xf32>
    %1530 = arith.addf %1529, %1526 : vector<8x128xf32>
    %1531 = arith.mulf %1528, %1530 : vector<8x128xf32>
    %cst_573 = arith.constant 1.000000e+00 : f32
    %1532 = vector.broadcast %cst_573 : f32 to vector<8x128xf32>
    %1533 = arith.subf %1531, %1532 : vector<8x128xf32>
    %cst_574 = arith.constant 1.000000e+00 : f32
    %1534 = vector.broadcast %cst_574 : f32 to vector<8x128xf32>
    %1535 = arith.addf %1531, %1534 : vector<8x128xf32>
    %1536 = arith.divf %1533, %1535 : vector<8x128xf32>
    %1537 = arith.mulf %1523, %1536 : vector<8x128xf32>
    %cst_575 = arith.constant dense<0.000000e+00> : vector<8x128xf32>
    %1538 = tpu.matmul %1537, %3, %cst_575 {dimension_numbers = #tpu.dot_dimension_numbers<[1], [0], [0], [1], [0, 0, 1, 1], [], []>} : vector<8x128xf32>, vector<128x128xf32>, vector<8x128xf32> -> vector<8x128xf32>
    %1539 = vector.broadcast %4 : vector<1x128xf32> to vector<8x128xf32>
    %1540 = arith.addf %1538, %1539 : vector<8x128xf32>
    %cst_576 = arith.constant 2.000000e+01 : f32
    %1541 = vector.broadcast %cst_576 : f32 to vector<8x128xf32>
    %1542 = arith.minimumf %1540, %1541 : vector<8x128xf32>
    %1543 = math.exp %1542 : vector<8x128xf32>
    %cst_577 = arith.constant 1.000000e+00 : f32
    %1544 = vector.broadcast %cst_577 : f32 to vector<8x128xf32>
    %1545 = arith.addf %1544, %1543 : vector<8x128xf32>
    %cst_578 = arith.constant 1.000000e+00 : f32
    %1546 = vector.broadcast %cst_578 : f32 to vector<8x128xf32>
    %1547 = arith.addf %1546, %1543 : vector<8x128xf32>
    %1548 = arith.mulf %1545, %1547 : vector<8x128xf32>
    %cst_579 = arith.constant 1.000000e+00 : f32
    %1549 = vector.broadcast %cst_579 : f32 to vector<8x128xf32>
    %1550 = arith.subf %1548, %1549 : vector<8x128xf32>
    %cst_580 = arith.constant 1.000000e+00 : f32
    %1551 = vector.broadcast %cst_580 : f32 to vector<8x128xf32>
    %1552 = arith.addf %1548, %1551 : vector<8x128xf32>
    %1553 = arith.divf %1550, %1552 : vector<8x128xf32>
    %1554 = arith.mulf %1540, %1553 : vector<8x128xf32>
    %cst_581 = arith.constant dense<0.000000e+00> : vector<8x128xf32>
    %1555 = tpu.matmul %1554, %5, %cst_581 {dimension_numbers = #tpu.dot_dimension_numbers<[1], [0], [0], [1], [0, 0, 1, 1], [], []>} : vector<8x128xf32>, vector<128x128xf32>, vector<8x128xf32> -> vector<8x128xf32>
    %1556 = vector.broadcast %6 : vector<1x128xf32> to vector<8x128xf32>
    %1557 = arith.addf %1555, %1556 : vector<8x128xf32>
    %c5_i32_582 = arith.constant 5 : i32
    %1558 = arith.muli %c5_i32_582, %1499 : i32
    %c0_i32_583 = arith.constant 0 : i32
    %1559 = arith.addi %1558, %c0_i32_583 : i32
    %1560 = arith.index_cast %1559 : i32 to index
    %1561 = memref.load %arg1[%1560] : memref<100xf32, #tpu.memory_space<smem>>
    %c5_i32_584 = arith.constant 5 : i32
    %1562 = arith.muli %c5_i32_584, %1499 : i32
    %c1_i32_585 = arith.constant 1 : i32
    %1563 = arith.addi %1562, %c1_i32_585 : i32
    %1564 = arith.index_cast %1563 : i32 to index
    %1565 = memref.load %arg1[%1564] : memref<100xf32, #tpu.memory_space<smem>>
    %c5_i32_586 = arith.constant 5 : i32
    %1566 = arith.muli %c5_i32_586, %1499 : i32
    %c2_i32_587 = arith.constant 2 : i32
    %1567 = arith.addi %1566, %c2_i32_587 : i32
    %1568 = arith.index_cast %1567 : i32 to index
    %1569 = memref.load %arg1[%1568] : memref<100xf32, #tpu.memory_space<smem>>
    %c5_i32_588 = arith.constant 5 : i32
    %1570 = arith.muli %c5_i32_588, %1499 : i32
    %c3_i32_589 = arith.constant 3 : i32
    %1571 = arith.addi %1570, %c3_i32_589 : i32
    %1572 = arith.index_cast %1571 : i32 to index
    %1573 = memref.load %arg1[%1572] : memref<100xf32, #tpu.memory_space<smem>>
    %c5_i32_590 = arith.constant 5 : i32
    %1574 = arith.muli %c5_i32_590, %1499 : i32
    %c4_i32_591 = arith.constant 4 : i32
    %1575 = arith.addi %1574, %c4_i32_591 : i32
    %1576 = arith.index_cast %1575 : i32 to index
    %1577 = memref.load %arg1[%1576] : memref<100xf32, #tpu.memory_space<smem>>
    %1578 = vector.broadcast %1561 : f32 to vector<8x128xf32>
    %1579 = arith.mulf %1578, %1498 : vector<8x128xf32>
    %1580 = vector.broadcast %1565 : f32 to vector<8x128xf32>
    %1581 = arith.mulf %1580, %1557 : vector<8x128xf32>
    %1582 = arith.subf %1579, %1581 : vector<8x128xf32>
    %cst_592 = arith.constant -1.000000e+00 : f32
    %cst_593 = arith.constant 1.000000e+00 : f32
    %1583 = vector.broadcast %cst_592 : f32 to vector<8x128xf32>
    %1584 = arith.maximumf %1583, %1582 : vector<8x128xf32>
    %1585 = vector.broadcast %cst_593 : f32 to vector<8x128xf32>
    %1586 = arith.minimumf %1585, %1584 : vector<8x128xf32>
    %1587 = vector.broadcast %1569 : f32 to vector<8x128xf32>
    %1588 = arith.mulf %1587, %1586 : vector<8x128xf32>
    %1589 = vector.broadcast %1573 : f32 to vector<8x128xf32>
    %1590 = arith.mulf %1589, %1498 : vector<8x128xf32>
    %1591 = arith.addf %1588, %1590 : vector<8x128xf32>
    %1592 = arith.index_cast %1499 : i32 to index
    %c0_594 = arith.constant 0 : index
    %c0_595 = arith.constant 0 : index
    %1593 = vector.load %arg4[%1592, %c0_594, %c0_595] : memref<20x8x128xf32, #tpu.memory_space<vmem>>, vector<1x8x128xf32>
    %1594 = vector.shape_cast %1593 : vector<1x8x128xf32> to vector<8x128xf32>
    %1595 = vector.broadcast %1577 : f32 to vector<8x128xf32>
    %1596 = arith.mulf %1595, %1594 : vector<8x128xf32>
    %1597 = arith.addf %1591, %1596 : vector<8x128xf32>
    %c16_i32 = arith.constant 16 : i32
    %c19_i32_596 = arith.constant 19 : i32
    %1598 = arith.subi %c19_i32_596, %c16_i32 : i32
    %1599 = arith.index_cast %1598 : i32 to index
    %c0_597 = arith.constant 0 : index
    %c0_598 = arith.constant 0 : index
    %1600 = vector.load %arg5[%1599, %c0_597, %c0_598] : memref<20x1x128xf32, #tpu.memory_space<vmem>>, vector<1x1x128xf32>
    %1601 = vector.shape_cast %1600 : vector<1x1x128xf32> to vector<1x128xf32>
    %cst_599 = arith.constant dense<0.000000e+00> : vector<8x128xf32>
    %1602 = tpu.matmul %1597, %0, %cst_599 {dimension_numbers = #tpu.dot_dimension_numbers<[1], [0], [0], [1], [0, 0, 1, 1], [], []>} : vector<8x128xf32>, vector<128x128xf32>, vector<8x128xf32> -> vector<8x128xf32>
    %1603 = vector.broadcast %1601 : vector<1x128xf32> to vector<8x128xf32>
    %1604 = arith.addf %1602, %1603 : vector<8x128xf32>
    %1605 = arith.addf %1604, %12 : vector<8x128xf32>
    %cst_600 = arith.constant 2.000000e+01 : f32
    %1606 = vector.broadcast %cst_600 : f32 to vector<8x128xf32>
    %1607 = arith.minimumf %1605, %1606 : vector<8x128xf32>
    %1608 = math.exp %1607 : vector<8x128xf32>
    %cst_601 = arith.constant 1.000000e+00 : f32
    %1609 = vector.broadcast %cst_601 : f32 to vector<8x128xf32>
    %1610 = arith.addf %1609, %1608 : vector<8x128xf32>
    %cst_602 = arith.constant 1.000000e+00 : f32
    %1611 = vector.broadcast %cst_602 : f32 to vector<8x128xf32>
    %1612 = arith.addf %1611, %1608 : vector<8x128xf32>
    %1613 = arith.mulf %1610, %1612 : vector<8x128xf32>
    %cst_603 = arith.constant 1.000000e+00 : f32
    %1614 = vector.broadcast %cst_603 : f32 to vector<8x128xf32>
    %1615 = arith.subf %1613, %1614 : vector<8x128xf32>
    %cst_604 = arith.constant 1.000000e+00 : f32
    %1616 = vector.broadcast %cst_604 : f32 to vector<8x128xf32>
    %1617 = arith.addf %1613, %1616 : vector<8x128xf32>
    %1618 = arith.divf %1615, %1617 : vector<8x128xf32>
    %1619 = arith.mulf %1605, %1618 : vector<8x128xf32>
    %cst_605 = arith.constant dense<0.000000e+00> : vector<8x128xf32>
    %1620 = tpu.matmul %1619, %1, %cst_605 {dimension_numbers = #tpu.dot_dimension_numbers<[1], [0], [0], [1], [0, 0, 1, 1], [], []>} : vector<8x128xf32>, vector<128x128xf32>, vector<8x128xf32> -> vector<8x128xf32>
    %1621 = vector.broadcast %2 : vector<1x128xf32> to vector<8x128xf32>
    %1622 = arith.addf %1620, %1621 : vector<8x128xf32>
    %cst_606 = arith.constant 2.000000e+01 : f32
    %1623 = vector.broadcast %cst_606 : f32 to vector<8x128xf32>
    %1624 = arith.minimumf %1622, %1623 : vector<8x128xf32>
    %1625 = math.exp %1624 : vector<8x128xf32>
    %cst_607 = arith.constant 1.000000e+00 : f32
    %1626 = vector.broadcast %cst_607 : f32 to vector<8x128xf32>
    %1627 = arith.addf %1626, %1625 : vector<8x128xf32>
    %cst_608 = arith.constant 1.000000e+00 : f32
    %1628 = vector.broadcast %cst_608 : f32 to vector<8x128xf32>
    %1629 = arith.addf %1628, %1625 : vector<8x128xf32>
    %1630 = arith.mulf %1627, %1629 : vector<8x128xf32>
    %cst_609 = arith.constant 1.000000e+00 : f32
    %1631 = vector.broadcast %cst_609 : f32 to vector<8x128xf32>
    %1632 = arith.subf %1630, %1631 : vector<8x128xf32>
    %cst_610 = arith.constant 1.000000e+00 : f32
    %1633 = vector.broadcast %cst_610 : f32 to vector<8x128xf32>
    %1634 = arith.addf %1630, %1633 : vector<8x128xf32>
    %1635 = arith.divf %1632, %1634 : vector<8x128xf32>
    %1636 = arith.mulf %1622, %1635 : vector<8x128xf32>
    %cst_611 = arith.constant dense<0.000000e+00> : vector<8x128xf32>
    %1637 = tpu.matmul %1636, %3, %cst_611 {dimension_numbers = #tpu.dot_dimension_numbers<[1], [0], [0], [1], [0, 0, 1, 1], [], []>} : vector<8x128xf32>, vector<128x128xf32>, vector<8x128xf32> -> vector<8x128xf32>
    %1638 = vector.broadcast %4 : vector<1x128xf32> to vector<8x128xf32>
    %1639 = arith.addf %1637, %1638 : vector<8x128xf32>
    %cst_612 = arith.constant 2.000000e+01 : f32
    %1640 = vector.broadcast %cst_612 : f32 to vector<8x128xf32>
    %1641 = arith.minimumf %1639, %1640 : vector<8x128xf32>
    %1642 = math.exp %1641 : vector<8x128xf32>
    %cst_613 = arith.constant 1.000000e+00 : f32
    %1643 = vector.broadcast %cst_613 : f32 to vector<8x128xf32>
    %1644 = arith.addf %1643, %1642 : vector<8x128xf32>
    %cst_614 = arith.constant 1.000000e+00 : f32
    %1645 = vector.broadcast %cst_614 : f32 to vector<8x128xf32>
    %1646 = arith.addf %1645, %1642 : vector<8x128xf32>
    %1647 = arith.mulf %1644, %1646 : vector<8x128xf32>
    %cst_615 = arith.constant 1.000000e+00 : f32
    %1648 = vector.broadcast %cst_615 : f32 to vector<8x128xf32>
    %1649 = arith.subf %1647, %1648 : vector<8x128xf32>
    %cst_616 = arith.constant 1.000000e+00 : f32
    %1650 = vector.broadcast %cst_616 : f32 to vector<8x128xf32>
    %1651 = arith.addf %1647, %1650 : vector<8x128xf32>
    %1652 = arith.divf %1649, %1651 : vector<8x128xf32>
    %1653 = arith.mulf %1639, %1652 : vector<8x128xf32>
    %cst_617 = arith.constant dense<0.000000e+00> : vector<8x128xf32>
    %1654 = tpu.matmul %1653, %5, %cst_617 {dimension_numbers = #tpu.dot_dimension_numbers<[1], [0], [0], [1], [0, 0, 1, 1], [], []>} : vector<8x128xf32>, vector<128x128xf32>, vector<8x128xf32> -> vector<8x128xf32>
    %1655 = vector.broadcast %6 : vector<1x128xf32> to vector<8x128xf32>
    %1656 = arith.addf %1654, %1655 : vector<8x128xf32>
    %c5_i32_618 = arith.constant 5 : i32
    %1657 = arith.muli %c5_i32_618, %1598 : i32
    %c0_i32_619 = arith.constant 0 : i32
    %1658 = arith.addi %1657, %c0_i32_619 : i32
    %1659 = arith.index_cast %1658 : i32 to index
    %1660 = memref.load %arg1[%1659] : memref<100xf32, #tpu.memory_space<smem>>
    %c5_i32_620 = arith.constant 5 : i32
    %1661 = arith.muli %c5_i32_620, %1598 : i32
    %c1_i32_621 = arith.constant 1 : i32
    %1662 = arith.addi %1661, %c1_i32_621 : i32
    %1663 = arith.index_cast %1662 : i32 to index
    %1664 = memref.load %arg1[%1663] : memref<100xf32, #tpu.memory_space<smem>>
    %c5_i32_622 = arith.constant 5 : i32
    %1665 = arith.muli %c5_i32_622, %1598 : i32
    %c2_i32_623 = arith.constant 2 : i32
    %1666 = arith.addi %1665, %c2_i32_623 : i32
    %1667 = arith.index_cast %1666 : i32 to index
    %1668 = memref.load %arg1[%1667] : memref<100xf32, #tpu.memory_space<smem>>
    %c5_i32_624 = arith.constant 5 : i32
    %1669 = arith.muli %c5_i32_624, %1598 : i32
    %c3_i32_625 = arith.constant 3 : i32
    %1670 = arith.addi %1669, %c3_i32_625 : i32
    %1671 = arith.index_cast %1670 : i32 to index
    %1672 = memref.load %arg1[%1671] : memref<100xf32, #tpu.memory_space<smem>>
    %c5_i32_626 = arith.constant 5 : i32
    %1673 = arith.muli %c5_i32_626, %1598 : i32
    %c4_i32_627 = arith.constant 4 : i32
    %1674 = arith.addi %1673, %c4_i32_627 : i32
    %1675 = arith.index_cast %1674 : i32 to index
    %1676 = memref.load %arg1[%1675] : memref<100xf32, #tpu.memory_space<smem>>
    %1677 = vector.broadcast %1660 : f32 to vector<8x128xf32>
    %1678 = arith.mulf %1677, %1597 : vector<8x128xf32>
    %1679 = vector.broadcast %1664 : f32 to vector<8x128xf32>
    %1680 = arith.mulf %1679, %1656 : vector<8x128xf32>
    %1681 = arith.subf %1678, %1680 : vector<8x128xf32>
    %cst_628 = arith.constant -1.000000e+00 : f32
    %cst_629 = arith.constant 1.000000e+00 : f32
    %1682 = vector.broadcast %cst_628 : f32 to vector<8x128xf32>
    %1683 = arith.maximumf %1682, %1681 : vector<8x128xf32>
    %1684 = vector.broadcast %cst_629 : f32 to vector<8x128xf32>
    %1685 = arith.minimumf %1684, %1683 : vector<8x128xf32>
    %1686 = vector.broadcast %1668 : f32 to vector<8x128xf32>
    %1687 = arith.mulf %1686, %1685 : vector<8x128xf32>
    %1688 = vector.broadcast %1672 : f32 to vector<8x128xf32>
    %1689 = arith.mulf %1688, %1597 : vector<8x128xf32>
    %1690 = arith.addf %1687, %1689 : vector<8x128xf32>
    %1691 = arith.index_cast %1598 : i32 to index
    %c0_630 = arith.constant 0 : index
    %c0_631 = arith.constant 0 : index
    %1692 = vector.load %arg4[%1691, %c0_630, %c0_631] : memref<20x8x128xf32, #tpu.memory_space<vmem>>, vector<1x8x128xf32>
    %1693 = vector.shape_cast %1692 : vector<1x8x128xf32> to vector<8x128xf32>
    %1694 = vector.broadcast %1676 : f32 to vector<8x128xf32>
    %1695 = arith.mulf %1694, %1693 : vector<8x128xf32>
    %1696 = arith.addf %1690, %1695 : vector<8x128xf32>
    %c17_i32 = arith.constant 17 : i32
    %c19_i32_632 = arith.constant 19 : i32
    %1697 = arith.subi %c19_i32_632, %c17_i32 : i32
    %1698 = arith.index_cast %1697 : i32 to index
    %c0_633 = arith.constant 0 : index
    %c0_634 = arith.constant 0 : index
    %1699 = vector.load %arg5[%1698, %c0_633, %c0_634] : memref<20x1x128xf32, #tpu.memory_space<vmem>>, vector<1x1x128xf32>
    %1700 = vector.shape_cast %1699 : vector<1x1x128xf32> to vector<1x128xf32>
    %cst_635 = arith.constant dense<0.000000e+00> : vector<8x128xf32>
    %1701 = tpu.matmul %1696, %0, %cst_635 {dimension_numbers = #tpu.dot_dimension_numbers<[1], [0], [0], [1], [0, 0, 1, 1], [], []>} : vector<8x128xf32>, vector<128x128xf32>, vector<8x128xf32> -> vector<8x128xf32>
    %1702 = vector.broadcast %1700 : vector<1x128xf32> to vector<8x128xf32>
    %1703 = arith.addf %1701, %1702 : vector<8x128xf32>
    %1704 = arith.addf %1703, %12 : vector<8x128xf32>
    %cst_636 = arith.constant 2.000000e+01 : f32
    %1705 = vector.broadcast %cst_636 : f32 to vector<8x128xf32>
    %1706 = arith.minimumf %1704, %1705 : vector<8x128xf32>
    %1707 = math.exp %1706 : vector<8x128xf32>
    %cst_637 = arith.constant 1.000000e+00 : f32
    %1708 = vector.broadcast %cst_637 : f32 to vector<8x128xf32>
    %1709 = arith.addf %1708, %1707 : vector<8x128xf32>
    %cst_638 = arith.constant 1.000000e+00 : f32
    %1710 = vector.broadcast %cst_638 : f32 to vector<8x128xf32>
    %1711 = arith.addf %1710, %1707 : vector<8x128xf32>
    %1712 = arith.mulf %1709, %1711 : vector<8x128xf32>
    %cst_639 = arith.constant 1.000000e+00 : f32
    %1713 = vector.broadcast %cst_639 : f32 to vector<8x128xf32>
    %1714 = arith.subf %1712, %1713 : vector<8x128xf32>
    %cst_640 = arith.constant 1.000000e+00 : f32
    %1715 = vector.broadcast %cst_640 : f32 to vector<8x128xf32>
    %1716 = arith.addf %1712, %1715 : vector<8x128xf32>
    %1717 = arith.divf %1714, %1716 : vector<8x128xf32>
    %1718 = arith.mulf %1704, %1717 : vector<8x128xf32>
    %cst_641 = arith.constant dense<0.000000e+00> : vector<8x128xf32>
    %1719 = tpu.matmul %1718, %1, %cst_641 {dimension_numbers = #tpu.dot_dimension_numbers<[1], [0], [0], [1], [0, 0, 1, 1], [], []>} : vector<8x128xf32>, vector<128x128xf32>, vector<8x128xf32> -> vector<8x128xf32>
    %1720 = vector.broadcast %2 : vector<1x128xf32> to vector<8x128xf32>
    %1721 = arith.addf %1719, %1720 : vector<8x128xf32>
    %cst_642 = arith.constant 2.000000e+01 : f32
    %1722 = vector.broadcast %cst_642 : f32 to vector<8x128xf32>
    %1723 = arith.minimumf %1721, %1722 : vector<8x128xf32>
    %1724 = math.exp %1723 : vector<8x128xf32>
    %cst_643 = arith.constant 1.000000e+00 : f32
    %1725 = vector.broadcast %cst_643 : f32 to vector<8x128xf32>
    %1726 = arith.addf %1725, %1724 : vector<8x128xf32>
    %cst_644 = arith.constant 1.000000e+00 : f32
    %1727 = vector.broadcast %cst_644 : f32 to vector<8x128xf32>
    %1728 = arith.addf %1727, %1724 : vector<8x128xf32>
    %1729 = arith.mulf %1726, %1728 : vector<8x128xf32>
    %cst_645 = arith.constant 1.000000e+00 : f32
    %1730 = vector.broadcast %cst_645 : f32 to vector<8x128xf32>
    %1731 = arith.subf %1729, %1730 : vector<8x128xf32>
    %cst_646 = arith.constant 1.000000e+00 : f32
    %1732 = vector.broadcast %cst_646 : f32 to vector<8x128xf32>
    %1733 = arith.addf %1729, %1732 : vector<8x128xf32>
    %1734 = arith.divf %1731, %1733 : vector<8x128xf32>
    %1735 = arith.mulf %1721, %1734 : vector<8x128xf32>
    %cst_647 = arith.constant dense<0.000000e+00> : vector<8x128xf32>
    %1736 = tpu.matmul %1735, %3, %cst_647 {dimension_numbers = #tpu.dot_dimension_numbers<[1], [0], [0], [1], [0, 0, 1, 1], [], []>} : vector<8x128xf32>, vector<128x128xf32>, vector<8x128xf32> -> vector<8x128xf32>
    %1737 = vector.broadcast %4 : vector<1x128xf32> to vector<8x128xf32>
    %1738 = arith.addf %1736, %1737 : vector<8x128xf32>
    %cst_648 = arith.constant 2.000000e+01 : f32
    %1739 = vector.broadcast %cst_648 : f32 to vector<8x128xf32>
    %1740 = arith.minimumf %1738, %1739 : vector<8x128xf32>
    %1741 = math.exp %1740 : vector<8x128xf32>
    %cst_649 = arith.constant 1.000000e+00 : f32
    %1742 = vector.broadcast %cst_649 : f32 to vector<8x128xf32>
    %1743 = arith.addf %1742, %1741 : vector<8x128xf32>
    %cst_650 = arith.constant 1.000000e+00 : f32
    %1744 = vector.broadcast %cst_650 : f32 to vector<8x128xf32>
    %1745 = arith.addf %1744, %1741 : vector<8x128xf32>
    %1746 = arith.mulf %1743, %1745 : vector<8x128xf32>
    %cst_651 = arith.constant 1.000000e+00 : f32
    %1747 = vector.broadcast %cst_651 : f32 to vector<8x128xf32>
    %1748 = arith.subf %1746, %1747 : vector<8x128xf32>
    %cst_652 = arith.constant 1.000000e+00 : f32
    %1749 = vector.broadcast %cst_652 : f32 to vector<8x128xf32>
    %1750 = arith.addf %1746, %1749 : vector<8x128xf32>
    %1751 = arith.divf %1748, %1750 : vector<8x128xf32>
    %1752 = arith.mulf %1738, %1751 : vector<8x128xf32>
    %cst_653 = arith.constant dense<0.000000e+00> : vector<8x128xf32>
    %1753 = tpu.matmul %1752, %5, %cst_653 {dimension_numbers = #tpu.dot_dimension_numbers<[1], [0], [0], [1], [0, 0, 1, 1], [], []>} : vector<8x128xf32>, vector<128x128xf32>, vector<8x128xf32> -> vector<8x128xf32>
    %1754 = vector.broadcast %6 : vector<1x128xf32> to vector<8x128xf32>
    %1755 = arith.addf %1753, %1754 : vector<8x128xf32>
    %c5_i32_654 = arith.constant 5 : i32
    %1756 = arith.muli %c5_i32_654, %1697 : i32
    %c0_i32_655 = arith.constant 0 : i32
    %1757 = arith.addi %1756, %c0_i32_655 : i32
    %1758 = arith.index_cast %1757 : i32 to index
    %1759 = memref.load %arg1[%1758] : memref<100xf32, #tpu.memory_space<smem>>
    %c5_i32_656 = arith.constant 5 : i32
    %1760 = arith.muli %c5_i32_656, %1697 : i32
    %c1_i32_657 = arith.constant 1 : i32
    %1761 = arith.addi %1760, %c1_i32_657 : i32
    %1762 = arith.index_cast %1761 : i32 to index
    %1763 = memref.load %arg1[%1762] : memref<100xf32, #tpu.memory_space<smem>>
    %c5_i32_658 = arith.constant 5 : i32
    %1764 = arith.muli %c5_i32_658, %1697 : i32
    %c2_i32_659 = arith.constant 2 : i32
    %1765 = arith.addi %1764, %c2_i32_659 : i32
    %1766 = arith.index_cast %1765 : i32 to index
    %1767 = memref.load %arg1[%1766] : memref<100xf32, #tpu.memory_space<smem>>
    %c5_i32_660 = arith.constant 5 : i32
    %1768 = arith.muli %c5_i32_660, %1697 : i32
    %c3_i32_661 = arith.constant 3 : i32
    %1769 = arith.addi %1768, %c3_i32_661 : i32
    %1770 = arith.index_cast %1769 : i32 to index
    %1771 = memref.load %arg1[%1770] : memref<100xf32, #tpu.memory_space<smem>>
    %c5_i32_662 = arith.constant 5 : i32
    %1772 = arith.muli %c5_i32_662, %1697 : i32
    %c4_i32_663 = arith.constant 4 : i32
    %1773 = arith.addi %1772, %c4_i32_663 : i32
    %1774 = arith.index_cast %1773 : i32 to index
    %1775 = memref.load %arg1[%1774] : memref<100xf32, #tpu.memory_space<smem>>
    %1776 = vector.broadcast %1759 : f32 to vector<8x128xf32>
    %1777 = arith.mulf %1776, %1696 : vector<8x128xf32>
    %1778 = vector.broadcast %1763 : f32 to vector<8x128xf32>
    %1779 = arith.mulf %1778, %1755 : vector<8x128xf32>
    %1780 = arith.subf %1777, %1779 : vector<8x128xf32>
    %cst_664 = arith.constant -1.000000e+00 : f32
    %cst_665 = arith.constant 1.000000e+00 : f32
    %1781 = vector.broadcast %cst_664 : f32 to vector<8x128xf32>
    %1782 = arith.maximumf %1781, %1780 : vector<8x128xf32>
    %1783 = vector.broadcast %cst_665 : f32 to vector<8x128xf32>
    %1784 = arith.minimumf %1783, %1782 : vector<8x128xf32>
    %1785 = vector.broadcast %1767 : f32 to vector<8x128xf32>
    %1786 = arith.mulf %1785, %1784 : vector<8x128xf32>
    %1787 = vector.broadcast %1771 : f32 to vector<8x128xf32>
    %1788 = arith.mulf %1787, %1696 : vector<8x128xf32>
    %1789 = arith.addf %1786, %1788 : vector<8x128xf32>
    %1790 = arith.index_cast %1697 : i32 to index
    %c0_666 = arith.constant 0 : index
    %c0_667 = arith.constant 0 : index
    %1791 = vector.load %arg4[%1790, %c0_666, %c0_667] : memref<20x8x128xf32, #tpu.memory_space<vmem>>, vector<1x8x128xf32>
    %1792 = vector.shape_cast %1791 : vector<1x8x128xf32> to vector<8x128xf32>
    %1793 = vector.broadcast %1775 : f32 to vector<8x128xf32>
    %1794 = arith.mulf %1793, %1792 : vector<8x128xf32>
    %1795 = arith.addf %1789, %1794 : vector<8x128xf32>
    %c18_i32 = arith.constant 18 : i32
    %c19_i32_668 = arith.constant 19 : i32
    %1796 = arith.subi %c19_i32_668, %c18_i32 : i32
    %1797 = arith.index_cast %1796 : i32 to index
    %c0_669 = arith.constant 0 : index
    %c0_670 = arith.constant 0 : index
    %1798 = vector.load %arg5[%1797, %c0_669, %c0_670] : memref<20x1x128xf32, #tpu.memory_space<vmem>>, vector<1x1x128xf32>
    %1799 = vector.shape_cast %1798 : vector<1x1x128xf32> to vector<1x128xf32>
    %cst_671 = arith.constant dense<0.000000e+00> : vector<8x128xf32>
    %1800 = tpu.matmul %1795, %0, %cst_671 {dimension_numbers = #tpu.dot_dimension_numbers<[1], [0], [0], [1], [0, 0, 1, 1], [], []>} : vector<8x128xf32>, vector<128x128xf32>, vector<8x128xf32> -> vector<8x128xf32>
    %1801 = vector.broadcast %1799 : vector<1x128xf32> to vector<8x128xf32>
    %1802 = arith.addf %1800, %1801 : vector<8x128xf32>
    %1803 = arith.addf %1802, %12 : vector<8x128xf32>
    %cst_672 = arith.constant 2.000000e+01 : f32
    %1804 = vector.broadcast %cst_672 : f32 to vector<8x128xf32>
    %1805 = arith.minimumf %1803, %1804 : vector<8x128xf32>
    %1806 = math.exp %1805 : vector<8x128xf32>
    %cst_673 = arith.constant 1.000000e+00 : f32
    %1807 = vector.broadcast %cst_673 : f32 to vector<8x128xf32>
    %1808 = arith.addf %1807, %1806 : vector<8x128xf32>
    %cst_674 = arith.constant 1.000000e+00 : f32
    %1809 = vector.broadcast %cst_674 : f32 to vector<8x128xf32>
    %1810 = arith.addf %1809, %1806 : vector<8x128xf32>
    %1811 = arith.mulf %1808, %1810 : vector<8x128xf32>
    %cst_675 = arith.constant 1.000000e+00 : f32
    %1812 = vector.broadcast %cst_675 : f32 to vector<8x128xf32>
    %1813 = arith.subf %1811, %1812 : vector<8x128xf32>
    %cst_676 = arith.constant 1.000000e+00 : f32
    %1814 = vector.broadcast %cst_676 : f32 to vector<8x128xf32>
    %1815 = arith.addf %1811, %1814 : vector<8x128xf32>
    %1816 = arith.divf %1813, %1815 : vector<8x128xf32>
    %1817 = arith.mulf %1803, %1816 : vector<8x128xf32>
    %cst_677 = arith.constant dense<0.000000e+00> : vector<8x128xf32>
    %1818 = tpu.matmul %1817, %1, %cst_677 {dimension_numbers = #tpu.dot_dimension_numbers<[1], [0], [0], [1], [0, 0, 1, 1], [], []>} : vector<8x128xf32>, vector<128x128xf32>, vector<8x128xf32> -> vector<8x128xf32>
    %1819 = vector.broadcast %2 : vector<1x128xf32> to vector<8x128xf32>
    %1820 = arith.addf %1818, %1819 : vector<8x128xf32>
    %cst_678 = arith.constant 2.000000e+01 : f32
    %1821 = vector.broadcast %cst_678 : f32 to vector<8x128xf32>
    %1822 = arith.minimumf %1820, %1821 : vector<8x128xf32>
    %1823 = math.exp %1822 : vector<8x128xf32>
    %cst_679 = arith.constant 1.000000e+00 : f32
    %1824 = vector.broadcast %cst_679 : f32 to vector<8x128xf32>
    %1825 = arith.addf %1824, %1823 : vector<8x128xf32>
    %cst_680 = arith.constant 1.000000e+00 : f32
    %1826 = vector.broadcast %cst_680 : f32 to vector<8x128xf32>
    %1827 = arith.addf %1826, %1823 : vector<8x128xf32>
    %1828 = arith.mulf %1825, %1827 : vector<8x128xf32>
    %cst_681 = arith.constant 1.000000e+00 : f32
    %1829 = vector.broadcast %cst_681 : f32 to vector<8x128xf32>
    %1830 = arith.subf %1828, %1829 : vector<8x128xf32>
    %cst_682 = arith.constant 1.000000e+00 : f32
    %1831 = vector.broadcast %cst_682 : f32 to vector<8x128xf32>
    %1832 = arith.addf %1828, %1831 : vector<8x128xf32>
    %1833 = arith.divf %1830, %1832 : vector<8x128xf32>
    %1834 = arith.mulf %1820, %1833 : vector<8x128xf32>
    %cst_683 = arith.constant dense<0.000000e+00> : vector<8x128xf32>
    %1835 = tpu.matmul %1834, %3, %cst_683 {dimension_numbers = #tpu.dot_dimension_numbers<[1], [0], [0], [1], [0, 0, 1, 1], [], []>} : vector<8x128xf32>, vector<128x128xf32>, vector<8x128xf32> -> vector<8x128xf32>
    %1836 = vector.broadcast %4 : vector<1x128xf32> to vector<8x128xf32>
    %1837 = arith.addf %1835, %1836 : vector<8x128xf32>
    %cst_684 = arith.constant 2.000000e+01 : f32
    %1838 = vector.broadcast %cst_684 : f32 to vector<8x128xf32>
    %1839 = arith.minimumf %1837, %1838 : vector<8x128xf32>
    %1840 = math.exp %1839 : vector<8x128xf32>
    %cst_685 = arith.constant 1.000000e+00 : f32
    %1841 = vector.broadcast %cst_685 : f32 to vector<8x128xf32>
    %1842 = arith.addf %1841, %1840 : vector<8x128xf32>
    %cst_686 = arith.constant 1.000000e+00 : f32
    %1843 = vector.broadcast %cst_686 : f32 to vector<8x128xf32>
    %1844 = arith.addf %1843, %1840 : vector<8x128xf32>
    %1845 = arith.mulf %1842, %1844 : vector<8x128xf32>
    %cst_687 = arith.constant 1.000000e+00 : f32
    %1846 = vector.broadcast %cst_687 : f32 to vector<8x128xf32>
    %1847 = arith.subf %1845, %1846 : vector<8x128xf32>
    %cst_688 = arith.constant 1.000000e+00 : f32
    %1848 = vector.broadcast %cst_688 : f32 to vector<8x128xf32>
    %1849 = arith.addf %1845, %1848 : vector<8x128xf32>
    %1850 = arith.divf %1847, %1849 : vector<8x128xf32>
    %1851 = arith.mulf %1837, %1850 : vector<8x128xf32>
    %cst_689 = arith.constant dense<0.000000e+00> : vector<8x128xf32>
    %1852 = tpu.matmul %1851, %5, %cst_689 {dimension_numbers = #tpu.dot_dimension_numbers<[1], [0], [0], [1], [0, 0, 1, 1], [], []>} : vector<8x128xf32>, vector<128x128xf32>, vector<8x128xf32> -> vector<8x128xf32>
    %1853 = vector.broadcast %6 : vector<1x128xf32> to vector<8x128xf32>
    %1854 = arith.addf %1852, %1853 : vector<8x128xf32>
    %c5_i32_690 = arith.constant 5 : i32
    %1855 = arith.muli %c5_i32_690, %1796 : i32
    %c0_i32_691 = arith.constant 0 : i32
    %1856 = arith.addi %1855, %c0_i32_691 : i32
    %1857 = arith.index_cast %1856 : i32 to index
    %1858 = memref.load %arg1[%1857] : memref<100xf32, #tpu.memory_space<smem>>
    %c5_i32_692 = arith.constant 5 : i32
    %1859 = arith.muli %c5_i32_692, %1796 : i32
    %c1_i32_693 = arith.constant 1 : i32
    %1860 = arith.addi %1859, %c1_i32_693 : i32
    %1861 = arith.index_cast %1860 : i32 to index
    %1862 = memref.load %arg1[%1861] : memref<100xf32, #tpu.memory_space<smem>>
    %c5_i32_694 = arith.constant 5 : i32
    %1863 = arith.muli %c5_i32_694, %1796 : i32
    %c2_i32_695 = arith.constant 2 : i32
    %1864 = arith.addi %1863, %c2_i32_695 : i32
    %1865 = arith.index_cast %1864 : i32 to index
    %1866 = memref.load %arg1[%1865] : memref<100xf32, #tpu.memory_space<smem>>
    %c5_i32_696 = arith.constant 5 : i32
    %1867 = arith.muli %c5_i32_696, %1796 : i32
    %c3_i32_697 = arith.constant 3 : i32
    %1868 = arith.addi %1867, %c3_i32_697 : i32
    %1869 = arith.index_cast %1868 : i32 to index
    %1870 = memref.load %arg1[%1869] : memref<100xf32, #tpu.memory_space<smem>>
    %c5_i32_698 = arith.constant 5 : i32
    %1871 = arith.muli %c5_i32_698, %1796 : i32
    %c4_i32_699 = arith.constant 4 : i32
    %1872 = arith.addi %1871, %c4_i32_699 : i32
    %1873 = arith.index_cast %1872 : i32 to index
    %1874 = memref.load %arg1[%1873] : memref<100xf32, #tpu.memory_space<smem>>
    %1875 = vector.broadcast %1858 : f32 to vector<8x128xf32>
    %1876 = arith.mulf %1875, %1795 : vector<8x128xf32>
    %1877 = vector.broadcast %1862 : f32 to vector<8x128xf32>
    %1878 = arith.mulf %1877, %1854 : vector<8x128xf32>
    %1879 = arith.subf %1876, %1878 : vector<8x128xf32>
    %cst_700 = arith.constant -1.000000e+00 : f32
    %cst_701 = arith.constant 1.000000e+00 : f32
    %1880 = vector.broadcast %cst_700 : f32 to vector<8x128xf32>
    %1881 = arith.maximumf %1880, %1879 : vector<8x128xf32>
    %1882 = vector.broadcast %cst_701 : f32 to vector<8x128xf32>
    %1883 = arith.minimumf %1882, %1881 : vector<8x128xf32>
    %1884 = vector.broadcast %1866 : f32 to vector<8x128xf32>
    %1885 = arith.mulf %1884, %1883 : vector<8x128xf32>
    %1886 = vector.broadcast %1870 : f32 to vector<8x128xf32>
    %1887 = arith.mulf %1886, %1795 : vector<8x128xf32>
    %1888 = arith.addf %1885, %1887 : vector<8x128xf32>
    %1889 = arith.index_cast %1796 : i32 to index
    %c0_702 = arith.constant 0 : index
    %c0_703 = arith.constant 0 : index
    %1890 = vector.load %arg4[%1889, %c0_702, %c0_703] : memref<20x8x128xf32, #tpu.memory_space<vmem>>, vector<1x8x128xf32>
    %1891 = vector.shape_cast %1890 : vector<1x8x128xf32> to vector<8x128xf32>
    %1892 = vector.broadcast %1874 : f32 to vector<8x128xf32>
    %1893 = arith.mulf %1892, %1891 : vector<8x128xf32>
    %1894 = arith.addf %1888, %1893 : vector<8x128xf32>
    %c19_i32_704 = arith.constant 19 : i32
    %c19_i32_705 = arith.constant 19 : i32
    %1895 = arith.subi %c19_i32_705, %c19_i32_704 : i32
    %1896 = arith.index_cast %1895 : i32 to index
    %c0_706 = arith.constant 0 : index
    %c0_707 = arith.constant 0 : index
    %1897 = vector.load %arg5[%1896, %c0_706, %c0_707] : memref<20x1x128xf32, #tpu.memory_space<vmem>>, vector<1x1x128xf32>
    %1898 = vector.shape_cast %1897 : vector<1x1x128xf32> to vector<1x128xf32>
    %cst_708 = arith.constant dense<0.000000e+00> : vector<8x128xf32>
    %1899 = tpu.matmul %1894, %0, %cst_708 {dimension_numbers = #tpu.dot_dimension_numbers<[1], [0], [0], [1], [0, 0, 1, 1], [], []>} : vector<8x128xf32>, vector<128x128xf32>, vector<8x128xf32> -> vector<8x128xf32>
    %1900 = vector.broadcast %1898 : vector<1x128xf32> to vector<8x128xf32>
    %1901 = arith.addf %1899, %1900 : vector<8x128xf32>
    %1902 = arith.addf %1901, %12 : vector<8x128xf32>
    %cst_709 = arith.constant 2.000000e+01 : f32
    %1903 = vector.broadcast %cst_709 : f32 to vector<8x128xf32>
    %1904 = arith.minimumf %1902, %1903 : vector<8x128xf32>
    %1905 = math.exp %1904 : vector<8x128xf32>
    %cst_710 = arith.constant 1.000000e+00 : f32
    %1906 = vector.broadcast %cst_710 : f32 to vector<8x128xf32>
    %1907 = arith.addf %1906, %1905 : vector<8x128xf32>
    %cst_711 = arith.constant 1.000000e+00 : f32
    %1908 = vector.broadcast %cst_711 : f32 to vector<8x128xf32>
    %1909 = arith.addf %1908, %1905 : vector<8x128xf32>
    %1910 = arith.mulf %1907, %1909 : vector<8x128xf32>
    %cst_712 = arith.constant 1.000000e+00 : f32
    %1911 = vector.broadcast %cst_712 : f32 to vector<8x128xf32>
    %1912 = arith.subf %1910, %1911 : vector<8x128xf32>
    %cst_713 = arith.constant 1.000000e+00 : f32
    %1913 = vector.broadcast %cst_713 : f32 to vector<8x128xf32>
    %1914 = arith.addf %1910, %1913 : vector<8x128xf32>
    %1915 = arith.divf %1912, %1914 : vector<8x128xf32>
    %1916 = arith.mulf %1902, %1915 : vector<8x128xf32>
    %cst_714 = arith.constant dense<0.000000e+00> : vector<8x128xf32>
    %1917 = tpu.matmul %1916, %1, %cst_714 {dimension_numbers = #tpu.dot_dimension_numbers<[1], [0], [0], [1], [0, 0, 1, 1], [], []>} : vector<8x128xf32>, vector<128x128xf32>, vector<8x128xf32> -> vector<8x128xf32>
    %1918 = vector.broadcast %2 : vector<1x128xf32> to vector<8x128xf32>
    %1919 = arith.addf %1917, %1918 : vector<8x128xf32>
    %cst_715 = arith.constant 2.000000e+01 : f32
    %1920 = vector.broadcast %cst_715 : f32 to vector<8x128xf32>
    %1921 = arith.minimumf %1919, %1920 : vector<8x128xf32>
    %1922 = math.exp %1921 : vector<8x128xf32>
    %cst_716 = arith.constant 1.000000e+00 : f32
    %1923 = vector.broadcast %cst_716 : f32 to vector<8x128xf32>
    %1924 = arith.addf %1923, %1922 : vector<8x128xf32>
    %cst_717 = arith.constant 1.000000e+00 : f32
    %1925 = vector.broadcast %cst_717 : f32 to vector<8x128xf32>
    %1926 = arith.addf %1925, %1922 : vector<8x128xf32>
    %1927 = arith.mulf %1924, %1926 : vector<8x128xf32>
    %cst_718 = arith.constant 1.000000e+00 : f32
    %1928 = vector.broadcast %cst_718 : f32 to vector<8x128xf32>
    %1929 = arith.subf %1927, %1928 : vector<8x128xf32>
    %cst_719 = arith.constant 1.000000e+00 : f32
    %1930 = vector.broadcast %cst_719 : f32 to vector<8x128xf32>
    %1931 = arith.addf %1927, %1930 : vector<8x128xf32>
    %1932 = arith.divf %1929, %1931 : vector<8x128xf32>
    %1933 = arith.mulf %1919, %1932 : vector<8x128xf32>
    %cst_720 = arith.constant dense<0.000000e+00> : vector<8x128xf32>
    %1934 = tpu.matmul %1933, %3, %cst_720 {dimension_numbers = #tpu.dot_dimension_numbers<[1], [0], [0], [1], [0, 0, 1, 1], [], []>} : vector<8x128xf32>, vector<128x128xf32>, vector<8x128xf32> -> vector<8x128xf32>
    %1935 = vector.broadcast %4 : vector<1x128xf32> to vector<8x128xf32>
    %1936 = arith.addf %1934, %1935 : vector<8x128xf32>
    %cst_721 = arith.constant 2.000000e+01 : f32
    %1937 = vector.broadcast %cst_721 : f32 to vector<8x128xf32>
    %1938 = arith.minimumf %1936, %1937 : vector<8x128xf32>
    %1939 = math.exp %1938 : vector<8x128xf32>
    %cst_722 = arith.constant 1.000000e+00 : f32
    %1940 = vector.broadcast %cst_722 : f32 to vector<8x128xf32>
    %1941 = arith.addf %1940, %1939 : vector<8x128xf32>
    %cst_723 = arith.constant 1.000000e+00 : f32
    %1942 = vector.broadcast %cst_723 : f32 to vector<8x128xf32>
    %1943 = arith.addf %1942, %1939 : vector<8x128xf32>
    %1944 = arith.mulf %1941, %1943 : vector<8x128xf32>
    %cst_724 = arith.constant 1.000000e+00 : f32
    %1945 = vector.broadcast %cst_724 : f32 to vector<8x128xf32>
    %1946 = arith.subf %1944, %1945 : vector<8x128xf32>
    %cst_725 = arith.constant 1.000000e+00 : f32
    %1947 = vector.broadcast %cst_725 : f32 to vector<8x128xf32>
    %1948 = arith.addf %1944, %1947 : vector<8x128xf32>
    %1949 = arith.divf %1946, %1948 : vector<8x128xf32>
    %1950 = arith.mulf %1936, %1949 : vector<8x128xf32>
    %cst_726 = arith.constant dense<0.000000e+00> : vector<8x128xf32>
    %1951 = tpu.matmul %1950, %5, %cst_726 {dimension_numbers = #tpu.dot_dimension_numbers<[1], [0], [0], [1], [0, 0, 1, 1], [], []>} : vector<8x128xf32>, vector<128x128xf32>, vector<8x128xf32> -> vector<8x128xf32>
    %1952 = vector.broadcast %6 : vector<1x128xf32> to vector<8x128xf32>
    %1953 = arith.addf %1951, %1952 : vector<8x128xf32>
    %c5_i32_727 = arith.constant 5 : i32
    %1954 = arith.muli %c5_i32_727, %1895 : i32
    %c0_i32_728 = arith.constant 0 : i32
    %1955 = arith.addi %1954, %c0_i32_728 : i32
    %1956 = arith.index_cast %1955 : i32 to index
    %1957 = memref.load %arg1[%1956] : memref<100xf32, #tpu.memory_space<smem>>
    %c5_i32_729 = arith.constant 5 : i32
    %1958 = arith.muli %c5_i32_729, %1895 : i32
    %c1_i32_730 = arith.constant 1 : i32
    %1959 = arith.addi %1958, %c1_i32_730 : i32
    %1960 = arith.index_cast %1959 : i32 to index
    %1961 = memref.load %arg1[%1960] : memref<100xf32, #tpu.memory_space<smem>>
    %c5_i32_731 = arith.constant 5 : i32
    %1962 = arith.muli %c5_i32_731, %1895 : i32
    %c2_i32_732 = arith.constant 2 : i32
    %1963 = arith.addi %1962, %c2_i32_732 : i32
    %1964 = arith.index_cast %1963 : i32 to index
    %1965 = memref.load %arg1[%1964] : memref<100xf32, #tpu.memory_space<smem>>
    %c5_i32_733 = arith.constant 5 : i32
    %1966 = arith.muli %c5_i32_733, %1895 : i32
    %c3_i32_734 = arith.constant 3 : i32
    %1967 = arith.addi %1966, %c3_i32_734 : i32
    %1968 = arith.index_cast %1967 : i32 to index
    %1969 = memref.load %arg1[%1968] : memref<100xf32, #tpu.memory_space<smem>>
    %c5_i32_735 = arith.constant 5 : i32
    %1970 = arith.muli %c5_i32_735, %1895 : i32
    %c4_i32_736 = arith.constant 4 : i32
    %1971 = arith.addi %1970, %c4_i32_736 : i32
    %1972 = arith.index_cast %1971 : i32 to index
    %1973 = memref.load %arg1[%1972] : memref<100xf32, #tpu.memory_space<smem>>
    %1974 = vector.broadcast %1957 : f32 to vector<8x128xf32>
    %1975 = arith.mulf %1974, %1894 : vector<8x128xf32>
    %1976 = vector.broadcast %1961 : f32 to vector<8x128xf32>
    %1977 = arith.mulf %1976, %1953 : vector<8x128xf32>
    %1978 = arith.subf %1975, %1977 : vector<8x128xf32>
    %cst_737 = arith.constant -1.000000e+00 : f32
    %cst_738 = arith.constant 1.000000e+00 : f32
    %1979 = vector.broadcast %cst_737 : f32 to vector<8x128xf32>
    %1980 = arith.maximumf %1979, %1978 : vector<8x128xf32>
    %1981 = vector.broadcast %cst_738 : f32 to vector<8x128xf32>
    %1982 = arith.minimumf %1981, %1980 : vector<8x128xf32>
    %1983 = vector.broadcast %1965 : f32 to vector<8x128xf32>
    %1984 = arith.mulf %1983, %1982 : vector<8x128xf32>
    %1985 = vector.broadcast %1969 : f32 to vector<8x128xf32>
    %1986 = arith.mulf %1985, %1894 : vector<8x128xf32>
    %1987 = arith.addf %1984, %1986 : vector<8x128xf32>
    %1988 = arith.index_cast %1895 : i32 to index
    %c0_739 = arith.constant 0 : index
    %c0_740 = arith.constant 0 : index
    %1989 = vector.load %arg4[%1988, %c0_739, %c0_740] : memref<20x8x128xf32, #tpu.memory_space<vmem>>, vector<1x8x128xf32>
    %1990 = vector.shape_cast %1989 : vector<1x8x128xf32> to vector<8x128xf32>
    %1991 = vector.broadcast %1973 : f32 to vector<8x128xf32>
    %1992 = arith.mulf %1991, %1990 : vector<8x128xf32>
    %1993 = arith.addf %1987, %1992 : vector<8x128xf32>
    %c20_i32 = arith.constant 20 : i32
    %cst_741 = arith.constant -1.000000e+00 : f32
    %cst_742 = arith.constant 1.000000e+00 : f32
    %1994 = vector.broadcast %cst_741 : f32 to vector<8x128xf32>
    %1995 = arith.maximumf %1994, %1993 : vector<8x128xf32>
    %1996 = vector.broadcast %cst_742 : f32 to vector<8x128xf32>
    %1997 = arith.minimumf %1996, %1995 : vector<8x128xf32>
    %c0_743 = arith.constant 0 : index
    %c0_744 = arith.constant 0 : index
    %1998 = vector.load %arg15[%c0_743, %c0_744] : memref<8x128xf32, #tpu.memory_space<vmem>>, vector<8x128xf32>
    tpu.vector_store %arg15[%c0_743, %c0_744], %1997 {strides = array<i32>} : memref<8x128xf32, #tpu.memory_space<vmem>>, vector<8x128xf32>,
    return
  }
  func.func @transform_0(%arg0: i32, %arg1: memref<100xf32, #tpu.memory_space<smem>>) -> (i32, i32) {
    %c0_i32 = arith.constant 0 : i32
    %c0_i32_0 = arith.constant 0 : i32
    return %arg0, %c0_i32 : i32, i32
  }
  func.func @transform_1(%arg0: i32, %arg1: memref<100xf32, #tpu.memory_space<smem>>) -> (i32, i32) {
    %c0_i32 = arith.constant 0 : i32
    %c0_i32_0 = arith.constant 0 : i32
    return %arg0, %c0_i32 : i32, i32
  }
  func.func @transform_2(%arg0: i32, %arg1: memref<100xf32, #tpu.memory_space<smem>>) -> (i32, i32, i32) {
    %c0_i32 = arith.constant 0 : i32
    %c0_i32_0 = arith.constant 0 : i32
    %c0_i32_1 = arith.constant 0 : i32
    return %c0_i32, %arg0, %c0_i32_0 : i32, i32, i32
  }
  func.func @transform_3(%arg0: i32, %arg1: memref<100xf32, #tpu.memory_space<smem>>) -> (i32, i32, i32) {
    %c0_i32 = arith.constant 0 : i32
    %c0_i32_0 = arith.constant 0 : i32
    %c0_i32_1 = arith.constant 0 : i32
    %c0_i32_2 = arith.constant 0 : i32
    return %c0_i32, %c0_i32_0, %c0_i32_1 : i32, i32, i32
  }
  func.func @transform_4(%arg0: i32, %arg1: memref<100xf32, #tpu.memory_space<smem>>) -> (i32, i32) {
    %c0_i32 = arith.constant 0 : i32
    %c0_i32_0 = arith.constant 0 : i32
    %c0_i32_1 = arith.constant 0 : i32
    return %c0_i32, %c0_i32_0 : i32, i32
  }
  func.func @transform_5(%arg0: i32, %arg1: memref<100xf32, #tpu.memory_space<smem>>) -> (i32, i32) {
    %c0_i32 = arith.constant 0 : i32
    %c0_i32_0 = arith.constant 0 : i32
    %c0_i32_1 = arith.constant 0 : i32
    return %c0_i32, %c0_i32_0 : i32, i32
  }
  func.func @transform_6(%arg0: i32, %arg1: memref<100xf32, #tpu.memory_space<smem>>) -> (i32, i32) {
    %c0_i32 = arith.constant 0 : i32
    %c0_i32_0 = arith.constant 0 : i32
    %c0_i32_1 = arith.constant 0 : i32
    return %c0_i32, %c0_i32_0 : i32, i32
  }
  func.func @transform_7(%arg0: i32, %arg1: memref<100xf32, #tpu.memory_space<smem>>) -> (i32, i32) {
    %c0_i32 = arith.constant 0 : i32
    %c0_i32_0 = arith.constant 0 : i32
    %c0_i32_1 = arith.constant 0 : i32
    return %c0_i32, %c0_i32_0 : i32, i32
  }
  func.func @transform_8(%arg0: i32, %arg1: memref<100xf32, #tpu.memory_space<smem>>) -> (i32, i32) {
    %c0_i32 = arith.constant 0 : i32
    %c0_i32_0 = arith.constant 0 : i32
    %c0_i32_1 = arith.constant 0 : i32
    return %c0_i32, %c0_i32_0 : i32, i32
  }
  func.func @transform_9(%arg0: i32, %arg1: memref<100xf32, #tpu.memory_space<smem>>) -> (i32, i32) {
    %c0_i32 = arith.constant 0 : i32
    %c0_i32_0 = arith.constant 0 : i32
    %c0_i32_1 = arith.constant 0 : i32
    return %c0_i32, %c0_i32_0 : i32, i32
  }
  func.func @transform_10(%arg0: i32, %arg1: memref<100xf32, #tpu.memory_space<smem>>) -> (i32, i32) {
    %c0_i32 = arith.constant 0 : i32
    %c0_i32_0 = arith.constant 0 : i32
    %c0_i32_1 = arith.constant 0 : i32
    return %c0_i32, %c0_i32_0 : i32, i32
  }
  func.func @transform_11(%arg0: i32, %arg1: memref<100xf32, #tpu.memory_space<smem>>) -> (i32, i32) {
    %c0_i32 = arith.constant 0 : i32
    %c0_i32_0 = arith.constant 0 : i32
    %c0_i32_1 = arith.constant 0 : i32
    return %c0_i32, %c0_i32_0 : i32, i32
  }
  func.func @transform_12(%arg0: i32, %arg1: memref<100xf32, #tpu.memory_space<smem>>) -> (i32, i32) {
    %c0_i32 = arith.constant 0 : i32
    %c0_i32_0 = arith.constant 0 : i32
    %c0_i32_1 = arith.constant 0 : i32
    return %c0_i32, %c0_i32_0 : i32, i32
  }
  func.func @transform_13(%arg0: i32, %arg1: memref<100xf32, #tpu.memory_space<smem>>) -> (i32, i32) {
    %c0_i32 = arith.constant 0 : i32
    %c0_i32_0 = arith.constant 0 : i32
    return %arg0, %c0_i32 : i32, i32
  }
}

</mosaic_0001>

<bundles_post_ra>
// kernel: diffusion_forward.3
= control target key start
LH: loop header
LB: loop body
LE: loop exit
PB: predicated region body
PF: predicated region fallthrough
CT: control target
= control target key end

     0   :  { %s4579_s16 = smov [#allocation3]   ;;  %s8372_s0 = inlined_call_operand.vmem [shape: f32[100], index: 0, kind: input, shape index: {}]   ;;  %s8373_s1 = inlined_call_operand.vmem [shape: f32[8,128], index: 1, kind: input, shape index: {}]   ;;  %s8374_s2 = inlined_call_operand.vmem [shape: f32[8,128], index: 2, kind: input, shape index: {}]   ;;  %s8375_s3 = inlined_call_operand.vmem [shape: f32[20,8,128], index: 3, kind: input, shape index: {}]   ;;  %s8376_s4 = inlined_call_operand.vmem [shape: f32[20,1,128], index: 4, kind: input, shape index: {}]   ;;  %s8377_s5 = inlined_call_operand.vmem [shape: f32[128,128], index: 5, kind: input, shape index: {}]   ;;  %s8378_s6 = inlined_call_operand.vmem [shape: f32[128,128], index: 6, kind: input, shape index: {}]   ;;  %s8379_s7 = inlined_call_operand.vmem [shape: f32[1,128], index: 7, kind: input, shape index: {}]   ;;  %s8380_s8 = inlined_call_operand.vmem [shape: f32[128,128], index: 8, kind: input, shape index: {}]   ;;  %s8381_s9 = inlined_call_operand.vmem [shape: f32[1,128], index: 9, kind: input, shape index: {}]   ;;  %s8382_s10 = inlined_call_operand.vmem [shape: f32[128,128], index: 10, kind: input, shape index: {}]   ;;  %s8383_s11 = inlined_call_operand.vmem [shape: f32[1,128], index: 11, kind: input, shape index: {}]   ;;  %s8384_s12 = inlined_call_operand.vmem [shape: f32[128,128], index: 12, kind: input, shape index: {}]   ;;  %s8385_s13 = inlined_call_operand.vmem [shape: f32[1,128], index: 13, kind: input, shape index: {}]   ;;  %s8386_s14 = inlined_call_operand.vmem [shape: f32[8,128], index: 14, kind: output, shape index: {}]  }
   0x1   :  { %s20_s15 = sshll.u32 %s8372_s0, 4  ;;  %s21_s15 = int_to_ptr.vmem [resolvable:$true] %s20_s15 }
   0x2   :  { %23 = dma.vmem_to_smem %s21_s15, 16, %s4579_s16, [#allocation2] }
   0x3   :  { %4577 = dma.done.wait [#allocation2], 16 }
   0x4   :  { %4578 = vsyncadd [#allocation2], 4294967280 }
   0x5   :  { %26 = sfence }
   0x6   :  { %v136_v0 = vld [vmem:[%s8378_s6 + $0x78] sm:$0xff]  ;;  %v135_v2 = vld [vmem:[%s8378_s6 + $0x70] sm:$0xff]  ;;  %v134_v4 = vld [vmem:[%s8378_s6 + $0x68] sm:$0xff]  ;;  %s3722_s19 = sld [smem:[#allocation3 + $0x61]] }
   0x7   :  { %v4664_v1 = vld [vmem:[%s8377_s5 + $0x78] sm:$0xff]  ;;  %141 = vmatpush.msra.mxu0 %v136_v0  ;;  %v4673_v3 = vld [vmem:[%s8377_s5 + $0x70] sm:$0xff]  ;;  %v4681_v5 = vld [vmem:[%s8377_s5 + $0x68] sm:$0xff]  ;;  %s3724_s20 = sld [smem:[#allocation3 + $0x63]] }
   0x8   :  { %167 = vmatpush.msra.mxu1 %v4664_v1  ;;  %v133_v6 = vld [vmem:[%s8378_s6 + $0x60] sm:$0xff]  ;;  %v132_v8 = vld [vmem:[%s8378_s6 + $0x58] sm:$0xff]  ;;  %v131_v10 = vld [vmem:[%s8378_s6 + $0x50] sm:$0xff]  ;;  %s3731_s23 = sld [smem:[#allocation3 + $0x5a]] }
   0x9   :  { %142 = vmatpush.msra.mxu0 %v135_v2  ;;  %v4690_v7 = vld [vmem:[%s8377_s5 + $0x60] sm:$0xff]  ;;  %v4699_v9 = vld [vmem:[%s8377_s5 + $0x58] sm:$0xff]  ;;  %v4708_v11 = vld [vmem:[%s8377_s5 + $0x50] sm:$0xff]  ;;  %s3732_s24 = sld [smem:[#allocation3 + $0x5b]] }
   0xa   :  { %168 = vmatpush.msra.mxu1 %v4673_v3  ;;  %v130_v12 = vld [vmem:[%s8378_s6 + $0x48] sm:$0xff]  ;;  %v129_v14 = vld [vmem:[%s8378_s6 + $0x40] sm:$0xff]  ;;  %v128_v16 = vld [vmem:[%s8378_s6 + $0x38] sm:$0xff]  ;;  %s3734_s25 = sld [smem:[#allocation3 + $0x5d]] }
   0xb   :  { %143 = vmatpush.msra.mxu0 %v134_v4  ;;  %v4717_v13 = vld [vmem:[%s8377_s5 + $0x48] sm:$0xff]  ;;  %v4726_v15 = vld [vmem:[%s8377_s5 + $0x40] sm:$0xff]  ;;  %v4734_v17 = vld [vmem:[%s8377_s5 + $0x38] sm:$0xff]  ;;  %s3733_s26 = sld [smem:[#allocation3 + $0x5c]] }
   0xc   :  { %169 = vmatpush.msra.mxu1 %v4681_v5  ;;  %v127_v18 = vld [vmem:[%s8378_s6 + $0x30] sm:$0xff]  ;;  %v126_v20 = vld [vmem:[%s8378_s6 + $0x28] sm:$0xff]  ;;  %v125_v22 = vld [vmem:[%s8378_s6 + $0x20] sm:$0xff]  ;;  %s3735_s27 = sld [smem:[#allocation3 + $0x5e]] }
   0xd   :  { %144 = vmatpush.msra.mxu0 %v133_v6  ;;  %v4743_v19 = vld [vmem:[%s8377_s5 + $0x30] sm:$0xff]  ;;  %v4752_v21 = vld [vmem:[%s8377_s5 + $0x28] sm:$0xff]  ;;  %v4762_v23 = vld [vmem:[%s8377_s5 + $0x20] sm:$0xff]  ;;  %s3744_s28 = sld [smem:[#allocation3 + $0x57]] }
   0xe   :  { %170 = vmatpush.msra.mxu1 %v4690_v7  ;;  %v124_v24 = vld [vmem:[%s8378_s6 + $0x18] sm:$0xff]  ;;  %v123_v26 = vld [vmem:[%s8378_s6 + $0x10] sm:$0xff]  ;;  %v122_v28 = vld [vmem:[%s8378_s6 + $0x8] sm:$0xff]  ;;  %s3746_s29 = sld [smem:[#allocation3 + $0x59]] }
   0xf   :  { %145 = vmatpush.msra.mxu0 %v132_v8  ;;  %v4771_v25 = vld [vmem:[%s8377_s5 + $0x18] sm:$0xff]  ;;  %v4780_v27 = vld [vmem:[%s8377_s5 + $0x10] sm:$0xff]  ;;  %v4789_v29 = vld [vmem:[%s8377_s5 + $0x8] sm:$0xff]  ;;  %s3757_s30 = sld [smem:[#allocation3 + $0x54]] }
  0x10   :  { %171 = vmatpush.msra.mxu1 %v4699_v9  ;;  %v121_v30 = vld [vmem:[%s8378_s6] sm:$0xff]  ;;  %v4846_v34 = vld [vmem:[%s8380_s8 + $0x78] sm:$0xff]  ;;  %v4852_v35 = vld [vmem:[%s8380_s8 + $0x70] sm:$0xff]  ;;  %s3723_s6 = sld [smem:[#allocation3 + $0x62]] }
  0x11   :  { %146 = vmatpush.msra.mxu0 %v131_v10  ;;  %v4798_v31 = vld [vmem:[%s8377_s5] sm:$0xff]  ;;  %214 = vmatpush.msra.mxu2 %v4846_v34  ;;  %v4858_v36 = vld [vmem:[%s8380_s8 + $0x68] sm:$0xff]  ;;  %v4869_v38 = vld [vmem:[%s8380_s8 + $0x58] sm:$0xff]  ;;  %s3764_s18 = sld [smem:[#allocation3 + $0x4b]] }
  0x12   :  { %172 = vmatpush.msra.mxu1 %v4708_v11  ;;  %v120_v32 = vld [vmem:[%s8374_s2] sm:$0xff]  ;;  %v4875_v39 = vld [vmem:[%s8380_s8 + $0x50] sm:$0xff]  ;;  %v4881_v40 = vld [vmem:[%s8380_s8 + $0x48] sm:$0xff]  ;;  %s3721_s2 = sld [smem:[#allocation3 + $0x60]] }
  0x13   :  { %147 = vmatpush.msra.mxu0 %v130_v12  ;;  %v4807_v33 = vld [vmem:[%s8373_s1] sm:$0xff]  ;;  %215 = vmatpush.msra.mxu2 %v4852_v35  ;;  %v4893_v42 = vld [vmem:[%s8380_s8 + $0x38] sm:$0xff]  ;;  %v4899_v43 = vld [vmem:[%s8380_s8 + $0x30] sm:$0xff]  ;;  %s3720_s1 = sld [smem:[#allocation3 + $0x5f]] }
  0x14   :  { %173 = vmatpush.msra.mxu1 %v4717_v13  ;;  %v4864_v37 = vld [vmem:[%s8380_s8 + $0x60] sm:$0xff]  ;;  %v3936_v45 = vld [vmem:[%s8376_s4 + $0x13] ss:$0 sm:$0xff]  ;;  %v4911_v46 = vld [vmem:[%s8380_s8 + $0x28] sm:$0xff]  ;;  %s3766_s21 = sld [smem:[#allocation3 + $0x4d]] }
  0x15   :  { %148 = vmatpush.msra.mxu0 %v129_v14  ;;  %216 = vmatpush.msra.mxu2 %v4858_v36  ;;  %v4887_v41 = vld [vmem:[%s8380_s8 + $0x40] sm:$0xff]  ;;  %v4925_v52 = vld [vmem:[%s8380_s8 + $0x18] sm:$0xff]  ;;  %v4932_v54 = vld [vmem:[%s8380_s8 + $0x10] sm:$0xff]  ;;  %s3777_s22 = sld [smem:[#allocation3 + $0x48]] }
  0x16   :  { %174 = vmatpush.msra.mxu1 %v4726_v15  ;;  %v3935_v44 = vld [vmem:[%s8379_s7] ss:$0 sm:$0xff]  ;;  %v4938_v56 = vld [vmem:[%s8380_s8 + $0x8] sm:$0xff]  ;;  %s3768_s7 = sld [smem:[#allocation3 + $0x4f]] }
  0x17   :  { %149 = vmatpush.msra.mxu0 %v128_v16  ;;  %217 = vmatpush.msra.mxu2 %v4864_v37  ;;  %v4917_v47 = vld [vmem:[%s8380_s8 + $0x20] sm:$0xff]  ;;  %s3779_s0 = sld [smem:[#allocation3 + $0x4a]] }
  0x18   :  { %175 = vmatpush.msra.mxu1 %v4734_v17  ;;  %v4944_v58 = vld [vmem:[%s8380_s8] sm:$0xff]  ;;  %s3798_s15 = sld [smem:[#allocation3 + $0x3d]] }
  0x19   :  { %150 = vmatpush.msra.mxu0 %v127_v18  ;;  %218 = vmatpush.msra.mxu2 %v4869_v38  ;;  %s3800_s16 = sld [smem:[#allocation3 + $0x3f]] }
  0x1a   :  { %176 = vmatpush.msra.mxu1 %v4743_v19  ;;  %s3812_s17 = sld [smem:[#allocation3 + $0x3b]] }
  0x1b   :  { %151 = vmatpush.msra.mxu0 %v126_v20  ;;  %219 = vmatpush.msra.mxu2 %v4875_v39 }
  0x1c   :  { %177 = vmatpush.msra.mxu1 %v4752_v21 }
  0x1d   :  { %152 = vmatpush.msra.mxu0 %v125_v22  ;;  %220 = vmatpush.msra.mxu2 %v4881_v40 }
  0x1e   :  { %178 = vmatpush.msra.mxu1 %v4762_v23 }
  0x1f   :  { %153 = vmatpush.msra.mxu0 %v124_v24  ;;  %221 = vmatpush.msra.mxu2 %v4887_v41  ;;  %v4983_v24 = vld [vmem:[%s8382_s10 + $0x78] sm:$0xff] }
  0x20   :  { %179 = vmatpush.msra.mxu1 %v4771_v25  ;;  %8821 = vst [vmem:[#allocation5_spill] sm:$0xff] %v4983_v24  ;;  %260 = vmatpush.msra.mxu3 %v4983_v24 }
  0x21   :  { %154 = vmatpush.msra.mxu0 %v123_v26  ;;  %222 = vmatpush.msra.mxu2 %v4893_v42  ;;  %v4989_v26 = vld [vmem:[%s8382_s10 + $0x70] sm:$0xff] }
  0x22   :  { %180 = vmatpush.msra.mxu1 %v4780_v27  ;;  %8822 = vst [vmem:[#allocation6_spill] sm:$0xff] %v4989_v26  ;;  %261 = vmatpush.msra.mxu3 %v4989_v26 }
  0x23   :  { %155 = vmatpush.msra.mxu0 %v122_v28  ;;  %223 = vmatpush.msra.mxu2 %v4899_v43  ;;  %v4995_v28 = vld [vmem:[%s8382_s10 + $0x68] sm:$0xff] }
  0x24   :  { %181 = vmatpush.msra.mxu1 %v4789_v29  ;;  %8823 = vst [vmem:[#allocation7_spill] sm:$0xff] %v4995_v28  ;;  %262 = vmatpush.msra.mxu3 %v4995_v28 }
  0x25   :  { %156 = vmatpush.msra.mxu0 %v121_v30  ;;  %224 = vmatpush.msra.mxu2 %v4911_v46  ;;  %v5001_v30 = vld [vmem:[%s8382_s10 + $0x60] sm:$0xff] }
  0x26   :  { %182 = vmatpush.msra.mxu1 %v4798_v31  ;;  %157 = vmatmul.f32.vlgmr.msra.gmra.mxu0 %v120_v32  ;;  %8824 = vst [vmem:[#allocation8_spill] sm:$0xff] %v5001_v30  ;;  %v5007_v32 = vld [vmem:[%s8382_s10 + $0x58] sm:$0xff] }
  0x27   :  { %183 = vmatmul.f32.vlgmr.msra.gmra.mxu1 %v4807_v33  ;;  %225 = vmatpush.msra.mxu2 %v4917_v47  ;;  %8825 = vst [vmem:[#allocation9_spill] sm:$0xff] %v5007_v32 }
  0x28   :  { %353 = vmatpush.msrb.mxu1 %v4664_v1  ;;  %263 = vmatpush.msra.mxu3 %v5001_v30 }
  0x29   :  { %226 = vmatpush.msra.mxu2 %v4925_v52 }
  0x2a   :  { %354 = vmatpush.msrb.mxu1 %v4673_v3  ;;  %264 = vmatpush.msra.mxu3 %v5007_v32 }
  0x2b   :  { %227 = vmatpush.msra.mxu2 %v4932_v54 }
  0x2c   :  { %355 = vmatpush.msrb.mxu1 %v4681_v5 }
  0x2d   :  { %228 = vmatpush.msra.mxu2 %v4938_v56 }
  0x2e   :  { %356 = vmatpush.msrb.mxu1 %v4690_v7 }
  0x2f   :  { %229 = vmatpush.msra.mxu2 %v4944_v58 }
  0x30   :  { %357 = vmatpush.msrb.mxu1 %v4699_v9 }
  0x31   :  { %397 = vmatpush.msrb.mxu2 %v4846_v34 }
  0x32   :  { %358 = vmatpush.msrb.mxu1 %v4708_v11 }
  0x33   :  { %398 = vmatpush.msrb.mxu2 %v4852_v35 }
  0x34   :  { %359 = vmatpush.msrb.mxu1 %v4717_v13 }
  0x35   :  { %399 = vmatpush.msrb.mxu2 %v4858_v36 }
  0x36   :  { %360 = vmatpush.msrb.mxu1 %v4726_v15 }
  0x37   :  { %400 = vmatpush.msrb.mxu2 %v4864_v37 }
  0x38   :  { %361 = vmatpush.msrb.mxu1 %v4734_v17 }
  0x39   :  { %401 = vmatpush.msrb.mxu2 %v4869_v38 }
  0x3a   :  { %362 = vmatpush.msrb.mxu1 %v4743_v19 }
  0x3b   :  { %402 = vmatpush.msrb.mxu2 %v4875_v39 }
  0x3c   :  { %363 = vmatpush.msrb.mxu1 %v4752_v21 }
  0x3d   :  { %403 = vmatpush.msrb.mxu2 %v4881_v40 }
  0x3e   :  { %364 = vmatpush.msrb.mxu1 %v4762_v23 }
  0x3f   :  { %404 = vmatpush.msrb.mxu2 %v4887_v41 }
  0x40   :  { %365 = vmatpush.msrb.mxu1 %v4771_v25 }
  0x41   :  { %405 = vmatpush.msrb.mxu2 %v4893_v42 }
  0x42   :  { %366 = vmatpush.msrb.mxu1 %v4780_v27 }
  0x43   :  { %406 = vmatpush.msrb.mxu2 %v4899_v43 }
  0x44   :  { %367 = vmatpush.msrb.mxu1 %v4789_v29 }
  0x45   :  { %407 = vmatpush.msrb.mxu2 %v4911_v46 }
  0x46   :  { %368 = vmatpush.msrb.mxu1 %v4798_v31 }
  0x47   :  { %408 = vmatpush.msrb.mxu2 %v4917_v47 }
  0x48   :  { %530 = vmatpush.msra.mxu1 %v4664_v1 }
  0x49   :  { %409 = vmatpush.msrb.mxu2 %v4925_v52 }
  0x4a   :  { %531 = vmatpush.msra.mxu1 %v4673_v3 }
  0x4b   :  { %410 = vmatpush.msrb.mxu2 %v4932_v54 }
  0x4c   :  { %532 = vmatpush.msra.mxu1 %v4681_v5 }
  0x4d   :  { %411 = vmatpush.msrb.mxu2 %v4938_v56 }
  0x4e   :  { %533 = vmatpush.msra.mxu1 %v4690_v7 }
  0x4f   :  { %412 = vmatpush.msrb.mxu2 %v4944_v58 }
  0x50   :  { %534 = vmatpush.msra.mxu1 %v4699_v9 }
  0x52   :  { %535 = vmatpush.msra.mxu1 %v4708_v11 }
  0x54   :  { %536 = vmatpush.msra.mxu1 %v4717_v13 }
  0x56   :  { %537 = vmatpush.msra.mxu1 %v4726_v15 }
  0x58   :  { %538 = vmatpush.msra.mxu1 %v4734_v17 }
  0x5a   :  { %539 = vmatpush.msra.mxu1 %v4743_v19 }
  0x5c   :  { %540 = vmatpush.msra.mxu1 %v4752_v21 }
  0x5e   :  { %541 = vmatpush.msra.mxu1 %v4762_v23 }
  0x60   :  { %542 = vmatpush.msra.mxu1 %v4771_v25 }
  0x62   :  { %543 = vmatpush.msra.mxu1 %v4780_v27 }
  0x64   :  { %544 = vmatpush.msra.mxu1 %v4789_v29 }
  0x66   :  { %545 = vmatpush.msra.mxu1 %v4798_v31 }
  0xa3   :  { %v158_v48 = vpop.f32.mrf.mxu0 }
  0xa4   :  { %v184_v49 = vpop.f32.mrf.mxu1  ;;  %v4920_v50 = vadd.f32 %v3935_v44, %v158_v48  ;;  %v5013_v44 = vld [vmem:[%s8382_s10 + $0x50] sm:$0xff]  ;;  %v5024_v48 = vld [vmem:[%s8382_s10 + $0x40] sm:$0xff] }
  0xa5   :  { %v185_v51 = vadd.f32 %v3936_v45, %v184_v49  ;;  %8826 = vst [vmem:[#allocation10_spill] sm:$0xff] %v5013_v44  ;;  %265 = vmatpush.msra.mxu3 %v5013_v44  ;;  %v5019_v45 = vld [vmem:[%s8382_s10 + $0x48] sm:$0xff]  ;;  %v5030_v49 = vld [vmem:[%s8382_s10 + $0x38] sm:$0xff] }
  0xa6   :  { %8827 = vst [vmem:[#allocation11_spill] sm:$0xff] %v5019_v45 }
  0xa7   :  { %v187_v53 = vadd.f32 %v185_v51, %v4920_v50  ;;  %8828 = vst [vmem:[#allocation12_spill] sm:$0xff] %v5024_v48  ;;  %266 = vmatpush.msra.mxu3 %v5019_v45  ;;  %v5036_v51 = vld [vmem:[%s8382_s10 + $0x30] sm:$0xff] }
  0xa8   :  { %8829 = vst [vmem:[#allocation13_spill] sm:$0xff] %v5030_v49 }
  0xa9   :  { %v188_v55 = vmin.f32 %v187_v53, 20.0  ;;  %267 = vmatpush.msra.mxu3 %v5024_v48  ;;  %8830 = vst [vmem:[#allocation14_spill] sm:$0xff] %v5036_v51 }
  0xab   :  { %v189_v57 = vmul.f32 1.442695, %v188_v55  ;;  %268 = vmatpush.msra.mxu3 %v5030_v49  ;;  %v5048_v55 = vld [vmem:[%s8381_s9] ss:$0 sm:$0xff] }
  0xac   :  { %8832 = vst [vmem:[#allocation16_spill] sm:$0xff] %v5048_v55 }
  0xad   :  { %3959 = vpow2.f32 %v189_v57  ;;  %269 = vmatpush.msra.mxu3 %v5036_v51  ;;  %v5053_v57 = vld [vmem:[%s8382_s10 + $0x20] sm:$0xff] }
  0xae   :  { %8833 = vst [vmem:[#allocation17_spill] sm:$0xff] %v5053_v57 }
  0xb3   :  { %v3960_v59 = vpop.eup %3959 }
  0xb4   :  { %v191_v60 = vadd.f32 1.0, %v3960_v59  ;;  %v5059_v59 = vld [vmem:[%s8382_s10 + $0x18] sm:$0xff] }
  0xb5   :  { %8834 = vst [vmem:[#allocation18_spill] sm:$0xff] %v5059_v59 }
  0xb6   :  { %v192_v61 = vmul.f32 %v191_v60, %v191_v60 }
  0xb8   :  { %v194_v62 = vadd.f32 1.0, %v192_v61  ;;  %v3717_v14 = vadd.f32 -1.0, %v192_v61 }
  0xba   :  { %3961 = vrcp.f32 %v194_v62  ;;  %v206_v4 = vand.u32 2147483648, %v194_v62  ;;  %v204_v8 = vand.u32 2147483647, %v194_v62  ;;  %vm200_vm1 = vweird.f32 %v194_v62 }
  0xbc   :  { %v207_v12 = vor.u32 1.1754944e-38, %v206_v4  ;;  %vm205_vm3 = vcmp.eq.f32.partialorder %v204_v8, 8.507059e+37  ;;  %v5078_v4 = vld [vmem:[%s8382_s10] sm:$0xff] }
  0xbd   :  { %8837 = vst [vmem:[#allocation21_spill] sm:$0xff] %v5078_v4 }
  0xc0   :  { %v3962_v63 = vpop.eup %3961 }
  0xc1   :  { %v196_v0 = vmul.f32 %v3962_v63, %v194_v62  ;;  %vm201_vm0 = vweird.f32 %v3962_v63  ;;  %v5066_v62 = vld [vmem:[%s8382_s10 + $0x10] sm:$0xff] }
  0xc2   :  { %vm202_vm2 = vmor %vm200_vm1, %vm201_vm0  ;;  %8835 = vst [vmem:[#allocation19_spill] sm:$0xff] %v5066_v62 }
  0xc3   :  { %v197_v2 = vsub.f32 1.0, %v196_v0  ;;  %v5072_v0 = vld [vmem:[%s8382_s10 + $0x8] sm:$0xff] }
  0xc4   :  { %8836 = vst [vmem:[#allocation20_spill] sm:$0xff] %v5072_v0 }
  0xc5   :  { %v198_v6 = vmul.f32 %v3962_v63, %v197_v2 }
  0xc7   :  { %v199_v10 = vadd.f32 %v3962_v63, %v198_v6 }
  0xc9   :  { %v203_v16 = vsel %vm202_vm2, %v3962_v63, %v199_v10 }
  0xca   :  { %v208_v18 = vsel %vm205_vm3, %v207_v12, %v203_v16 }
  0xcb   :  { %v209_v20 = vmul.f32 %v3717_v14, %v208_v18 }
  0xcd   :  { %v210_v22 = vmul.f32 %v209_v20, %v187_v53  ;;  %v5042_v53 = vld [vmem:[%s8382_s10 + $0x28] sm:$0xff] }
  0xce   :  { %8831 = vst [vmem:[#allocation15_spill] sm:$0xff] %v5042_v53  ;;  %270 = vmatpush.msra.mxu3 %v5042_v53 }
  0xcf   :  { %230 = vmatmul.f32.vlgmr.msra.gmra.mxu2 %v210_v22 }
  0xd0   :  { %574 = vmatpush.msra.mxu2 %v4846_v34  ;;  %271 = vmatpush.msra.mxu3 %v5053_v57 }
  0xd2   :  { %575 = vmatpush.msra.mxu2 %v4852_v35  ;;  %272 = vmatpush.msra.mxu3 %v5059_v59 }
  0xd4   :  { %576 = vmatpush.msra.mxu2 %v4858_v36  ;;  %273 = vmatpush.msra.mxu3 %v5066_v62 }
  0xd6   :  { %577 = vmatpush.msra.mxu2 %v4864_v37  ;;  %274 = vmatpush.msra.mxu3 %v5072_v0 }
  0xd8   :  { %578 = vmatpush.msra.mxu2 %v4869_v38  ;;  %275 = vmatpush.msra.mxu3 %v5078_v4 }
  0xda   :  { %579 = vmatpush.msra.mxu2 %v4875_v39  ;;  %440 = vmatpush.msrb.mxu3 %v4983_v24 }
  0xdc   :  { %580 = vmatpush.msra.mxu2 %v4881_v40  ;;  %441 = vmatpush.msrb.mxu3 %v4989_v26 }
  0xde   :  { %581 = vmatpush.msra.mxu2 %v4887_v41  ;;  %442 = vmatpush.msrb.mxu3 %v4995_v28 }
  0xe0   :  { %582 = vmatpush.msra.mxu2 %v4893_v42  ;;  %443 = vmatpush.msrb.mxu3 %v5001_v30 }
  0xe2   :  { %583 = vmatpush.msra.mxu2 %v4899_v43  ;;  %444 = vmatpush.msrb.mxu3 %v5007_v32 }
  0xe4   :  { %584 = vmatpush.msra.mxu2 %v4911_v46  ;;  %445 = vmatpush.msrb.mxu3 %v5013_v44 }
  0xe6   :  { %585 = vmatpush.msra.mxu2 %v4917_v47  ;;  %446 = vmatpush.msrb.mxu3 %v5019_v45 }
  0xe8   :  { %586 = vmatpush.msra.mxu2 %v4925_v52  ;;  %447 = vmatpush.msrb.mxu3 %v5024_v48 }
  0xea   :  { %587 = vmatpush.msra.mxu2 %v4932_v54  ;;  %448 = vmatpush.msrb.mxu3 %v5030_v49 }
  0xec   :  { %588 = vmatpush.msra.mxu2 %v4938_v56  ;;  %449 = vmatpush.msrb.mxu3 %v5036_v51 }
  0xee   :  { %589 = vmatpush.msra.mxu2 %v4944_v58  ;;  %450 = vmatpush.msrb.mxu3 %v5042_v53 }
  0xf0   :  { %451 = vmatpush.msrb.mxu3 %v5053_v57 }
  0xf2   :  { %452 = vmatpush.msrb.mxu3 %v5059_v59 }
  0xf4   :  { %453 = vmatpush.msrb.mxu3 %v5066_v62 }
  0xf6   :  { %454 = vmatpush.msrb.mxu3 %v5072_v0 }
  0xf8   :  { %455 = vmatpush.msrb.mxu3 %v5078_v4 }
 0x152   :  { %v231_v60 = vpop.f32.mrf.mxu2 }
 0x153   :  { %v232_v61 = vadd.f32 %v5048_v55, %v231_v60 }
 0x155   :  { %v234_v63 = vmin.f32 %v232_v61, 20.0 }
 0x157   :  { %v235_v2 = vmul.f32 1.442695, %v234_v63 }
 0x159   :  { %3963 = vpow2.f32 %v235_v2 }
 0x15f   :  { %v3964_v6 = vpop.eup %3963 }
 0x160   :  { %v237_v8 = vadd.f32 1.0, %v3964_v6 }
 0x162   :  { %v238_v10 = vmul.f32 %v237_v8, %v237_v8 }
 0x164   :  { %v240_v12 = vadd.f32 1.0, %v238_v10  ;;  %v3718_v6 = vadd.f32 -1.0, %v238_v10  ;;  %v5129_v10 = vld [vmem:[%s8384_s12 + $0x68] sm:$0xff] }
 0x166   :  { %3965 = vrcp.f32 %v240_v12  ;;  %v252_v20 = vand.u32 2147483648, %v240_v12  ;;  %v250_v60 = vand.u32 2147483647, %v240_v12  ;;  %vm246_vm5 = vweird.f32 %v240_v12 }
 0x168   :  { %v253_v2 = vor.u32 1.1754944e-38, %v252_v20  ;;  %vm251_vm7 = vcmp.eq.f32.partialorder %v250_v60, 8.507059e+37  ;;  %v5147_v20 = vld [vmem:[%s8384_s12 + $0x50] sm:$0xff]  ;;  %v5159_v60 = vld [vmem:[%s8384_s12 + $0x40] sm:$0xff] }
 0x16c   :  { %v3966_v14 = vpop.eup %3965 }
 0x16d   :  { %v242_v16 = vmul.f32 %v3966_v14, %v240_v12  ;;  %vm247_vm4 = vweird.f32 %v3966_v14  ;;  %v5135_v12 = vld [vmem:[%s8384_s12 + $0x60] sm:$0xff] }
 0x16e   :  { %vm248_vm6 = vmor %vm246_vm5, %vm247_vm4 }
 0x16f   :  { %v243_v18 = vsub.f32 1.0, %v242_v16 }
 0x171   :  { %v244_v22 = vmul.f32 %v3966_v14, %v243_v18 }
 0x173   :  { %v245_v63 = vadd.f32 %v3966_v14, %v244_v22  ;;  %v5153_v22 = vld [vmem:[%s8384_s12 + $0x48] sm:$0xff] }
 0x175   :  { %v249_v8 = vsel %vm248_vm6, %v3966_v14, %v245_v63  ;;  %v5141_v14 = vld [vmem:[%s8384_s12 + $0x58] sm:$0xff] }
 0x176   :  { %v254_v16 = vsel %vm251_vm7, %v253_v2, %v249_v8  ;;  %v5165_v63 = vld [vmem:[%s8384_s12 + $0x38] sm:$0xff]  ;;  %v5171_v2 = vld [vmem:[%s8384_s12 + $0x30] sm:$0xff]  ;;  %v5182_v8 = vld [vmem:[%s8384_s12 + $0x28] sm:$0xff] }
 0x177   :  { %v255_v55 = vmul.f32 %v3718_v6, %v254_v16  ;;  %v5177_v6 = vld [vmem:[%s8383_s11] ss:$0 sm:$0xff] }
 0x178   :  { %8838 = vst [vmem:[#allocation22_spill] sm:$0xff] %v5177_v6  ;;  %v5188_v16 = vld [vmem:[%s8384_s12 + $0x20] sm:$0xff] }
 0x179   :  { %v256_v18 = vmul.f32 %v255_v55, %v232_v61  ;;  %v5117_v55 = vld [vmem:[%s8384_s12 + $0x78] sm:$0xff]  ;;  %v5123_v61 = vld [vmem:[%s8384_s12 + $0x70] sm:$0xff] }
 0x17a   :  { %306 = vmatpush.msrb.mxu0 %v5117_v55 }
 0x17b   :  { %276 = vmatmul.f32.vlgmr.msra.gmra.mxu3 %v256_v18 }
 0x17c   :  { %617 = vmatpush.msra.mxu3 %v4983_v24  ;;  %307 = vmatpush.msrb.mxu0 %v5123_v61 }
 0x17e   :  { %618 = vmatpush.msra.mxu3 %v4989_v26  ;;  %308 = vmatpush.msrb.mxu0 %v5129_v10 }
 0x180   :  { %619 = vmatpush.msra.mxu3 %v4995_v28  ;;  %309 = vmatpush.msrb.mxu0 %v5135_v12 }
 0x182   :  { %620 = vmatpush.msra.mxu3 %v5001_v30  ;;  %310 = vmatpush.msrb.mxu0 %v5141_v14 }
 0x184   :  { %621 = vmatpush.msra.mxu3 %v5007_v32  ;;  %311 = vmatpush.msrb.mxu0 %v5147_v20 }
 0x186   :  { %622 = vmatpush.msra.mxu3 %v5013_v44  ;;  %312 = vmatpush.msrb.mxu0 %v5153_v22 }
 0x188   :  { %623 = vmatpush.msra.mxu3 %v5019_v45  ;;  %313 = vmatpush.msrb.mxu0 %v5159_v60 }
 0x18a   :  { %624 = vmatpush.msra.mxu3 %v5024_v48  ;;  %314 = vmatpush.msrb.mxu0 %v5165_v63 }
 0x18c   :  { %625 = vmatpush.msra.mxu3 %v5030_v49  ;;  %315 = vmatpush.msrb.mxu0 %v5171_v2 }
 0x18e   :  { %626 = vmatpush.msra.mxu3 %v5036_v51  ;;  %316 = vmatpush.msrb.mxu0 %v5182_v8 }
 0x190   :  { %627 = vmatpush.msra.mxu3 %v5042_v53  ;;  %317 = vmatpush.msrb.mxu0 %v5188_v16 }
 0x192   :  { %628 = vmatpush.msra.mxu3 %v5053_v57 }
 0x194   :  { %629 = vmatpush.msra.mxu3 %v5059_v59  ;;  %v5201_v59 = vld [vmem:[%s8384_s12 + $0x10] sm:$0xff] }
 0x195   :  { %8840 = vst [vmem:[#allocation24_spill] sm:$0xff] %v5201_v59 }
 0x196   :  { %630 = vmatpush.msra.mxu3 %v5066_v62 }
 0x198   :  { %631 = vmatpush.msra.mxu3 %v5072_v0  ;;  %v5195_v0 = vld [vmem:[%s8384_s12 + $0x18] sm:$0xff] }
 0x199   :  { %8839 = vst [vmem:[#allocation23_spill] sm:$0xff] %v5195_v0  ;;  %318 = vmatpush.msrb.mxu0 %v5195_v0 }
 0x19a   :  { %632 = vmatpush.msra.mxu3 %v5078_v4 }
 0x19b   :  { %319 = vmatpush.msrb.mxu0 %v5201_v59 }
 0x1fe   :  { %v277_v18 = vpop.f32.mrf.mxu3 }
 0x1ff   :  { %v278_v4 = vadd.f32 %v5177_v6, %v277_v18  ;;  %v5207_v18 = vld [vmem:[%s8384_s12 + $0x8] sm:$0xff]  ;;  %v5213_v6 = vld [vmem:[%s8384_s12] sm:$0xff] }
 0x200   :  { %8841 = vst [vmem:[#allocation25_spill] sm:$0xff] %v5207_v18  ;;  %320 = vmatpush.msrb.mxu0 %v5207_v18 }
 0x201   :  { %v280_v62 = vmin.f32 %v278_v4, 20.0  ;;  %8842 = vst [vmem:[#allocation26_spill] sm:$0xff] %v5213_v6 }
 0x202   :  { %321 = vmatpush.msrb.mxu0 %v5213_v6 }
 0x203   :  { %v281_v57 = vmul.f32 1.442695, %v280_v62 }
 0x204   :  { %483 = vmatpush.msra.mxu0 %v5117_v55 }
 0x205   :  { %3967 = vpow2.f32 %v281_v57 }
 0x206   :  { %484 = vmatpush.msra.mxu0 %v5123_v61 }
 0x208   :  { %485 = vmatpush.msra.mxu0 %v5129_v10 }
 0x20a   :  { %486 = vmatpush.msra.mxu0 %v5135_v12 }
 0x20b   :  { %v3968_v62 = vpop.eup %3967 }
 0x20c   :  { %v283_v53 = vadd.f32 1.0, %v3968_v62  ;;  %487 = vmatpush.msra.mxu0 %v5141_v14 }
 0x20e   :  { %v284_v51 = vmul.f32 %v283_v53, %v283_v53  ;;  %488 = vmatpush.msra.mxu0 %v5147_v20 }
 0x210   :  { %v286_v57 = vadd.f32 1.0, %v284_v51  ;;  %489 = vmatpush.msra.mxu0 %v5153_v22  ;;  %v3719_v28 = vadd.f32 -1.0, %v284_v51 }
 0x212   :  { %3969 = vrcp.f32 %v286_v57  ;;  %490 = vmatpush.msra.mxu0 %v5159_v60  ;;  %v298_v53 = vand.u32 2147483648, %v286_v57  ;;  %v296_v44 = vand.u32 2147483647, %v286_v57  ;;  %vm292_vm9 = vweird.f32 %v286_v57 }
 0x214   :  { %491 = vmatpush.msra.mxu0 %v5165_v63  ;;  %v299_v30 = vor.u32 1.1754944e-38, %v298_v53  ;;  %vm297_vm11 = vcmp.eq.f32.partialorder %v296_v44, 8.507059e+37  ;;  %v345_v53 = vstv %s3724_s20  ;;  %s3767_s20 = sld [smem:[#allocation3 + $0x4e]] }
 0x216   :  { %492 = vmatpush.msra.mxu0 %v5171_v2 }
 0x218   :  { %v3970_v49 = vpop.eup %3969  ;;  %493 = vmatpush.msra.mxu0 %v5182_v8 }
 0x219   :  { %v288_v48 = vmul.f32 %v3970_v49, %v286_v57  ;;  %vm293_vm8 = vweird.f32 %v3970_v49  ;;  %v3726_v57 = vld [vmem:[%s8375_s3 + $0x98] sm:$0xff] }
 0x21a   :  { %494 = vmatpush.msra.mxu0 %v5188_v16  ;;  %vm294_vm10 = vmor %vm292_vm9, %vm293_vm8 }
 0x21b   :  { %v289_v62 = vsub.f32 1.0, %v288_v48 }
 0x21c   :  { %495 = vmatpush.msra.mxu0 %v5195_v0 }
 0x21d   :  { %v290_v45 = vmul.f32 %v3970_v49, %v289_v62 }
 0x21e   :  { %496 = vmatpush.msra.mxu0 %v5201_v59 }
 0x21f   :  { %v291_v32 = vadd.f32 %v3970_v49, %v290_v45 }
 0x220   :  { %497 = vmatpush.msra.mxu0 %v5207_v18 }
 0x221   :  { %v295_v26 = vsel %vm294_vm10, %v3970_v49, %v291_v32  ;;  %v340_v49 = vstv %s3723_s6  ;;  %s3810_s6 = sld [smem:[#allocation3 + $0x39]] }
 0x222   :  { %v300_v48 = vsel %vm297_vm11, %v299_v30, %v295_v26  ;;  %498 = vmatpush.msra.mxu0 %v5213_v6  ;;  %v331_v26 = vstv %s3720_s1  ;;  %v333_v30 = vstv %s3721_s2  ;;  %s3799_s1 = sld [smem:[#allocation3 + $0x3e]] }
 0x223   :  { %v301_v24 = vmul.f32 %v3719_v28, %v300_v48  ;;  %v332_v32 = vmul.f32 %v331_v26, %v4807_v33  ;;  %v341_v48 = vmul.f32 %v340_v49, %v4807_v33  ;;  %s3801_s2 = sld [smem:[#allocation3 + $0x40]] }
 0x225   :  { %v302_v62 = vmul.f32 %v301_v24, %v278_v4  ;;  %v5251_v24 = vld [vmem:[%s8385_s13] ss:$0 sm:$0xff]  ;;  %v338_v4 = vstv %s3722_s19  ;;  %s3765_s19 = sld [smem:[#allocation3 + $0x4c]] }
 0x227   :  { %322 = vmatmul.f32.vlgmr.msrb.gmra.mxu0 %v302_v62 }
 0x228   :  { %660 = vmatpush.msrb.mxu0 %v5117_v55 }
 0x22a   :  { %661 = vmatpush.msrb.mxu0 %v5123_v61 }
 0x22c   :  { %662 = vmatpush.msrb.mxu0 %v5129_v10 }
 0x22e   :  { %663 = vmatpush.msrb.mxu0 %v5135_v12 }
 0x230   :  { %664 = vmatpush.msrb.mxu0 %v5141_v14 }
 0x232   :  { %665 = vmatpush.msrb.mxu0 %v5147_v20 }
 0x234   :  { %666 = vmatpush.msrb.mxu0 %v5153_v22 }
 0x236   :  { %667 = vmatpush.msrb.mxu0 %v5159_v60 }
 0x238   :  { %668 = vmatpush.msrb.mxu0 %v5165_v63 }
 0x23a   :  { %669 = vmatpush.msrb.mxu0 %v5171_v2 }
 0x23c   :  { %670 = vmatpush.msrb.mxu0 %v5182_v8 }
 0x23e   :  { %671 = vmatpush.msrb.mxu0 %v5188_v16 }
 0x240   :  { %672 = vmatpush.msrb.mxu0 %v5195_v0 }
 0x242   :  { %673 = vmatpush.msrb.mxu0 %v5201_v59 }
 0x244   :  { %674 = vmatpush.msrb.mxu0 %v5207_v18  ;;  %v346_v18 = vmul.f32 %v3726_v57, %v345_v53 }
 0x246   :  { %675 = vmatpush.msrb.mxu0 %v5213_v6 }
 0x2a4   :  { %v323_v28 = vpop.f32.mrf.mxu0 }
 0x2a5   :  { %v324_v44 = vadd.f32 %v5251_v24, %v323_v28 }
 0x2a7   :  { %v334_v45 = vmul.f32 %v333_v30, %v324_v44 }
 0x2a9   :  { %v335_v51 = vsub.f32 %v332_v32, %v334_v45 }
 0x2ab   :  { %v3725_v62 = vclamps-f32 %v335_v51, 1.0 }
 0x2ad   :  { %v339_v6 = vmul.f32 %v3725_v62, %v338_v4 }
 0x2af   :  { %v342_v59 = vadd.f32 %v341_v48, %v339_v6 }
 0x2b1   :  { %v5259_v0 = vadd.f32 %v346_v18, %v342_v59 }
 0x2b3   :  { %369 = vmatmul.f32.vlgmr.msrb.gmra.mxu1 %v5259_v0 }
 0x2b4   :  { %707 = vmatpush.msrb.mxu1 %v4664_v1  ;;  %v3940_v1 = vld [vmem:[%s8376_s4 + $0x12] ss:$0 sm:$0xff] }
 0x2b6   :  { %708 = vmatpush.msrb.mxu1 %v4673_v3 }
 0x2b8   :  { %709 = vmatpush.msrb.mxu1 %v4681_v5 }
 0x2ba   :  { %710 = vmatpush.msrb.mxu1 %v4690_v7 }
 0x2bc   :  { %711 = vmatpush.msrb.mxu1 %v4699_v9 }
 0x2be   :  { %712 = vmatpush.msrb.mxu1 %v4708_v11 }
 0x2c0   :  { %713 = vmatpush.msrb.mxu1 %v4717_v13 }
 0x2c2   :  { %714 = vmatpush.msrb.mxu1 %v4726_v15 }
 0x2c4   :  { %715 = vmatpush.msrb.mxu1 %v4734_v17 }
 0x2c6   :  { %716 = vmatpush.msrb.mxu1 %v4743_v19 }
 0x2c8   :  { %717 = vmatpush.msrb.mxu1 %v4752_v21 }
 0x2ca   :  { %718 = vmatpush.msrb.mxu1 %v4762_v23 }
 0x2cc   :  { %719 = vmatpush.msrb.mxu1 %v4771_v25 }
 0x2ce   :  { %720 = vmatpush.msrb.mxu1 %v4780_v27 }
 0x2d0   :  { %721 = vmatpush.msrb.mxu1 %v4789_v29 }
 0x2d2   :  { %722 = vmatpush.msrb.mxu1 %v4798_v31 }
 0x330   :  { %v370_v3 = vpop.f32.mrf.mxu1 }
 0x331   :  { %v371_v5 = vadd.f32 %v3940_v1, %v370_v3  ;;  %v8844_v1 = vld [vmem:[#allocation5_spill] sm:$0xff]  ;;  %v8845_v3 = vld [vmem:[#allocation6_spill] sm:$0xff] }
 0x333   :  { %v373_v7 = vadd.f32 %v371_v5, %v4920_v50  ;;  %v8846_v5 = vld [vmem:[#allocation7_spill] sm:$0xff] }
 0x335   :  { %v374_v9 = vmin.f32 %v373_v7, 20.0 }
 0x337   :  { %v375_v11 = vmul.f32 1.442695, %v374_v9  ;;  %v8848_v9 = vld [vmem:[#allocation9_spill] sm:$0xff] }
 0x339   :  { %3971 = vpow2.f32 %v375_v11  ;;  %v8849_v11 = vld [vmem:[#allocation10_spill] sm:$0xff] }
 0x33f   :  { %v3972_v13 = vpop.eup %3971 }
 0x340   :  { %v377_v15 = vadd.f32 1.0, %v3972_v13  ;;  %v8850_v13 = vld [vmem:[#allocation11_spill] sm:$0xff] }
 0x342   :  { %v378_v17 = vmul.f32 %v377_v15, %v377_v15  ;;  %v8851_v15 = vld [vmem:[#allocation12_spill] sm:$0xff] }
 0x344   :  { %v380_v19 = vadd.f32 1.0, %v378_v17  ;;  %v3728_v6 = vadd.f32 -1.0, %v378_v17  ;;  %v8852_v17 = vld [vmem:[#allocation13_spill] sm:$0xff] }
 0x346   :  { %3973 = vrcp.f32 %v380_v19  ;;  %v392_v27 = vand.u32 2147483648, %v380_v19  ;;  %v390_v31 = vand.u32 2147483647, %v380_v19  ;;  %vm386_vm13 = vweird.f32 %v380_v19 }
 0x348   :  { %v393_v59 = vor.u32 1.1754944e-38, %v392_v27  ;;  %vm391_vm15 = vcmp.eq.f32.partialorder %v390_v31, 8.507059e+37  ;;  %v8857_v27 = vld [vmem:[#allocation19_spill] sm:$0xff]  ;;  %v8859_v31 = vld [vmem:[#allocation21_spill] sm:$0xff] }
 0x34c   :  { %v3974_v21 = vpop.eup %3973 }
 0x34d   :  { %v382_v23 = vmul.f32 %v3974_v21, %v380_v19  ;;  %vm387_vm12 = vweird.f32 %v3974_v21  ;;  %v8853_v19 = vld [vmem:[#allocation14_spill] sm:$0xff] }
 0x34e   :  { %vm388_vm14 = vmor %vm386_vm13, %vm387_vm12 }
 0x34f   :  { %v383_v25 = vsub.f32 1.0, %v382_v23  ;;  %v8855_v23 = vld [vmem:[#allocation17_spill] sm:$0xff] }
 0x351   :  { %v384_v29 = vmul.f32 %v3974_v21, %v383_v25  ;;  %v8856_v25 = vld [vmem:[#allocation18_spill] sm:$0xff] }
 0x353   :  { %v385_v33 = vadd.f32 %v3974_v21, %v384_v29  ;;  %v8858_v29 = vld [vmem:[#allocation20_spill] sm:$0xff] }
 0x355   :  { %v389_v18 = vsel %vm388_vm14, %v3974_v21, %v385_v33  ;;  %v8854_v21 = vld [vmem:[#allocation15_spill] sm:$0xff] }
 0x356   :  { %v394_v26 = vsel %vm391_vm15, %v393_v59, %v389_v18  ;;  %v8860_v59 = vld [vmem:[#allocation22_spill] sm:$0xff] }
 0x357   :  { %v395_v28 = vmul.f32 %v3728_v6, %v394_v26 }
 0x359   :  { %v396_v30 = vmul.f32 %v395_v28, %v373_v7  ;;  %v8847_v7 = vld [vmem:[#allocation8_spill] sm:$0xff] }
 0x35b   :  { %413 = vmatmul.f32.vlgmr.msrb.gmra.mxu2 %v396_v30 }
 0x35c   :  { %751 = vmatpush.msrb.mxu2 %v4846_v34 }
 0x35e   :  { %752 = vmatpush.msrb.mxu2 %v4852_v35  ;;  %v8843_v35 = vld [vmem:[#allocation16_spill] sm:$0xff] }
 0x360   :  { %753 = vmatpush.msrb.mxu2 %v4858_v36 }
 0x362   :  { %754 = vmatpush.msrb.mxu2 %v4864_v37 }
 0x364   :  { %755 = vmatpush.msrb.mxu2 %v4869_v38 }
 0x366   :  { %756 = vmatpush.msrb.mxu2 %v4875_v39 }
 0x368   :  { %757 = vmatpush.msrb.mxu2 %v4881_v40 }
 0x36a   :  { %758 = vmatpush.msrb.mxu2 %v4887_v41 }
 0x36c   :  { %759 = vmatpush.msrb.mxu2 %v4893_v42 }
 0x36e   :  { %760 = vmatpush.msrb.mxu2 %v4899_v43 }
 0x370   :  { %761 = vmatpush.msrb.mxu2 %v4911_v46 }
 0x372   :  { %762 = vmatpush.msrb.mxu2 %v4917_v47 }
 0x374   :  { %763 = vmatpush.msrb.mxu2 %v4925_v52 }
 0x376   :  { %764 = vmatpush.msrb.mxu2 %v4932_v54 }
 0x378   :  { %765 = vmatpush.msrb.mxu2 %v4938_v56 }
 0x37a   :  { %766 = vmatpush.msrb.mxu2 %v4944_v58 }
 0x3de   :  { %v414_v34 = vpop.f32.mrf.mxu2 }
 0x3df   :  { %v415_v36 = vadd.f32 %v8843_v35, %v414_v34 }
 0x3e1   :  { %v417_v37 = vmin.f32 %v415_v36, 20.0 }
 0x3e3   :  { %v418_v38 = vmul.f32 1.442695, %v417_v37 }
 0x3e5   :  { %3975 = vpow2.f32 %v418_v38 }
 0x3eb   :  { %v3976_v39 = vpop.eup %3975 }
 0x3ec   :  { %v420_v40 = vadd.f32 1.0, %v3976_v39 }
 0x3ee   :  { %v421_v41 = vmul.f32 %v420_v40, %v420_v40 }
 0x3f0   :  { %v423_v42 = vadd.f32 1.0, %v421_v41  ;;  %v3729_v4 = vadd.f32 -1.0, %v421_v41 }
 0x3f2   :  { %3977 = vrcp.f32 %v423_v42  ;;  %v435_v32 = vand.u32 2147483648, %v423_v42  ;;  %v433_v45 = vand.u32 2147483647, %v423_v42  ;;  %vm429_vm1 = vweird.f32 %v423_v42 }
 0x3f4   :  { %v436_v51 = vor.u32 1.1754944e-38, %v435_v32  ;;  %vm434_vm3 = vcmp.eq.f32.partialorder %v433_v45, 8.507059e+37 }
 0x3f8   :  { %v3978_v43 = vpop.eup %3977 }
 0x3f9   :  { %v425_v46 = vmul.f32 %v3978_v43, %v423_v42  ;;  %vm430_vm0 = vweird.f32 %v3978_v43 }
 0x3fa   :  { %vm431_vm2 = vmor %vm429_vm1, %vm430_vm0 }
 0x3fb   :  { %v426_v47 = vsub.f32 1.0, %v425_v46 }
 0x3fd   :  { %v427_v44 = vmul.f32 %v3978_v43, %v426_v47 }
 0x3ff   :  { %v428_v49 = vadd.f32 %v3978_v43, %v427_v44 }
 0x401   :  { %v432_v57 = vsel %vm431_vm2, %v3978_v43, %v428_v49 }
 0x402   :  { %v437_v53 = vsel %vm434_vm3, %v436_v51, %v432_v57  ;;  %v8861_v51 = vld [vmem:[#allocation23_spill] sm:$0xff]  ;;  %v8863_v57 = vld [vmem:[#allocation25_spill] sm:$0xff] }
 0x403   :  { %v438_v48 = vmul.f32 %v3729_v4, %v437_v53  ;;  %v8862_v4 = vld [vmem:[#allocation24_spill] sm:$0xff]  ;;  %v8864_v53 = vld [vmem:[#allocation26_spill] sm:$0xff] }
 0x405   :  { %v439_v62 = vmul.f32 %v438_v48, %v415_v36 }
 0x407   :  { %456 = vmatmul.f32.vlgmr.msrb.gmra.mxu3 %v439_v62  ;;  %v508_v62 = vstv %s3731_s23  ;;  %s3790_s23 = sld [smem:[#allocation3 + $0x45]] }
 0x408   :  { %794 = vmatpush.msrb.mxu3 %v8844_v1 }
 0x40a   :  { %795 = vmatpush.msrb.mxu3 %v8845_v3 }
 0x40c   :  { %796 = vmatpush.msrb.mxu3 %v8846_v5 }
 0x40e   :  { %797 = vmatpush.msrb.mxu3 %v8847_v7 }
 0x410   :  { %798 = vmatpush.msrb.mxu3 %v8848_v9 }
 0x412   :  { %799 = vmatpush.msrb.mxu3 %v8849_v11 }
 0x414   :  { %800 = vmatpush.msrb.mxu3 %v8850_v13 }
 0x416   :  { %801 = vmatpush.msrb.mxu3 %v8851_v15 }
 0x418   :  { %802 = vmatpush.msrb.mxu3 %v8852_v17 }
 0x41a   :  { %803 = vmatpush.msrb.mxu3 %v8853_v19 }
 0x41c   :  { %804 = vmatpush.msrb.mxu3 %v8854_v21 }
 0x41e   :  { %805 = vmatpush.msrb.mxu3 %v8855_v23 }
 0x420   :  { %806 = vmatpush.msrb.mxu3 %v8856_v25 }
 0x422   :  { %807 = vmatpush.msrb.mxu3 %v8857_v27 }
 0x424   :  { %808 = vmatpush.msrb.mxu3 %v8858_v29 }
 0x426   :  { %809 = vmatpush.msrb.mxu3 %v8859_v31 }
 0x48a   :  { %v457_v33 = vpop.f32.mrf.mxu3 }
 0x48b   :  { %v458_v6 = vadd.f32 %v8860_v59, %v457_v33  ;;  %v510_v33 = vstv %s3732_s24  ;;  %s3831_s24 = sld [smem:[#allocation3 + $0x2e]] }
 0x48d   :  { %v460_v18 = vmin.f32 %v458_v6, 20.0 }
 0x48f   :  { %v461_v26 = vmul.f32 1.442695, %v460_v18  ;;  %v509_v18 = vmul.f32 %v508_v62, %v5259_v0  ;;  %v5392_v62 = vld [vmem:[%s8377_s5 + $0x38] sm:$0xff] }
 0x490   :  { %8867 = vst [vmem:[#allocation6_spill] sm:$0xff] %v5392_v62 }
 0x491   :  { %3979 = vpow2.f32 %v461_v26 }
 0x497   :  { %v3980_v28 = vpop.eup %3979 }
 0x498   :  { %v463_v30 = vadd.f32 1.0, %v3980_v28 }
 0x49a   :  { %v464_v34 = vmul.f32 %v463_v30, %v463_v30  ;;  %v517_v30 = vstv %s3734_s25  ;;  %s3742_s25 = sld [smem:[#allocation3 + $0x55]] }
 0x49c   :  { %v466_v36 = vadd.f32 1.0, %v464_v34  ;;  %v3730_v47 = vadd.f32 -1.0, %v464_v34  ;;  %v515_v34 = vstv %s3733_s26  ;;  %s3743_s26 = sld [smem:[#allocation3 + $0x56]] }
 0x49e   :  { %3981 = vrcp.f32 %v466_v36  ;;  %v478_v40 = vand.u32 2147483648, %v466_v36  ;;  %v476_v42 = vand.u32 2147483647, %v466_v36  ;;  %vm472_vm5 = vweird.f32 %v466_v36 }
 0x4a0   :  { %v479_v46 = vor.u32 1.1754944e-38, %v478_v40  ;;  %vm477_vm7 = vcmp.eq.f32.partialorder %v476_v42, 8.507059e+37 }
 0x4a4   :  { %v3982_v37 = vpop.eup %3981 }
 0x4a5   :  { %v468_v38 = vmul.f32 %v3982_v37, %v466_v36  ;;  %vm473_vm4 = vweird.f32 %v3982_v37  ;;  %v3737_v36 = vld [vmem:[%s8375_s3 + $0x90] sm:$0xff] }
 0x4a6   :  { %vm474_vm6 = vmor %vm472_vm5, %vm473_vm4 }
 0x4a7   :  { %v469_v39 = vsub.f32 1.0, %v468_v38 }
 0x4a9   :  { %v470_v41 = vmul.f32 %v3982_v37, %v469_v39  ;;  %v518_v39 = vmul.f32 %v517_v30, %v5259_v0  ;;  %v5356_v0 = vld [vmem:[%s8377_s5 + $0x68] sm:$0xff] }
 0x4aa   :  { %v5428_v30 = vld [vmem:[%s8377_s5 + $0x8] sm:$0xff] }
 0x4ab   :  { %v471_v43 = vadd.f32 %v3982_v37, %v470_v41  ;;  %8873 = vst [vmem:[#allocation12_spill] sm:$0xff] %v5428_v30 }
 0x4ad   :  { %v475_v32 = vsel %vm474_vm6, %v3982_v37, %v471_v43  ;;  %v522_v37 = vstv %s3735_s27  ;;  %s3745_s27 = sld [smem:[#allocation3 + $0x58]] }
 0x4ae   :  { %v480_v44 = vsel %vm477_vm7, %v479_v46, %v475_v32  ;;  %v523_v41 = vmul.f32 %v3737_v36, %v522_v37  ;;  %v5344_v46 = vld [vmem:[%s8377_s5 + $0x78] sm:$0xff]  ;;  %v5362_v32 = vld [vmem:[%s8377_s5 + $0x60] sm:$0xff]  ;;  %v3941_v36 = vld [vmem:[%s8376_s4 + $0x11] ss:$0 sm:$0xff] }
 0x4af   :  { %v481_v45 = vmul.f32 %v3730_v47, %v480_v44  ;;  %v5350_v47 = vld [vmem:[%s8377_s5 + $0x70] sm:$0xff]  ;;  %v5368_v44 = vld [vmem:[%s8377_s5 + $0x58] sm:$0xff] }
 0x4b1   :  { %v482_v49 = vmul.f32 %v481_v45, %v458_v6  ;;  %v5374_v45 = vld [vmem:[%s8377_s5 + $0x50] sm:$0xff] }
 0x4b3   :  { %499 = vmatmul.f32.vlgmr.msra.gmra.mxu0 %v482_v49  ;;  %v5380_v49 = vld [vmem:[%s8377_s5 + $0x48] sm:$0xff] }
 0x4b4   :  { %837 = vmatpush.msra.mxu0 %v5117_v55  ;;  %8865 = vst [vmem:[#allocation16_spill] sm:$0xff] %v5380_v49 }
 0x4b6   :  { %838 = vmatpush.msra.mxu0 %v5123_v61 }
 0x4b8   :  { %839 = vmatpush.msra.mxu0 %v5129_v10 }
 0x4ba   :  { %840 = vmatpush.msra.mxu0 %v5135_v12 }
 0x4bc   :  { %841 = vmatpush.msra.mxu0 %v5141_v14 }
 0x4be   :  { %842 = vmatpush.msra.mxu0 %v5147_v20 }
 0x4c0   :  { %843 = vmatpush.msra.mxu0 %v5153_v22 }
 0x4c2   :  { %844 = vmatpush.msra.mxu0 %v5159_v60 }
 0x4c4   :  { %845 = vmatpush.msra.mxu0 %v5165_v63 }
 0x4c6   :  { %846 = vmatpush.msra.mxu0 %v5171_v2 }
 0x4c8   :  { %847 = vmatpush.msra.mxu0 %v5182_v8 }
 0x4ca   :  { %848 = vmatpush.msra.mxu0 %v5188_v16 }
 0x4cc   :  { %849 = vmatpush.msra.mxu0 %v8861_v51 }
 0x4ce   :  { %850 = vmatpush.msra.mxu0 %v8862_v4 }
 0x4d0   :  { %851 = vmatpush.msra.mxu0 %v8863_v57 }
 0x4d2   :  { %852 = vmatpush.msra.mxu0 %v8864_v53 }
 0x530   :  { %v500_v48 = vpop.f32.mrf.mxu0 }
 0x531   :  { %v501_v6 = vadd.f32 %v5251_v24, %v500_v48  ;;  %v5386_v48 = vld [vmem:[%s8377_s5 + $0x40] sm:$0xff] }
 0x532   :  { %8866 = vst [vmem:[#allocation5_spill] sm:$0xff] %v5386_v48 }
 0x533   :  { %v511_v26 = vmul.f32 %v510_v33, %v501_v6  ;;  %v5398_v33 = vld [vmem:[%s8377_s5 + $0x30] sm:$0xff]  ;;  %v5404_v6 = vld [vmem:[%s8377_s5 + $0x28] sm:$0xff] }
 0x534   :  { %8868 = vst [vmem:[#allocation7_spill] sm:$0xff] %v5398_v33 }
 0x535   :  { %v512_v28 = vsub.f32 %v509_v18, %v511_v26  ;;  %8869 = vst [vmem:[#allocation8_spill] sm:$0xff] %v5404_v6  ;;  %v5410_v18 = vld [vmem:[%s8377_s5 + $0x20] sm:$0xff]  ;;  %v5416_v26 = vld [vmem:[%s8377_s5 + $0x18] sm:$0xff] }
 0x536   :  { %8870 = vst [vmem:[#allocation9_spill] sm:$0xff] %v5410_v18 }
 0x537   :  { %v3736_v38 = vclamps-f32 %v512_v28, 1.0  ;;  %8871 = vst [vmem:[#allocation10_spill] sm:$0xff] %v5416_v26  ;;  %v5422_v28 = vld [vmem:[%s8377_s5 + $0x10] sm:$0xff] }
 0x538   :  { %8872 = vst [vmem:[#allocation11_spill] sm:$0xff] %v5422_v28 }
 0x539   :  { %v516_v40 = vmul.f32 %v3736_v38, %v515_v34  ;;  %v5434_v34 = vld [vmem:[%s8377_s5] sm:$0xff] }
 0x53a   :  { %8874 = vst [vmem:[#allocation13_spill] sm:$0xff] %v5434_v34 }
 0x53b   :  { %v519_v42 = vadd.f32 %v518_v39, %v516_v40 }
 0x53d   :  { %v5338_v43 = vadd.f32 %v523_v41, %v519_v42 }
 0x53f   :  { %546 = vmatmul.f32.vlgmr.msra.gmra.mxu1 %v5338_v43 }
 0x540   :  { %884 = vmatpush.msra.mxu1 %v5344_v46 }
 0x542   :  { %885 = vmatpush.msra.mxu1 %v5350_v47 }
 0x544   :  { %886 = vmatpush.msra.mxu1 %v5356_v0 }
 0x546   :  { %887 = vmatpush.msra.mxu1 %v5362_v32 }
 0x548   :  { %888 = vmatpush.msra.mxu1 %v5368_v44 }
 0x54a   :  { %889 = vmatpush.msra.mxu1 %v5374_v45 }
 0x54c   :  { %890 = vmatpush.msra.mxu1 %v5380_v49 }
 0x54e   :  { %891 = vmatpush.msra.mxu1 %v5386_v48 }
 0x550   :  { %892 = vmatpush.msra.mxu1 %v5392_v62 }
 0x552   :  { %893 = vmatpush.msra.mxu1 %v5398_v33 }
 0x554   :  { %894 = vmatpush.msra.mxu1 %v5404_v6 }
 0x556   :  { %895 = vmatpush.msra.mxu1 %v5410_v18 }
 0x558   :  { %896 = vmatpush.msra.mxu1 %v5416_v26 }
 0x55a   :  { %897 = vmatpush.msra.mxu1 %v5422_v28 }
 0x55c   :  { %898 = vmatpush.msra.mxu1 %v5428_v30 }
 0x55e   :  { %899 = vmatpush.msra.mxu1 %v5434_v34 }
 0x5bc   :  { %v547_v37 = vpop.f32.mrf.mxu1 }
 0x5bd   :  { %v548_v38 = vadd.f32 %v3941_v36, %v547_v37 }
 0x5bf   :  { %v550_v39 = vadd.f32 %v548_v38, %v4920_v50 }
 0x5c1   :  { %v551_v40 = vmin.f32 %v550_v39, 20.0 }
 0x5c3   :  { %v552_v41 = vmul.f32 1.442695, %v551_v40 }
 0x5c5   :  { %3983 = vpow2.f32 %v552_v41 }
 0x5cb   :  { %v3984_v42 = vpop.eup %3983 }
 0x5cc   :  { %v554_v30 = vadd.f32 1.0, %v3984_v42 }
 0x5ce   :  { %v555_v28 = vmul.f32 %v554_v30, %v554_v30  ;;  %v5444_v30 = vld [vmem:[%s8380_s8 + $0x78] sm:$0xff] }
 0x5d0   :  { %v557_v26 = vadd.f32 1.0, %v555_v28  ;;  %v3739_v37 = vadd.f32 -1.0, %v555_v28  ;;  %v5492_v28 = vld [vmem:[%s8380_s8 + $0x38] sm:$0xff] }
 0x5d1   :  { %8878 = vst [vmem:[#allocation18_spill] sm:$0xff] %v5492_v28 }
 0x5d2   :  { %3985 = vrcp.f32 %v557_v26  ;;  %v569_v34 = vand.u32 2147483648, %v557_v26  ;;  %v567_v48 = vand.u32 2147483647, %v557_v26  ;;  %vm563_vm9 = vweird.f32 %v557_v26 }
 0x5d4   :  { %v570_v36 = vor.u32 1.1754944e-38, %v569_v34  ;;  %vm568_vm11 = vcmp.eq.f32.partialorder %v567_v48, 8.507059e+37  ;;  %v5462_v48 = vld [vmem:[%s8380_s8 + $0x60] sm:$0xff]  ;;  %v5498_v34 = vld [vmem:[%s8380_s8 + $0x30] sm:$0xff] }
 0x5d5   :  { %8879 = vst [vmem:[#allocation19_spill] sm:$0xff] %v5498_v34 }
 0x5d8   :  { %v3986_v18 = vpop.eup %3985 }
 0x5d9   :  { %v559_v6 = vmul.f32 %v3986_v18, %v557_v26  ;;  %vm564_vm8 = vweird.f32 %v3986_v18  ;;  %v5486_v26 = vld [vmem:[%s8380_s8 + $0x40] sm:$0xff] }
 0x5da   :  { %vm565_vm10 = vmor %vm563_vm9, %vm564_vm8  ;;  %8877 = vst [vmem:[#allocation17_spill] sm:$0xff] %v5486_v26 }
 0x5db   :  { %v560_v33 = vsub.f32 1.0, %v559_v6  ;;  %v5474_v6 = vld [vmem:[%s8380_s8 + $0x50] sm:$0xff] }
 0x5dc   :  { %8875 = vst [vmem:[#allocation14_spill] sm:$0xff] %v5474_v6 }
 0x5dd   :  { %v561_v62 = vmul.f32 %v3986_v18, %v560_v33  ;;  %v5468_v33 = vld [vmem:[%s8380_s8 + $0x58] sm:$0xff] }
 0x5df   :  { %v562_v49 = vadd.f32 %v3986_v18, %v561_v62  ;;  %v5450_v62 = vld [vmem:[%s8380_s8 + $0x70] sm:$0xff] }
 0x5e1   :  { %v566_v38 = vsel %vm565_vm10, %v3986_v18, %v562_v49  ;;  %v5456_v49 = vld [vmem:[%s8380_s8 + $0x68] sm:$0xff] }
 0x5e2   :  { %v571_v40 = vsel %vm568_vm11, %v570_v36, %v566_v38  ;;  %v5480_v18 = vld [vmem:[%s8380_s8 + $0x48] sm:$0xff]  ;;  %v5510_v36 = vld [vmem:[%s8380_s8 + $0x20] sm:$0xff] }
 0x5e3   :  { %v572_v41 = vmul.f32 %v3739_v37, %v571_v40  ;;  %8876 = vst [vmem:[#allocation15_spill] sm:$0xff] %v5480_v18 }
 0x5e4   :  { %8881 = vst [vmem:[#allocation21_spill] sm:$0xff] %v5510_v36 }
 0x5e5   :  { %v573_v42 = vmul.f32 %v572_v41, %v550_v39  ;;  %v5504_v39 = vld [vmem:[%s8380_s8 + $0x28] sm:$0xff] }
 0x5e6   :  { %8880 = vst [vmem:[#allocation20_spill] sm:$0xff] %v5504_v39 }
 0x5e7   :  { %590 = vmatmul.f32.vlgmr.msra.gmra.mxu2 %v573_v42 }
 0x5e8   :  { %928 = vmatpush.msra.mxu2 %v5444_v30 }
 0x5ea   :  { %929 = vmatpush.msra.mxu2 %v5450_v62 }
 0x5ec   :  { %930 = vmatpush.msra.mxu2 %v5456_v49 }
 0x5ee   :  { %931 = vmatpush.msra.mxu2 %v5462_v48 }
 0x5f0   :  { %932 = vmatpush.msra.mxu2 %v5468_v33 }
 0x5f2   :  { %933 = vmatpush.msra.mxu2 %v5474_v6 }
 0x5f4   :  { %934 = vmatpush.msra.mxu2 %v5480_v18 }
 0x5f6   :  { %935 = vmatpush.msra.mxu2 %v5486_v26 }
 0x5f8   :  { %936 = vmatpush.msra.mxu2 %v5492_v28 }
 0x5fa   :  { %937 = vmatpush.msra.mxu2 %v5498_v34 }
 0x5fc   :  { %938 = vmatpush.msra.mxu2 %v5504_v39 }
 0x5fe   :  { %939 = vmatpush.msra.mxu2 %v5510_v36 }
 0x600   :  { %940 = vmatpush.msra.mxu2 %v4925_v52 }
 0x602   :  { %941 = vmatpush.msra.mxu2 %v4932_v54 }
 0x604   :  { %942 = vmatpush.msra.mxu2 %v4938_v56 }
 0x606   :  { %943 = vmatpush.msra.mxu2 %v4944_v58 }
 0x66a   :  { %v591_v37 = vpop.f32.mrf.mxu2 }
 0x66b   :  { %v592_v38 = vadd.f32 %v8843_v35, %v591_v37 }
 0x66d   :  { %v594_v40 = vmin.f32 %v592_v38, 20.0 }
 0x66f   :  { %v595_v41 = vmul.f32 1.442695, %v594_v40 }
 0x671   :  { %3987 = vpow2.f32 %v595_v41 }
 0x677   :  { %v3988_v42 = vpop.eup %3987 }
 0x678   :  { %v597_v39 = vadd.f32 1.0, %v3988_v42 }
 0x67a   :  { %v598_v34 = vmul.f32 %v597_v39, %v597_v39  ;;  %v8884_v39 = vld [vmem:[#allocation6_spill] sm:$0xff] }
 0x67c   :  { %v600_v28 = vadd.f32 1.0, %v598_v34  ;;  %v3740_v35 = vadd.f32 -1.0, %v598_v34 }
 0x67e   :  { %3989 = vrcp.f32 %v600_v28  ;;  %v612_v18 = vand.u32 2147483648, %v600_v28  ;;  %v610_v56 = vand.u32 2147483647, %v600_v28  ;;  %vm606_vm13 = vweird.f32 %v600_v28 }
 0x680   :  { %v613_v58 = vor.u32 1.1754944e-38, %v612_v18  ;;  %vm611_vm15 = vcmp.eq.f32.partialorder %v610_v56, 8.507059e+37  ;;  %v8889_v56 = vld [vmem:[#allocation11_spill] sm:$0xff] }
 0x684   :  { %v3990_v36 = vpop.eup %3989 }
 0x685   :  { %v602_v26 = vmul.f32 %v3990_v36, %v600_v28  ;;  %vm607_vm12 = vweird.f32 %v3990_v36 }
 0x686   :  { %vm608_vm14 = vmor %vm606_vm13, %vm607_vm12 }
 0x687   :  { %v603_v52 = vsub.f32 1.0, %v602_v26 }
 0x689   :  { %v604_v54 = vmul.f32 %v3990_v36, %v603_v52  ;;  %v8887_v52 = vld [vmem:[#allocation9_spill] sm:$0xff] }
 0x68b   :  { %v605_v6 = vadd.f32 %v3990_v36, %v604_v54  ;;  %v8888_v54 = vld [vmem:[#allocation10_spill] sm:$0xff] }
 0x68d   :  { %v609_v37 = vsel %vm608_vm14, %v3990_v36, %v605_v6  ;;  %v8885_v36 = vld [vmem:[#allocation7_spill] sm:$0xff] }
 0x68e   :  { %v614_v40 = vsel %vm611_vm15, %v613_v58, %v609_v37  ;;  %v8890_v58 = vld [vmem:[#allocation12_spill] sm:$0xff]  ;;  %v3942_v37 = vld [vmem:[%s8376_s4 + $0x10] ss:$0 sm:$0xff] }
 0x68f   :  { %v615_v41 = vmul.f32 %v3740_v35, %v614_v40  ;;  %v8891_v35 = vld [vmem:[#allocation13_spill] sm:$0xff] }
 0x691   :  { %v616_v42 = vmul.f32 %v615_v41, %v592_v38  ;;  %v8886_v38 = vld [vmem:[#allocation8_spill] sm:$0xff] }
 0x693   :  { %633 = vmatmul.f32.vlgmr.msra.gmra.mxu3 %v616_v42 }
 0x694   :  { %971 = vmatpush.msra.mxu3 %v8844_v1 }
 0x696   :  { %972 = vmatpush.msra.mxu3 %v8845_v3 }
 0x698   :  { %973 = vmatpush.msra.mxu3 %v8846_v5 }
 0x69a   :  { %974 = vmatpush.msra.mxu3 %v8847_v7 }
 0x69c   :  { %975 = vmatpush.msra.mxu3 %v8848_v9 }
 0x69e   :  { %976 = vmatpush.msra.mxu3 %v8849_v11 }
 0x6a0   :  { %977 = vmatpush.msra.mxu3 %v8850_v13 }
 0x6a2   :  { %978 = vmatpush.msra.mxu3 %v8851_v15 }
 0x6a4   :  { %979 = vmatpush.msra.mxu3 %v8852_v17 }
 0x6a6   :  { %980 = vmatpush.msra.mxu3 %v8853_v19 }
 0x6a8   :  { %981 = vmatpush.msra.mxu3 %v8854_v21 }
 0x6aa   :  { %982 = vmatpush.msra.mxu3 %v8855_v23 }
 0x6ac   :  { %983 = vmatpush.msra.mxu3 %v8856_v25 }
 0x6ae   :  { %984 = vmatpush.msra.mxu3 %v8857_v27 }
 0x6b0   :  { %985 = vmatpush.msra.mxu3 %v8858_v29 }
 0x6b2   :  { %986 = vmatpush.msra.mxu3 %v8859_v31 }
 0x716   :  { %v634_v1 = vpop.f32.mrf.mxu3 }
 0x717   :  { %v635_v3 = vadd.f32 %v8860_v59, %v634_v1 }
 0x719   :  { %v637_v5 = vmin.f32 %v635_v3, 20.0 }
 0x71b   :  { %v638_v7 = vmul.f32 1.442695, %v637_v5 }
 0x71d   :  { %3991 = vpow2.f32 %v638_v7 }
 0x723   :  { %v3992_v9 = vpop.eup %3991 }
 0x724   :  { %v640_v11 = vadd.f32 1.0, %v3992_v9 }
 0x726   :  { %v641_v13 = vmul.f32 %v640_v11, %v640_v11 }
 0x728   :  { %v643_v15 = vadd.f32 1.0, %v641_v13  ;;  %v3741_v59 = vadd.f32 -1.0, %v641_v13 }
 0x72a   :  { %3993 = vrcp.f32 %v643_v15  ;;  %v655_v23 = vand.u32 2147483648, %v643_v15  ;;  %v653_v27 = vand.u32 2147483647, %v643_v15  ;;  %vm649_vm1 = vweird.f32 %v643_v15 }
 0x72c   :  { %v656_v31 = vor.u32 1.1754944e-38, %v655_v23  ;;  %vm654_vm3 = vcmp.eq.f32.partialorder %v653_v27, 8.507059e+37 }
 0x730   :  { %v3994_v17 = vpop.eup %3993 }
 0x731   :  { %v645_v19 = vmul.f32 %v3994_v17, %v643_v15  ;;  %vm650_vm0 = vweird.f32 %v3994_v17 }
 0x732   :  { %vm651_vm2 = vmor %vm649_vm1, %vm650_vm0 }
 0x733   :  { %v646_v21 = vsub.f32 1.0, %v645_v19 }
 0x735   :  { %v647_v25 = vmul.f32 %v3994_v17, %v646_v21 }
 0x737   :  { %v648_v29 = vadd.f32 %v3994_v17, %v647_v25 }
 0x739   :  { %v652_v6 = vsel %vm651_vm2, %v3994_v17, %v648_v29 }
 0x73a   :  { %v657_v18 = vsel %vm654_vm3, %v656_v31, %v652_v6 }
 0x73b   :  { %v658_v26 = vmul.f32 %v3741_v59, %v657_v18 }
 0x73d   :  { %v659_v28 = vmul.f32 %v658_v26, %v635_v3  ;;  %v8892_v26 = vld [vmem:[#allocation14_spill] sm:$0xff] }
 0x73f   :  { %676 = vmatmul.f32.vlgmr.msrb.gmra.mxu0 %v659_v28  ;;  %v8893_v28 = vld [vmem:[#allocation15_spill] sm:$0xff] }
 0x740   :  { %1014 = vmatpush.msrb.mxu0 %v5117_v55 }
 0x742   :  { %1015 = vmatpush.msrb.mxu0 %v5123_v61  ;;  %v685_v61 = vstv %s3742_s25  ;;  %s3833_s25 = sld [smem:[#allocation3 + $0x30]] }
 0x744   :  { %1016 = vmatpush.msrb.mxu0 %v5129_v10  ;;  %v687_v10 = vstv %s3743_s26  ;;  %s3753_s26 = sld [smem:[#allocation3 + $0x50]] }
 0x746   :  { %1017 = vmatpush.msrb.mxu0 %v5135_v12 }
 0x748   :  { %1018 = vmatpush.msrb.mxu0 %v5141_v14  ;;  %v686_v14 = vmul.f32 %v685_v61, %v5338_v43  ;;  %v8895_v61 = vld [vmem:[#allocation18_spill] sm:$0xff] }
 0x74a   :  { %1019 = vmatpush.msrb.mxu0 %v5147_v20 }
 0x74c   :  { %1020 = vmatpush.msrb.mxu0 %v5153_v22 }
 0x74e   :  { %1021 = vmatpush.msrb.mxu0 %v5159_v60  ;;  %v692_v60 = vstv %s3744_s28  ;;  %s3756_s28 = sld [smem:[#allocation3 + $0x53]] }
 0x750   :  { %1022 = vmatpush.msrb.mxu0 %v5165_v63  ;;  %v694_v63 = vstv %s3745_s27  ;;  %s3754_s27 = sld [smem:[#allocation3 + $0x51]] }
 0x752   :  { %1023 = vmatpush.msrb.mxu0 %v5171_v2  ;;  %v3748_v2 = vld [vmem:[%s8375_s3 + $0x88] sm:$0xff] }
 0x754   :  { %1024 = vmatpush.msrb.mxu0 %v5182_v8  ;;  %v699_v8 = vstv %s3746_s29  ;;  %s3755_s29 = sld [smem:[#allocation3 + $0x52]] }
 0x756   :  { %1025 = vmatpush.msrb.mxu0 %v5188_v16 }
 0x758   :  { %1026 = vmatpush.msrb.mxu0 %v8861_v51 }
 0x75a   :  { %1027 = vmatpush.msrb.mxu0 %v8862_v4  ;;  %v695_v4 = vmul.f32 %v694_v63, %v5338_v43  ;;  %v8883_v43 = vld [vmem:[#allocation5_spill] sm:$0xff] }
 0x75b   :  { %v5613_v63 = vld [vmem:[%s8380_s8] sm:$0xff] }
 0x75c   :  { %1028 = vmatpush.msrb.mxu0 %v8863_v57  ;;  %v700_v57 = vmul.f32 %v3748_v2, %v699_v8  ;;  %v5619_v8 = vld [vmem:[%s8381_s9] ss:$0 sm:$0xff] }
 0x75e   :  { %1029 = vmatpush.msrb.mxu0 %v8864_v53 }
 0x7bc   :  { %v677_v55 = vpop.f32.mrf.mxu0 }
 0x7bd   :  { %v678_v12 = vadd.f32 %v5251_v24, %v677_v55  ;;  %v8882_v24 = vld [vmem:[#allocation16_spill] sm:$0xff]  ;;  %v8894_v55 = vld [vmem:[#allocation17_spill] sm:$0xff] }
 0x7bf   :  { %v688_v20 = vmul.f32 %v687_v10, %v678_v12  ;;  %v8896_v10 = vld [vmem:[#allocation19_spill] sm:$0xff]  ;;  %v8897_v12 = vld [vmem:[#allocation20_spill] sm:$0xff] }
 0x7c1   :  { %v689_v22 = vsub.f32 %v686_v14, %v688_v20  ;;  %v8898_v14 = vld [vmem:[#allocation21_spill] sm:$0xff]  ;;  %v5595_v20 = vld [vmem:[%s8380_s8 + $0x18] sm:$0xff] }
 0x7c3   :  { %v3747_v16 = vclamps-f32 %v689_v22, 1.0  ;;  %v5601_v22 = vld [vmem:[%s8380_s8 + $0x10] sm:$0xff] }
 0x7c5   :  { %v693_v51 = vmul.f32 %v3747_v16, %v692_v60  ;;  %v5607_v60 = vld [vmem:[%s8380_s8 + $0x8] sm:$0xff] }
 0x7c7   :  { %v696_v53 = vadd.f32 %v695_v4, %v693_v51 }
 0x7c9   :  { %v5557_v34 = vadd.f32 %v700_v57, %v696_v53 }
 0x7cb   :  { %723 = vmatmul.f32.vlgmr.msrb.gmra.mxu1 %v5557_v34 }
 0x7cc   :  { %1061 = vmatpush.msrb.mxu1 %v5344_v46 }
 0x7ce   :  { %1062 = vmatpush.msrb.mxu1 %v5350_v47 }
 0x7d0   :  { %1063 = vmatpush.msrb.mxu1 %v5356_v0 }
 0x7d2   :  { %1064 = vmatpush.msrb.mxu1 %v5362_v32 }
 0x7d4   :  { %1065 = vmatpush.msrb.mxu1 %v5368_v44 }
 0x7d6   :  { %1066 = vmatpush.msrb.mxu1 %v5374_v45 }
 0x7d8   :  { %1067 = vmatpush.msrb.mxu1 %v8882_v24 }
 0x7da   :  { %1068 = vmatpush.msrb.mxu1 %v8883_v43 }
 0x7dc   :  { %1069 = vmatpush.msrb.mxu1 %v8884_v39 }
 0x7de   :  { %1070 = vmatpush.msrb.mxu1 %v8885_v36 }
 0x7e0   :  { %1071 = vmatpush.msrb.mxu1 %v8886_v38 }
 0x7e2   :  { %1072 = vmatpush.msrb.mxu1 %v8887_v52 }
 0x7e4   :  { %1073 = vmatpush.msrb.mxu1 %v8888_v54 }
 0x7e6   :  { %1074 = vmatpush.msrb.mxu1 %v8889_v56 }
 0x7e8   :  { %1075 = vmatpush.msrb.mxu1 %v8890_v58 }
 0x7ea   :  { %1076 = vmatpush.msrb.mxu1 %v8891_v35 }
 0x848   :  { %v724_v40 = vpop.f32.mrf.mxu1 }
 0x849   :  { %v725_v41 = vadd.f32 %v3942_v37, %v724_v40 }
 0x84b   :  { %v727_v42 = vadd.f32 %v725_v41, %v4920_v50 }
 0x84d   :  { %v728_v1 = vmin.f32 %v727_v42, 20.0 }
 0x84f   :  { %v729_v3 = vmul.f32 1.442695, %v728_v1 }
 0x851   :  { %3995 = vpow2.f32 %v729_v3 }
 0x857   :  { %v3996_v5 = vpop.eup %3995 }
 0x858   :  { %v731_v7 = vadd.f32 1.0, %v3996_v5 }
 0x85a   :  { %v732_v9 = vmul.f32 %v731_v7, %v731_v7 }
 0x85c   :  { %v734_v11 = vadd.f32 1.0, %v732_v9  ;;  %v3750_v29 = vadd.f32 -1.0, %v732_v9 }
 0x85e   :  { %3997 = vrcp.f32 %v734_v11  ;;  %v746_v19 = vand.u32 2147483648, %v734_v11  ;;  %v744_v23 = vand.u32 2147483647, %v734_v11  ;;  %vm740_vm5 = vweird.f32 %v734_v11 }
 0x860   :  { %v747_v27 = vor.u32 1.1754944e-38, %v746_v19  ;;  %vm745_vm7 = vcmp.eq.f32.partialorder %v744_v23, 8.507059e+37  ;;  %v5625_v23 = vld [vmem:[%s8382_s10 + $0x78] sm:$0xff] }
 0x864   :  { %v3998_v13 = vpop.eup %3997 }
 0x865   :  { %v736_v15 = vmul.f32 %v3998_v13, %v734_v11  ;;  %vm741_vm4 = vweird.f32 %v3998_v13 }
 0x866   :  { %vm742_vm6 = vmor %vm740_vm5, %vm741_vm4 }
 0x867   :  { %v737_v17 = vsub.f32 1.0, %v736_v15 }
 0x869   :  { %v738_v21 = vmul.f32 %v3998_v13, %v737_v17 }
 0x86b   :  { %v739_v25 = vadd.f32 %v3998_v13, %v738_v21 }
 0x86d   :  { %v743_v31 = vsel %vm742_vm6, %v3998_v13, %v739_v25  ;;  %v5631_v25 = vld [vmem:[%s8382_s10 + $0x70] sm:$0xff] }
 0x86e   :  { %v748_v59 = vsel %vm745_vm7, %v747_v27, %v743_v31  ;;  %v5637_v27 = vld [vmem:[%s8382_s10 + $0x68] sm:$0xff]  ;;  %v5649_v31 = vld [vmem:[%s8382_s10 + $0x58] sm:$0xff] }
 0x86f   :  { %v749_v6 = vmul.f32 %v3750_v29, %v748_v59  ;;  %v5643_v29 = vld [vmem:[%s8382_s10 + $0x60] sm:$0xff]  ;;  %v5655_v59 = vld [vmem:[%s8382_s10 + $0x50] sm:$0xff] }
 0x871   :  { %v750_v18 = vmul.f32 %v749_v6, %v727_v42  ;;  %v5661_v6 = vld [vmem:[%s8382_s10 + $0x48] sm:$0xff] }
 0x873   :  { %767 = vmatmul.f32.vlgmr.msrb.gmra.mxu2 %v750_v18  ;;  %v5667_v18 = vld [vmem:[%s8382_s10 + $0x40] sm:$0xff] }
 0x874   :  { %1105 = vmatpush.msrb.mxu2 %v5444_v30 }
 0x876   :  { %1106 = vmatpush.msrb.mxu2 %v5450_v62 }
 0x878   :  { %1107 = vmatpush.msrb.mxu2 %v5456_v49 }
 0x87a   :  { %1108 = vmatpush.msrb.mxu2 %v5462_v48 }
 0x87c   :  { %1109 = vmatpush.msrb.mxu2 %v5468_v33 }
 0x87e   :  { %1110 = vmatpush.msrb.mxu2 %v8892_v26 }
 0x880   :  { %1111 = vmatpush.msrb.mxu2 %v8893_v28 }
 0x882   :  { %1112 = vmatpush.msrb.mxu2 %v8894_v55 }
 0x884   :  { %1113 = vmatpush.msrb.mxu2 %v8895_v61 }
 0x886   :  { %1114 = vmatpush.msrb.mxu2 %v8896_v10 }
 0x888   :  { %1115 = vmatpush.msrb.mxu2 %v8897_v12 }
 0x88a   :  { %1116 = vmatpush.msrb.mxu2 %v8898_v14 }
 0x88c   :  { %1117 = vmatpush.msrb.mxu2 %v5595_v20 }
 0x88e   :  { %1118 = vmatpush.msrb.mxu2 %v5601_v22 }
 0x890   :  { %1119 = vmatpush.msrb.mxu2 %v5607_v60 }
 0x892   :  { %1120 = vmatpush.msrb.mxu2 %v5613_v63 }
 0x8f6   :  { %v768_v2 = vpop.f32.mrf.mxu2 }
 0x8f7   :  { %v769_v16 = vadd.f32 %v5619_v8, %v768_v2  ;;  %v5673_v2 = vld [vmem:[%s8382_s10 + $0x38] sm:$0xff] }
 0x8f9   :  { %v771_v51 = vmin.f32 %v769_v16, 20.0 }
 0x8fb   :  { %v772_v4 = vmul.f32 1.442695, %v771_v51  ;;  %v5685_v51 = vld [vmem:[%s8382_s10 + $0x28] sm:$0xff] }
 0x8fd   :  { %3999 = vpow2.f32 %v772_v4  ;;  %v5691_v4 = vld [vmem:[%s8382_s10 + $0x20] sm:$0xff] }
 0x8fe   :  { %8899 = vst [vmem:[#allocation22_spill] sm:$0xff] %v5691_v4 }
 0x903   :  { %v4000_v57 = vpop.eup %3999 }
 0x904   :  { %v774_v53 = vadd.f32 1.0, %v4000_v57  ;;  %v5697_v57 = vld [vmem:[%s8382_s10 + $0x18] sm:$0xff] }
 0x905   :  { %8900 = vst [vmem:[#allocation23_spill] sm:$0xff] %v5697_v57 }
 0x906   :  { %v775_v37 = vmul.f32 %v774_v53, %v774_v53  ;;  %v5703_v53 = vld [vmem:[%s8382_s10 + $0x10] sm:$0xff] }
 0x907   :  { %8901 = vst [vmem:[#allocation24_spill] sm:$0xff] %v5703_v53 }
 0x908   :  { %v777_v40 = vadd.f32 1.0, %v775_v37  ;;  %v3751_v13 = vadd.f32 -1.0, %v775_v37  ;;  %v5709_v37 = vld [vmem:[%s8382_s10 + $0x8] sm:$0xff] }
 0x909   :  { %8902 = vst [vmem:[#allocation25_spill] sm:$0xff] %v5709_v37 }
 0x90a   :  { %4001 = vrcp.f32 %v777_v40  ;;  %v789_v3 = vand.u32 2147483648, %v777_v40  ;;  %v787_v7 = vand.u32 2147483647, %v777_v40  ;;  %vm783_vm9 = vweird.f32 %v777_v40 }
 0x90c   :  { %v790_v11 = vor.u32 1.1754944e-38, %v789_v3  ;;  %vm788_vm11 = vcmp.eq.f32.partialorder %v787_v7, 8.507059e+37 }
 0x910   :  { %v4002_v41 = vpop.eup %4001 }
 0x911   :  { %v779_v42 = vmul.f32 %v4002_v41, %v777_v40  ;;  %vm784_vm8 = vweird.f32 %v4002_v41  ;;  %v5715_v40 = vld [vmem:[%s8382_s10] sm:$0xff] }
 0x912   :  { %vm785_vm10 = vmor %vm783_vm9, %vm784_vm8  ;;  %8903 = vst [vmem:[#allocation26_spill] sm:$0xff] %v5715_v40 }
 0x913   :  { %v780_v1 = vsub.f32 1.0, %v779_v42  ;;  %v5721_v42 = vld [vmem:[%s8383_s11] ss:$0 sm:$0xff] }
 0x914   :  { %8904 = vst [vmem:[#allocation16_spill] sm:$0xff] %v5721_v42 }
 0x915   :  { %v781_v5 = vmul.f32 %v4002_v41, %v780_v1 }
 0x917   :  { %v782_v9 = vadd.f32 %v4002_v41, %v781_v5 }
 0x919   :  { %v786_v15 = vsel %vm785_vm10, %v4002_v41, %v782_v9 }
 0x91a   :  { %v791_v17 = vsel %vm788_vm11, %v790_v11, %v786_v15 }
 0x91b   :  { %v792_v19 = vmul.f32 %v3751_v13, %v791_v17 }
 0x91d   :  { %v793_v21 = vmul.f32 %v792_v19, %v769_v16  ;;  %v5679_v16 = vld [vmem:[%s8382_s10 + $0x30] sm:$0xff] }
 0x91f   :  { %810 = vmatmul.f32.vlgmr.msrb.gmra.mxu3 %v793_v21 }
 0x920   :  { %1148 = vmatpush.msrb.mxu3 %v5625_v23 }
 0x922   :  { %1149 = vmatpush.msrb.mxu3 %v5631_v25 }
 0x924   :  { %1150 = vmatpush.msrb.mxu3 %v5637_v27 }
 0x926   :  { %1151 = vmatpush.msrb.mxu3 %v5643_v29 }
 0x928   :  { %1152 = vmatpush.msrb.mxu3 %v5649_v31 }
 0x92a   :  { %1153 = vmatpush.msrb.mxu3 %v5655_v59 }
 0x92c   :  { %1154 = vmatpush.msrb.mxu3 %v5661_v6 }
 0x92e   :  { %1155 = vmatpush.msrb.mxu3 %v5667_v18 }
 0x930   :  { %1156 = vmatpush.msrb.mxu3 %v5673_v2 }
 0x932   :  { %1157 = vmatpush.msrb.mxu3 %v5679_v16 }
 0x934   :  { %1158 = vmatpush.msrb.mxu3 %v5685_v51 }
 0x936   :  { %1159 = vmatpush.msrb.mxu3 %v5691_v4 }
 0x938   :  { %1160 = vmatpush.msrb.mxu3 %v5697_v57 }
 0x93a   :  { %1161 = vmatpush.msrb.mxu3 %v5703_v53 }
 0x93c   :  { %1162 = vmatpush.msrb.mxu3 %v5709_v37 }
 0x93e   :  { %1163 = vmatpush.msrb.mxu3 %v5715_v40 }
 0x9a2   :  { %v811_v41 = vpop.f32.mrf.mxu3 }
 0x9a3   :  { %v812_v1 = vadd.f32 %v5721_v42, %v811_v41 }
 0x9a5   :  { %v814_v3 = vmin.f32 %v812_v1, 20.0 }
 0x9a7   :  { %v815_v5 = vmul.f32 1.442695, %v814_v3 }
 0x9a9   :  { %4003 = vpow2.f32 %v815_v5 }
 0x9af   :  { %v4004_v7 = vpop.eup %4003 }
 0x9b0   :  { %v817_v9 = vadd.f32 1.0, %v4004_v7 }
 0x9b2   :  { %v818_v11 = vmul.f32 %v817_v9, %v817_v9  ;;  %v5727_v9 = vld [vmem:[%s8384_s12 + $0x78] sm:$0xff] }
 0x9b3   :  { %8905 = vst [vmem:[#allocation5_spill] sm:$0xff] %v5727_v9 }
 0x9b4   :  { %v820_v13 = vadd.f32 1.0, %v818_v11  ;;  %v3752_v41 = vadd.f32 -1.0, %v818_v11  ;;  %v5769_v11 = vld [vmem:[%s8384_s12 + $0x40] sm:$0xff] }
 0x9b5   :  { %8912 = vst [vmem:[#allocation12_spill] sm:$0xff] %v5769_v11 }
 0x9b6   :  { %4005 = vrcp.f32 %v820_v13  ;;  %v832_v21 = vand.u32 2147483648, %v820_v13  ;;  %v830_v37 = vand.u32 2147483647, %v820_v13  ;;  %vm826_vm13 = vweird.f32 %v820_v13 }
 0x9b8   :  { %v833_v57 = vor.u32 1.1754944e-38, %v832_v21  ;;  %vm831_vm15 = vcmp.eq.f32.partialorder %v830_v37, 8.507059e+37  ;;  %v5751_v37 = vld [vmem:[%s8384_s12 + $0x58] sm:$0xff] }
 0x9b9   :  { %8909 = vst [vmem:[#allocation9_spill] sm:$0xff] %v5751_v37  ;;  %v5799_v21 = vld [vmem:[%s8384_s12 + $0x18] sm:$0xff] }
 0x9ba   :  { %8917 = vst [vmem:[#allocation18_spill] sm:$0xff] %v5799_v21 }
 0x9bc   :  { %v4006_v15 = vpop.eup %4005 }
 0x9bd   :  { %v822_v17 = vmul.f32 %v4006_v15, %v820_v13  ;;  %vm827_vm12 = vweird.f32 %v4006_v15  ;;  %v5775_v13 = vld [vmem:[%s8384_s12 + $0x38] sm:$0xff] }
 0x9be   :  { %vm828_vm14 = vmor %vm826_vm13, %vm827_vm12  ;;  %8913 = vst [vmem:[#allocation13_spill] sm:$0xff] %v5775_v13 }
 0x9bf   :  { %v823_v19 = vsub.f32 1.0, %v822_v17  ;;  %v5787_v17 = vld [vmem:[%s8384_s12 + $0x28] sm:$0xff] }
 0x9c0   :  { %8915 = vst [vmem:[#allocation15_spill] sm:$0xff] %v5787_v17 }
 0x9c1   :  { %v824_v40 = vmul.f32 %v4006_v15, %v823_v19  ;;  %v5793_v19 = vld [vmem:[%s8384_s12 + $0x20] sm:$0xff] }
 0x9c2   :  { %8916 = vst [vmem:[#allocation17_spill] sm:$0xff] %v5793_v19 }
 0x9c3   :  { %v825_v53 = vadd.f32 %v4006_v15, %v824_v40  ;;  %v5733_v40 = vld [vmem:[%s8384_s12 + $0x70] sm:$0xff] }
 0x9c4   :  { %8906 = vst [vmem:[#allocation6_spill] sm:$0xff] %v5733_v40 }
 0x9c5   :  { %v829_v42 = vsel %vm828_vm14, %v4006_v15, %v825_v53  ;;  %v5745_v53 = vld [vmem:[%s8384_s12 + $0x60] sm:$0xff]  ;;  %v5781_v15 = vld [vmem:[%s8384_s12 + $0x30] sm:$0xff] }
 0x9c6   :  { %v834_v3 = vsel %vm831_vm15, %v833_v57, %v829_v42  ;;  %v5739_v57 = vld [vmem:[%s8384_s12 + $0x68] sm:$0xff]  ;;  %8908 = vst [vmem:[#allocation8_spill] sm:$0xff] %v5745_v53  ;;  %v5757_v42 = vld [vmem:[%s8384_s12 + $0x50] sm:$0xff] }
 0x9c7   :  { %v835_v5 = vmul.f32 %v3752_v41, %v834_v3  ;;  %8907 = vst [vmem:[#allocation7_spill] sm:$0xff] %v5739_v57  ;;  %v5805_v41 = vld [vmem:[%s8384_s12 + $0x10] sm:$0xff]  ;;  %v5811_v3 = vld [vmem:[%s8384_s12 + $0x8] sm:$0xff] }
 0x9c8   :  { %8910 = vst [vmem:[#allocation10_spill] sm:$0xff] %v5757_v42 }
 0x9c9   :  { %v836_v7 = vmul.f32 %v835_v5, %v812_v1  ;;  %v5763_v1 = vld [vmem:[%s8384_s12 + $0x48] sm:$0xff]  ;;  %8914 = vst [vmem:[#allocation14_spill] sm:$0xff] %v5781_v15  ;;  %v5817_v5 = vld [vmem:[%s8384_s12] sm:$0xff] }
 0x9ca   :  { %8911 = vst [vmem:[#allocation11_spill] sm:$0xff] %v5763_v1 }
 0x9cb   :  { %853 = vmatmul.f32.vlgmr.msra.gmra.mxu0 %v836_v7  ;;  %8918 = vst [vmem:[#allocation19_spill] sm:$0xff] %v5805_v41 }
 0x9cc   :  { %1191 = vmatpush.msra.mxu0 %v5727_v9  ;;  %8919 = vst [vmem:[#allocation20_spill] sm:$0xff] %v5811_v3 }
 0x9cd   :  { %8920 = vst [vmem:[#allocation21_spill] sm:$0xff] %v5817_v5 }
 0x9ce   :  { %1192 = vmatpush.msra.mxu0 %v5733_v40 }
 0x9d0   :  { %1193 = vmatpush.msra.mxu0 %v5739_v57 }
 0x9d2   :  { %1194 = vmatpush.msra.mxu0 %v5745_v53 }
 0x9d4   :  { %1195 = vmatpush.msra.mxu0 %v5751_v37 }
 0x9d6   :  { %1196 = vmatpush.msra.mxu0 %v5757_v42  ;;  %v876_v42 = vstv %s3757_s30  ;;  %s3797_s30 = sld [smem:[#allocation3 + $0x3c]] }
 0x9d8   :  { %1197 = vmatpush.msra.mxu0 %v5763_v1  ;;  %v3759_v1 = vld [vmem:[%s8375_s3 + $0x80] sm:$0xff] }
 0x9d9   :  { %v877_v40 = vmul.f32 %v3759_v1, %v876_v42 }
 0x9da   :  { %1198 = vmatpush.msra.mxu0 %v5769_v11  ;;  %v871_v11 = vstv %s3756_s28  ;;  %s3843_s28 = sld [smem:[#allocation3 + $0x2a]] }
 0x9db   :  { %v872_v57 = vmul.f32 %v871_v11, %v5557_v34 }
 0x9dc   :  { %1199 = vmatpush.msra.mxu0 %v5775_v13 }
 0x9de   :  { %1200 = vmatpush.msra.mxu0 %v5781_v15 }
 0x9e0   :  { %1201 = vmatpush.msra.mxu0 %v5787_v17 }
 0x9e2   :  { %1202 = vmatpush.msra.mxu0 %v5793_v19  ;;  %v5823_v19 = vld [vmem:[%s8385_s13] ss:$0 sm:$0xff] }
 0x9e4   :  { %1203 = vmatpush.msra.mxu0 %v5799_v21  ;;  %v864_v21 = vstv %s3754_s27  ;;  %s3834_s27 = sld [smem:[#allocation3 + $0x31]] }
 0x9e6   :  { %1204 = vmatpush.msra.mxu0 %v5805_v41  ;;  %v862_v41 = vstv %s3753_s26  ;;  %s3832_s26 = sld [smem:[#allocation3 + $0x2f]] }
 0x9e7   :  { %v863_v17 = vmul.f32 %v862_v41, %v5557_v34 }
 0x9e8   :  { %1205 = vmatpush.msra.mxu0 %v5811_v3 }
 0x9ea   :  { %1206 = vmatpush.msra.mxu0 %v5817_v5  ;;  %v869_v5 = vstv %s3755_s29  ;;  %s3845_s29 = sld [smem:[#allocation3 + $0x2c]] }
 0xa48   :  { %v854_v7 = vpop.f32.mrf.mxu0 }
 0xa49   :  { %v855_v3 = vadd.f32 %v5823_v19, %v854_v7  ;;  %v8921_v7 = vld [vmem:[#allocation22_spill] sm:$0xff] }
 0xa4b   :  { %v865_v15 = vmul.f32 %v864_v21, %v855_v3 }
 0xa4d   :  { %v866_v13 = vsub.f32 %v863_v17, %v865_v15 }
 0xa4f   :  { %v3758_v37 = vclamps-f32 %v866_v13, 1.0 }
 0xa51   :  { %v870_v53 = vmul.f32 %v3758_v37, %v869_v5 }
 0xa53   :  { %v873_v9 = vadd.f32 %v872_v57, %v870_v53 }
 0xa55   :  { %v5831_v4 = vadd.f32 %v877_v40, %v873_v9 }
 0xa57   :  { %900 = vmatmul.f32.vlgmr.msra.gmra.mxu1 %v5831_v4 }
 0xa58   :  { %1238 = vmatpush.msra.mxu1 %v5344_v46  ;;  %v3943_v46 = vld [vmem:[%s8376_s4 + $0xf] ss:$0 sm:$0xff] }
 0xa5a   :  { %1239 = vmatpush.msra.mxu1 %v5350_v47 }
 0xa5c   :  { %1240 = vmatpush.msra.mxu1 %v5356_v0 }
 0xa5e   :  { %1241 = vmatpush.msra.mxu1 %v5362_v32 }
 0xa60   :  { %1242 = vmatpush.msra.mxu1 %v5368_v44 }
 0xa62   :  { %1243 = vmatpush.msra.mxu1 %v5374_v45 }
 0xa64   :  { %1244 = vmatpush.msra.mxu1 %v8882_v24 }
 0xa66   :  { %1245 = vmatpush.msra.mxu1 %v8883_v43 }
 0xa68   :  { %1246 = vmatpush.msra.mxu1 %v8884_v39 }
 0xa6a   :  { %1247 = vmatpush.msra.mxu1 %v8885_v36 }
 0xa6c   :  { %1248 = vmatpush.msra.mxu1 %v8886_v38 }
 0xa6e   :  { %1249 = vmatpush.msra.mxu1 %v8887_v52 }
 0xa70   :  { %1250 = vmatpush.msra.mxu1 %v8888_v54 }
 0xa72   :  { %1251 = vmatpush.msra.mxu1 %v8889_v56 }
 0xa74   :  { %1252 = vmatpush.msra.mxu1 %v8890_v58 }
 0xa76   :  { %1253 = vmatpush.msra.mxu1 %v8891_v35 }
 0xad4   :  { %v901_v47 = vpop.f32.mrf.mxu1 }
 0xad5   :  { %v902_v0 = vadd.f32 %v3943_v46, %v901_v47  ;;  %v8922_v46 = vld [vmem:[#allocation23_spill] sm:$0xff]  ;;  %v8923_v47 = vld [vmem:[#allocation24_spill] sm:$0xff] }
 0xad7   :  { %v904_v32 = vadd.f32 %v902_v0, %v4920_v50  ;;  %v8924_v0 = vld [vmem:[#allocation25_spill] sm:$0xff] }
 0xad9   :  { %v905_v44 = vmin.f32 %v904_v32, 20.0 }
 0xadb   :  { %v906_v45 = vmul.f32 1.442695, %v905_v44 }
 0xadd   :  { %4007 = vpow2.f32 %v906_v45  ;;  %v8926_v45 = vld [vmem:[#allocation16_spill] sm:$0xff] }
 0xae3   :  { %v4008_v34 = vpop.eup %4007 }
 0xae4   :  { %v908_v24 = vadd.f32 1.0, %v4008_v34 }
 0xae6   :  { %v909_v43 = vmul.f32 %v908_v24, %v908_v24 }
 0xae8   :  { %v911_v39 = vadd.f32 1.0, %v909_v43  ;;  %v3761_v40 = vadd.f32 -1.0, %v909_v43 }
 0xaea   :  { %4009 = vrcp.f32 %v911_v39  ;;  %v923_v54 = vand.u32 2147483648, %v911_v39  ;;  %v921_v58 = vand.u32 2147483647, %v911_v39  ;;  %vm917_vm1 = vweird.f32 %v911_v39 }
 0xaec   :  { %v924_v9 = vor.u32 1.1754944e-38, %v923_v54  ;;  %vm922_vm3 = vcmp.eq.f32.partialorder %v921_v58, 8.507059e+37 }
 0xaf0   :  { %v4010_v36 = vpop.eup %4009 }
 0xaf1   :  { %v913_v38 = vmul.f32 %v4010_v36, %v911_v39  ;;  %vm918_vm0 = vweird.f32 %v4010_v36 }
 0xaf2   :  { %vm919_vm2 = vmor %vm917_vm1, %vm918_vm0 }
 0xaf3   :  { %v914_v52 = vsub.f32 1.0, %v913_v38 }
 0xaf5   :  { %v915_v56 = vmul.f32 %v4010_v36, %v914_v52 }
 0xaf7   :  { %v916_v35 = vadd.f32 %v4010_v36, %v915_v56 }
 0xaf9   :  { %v920_v57 = vsel %vm919_vm2, %v4010_v36, %v916_v35 }
 0xafa   :  { %v925_v53 = vsel %vm922_vm3, %v924_v9, %v920_v57 }
 0xafb   :  { %v926_v37 = vmul.f32 %v3761_v40, %v925_v53 }
 0xafd   :  { %v927_v42 = vmul.f32 %v926_v37, %v904_v32  ;;  %v8925_v32 = vld [vmem:[#allocation26_spill] sm:$0xff] }
 0xaff   :  { %944 = vmatmul.f32.vlgmr.msra.gmra.mxu2 %v927_v42 }
 0xb00   :  { %1282 = vmatpush.msra.mxu2 %v5444_v30 }
 0xb02   :  { %1283 = vmatpush.msra.mxu2 %v5450_v62 }
 0xb04   :  { %1284 = vmatpush.msra.mxu2 %v5456_v49 }
 0xb06   :  { %1285 = vmatpush.msra.mxu2 %v5462_v48 }
 0xb08   :  { %1286 = vmatpush.msra.mxu2 %v5468_v33 }
 0xb0a   :  { %1287 = vmatpush.msra.mxu2 %v8892_v26 }
 0xb0c   :  { %1288 = vmatpush.msra.mxu2 %v8893_v28 }
 0xb0e   :  { %1289 = vmatpush.msra.mxu2 %v8894_v55 }
 0xb10   :  { %1290 = vmatpush.msra.mxu2 %v8895_v61 }
 0xb12   :  { %1291 = vmatpush.msra.mxu2 %v8896_v10 }
 0xb14   :  { %1292 = vmatpush.msra.mxu2 %v8897_v12 }
 0xb16   :  { %1293 = vmatpush.msra.mxu2 %v8898_v14 }
 0xb18   :  { %1294 = vmatpush.msra.mxu2 %v5595_v20 }
 0xb1a   :  { %1295 = vmatpush.msra.mxu2 %v5601_v22 }
 0xb1c   :  { %1296 = vmatpush.msra.mxu2 %v5607_v60 }
 0xb1e   :  { %1297 = vmatpush.msra.mxu2 %v5613_v63 }
 0xb82   :  { %v945_v30 = vpop.f32.mrf.mxu2 }
 0xb83   :  { %v946_v62 = vadd.f32 %v5619_v8, %v945_v30 }
 0xb85   :  { %v948_v49 = vmin.f32 %v946_v62, 20.0 }
 0xb87   :  { %v949_v48 = vmul.f32 1.442695, %v948_v49 }
 0xb89   :  { %4011 = vpow2.f32 %v949_v48  ;;  %v8927_v48 = vld [vmem:[#allocation5_spill] sm:$0xff] }
 0xb8f   :  { %v4012_v33 = vpop.eup %4011 }
 0xb90   :  { %v951_v26 = vadd.f32 1.0, %v4012_v33  ;;  %v8928_v33 = vld [vmem:[#allocation6_spill] sm:$0xff] }
 0xb92   :  { %v952_v28 = vmul.f32 %v951_v26, %v951_v26  ;;  %v8929_v26 = vld [vmem:[#allocation7_spill] sm:$0xff] }
 0xb94   :  { %v954_v55 = vadd.f32 1.0, %v952_v28  ;;  %v3762_v17 = vadd.f32 -1.0, %v952_v28  ;;  %v8930_v28 = vld [vmem:[#allocation8_spill] sm:$0xff] }
 0xb96   :  { %4013 = vrcp.f32 %v954_v55  ;;  %v966_v14 = vand.u32 2147483648, %v954_v55  ;;  %v964_v11 = vand.u32 2147483647, %v954_v55  ;;  %vm960_vm5 = vweird.f32 %v954_v55 }
 0xb98   :  { %v967_v15 = vor.u32 1.1754944e-38, %v966_v14  ;;  %vm965_vm7 = vcmp.eq.f32.partialorder %v964_v11, 8.507059e+37  ;;  %v8935_v14 = vld [vmem:[#allocation13_spill] sm:$0xff]  ;;  %v8937_v11 = vld [vmem:[#allocation15_spill] sm:$0xff] }
 0xb9c   :  { %v4014_v61 = vpop.eup %4013 }
 0xb9d   :  { %v956_v10 = vmul.f32 %v4014_v61, %v954_v55  ;;  %vm961_vm4 = vweird.f32 %v4014_v61  ;;  %v8931_v55 = vld [vmem:[#allocation9_spill] sm:$0xff] }
 0xb9e   :  { %vm962_vm6 = vmor %vm960_vm5, %vm961_vm4 }
 0xb9f   :  { %v957_v12 = vsub.f32 1.0, %v956_v10  ;;  %v8933_v10 = vld [vmem:[#allocation11_spill] sm:$0xff] }
 0xba1   :  { %v958_v1 = vmul.f32 %v4014_v61, %v957_v12  ;;  %v8934_v12 = vld [vmem:[#allocation12_spill] sm:$0xff] }
 0xba3   :  { %v959_v13 = vadd.f32 %v4014_v61, %v958_v1  ;;  %v8936_v1 = vld [vmem:[#allocation14_spill] sm:$0xff] }
 0xba5   :  { %v963_v21 = vsel %vm962_vm6, %v4014_v61, %v959_v13  ;;  %v8932_v61 = vld [vmem:[#allocation10_spill] sm:$0xff]  ;;  %v8938_v13 = vld [vmem:[#allocation17_spill] sm:$0xff] }
 0xba6   :  { %v968_v41 = vsel %vm965_vm7, %v967_v15, %v963_v21  ;;  %v8939_v15 = vld [vmem:[#allocation18_spill] sm:$0xff]  ;;  %v8941_v21 = vld [vmem:[#allocation20_spill] sm:$0xff] }
 0xba7   :  { %v969_v3 = vmul.f32 %v3762_v17, %v968_v41  ;;  %v8940_v17 = vld [vmem:[#allocation19_spill] sm:$0xff]  ;;  %v8942_v41 = vld [vmem:[#allocation21_spill] sm:$0xff] }
 0xba9   :  { %v970_v5 = vmul.f32 %v969_v3, %v946_v62 }
 0xbab   :  { %987 = vmatmul.f32.vlgmr.msra.gmra.mxu3 %v970_v5  ;;  %v1039_v5 = vstv %s3764_s18  ;;  %s3823_s18 = sld [smem:[#allocation3 + $0x36]] }
 0xbac   :  { %1325 = vmatpush.msra.mxu3 %v5625_v23 }
 0xbae   :  { %1326 = vmatpush.msra.mxu3 %v5631_v25 }
 0xbb0   :  { %1327 = vmatpush.msra.mxu3 %v5637_v27 }
 0xbb2   :  { %1328 = vmatpush.msra.mxu3 %v5643_v29 }
 0xbb4   :  { %1329 = vmatpush.msra.mxu3 %v5649_v31 }
 0xbb6   :  { %1330 = vmatpush.msra.mxu3 %v5655_v59 }
 0xbb8   :  { %1331 = vmatpush.msra.mxu3 %v5661_v6 }
 0xbba   :  { %1332 = vmatpush.msra.mxu3 %v5667_v18 }
 0xbbc   :  { %1333 = vmatpush.msra.mxu3 %v5673_v2 }
 0xbbe   :  { %1334 = vmatpush.msra.mxu3 %v5679_v16 }
 0xbc0   :  { %1335 = vmatpush.msra.mxu3 %v5685_v51 }
 0xbc2   :  { %1336 = vmatpush.msra.mxu3 %v8921_v7 }
 0xbc4   :  { %1337 = vmatpush.msra.mxu3 %v8922_v46 }
 0xbc6   :  { %1338 = vmatpush.msra.mxu3 %v8923_v47 }
 0xbc8   :  { %1339 = vmatpush.msra.mxu3 %v8924_v0 }
 0xbca   :  { %1340 = vmatpush.msra.mxu3 %v8925_v32 }
 0xc2e   :  { %v988_v44 = vpop.f32.mrf.mxu3 }
 0xc2f   :  { %v989_v34 = vadd.f32 %v8926_v45, %v988_v44  ;;  %v1041_v44 = vstv %s3765_s19  ;;  %s3864_s19 = sld [smem:[#allocation3 + $0x1f]] }
 0xc31   :  { %v991_v24 = vmin.f32 %v989_v34, 20.0 }
 0xc33   :  { %v992_v43 = vmul.f32 1.442695, %v991_v24  ;;  %v1040_v24 = vmul.f32 %v1039_v5, %v5831_v4  ;;  %v5964_v5 = vld [vmem:[%s8377_s5 + $0x38] sm:$0xff] }
 0xc34   :  { %8945 = vst [vmem:[#allocation24_spill] sm:$0xff] %v5964_v5 }
 0xc35   :  { %4015 = vpow2.f32 %v992_v43 }
 0xc3b   :  { %v4016_v39 = vpop.eup %4015 }
 0xc3c   :  { %v994_v36 = vadd.f32 1.0, %v4016_v39 }
 0xc3e   :  { %v995_v38 = vmul.f32 %v994_v36, %v994_v36  ;;  %v1046_v36 = vstv %s3766_s21  ;;  %s3776_s21 = sld [smem:[#allocation3 + $0x47]] }
 0xc40   :  { %v997_v52 = vadd.f32 1.0, %v995_v38  ;;  %v3763_v37 = vadd.f32 -1.0, %v995_v38  ;;  %v1048_v38 = vstv %s3767_s20  ;;  %s3775_s20 = sld [smem:[#allocation3 + $0x46]] }
 0xc42   :  { %4017 = vrcp.f32 %v997_v52  ;;  %v1009_v35 = vand.u32 2147483648, %v997_v52  ;;  %v1007_v40 = vand.u32 2147483647, %v997_v52  ;;  %vm1003_vm9 = vweird.f32 %v997_v52 }
 0xc44   :  { %v1010_v53 = vor.u32 1.1754944e-38, %v1009_v35  ;;  %vm1008_vm11 = vcmp.eq.f32.partialorder %v1007_v40, 8.507059e+37  ;;  %v1049_v35 = vmul.f32 %v1048_v38, %v5831_v4  ;;  %v5928_v4 = vld [vmem:[%s8377_s5 + $0x68] sm:$0xff]  ;;  %v6006_v38 = vld [vmem:[%s8377_s5] sm:$0xff] }
 0xc45   :  { %8952 = vst [vmem:[#allocation8_spill] sm:$0xff] %v6006_v38 }
 0xc48   :  { %v4018_v54 = vpop.eup %4017 }
 0xc49   :  { %v999_v56 = vmul.f32 %v4018_v54, %v997_v52  ;;  %vm1004_vm8 = vweird.f32 %v4018_v54  ;;  %v3770_v52 = vld [vmem:[%s8375_s3 + $0x78] sm:$0xff] }
 0xc4a   :  { %vm1005_vm10 = vmor %vm1003_vm9, %vm1004_vm8 }
 0xc4b   :  { %v1000_v58 = vsub.f32 1.0, %v999_v56 }
 0xc4d   :  { %v1001_v9 = vmul.f32 %v4018_v54, %v1000_v58 }
 0xc4f   :  { %v1002_v57 = vadd.f32 %v4018_v54, %v1001_v9 }
 0xc51   :  { %v1006_v42 = vsel %vm1005_vm10, %v4018_v54, %v1002_v57  ;;  %v1053_v54 = vstv %s3768_s7  ;;  %s3778_s7 = sld [smem:[#allocation3 + $0x49]] }
 0xc52   :  { %v1011_v30 = vsel %vm1008_vm11, %v1010_v53, %v1006_v42  ;;  %v1054_v9 = vmul.f32 %v3770_v52, %v1053_v54  ;;  %v5916_v53 = vld [vmem:[%s8377_s5 + $0x78] sm:$0xff]  ;;  %v5934_v42 = vld [vmem:[%s8377_s5 + $0x60] sm:$0xff]  ;;  %v3944_v52 = vld [vmem:[%s8376_s4 + $0xe] ss:$0 sm:$0xff] }
 0xc53   :  { %v1012_v62 = vmul.f32 %v3763_v37, %v1011_v30  ;;  %v5922_v37 = vld [vmem:[%s8377_s5 + $0x70] sm:$0xff]  ;;  %v5940_v30 = vld [vmem:[%s8377_s5 + $0x58] sm:$0xff] }
 0xc55   :  { %v1013_v49 = vmul.f32 %v1012_v62, %v989_v34  ;;  %v5946_v62 = vld [vmem:[%s8377_s5 + $0x50] sm:$0xff] }
 0xc57   :  { %1030 = vmatmul.f32.vlgmr.msrb.gmra.mxu0 %v1013_v49  ;;  %v5952_v49 = vld [vmem:[%s8377_s5 + $0x48] sm:$0xff] }
 0xc58   :  { %1368 = vmatpush.msrb.mxu0 %v8927_v48  ;;  %8943 = vst [vmem:[#allocation22_spill] sm:$0xff] %v5952_v49 }
 0xc5a   :  { %1369 = vmatpush.msrb.mxu0 %v8928_v33 }
 0xc5c   :  { %1370 = vmatpush.msrb.mxu0 %v8929_v26 }
 0xc5e   :  { %1371 = vmatpush.msrb.mxu0 %v8930_v28 }
 0xc60   :  { %1372 = vmatpush.msrb.mxu0 %v8931_v55 }
 0xc62   :  { %1373 = vmatpush.msrb.mxu0 %v8932_v61 }
 0xc64   :  { %1374 = vmatpush.msrb.mxu0 %v8933_v10 }
 0xc66   :  { %1375 = vmatpush.msrb.mxu0 %v8934_v12 }
 0xc68   :  { %1376 = vmatpush.msrb.mxu0 %v8935_v14 }
 0xc6a   :  { %1377 = vmatpush.msrb.mxu0 %v8936_v1 }
 0xc6c   :  { %1378 = vmatpush.msrb.mxu0 %v8937_v11 }
 0xc6e   :  { %1379 = vmatpush.msrb.mxu0 %v8938_v13 }
 0xc70   :  { %1380 = vmatpush.msrb.mxu0 %v8939_v15 }
 0xc72   :  { %1381 = vmatpush.msrb.mxu0 %v8940_v17 }
 0xc74   :  { %1382 = vmatpush.msrb.mxu0 %v8941_v21 }
 0xc76   :  { %1383 = vmatpush.msrb.mxu0 %v8942_v41 }
 0xcd4   :  { %v1031_v3 = vpop.f32.mrf.mxu0 }
 0xcd5   :  { %v1032_v34 = vadd.f32 %v5823_v19, %v1031_v3  ;;  %v5958_v3 = vld [vmem:[%s8377_s5 + $0x40] sm:$0xff] }
 0xcd6   :  { %8944 = vst [vmem:[#allocation23_spill] sm:$0xff] %v5958_v3 }
 0xcd7   :  { %v1042_v43 = vmul.f32 %v1041_v44, %v1032_v34  ;;  %v5970_v44 = vld [vmem:[%s8377_s5 + $0x30] sm:$0xff]  ;;  %v5976_v34 = vld [vmem:[%s8377_s5 + $0x28] sm:$0xff] }
 0xcd8   :  { %8946 = vst [vmem:[#allocation25_spill] sm:$0xff] %v5970_v44 }
 0xcd9   :  { %v1043_v39 = vsub.f32 %v1040_v24, %v1042_v43  ;;  %8947 = vst [vmem:[#allocation26_spill] sm:$0xff] %v5976_v34  ;;  %v5982_v24 = vld [vmem:[%s8377_s5 + $0x20] sm:$0xff]  ;;  %v5988_v43 = vld [vmem:[%s8377_s5 + $0x18] sm:$0xff] }
 0xcda   :  { %8948 = vst [vmem:[#allocation16_spill] sm:$0xff] %v5982_v24 }
 0xcdb   :  { %v3769_v56 = vclamps-f32 %v1043_v39, 1.0  ;;  %8949 = vst [vmem:[#allocation5_spill] sm:$0xff] %v5988_v43  ;;  %v5994_v39 = vld [vmem:[%s8377_s5 + $0x10] sm:$0xff] }
 0xcdc   :  { %8950 = vst [vmem:[#allocation6_spill] sm:$0xff] %v5994_v39 }
 0xcdd   :  { %v1047_v58 = vmul.f32 %v3769_v56, %v1046_v36  ;;  %v6000_v36 = vld [vmem:[%s8377_s5 + $0x8] sm:$0xff] }
 0xcde   :  { %8951 = vst [vmem:[#allocation7_spill] sm:$0xff] %v6000_v36 }
 0xcdf   :  { %v1050_v40 = vadd.f32 %v1049_v35, %v1047_v58 }
 0xce1   :  { %v5910_v57 = vadd.f32 %v1054_v9, %v1050_v40 }
 0xce3   :  { %1077 = vmatmul.f32.vlgmr.msrb.gmra.mxu1 %v5910_v57 }
 0xce4   :  { %1415 = vmatpush.msrb.mxu1 %v5916_v53 }
 0xce6   :  { %1416 = vmatpush.msrb.mxu1 %v5922_v37 }
 0xce8   :  { %1417 = vmatpush.msrb.mxu1 %v5928_v4 }
 0xcea   :  { %1418 = vmatpush.msrb.mxu1 %v5934_v42 }
 0xcec   :  { %1419 = vmatpush.msrb.mxu1 %v5940_v30 }
 0xcee   :  { %1420 = vmatpush.msrb.mxu1 %v5946_v62 }
 0xcf0   :  { %1421 = vmatpush.msrb.mxu1 %v5952_v49 }
 0xcf2   :  { %1422 = vmatpush.msrb.mxu1 %v5958_v3 }
 0xcf4   :  { %1423 = vmatpush.msrb.mxu1 %v5964_v5 }
 0xcf6   :  { %1424 = vmatpush.msrb.mxu1 %v5970_v44 }
 0xcf8   :  { %1425 = vmatpush.msrb.mxu1 %v5976_v34 }
 0xcfa   :  { %1426 = vmatpush.msrb.mxu1 %v5982_v24 }
 0xcfc   :  { %1427 = vmatpush.msrb.mxu1 %v5988_v43 }
 0xcfe   :  { %1428 = vmatpush.msrb.mxu1 %v5994_v39 }
 0xd00   :  { %1429 = vmatpush.msrb.mxu1 %v6000_v36 }
 0xd02   :  { %1430 = vmatpush.msrb.mxu1 %v6006_v38 }
 0xd60   :  { %v1078_v54 = vpop.f32.mrf.mxu1 }
 0xd61   :  { %v1079_v56 = vadd.f32 %v3944_v52, %v1078_v54 }
 0xd63   :  { %v1081_v58 = vadd.f32 %v1079_v56, %v4920_v50 }
 0xd65   :  { %v1082_v35 = vmin.f32 %v1081_v58, 20.0 }
 0xd67   :  { %v1083_v9 = vmul.f32 1.442695, %v1082_v35 }
 0xd69   :  { %4019 = vpow2.f32 %v1083_v9 }
 0xd6f   :  { %v4020_v40 = vpop.eup %4019 }
 0xd70   :  { %v1085_v36 = vadd.f32 1.0, %v4020_v40 }
 0xd72   :  { %v1086_v39 = vmul.f32 %v1085_v36, %v1085_v36  ;;  %v6016_v36 = vld [vmem:[%s8380_s8 + $0x78] sm:$0xff] }
 0xd74   :  { %v1088_v43 = vadd.f32 1.0, %v1086_v39  ;;  %v3772_v54 = vadd.f32 -1.0, %v1086_v39  ;;  %v6064_v39 = vld [vmem:[%s8380_s8 + $0x38] sm:$0xff] }
 0xd75   :  { %8956 = vst [vmem:[#allocation12_spill] sm:$0xff] %v6064_v39 }
 0xd76   :  { %4021 = vrcp.f32 %v1088_v43  ;;  %v1100_v38 = vand.u32 2147483648, %v1088_v43  ;;  %v1098_v3 = vand.u32 2147483647, %v1088_v43  ;;  %vm1094_vm13 = vweird.f32 %v1088_v43 }
 0xd78   :  { %v1101_v52 = vor.u32 1.1754944e-38, %v1100_v38  ;;  %vm1099_vm15 = vcmp.eq.f32.partialorder %v1098_v3, 8.507059e+37  ;;  %v6034_v3 = vld [vmem:[%s8380_s8 + $0x60] sm:$0xff]  ;;  %v6070_v38 = vld [vmem:[%s8380_s8 + $0x30] sm:$0xff] }
 0xd79   :  { %8957 = vst [vmem:[#allocation13_spill] sm:$0xff] %v6070_v38 }
 0xd7c   :  { %v4022_v24 = vpop.eup %4021 }
 0xd7d   :  { %v1090_v34 = vmul.f32 %v4022_v24, %v1088_v43  ;;  %vm1095_vm12 = vweird.f32 %v4022_v24  ;;  %v6058_v43 = vld [vmem:[%s8380_s8 + $0x40] sm:$0xff] }
 0xd7e   :  { %vm1096_vm14 = vmor %vm1094_vm13, %vm1095_vm12  ;;  %8955 = vst [vmem:[#allocation11_spill] sm:$0xff] %v6058_v43 }
 0xd7f   :  { %v1091_v44 = vsub.f32 1.0, %v1090_v34  ;;  %v6046_v34 = vld [vmem:[%s8380_s8 + $0x50] sm:$0xff] }
 0xd80   :  { %8953 = vst [vmem:[#allocation9_spill] sm:$0xff] %v6046_v34 }
 0xd81   :  { %v1092_v5 = vmul.f32 %v4022_v24, %v1091_v44  ;;  %v6040_v44 = vld [vmem:[%s8380_s8 + $0x58] sm:$0xff] }
 0xd83   :  { %v1093_v49 = vadd.f32 %v4022_v24, %v1092_v5  ;;  %v6022_v5 = vld [vmem:[%s8380_s8 + $0x70] sm:$0xff] }
 0xd85   :  { %v1097_v56 = vsel %vm1096_vm14, %v4022_v24, %v1093_v49  ;;  %v6028_v49 = vld [vmem:[%s8380_s8 + $0x68] sm:$0xff] }
 0xd86   :  { %v1102_v35 = vsel %vm1099_vm15, %v1101_v52, %v1097_v56  ;;  %v6052_v24 = vld [vmem:[%s8380_s8 + $0x48] sm:$0xff]  ;;  %v6082_v52 = vld [vmem:[%s8380_s8 + $0x20] sm:$0xff] }
 0xd87   :  { %v1103_v9 = vmul.f32 %v3772_v54, %v1102_v35  ;;  %8954 = vst [vmem:[#allocation10_spill] sm:$0xff] %v6052_v24 }
 0xd88   :  { %8959 = vst [vmem:[#allocation15_spill] sm:$0xff] %v6082_v52 }
 0xd89   :  { %v1104_v40 = vmul.f32 %v1103_v9, %v1081_v58  ;;  %v6076_v58 = vld [vmem:[%s8380_s8 + $0x28] sm:$0xff] }
 0xd8a   :  { %8958 = vst [vmem:[#allocation14_spill] sm:$0xff] %v6076_v58 }
 0xd8b   :  { %1121 = vmatmul.f32.vlgmr.msrb.gmra.mxu2 %v1104_v40 }
 0xd8c   :  { %1459 = vmatpush.msrb.mxu2 %v6016_v36 }
 0xd8e   :  { %1460 = vmatpush.msrb.mxu2 %v6022_v5 }
 0xd90   :  { %1461 = vmatpush.msrb.mxu2 %v6028_v49 }
 0xd92   :  { %1462 = vmatpush.msrb.mxu2 %v6034_v3 }
 0xd94   :  { %1463 = vmatpush.msrb.mxu2 %v6040_v44 }
 0xd96   :  { %1464 = vmatpush.msrb.mxu2 %v6046_v34 }
 0xd98   :  { %1465 = vmatpush.msrb.mxu2 %v6052_v24 }
 0xd9a   :  { %1466 = vmatpush.msrb.mxu2 %v6058_v43 }
 0xd9c   :  { %1467 = vmatpush.msrb.mxu2 %v6064_v39 }
 0xd9e   :  { %1468 = vmatpush.msrb.mxu2 %v6070_v38 }
 0xda0   :  { %1469 = vmatpush.msrb.mxu2 %v6076_v58 }
 0xda2   :  { %1470 = vmatpush.msrb.mxu2 %v6082_v52 }
 0xda4   :  { %1471 = vmatpush.msrb.mxu2 %v5595_v20 }
 0xda6   :  { %1472 = vmatpush.msrb.mxu2 %v5601_v22 }
 0xda8   :  { %1473 = vmatpush.msrb.mxu2 %v5607_v60 }
 0xdaa   :  { %1474 = vmatpush.msrb.mxu2 %v5613_v63 }
 0xe0e   :  { %v1122_v54 = vpop.f32.mrf.mxu2 }
 0xe0f   :  { %v1123_v56 = vadd.f32 %v5619_v8, %v1122_v54 }
 0xe11   :  { %v1125_v35 = vmin.f32 %v1123_v56, 20.0 }
 0xe13   :  { %v1126_v9 = vmul.f32 1.442695, %v1125_v35 }
 0xe15   :  { %4023 = vpow2.f32 %v1126_v9 }
 0xe1b   :  { %v4024_v40 = vpop.eup %4023 }
 0xe1c   :  { %v1128_v58 = vadd.f32 1.0, %v4024_v40 }
 0xe1e   :  { %v1129_v38 = vmul.f32 %v1128_v58, %v1128_v58  ;;  %v8962_v58 = vld [vmem:[#allocation24_spill] sm:$0xff] }
 0xe20   :  { %v1131_v39 = vadd.f32 1.0, %v1129_v38  ;;  %v3773_v8 = vadd.f32 -1.0, %v1129_v38 }
 0xe22   :  { %4025 = vrcp.f32 %v1131_v39  ;;  %v1143_v24 = vand.u32 2147483648, %v1131_v39  ;;  %v1141_v60 = vand.u32 2147483647, %v1131_v39  ;;  %vm1137_vm1 = vweird.f32 %v1131_v39 }
 0xe24   :  { %v1144_v63 = vor.u32 1.1754944e-38, %v1143_v24  ;;  %vm1142_vm3 = vcmp.eq.f32.partialorder %v1141_v60, 8.507059e+37  ;;  %v8967_v60 = vld [vmem:[#allocation6_spill] sm:$0xff] }
 0xe28   :  { %v4026_v52 = vpop.eup %4025 }
 0xe29   :  { %v1133_v43 = vmul.f32 %v4026_v52, %v1131_v39  ;;  %vm1138_vm0 = vweird.f32 %v4026_v52 }
 0xe2a   :  { %vm1139_vm2 = vmor %vm1137_vm1, %vm1138_vm0 }
 0xe2b   :  { %v1134_v20 = vsub.f32 1.0, %v1133_v43 }
 0xe2d   :  { %v1135_v22 = vmul.f32 %v4026_v52, %v1134_v20  ;;  %v8965_v20 = vld [vmem:[#allocation16_spill] sm:$0xff] }
 0xe2f   :  { %v1136_v34 = vadd.f32 %v4026_v52, %v1135_v22  ;;  %v8966_v22 = vld [vmem:[#allocation5_spill] sm:$0xff] }
 0xe31   :  { %v1140_v54 = vsel %vm1139_vm2, %v4026_v52, %v1136_v34  ;;  %v8963_v52 = vld [vmem:[#allocation25_spill] sm:$0xff] }
 0xe32   :  { %v1145_v35 = vsel %vm1142_vm3, %v1144_v63, %v1140_v54  ;;  %v8968_v63 = vld [vmem:[#allocation7_spill] sm:$0xff]  ;;  %v3945_v54 = vld [vmem:[%s8376_s4 + $0xd] ss:$0 sm:$0xff] }
 0xe33   :  { %v1146_v9 = vmul.f32 %v3773_v8, %v1145_v35  ;;  %v8969_v8 = vld [vmem:[#allocation8_spill] sm:$0xff] }
 0xe35   :  { %v1147_v40 = vmul.f32 %v1146_v9, %v1123_v56  ;;  %v8964_v56 = vld [vmem:[#allocation26_spill] sm:$0xff] }
 0xe37   :  { %1164 = vmatmul.f32.vlgmr.msrb.gmra.mxu3 %v1147_v40 }
 0xe38   :  { %1502 = vmatpush.msrb.mxu3 %v5625_v23 }
 0xe3a   :  { %1503 = vmatpush.msrb.mxu3 %v5631_v25 }
 0xe3c   :  { %1504 = vmatpush.msrb.mxu3 %v5637_v27 }
 0xe3e   :  { %1505 = vmatpush.msrb.mxu3 %v5643_v29 }
 0xe40   :  { %1506 = vmatpush.msrb.mxu3 %v5649_v31 }
 0xe42   :  { %1507 = vmatpush.msrb.mxu3 %v5655_v59 }
 0xe44   :  { %1508 = vmatpush.msrb.mxu3 %v5661_v6 }
 0xe46   :  { %1509 = vmatpush.msrb.mxu3 %v5667_v18 }
 0xe48   :  { %1510 = vmatpush.msrb.mxu3 %v5673_v2 }
 0xe4a   :  { %1511 = vmatpush.msrb.mxu3 %v5679_v16 }
 0xe4c   :  { %1512 = vmatpush.msrb.mxu3 %v5685_v51 }
 0xe4e   :  { %1513 = vmatpush.msrb.mxu3 %v8921_v7 }
 0xe50   :  { %1514 = vmatpush.msrb.mxu3 %v8922_v46 }
 0xe52   :  { %1515 = vmatpush.msrb.mxu3 %v8923_v47 }
 0xe54   :  { %1516 = vmatpush.msrb.mxu3 %v8924_v0 }
 0xe56   :  { %1517 = vmatpush.msrb.mxu3 %v8925_v32 }
 0xeba   :  { %v1165_v23 = vpop.f32.mrf.mxu3 }
 0xebb   :  { %v1166_v25 = vadd.f32 %v8926_v45, %v1165_v23 }
 0xebd   :  { %v1168_v27 = vmin.f32 %v1166_v25, 20.0 }
 0xebf   :  { %v1169_v29 = vmul.f32 1.442695, %v1168_v27 }
 0xec1   :  { %4027 = vpow2.f32 %v1169_v29 }
 0xec7   :  { %v4028_v31 = vpop.eup %4027 }
 0xec8   :  { %v1171_v59 = vadd.f32 1.0, %v4028_v31 }
 0xeca   :  { %v1172_v6 = vmul.f32 %v1171_v59, %v1171_v59 }
 0xecc   :  { %v1174_v18 = vadd.f32 1.0, %v1172_v6  ;;  %v3774_v45 = vadd.f32 -1.0, %v1172_v6 }
 0xece   :  { %4029 = vrcp.f32 %v1174_v18  ;;  %v1186_v7 = vand.u32 2147483648, %v1174_v18  ;;  %v1184_v47 = vand.u32 2147483647, %v1174_v18  ;;  %vm1180_vm5 = vweird.f32 %v1174_v18 }
 0xed0   :  { %v1187_v32 = vor.u32 1.1754944e-38, %v1186_v7  ;;  %vm1185_vm7 = vcmp.eq.f32.partialorder %v1184_v47, 8.507059e+37 }
 0xed4   :  { %v4030_v2 = vpop.eup %4029 }
 0xed5   :  { %v1176_v16 = vmul.f32 %v4030_v2, %v1174_v18  ;;  %vm1181_vm4 = vweird.f32 %v4030_v2 }
 0xed6   :  { %vm1182_vm6 = vmor %vm1180_vm5, %vm1181_vm4 }
 0xed7   :  { %v1177_v51 = vsub.f32 1.0, %v1176_v16 }
 0xed9   :  { %v1178_v46 = vmul.f32 %v4030_v2, %v1177_v51 }
 0xedb   :  { %v1179_v0 = vadd.f32 %v4030_v2, %v1178_v46 }
 0xedd   :  { %v1183_v34 = vsel %vm1182_vm6, %v4030_v2, %v1179_v0 }
 0xede   :  { %v1188_v24 = vsel %vm1185_vm7, %v1187_v32, %v1183_v34 }
 0xedf   :  { %v1189_v43 = vmul.f32 %v3774_v45, %v1188_v24 }
 0xee1   :  { %v1190_v39 = vmul.f32 %v1189_v43, %v1166_v25  ;;  %v8970_v43 = vld [vmem:[#allocation9_spill] sm:$0xff] }
 0xee3   :  { %1207 = vmatmul.f32.vlgmr.msra.gmra.mxu0 %v1190_v39  ;;  %v8971_v39 = vld [vmem:[#allocation10_spill] sm:$0xff] }
 0xee4   :  { %1545 = vmatpush.msra.mxu0 %v8927_v48 }
 0xee6   :  { %1546 = vmatpush.msra.mxu0 %v8928_v33  ;;  %v1216_v33 = vstv %s3775_s20  ;;  %s3866_s20 = sld [smem:[#allocation3 + $0x21]] }
 0xee8   :  { %1547 = vmatpush.msra.mxu0 %v8929_v26  ;;  %v1218_v26 = vstv %s3776_s21  ;;  %s3786_s21 = sld [smem:[#allocation3 + $0x41]] }
 0xeea   :  { %1548 = vmatpush.msra.mxu0 %v8930_v28 }
 0xeec   :  { %1549 = vmatpush.msra.mxu0 %v8931_v55  ;;  %v1217_v55 = vmul.f32 %v1216_v33, %v5910_v57  ;;  %v8973_v33 = vld [vmem:[#allocation12_spill] sm:$0xff] }
 0xeee   :  { %1550 = vmatpush.msra.mxu0 %v8932_v61 }
 0xef0   :  { %1551 = vmatpush.msra.mxu0 %v8933_v10 }
 0xef2   :  { %1552 = vmatpush.msra.mxu0 %v8934_v12  ;;  %v1223_v12 = vstv %s3777_s22  ;;  %s3789_s22 = sld [smem:[#allocation3 + $0x44]] }
 0xef4   :  { %1553 = vmatpush.msra.mxu0 %v8935_v14  ;;  %v1225_v14 = vstv %s3778_s7  ;;  %s3787_s7 = sld [smem:[#allocation3 + $0x42]] }
 0xef6   :  { %1554 = vmatpush.msra.mxu0 %v8936_v1  ;;  %v3781_v1 = vld [vmem:[%s8375_s3 + $0x70] sm:$0xff] }
 0xef8   :  { %1555 = vmatpush.msra.mxu0 %v8937_v11  ;;  %v1230_v11 = vstv %s3779_s0  ;;  %s3788_s0 = sld [smem:[#allocation3 + $0x43]] }
 0xefa   :  { %1556 = vmatpush.msra.mxu0 %v8938_v13 }
 0xefc   :  { %1557 = vmatpush.msra.mxu0 %v8939_v15 }
 0xefe   :  { %1558 = vmatpush.msra.mxu0 %v8940_v17  ;;  %v1226_v17 = vmul.f32 %v1225_v14, %v5910_v57  ;;  %v8961_v57 = vld [vmem:[#allocation23_spill] sm:$0xff]  ;;  %v6185_v14 = vld [vmem:[%s8380_s8] sm:$0xff] }
 0xf00   :  { %1559 = vmatpush.msra.mxu0 %v8941_v21  ;;  %v1231_v21 = vmul.f32 %v3781_v1, %v1230_v11  ;;  %v6191_v11 = vld [vmem:[%s8381_s9] ss:$0 sm:$0xff] }
 0xf02   :  { %1560 = vmatpush.msra.mxu0 %v8942_v41 }
 0xf60   :  { %v1208_v48 = vpop.f32.mrf.mxu0 }
 0xf61   :  { %v1209_v28 = vadd.f32 %v5823_v19, %v1208_v48  ;;  %v8960_v19 = vld [vmem:[#allocation22_spill] sm:$0xff]  ;;  %v8972_v48 = vld [vmem:[#allocation11_spill] sm:$0xff] }
 0xf63   :  { %v1219_v61 = vmul.f32 %v1218_v26, %v1209_v28  ;;  %v8974_v26 = vld [vmem:[#allocation13_spill] sm:$0xff]  ;;  %v8975_v28 = vld [vmem:[#allocation14_spill] sm:$0xff] }
 0xf65   :  { %v1220_v10 = vsub.f32 %v1217_v55, %v1219_v61  ;;  %v8976_v55 = vld [vmem:[#allocation15_spill] sm:$0xff]  ;;  %v6167_v61 = vld [vmem:[%s8380_s8 + $0x18] sm:$0xff] }
 0xf67   :  { %v3780_v13 = vclamps-f32 %v1220_v10, 1.0  ;;  %v6173_v10 = vld [vmem:[%s8380_s8 + $0x10] sm:$0xff] }
 0xf69   :  { %v1224_v15 = vmul.f32 %v3780_v13, %v1223_v12  ;;  %v6179_v12 = vld [vmem:[%s8380_s8 + $0x8] sm:$0xff] }
 0xf6b   :  { %v1227_v41 = vadd.f32 %v1226_v17, %v1224_v15 }
 0xf6d   :  { %v6129_v38 = vadd.f32 %v1231_v21, %v1227_v41 }
 0xf6f   :  { %1254 = vmatmul.f32.vlgmr.msra.gmra.mxu1 %v6129_v38 }
 0xf70   :  { %1592 = vmatpush.msra.mxu1 %v5916_v53 }
 0xf72   :  { %1593 = vmatpush.msra.mxu1 %v5922_v37 }
 0xf74   :  { %1594 = vmatpush.msra.mxu1 %v5928_v4 }
 0xf76   :  { %1595 = vmatpush.msra.mxu1 %v5934_v42 }
 0xf78   :  { %1596 = vmatpush.msra.mxu1 %v5940_v30 }
 0xf7a   :  { %1597 = vmatpush.msra.mxu1 %v5946_v62 }
 0xf7c   :  { %1598 = vmatpush.msra.mxu1 %v8960_v19 }
 0xf7e   :  { %1599 = vmatpush.msra.mxu1 %v8961_v57 }
 0xf80   :  { %1600 = vmatpush.msra.mxu1 %v8962_v58 }
 0xf82   :  { %1601 = vmatpush.msra.mxu1 %v8963_v52 }
 0xf84   :  { %1602 = vmatpush.msra.mxu1 %v8964_v56 }
 0xf86   :  { %1603 = vmatpush.msra.mxu1 %v8965_v20 }
 0xf88   :  { %1604 = vmatpush.msra.mxu1 %v8966_v22 }
 0xf8a   :  { %1605 = vmatpush.msra.mxu1 %v8967_v60 }
 0xf8c   :  { %1606 = vmatpush.msra.mxu1 %v8968_v63 }
 0xf8e   :  { %1607 = vmatpush.msra.mxu1 %v8969_v8 }
 0xfec   :  { %v1255_v35 = vpop.f32.mrf.mxu1 }
 0xfed   :  { %v1256_v9 = vadd.f32 %v3945_v54, %v1255_v35 }
 0xfef   :  { %v1258_v40 = vadd.f32 %v1256_v9, %v4920_v50 }
 0xff1   :  { %v1259_v23 = vmin.f32 %v1258_v40, 20.0 }
 0xff3   :  { %v1260_v25 = vmul.f32 1.442695, %v1259_v23 }
 0xff5   :  { %4031 = vpow2.f32 %v1260_v25 }
 0xffb   :  { %v4032_v27 = vpop.eup %4031 }
 0xffc   :  { %v1262_v29 = vadd.f32 1.0, %v4032_v27 }
 0xffe   :  { %v1263_v31 = vmul.f32 %v1262_v29, %v1262_v29 }
0x1000   :  { %v1265_v59 = vadd.f32 1.0, %v1263_v31  ;;  %v3783_v0 = vadd.f32 -1.0, %v1263_v31 }
0x1002   :  { %4033 = vrcp.f32 %v1265_v59  ;;  %v1277_v16 = vand.u32 2147483648, %v1265_v59  ;;  %v1275_v7 = vand.u32 2147483647, %v1265_v59  ;;  %vm1271_vm9 = vweird.f32 %v1265_v59 }
0x1004   :  { %v1278_v47 = vor.u32 1.1754944e-38, %v1277_v16  ;;  %vm1276_vm11 = vcmp.eq.f32.partialorder %v1275_v7, 8.507059e+37  ;;  %v6197_v7 = vld [vmem:[%s8382_s10 + $0x78] sm:$0xff] }
0x1008   :  { %v4034_v6 = vpop.eup %4033 }
0x1009   :  { %v1267_v18 = vmul.f32 %v4034_v6, %v1265_v59  ;;  %vm1272_vm8 = vweird.f32 %v4034_v6 }
0x100a   :  { %vm1273_vm10 = vmor %vm1271_vm9, %vm1272_vm8 }
0x100b   :  { %v1268_v2 = vsub.f32 1.0, %v1267_v18 }
0x100d   :  { %v1269_v51 = vmul.f32 %v4034_v6, %v1268_v2 }
0x100f   :  { %v1270_v46 = vadd.f32 %v4034_v6, %v1269_v51 }
0x1011   :  { %v1274_v32 = vsel %vm1273_vm10, %v4034_v6, %v1270_v46  ;;  %v6203_v46 = vld [vmem:[%s8382_s10 + $0x70] sm:$0xff] }
0x1012   :  { %v1279_v45 = vsel %vm1276_vm11, %v1278_v47, %v1274_v32  ;;  %v6209_v47 = vld [vmem:[%s8382_s10 + $0x68] sm:$0xff]  ;;  %v6221_v32 = vld [vmem:[%s8382_s10 + $0x58] sm:$0xff] }
0x1013   :  { %v1280_v34 = vmul.f32 %v3783_v0, %v1279_v45  ;;  %v6215_v0 = vld [vmem:[%s8382_s10 + $0x60] sm:$0xff]  ;;  %v6227_v45 = vld [vmem:[%s8382_s10 + $0x50] sm:$0xff] }
0x1015   :  { %v1281_v24 = vmul.f32 %v1280_v34, %v1258_v40  ;;  %v6233_v34 = vld [vmem:[%s8382_s10 + $0x48] sm:$0xff] }
0x1017   :  { %1298 = vmatmul.f32.vlgmr.msra.gmra.mxu2 %v1281_v24  ;;  %v6239_v24 = vld [vmem:[%s8382_s10 + $0x40] sm:$0xff] }
0x1018   :  { %1636 = vmatpush.msra.mxu2 %v6016_v36 }
0x101a   :  { %1637 = vmatpush.msra.mxu2 %v6022_v5 }
0x101c   :  { %1638 = vmatpush.msra.mxu2 %v6028_v49 }
0x101e   :  { %1639 = vmatpush.msra.mxu2 %v6034_v3 }
0x1020   :  { %1640 = vmatpush.msra.mxu2 %v6040_v44 }
0x1022   :  { %1641 = vmatpush.msra.mxu2 %v8970_v43 }
0x1024   :  { %1642 = vmatpush.msra.mxu2 %v8971_v39 }
0x1026   :  { %1643 = vmatpush.msra.mxu2 %v8972_v48 }
0x1028   :  { %1644 = vmatpush.msra.mxu2 %v8973_v33 }
0x102a   :  { %1645 = vmatpush.msra.mxu2 %v8974_v26 }
0x102c   :  { %1646 = vmatpush.msra.mxu2 %v8975_v28 }
0x102e   :  { %1647 = vmatpush.msra.mxu2 %v8976_v55 }
0x1030   :  { %1648 = vmatpush.msra.mxu2 %v6167_v61 }
0x1032   :  { %1649 = vmatpush.msra.mxu2 %v6173_v10 }
0x1034   :  { %1650 = vmatpush.msra.mxu2 %v6179_v12 }
0x1036   :  { %1651 = vmatpush.msra.mxu2 %v6185_v14 }
0x109a   :  { %v1299_v1 = vpop.f32.mrf.mxu2 }
0x109b   :  { %v1300_v13 = vadd.f32 %v6191_v11, %v1299_v1  ;;  %v6245_v1 = vld [vmem:[%s8382_s10 + $0x38] sm:$0xff] }
0x109d   :  { %v1302_v15 = vmin.f32 %v1300_v13, 20.0 }
0x109f   :  { %v1303_v17 = vmul.f32 1.442695, %v1302_v15  ;;  %v6257_v15 = vld [vmem:[%s8382_s10 + $0x28] sm:$0xff] }
0x10a1   :  { %4035 = vpow2.f32 %v1303_v17  ;;  %v6263_v17 = vld [vmem:[%s8382_s10 + $0x20] sm:$0xff] }
0x10a2   :  { %8977 = vst [vmem:[#allocation17_spill] sm:$0xff] %v6263_v17 }
0x10a7   :  { %v4036_v21 = vpop.eup %4035 }
0x10a8   :  { %v1305_v41 = vadd.f32 1.0, %v4036_v21  ;;  %v6269_v21 = vld [vmem:[%s8382_s10 + $0x18] sm:$0xff] }
0x10a9   :  { %8978 = vst [vmem:[#allocation18_spill] sm:$0xff] %v6269_v21 }
0x10aa   :  { %v1306_v54 = vmul.f32 %v1305_v41, %v1305_v41  ;;  %v6275_v41 = vld [vmem:[%s8382_s10 + $0x10] sm:$0xff] }
0x10ab   :  { %8979 = vst [vmem:[#allocation19_spill] sm:$0xff] %v6275_v41 }
0x10ac   :  { %v1308_v35 = vadd.f32 1.0, %v1306_v54  ;;  %v3784_v6 = vadd.f32 -1.0, %v1306_v54  ;;  %v6281_v54 = vld [vmem:[%s8382_s10 + $0x8] sm:$0xff] }
0x10ad   :  { %8980 = vst [vmem:[#allocation20_spill] sm:$0xff] %v6281_v54 }
0x10ae   :  { %4037 = vrcp.f32 %v1308_v35  ;;  %v1320_v25 = vand.u32 2147483648, %v1308_v35  ;;  %v1318_v29 = vand.u32 2147483647, %v1308_v35  ;;  %vm1314_vm13 = vweird.f32 %v1308_v35 }
0x10b0   :  { %v1321_v59 = vor.u32 1.1754944e-38, %v1320_v25  ;;  %vm1319_vm15 = vcmp.eq.f32.partialorder %v1318_v29, 8.507059e+37 }
0x10b4   :  { %v4038_v9 = vpop.eup %4037 }
0x10b5   :  { %v1310_v40 = vmul.f32 %v4038_v9, %v1308_v35  ;;  %vm1315_vm12 = vweird.f32 %v4038_v9  ;;  %v6287_v35 = vld [vmem:[%s8382_s10] sm:$0xff] }
0x10b6   :  { %vm1316_vm14 = vmor %vm1314_vm13, %vm1315_vm12  ;;  %8981 = vst [vmem:[#allocation21_spill] sm:$0xff] %v6287_v35 }
0x10b7   :  { %v1311_v23 = vsub.f32 1.0, %v1310_v40  ;;  %v6293_v40 = vld [vmem:[%s8383_s11] ss:$0 sm:$0xff] }
0x10b8   :  { %8982 = vst [vmem:[#allocation22_spill] sm:$0xff] %v6293_v40 }
0x10b9   :  { %v1312_v27 = vmul.f32 %v4038_v9, %v1311_v23 }
0x10bb   :  { %v1313_v31 = vadd.f32 %v4038_v9, %v1312_v27 }
0x10bd   :  { %v1317_v18 = vsel %vm1316_vm14, %v4038_v9, %v1313_v31 }
0x10be   :  { %v1322_v2 = vsel %vm1319_vm15, %v1321_v59, %v1317_v18 }
0x10bf   :  { %v1323_v16 = vmul.f32 %v3784_v6, %v1322_v2 }
0x10c1   :  { %v1324_v51 = vmul.f32 %v1323_v16, %v1300_v13  ;;  %v6251_v13 = vld [vmem:[%s8382_s10 + $0x30] sm:$0xff] }
0x10c3   :  { %1341 = vmatmul.f32.vlgmr.msra.gmra.mxu3 %v1324_v51 }
0x10c4   :  { %1679 = vmatpush.msra.mxu3 %v6197_v7 }
0x10c6   :  { %1680 = vmatpush.msra.mxu3 %v6203_v46 }
0x10c8   :  { %1681 = vmatpush.msra.mxu3 %v6209_v47 }
0x10ca   :  { %1682 = vmatpush.msra.mxu3 %v6215_v0 }
0x10cc   :  { %1683 = vmatpush.msra.mxu3 %v6221_v32 }
0x10ce   :  { %1684 = vmatpush.msra.mxu3 %v6227_v45 }
0x10d0   :  { %1685 = vmatpush.msra.mxu3 %v6233_v34 }
0x10d2   :  { %1686 = vmatpush.msra.mxu3 %v6239_v24 }
0x10d4   :  { %1687 = vmatpush.msra.mxu3 %v6245_v1 }
0x10d6   :  { %1688 = vmatpush.msra.mxu3 %v6251_v13 }
0x10d8   :  { %1689 = vmatpush.msra.mxu3 %v6257_v15 }
0x10da   :  { %1690 = vmatpush.msra.mxu3 %v6263_v17 }
0x10dc   :  { %1691 = vmatpush.msra.mxu3 %v6269_v21 }
0x10de   :  { %1692 = vmatpush.msra.mxu3 %v6275_v41 }
0x10e0   :  { %1693 = vmatpush.msra.mxu3 %v6281_v54 }
0x10e2   :  { %1694 = vmatpush.msra.mxu3 %v6287_v35 }
0x1146   :  { %v1342_v9 = vpop.f32.mrf.mxu3 }
0x1147   :  { %v1343_v23 = vadd.f32 %v6293_v40, %v1342_v9 }
0x1149   :  { %v1345_v25 = vmin.f32 %v1343_v23, 20.0 }
0x114b   :  { %v1346_v27 = vmul.f32 1.442695, %v1345_v25 }
0x114d   :  { %4039 = vpow2.f32 %v1346_v27 }
0x1153   :  { %v4040_v29 = vpop.eup %4039 }
0x1154   :  { %v1348_v31 = vadd.f32 1.0, %v4040_v29 }
0x1156   :  { %v1349_v59 = vmul.f32 %v1348_v31, %v1348_v31  ;;  %v6299_v31 = vld [vmem:[%s8384_s12 + $0x78] sm:$0xff] }
0x1157   :  { %8983 = vst [vmem:[#allocation23_spill] sm:$0xff] %v6299_v31 }
0x1158   :  { %v1351_v6 = vadd.f32 1.0, %v1349_v59  ;;  %v3785_v9 = vadd.f32 -1.0, %v1349_v59  ;;  %v6341_v59 = vld [vmem:[%s8384_s12 + $0x40] sm:$0xff] }
0x1159   :  { %8990 = vst [vmem:[#allocation7_spill] sm:$0xff] %v6341_v59 }
0x115a   :  { %4041 = vrcp.f32 %v1351_v6  ;;  %v1363_v51 = vand.u32 2147483648, %v1351_v6  ;;  %v1361_v54 = vand.u32 2147483647, %v1351_v6  ;;  %vm1357_vm1 = vweird.f32 %v1351_v6 }
0x115c   :  { %v1364_v21 = vor.u32 1.1754944e-38, %v1363_v51  ;;  %vm1362_vm3 = vcmp.eq.f32.partialorder %v1361_v54, 8.507059e+37  ;;  %v6323_v54 = vld [vmem:[%s8384_s12 + $0x58] sm:$0xff] }
0x115d   :  { %8987 = vst [vmem:[#allocation16_spill] sm:$0xff] %v6323_v54  ;;  %v6371_v51 = vld [vmem:[%s8384_s12 + $0x18] sm:$0xff] }
0x115e   :  { %8995 = vst [vmem:[#allocation12_spill] sm:$0xff] %v6371_v51 }
0x1160   :  { %v4042_v18 = vpop.eup %4041 }
0x1161   :  { %v1353_v2 = vmul.f32 %v4042_v18, %v1351_v6  ;;  %vm1358_vm0 = vweird.f32 %v4042_v18  ;;  %v6347_v6 = vld [vmem:[%s8384_s12 + $0x38] sm:$0xff] }
0x1162   :  { %vm1359_vm2 = vmor %vm1357_vm1, %vm1358_vm0  ;;  %8991 = vst [vmem:[#allocation8_spill] sm:$0xff] %v6347_v6 }
0x1163   :  { %v1354_v16 = vsub.f32 1.0, %v1353_v2  ;;  %v6359_v2 = vld [vmem:[%s8384_s12 + $0x28] sm:$0xff] }
0x1164   :  { %8993 = vst [vmem:[#allocation10_spill] sm:$0xff] %v6359_v2 }
0x1165   :  { %v1355_v35 = vmul.f32 %v4042_v18, %v1354_v16  ;;  %v6365_v16 = vld [vmem:[%s8384_s12 + $0x20] sm:$0xff] }
0x1166   :  { %8994 = vst [vmem:[#allocation11_spill] sm:$0xff] %v6365_v16 }
0x1167   :  { %v1356_v41 = vadd.f32 %v4042_v18, %v1355_v35  ;;  %v6305_v35 = vld [vmem:[%s8384_s12 + $0x70] sm:$0xff] }
0x1168   :  { %8984 = vst [vmem:[#allocation24_spill] sm:$0xff] %v6305_v35 }
0x1169   :  { %v1360_v40 = vsel %vm1359_vm2, %v4042_v18, %v1356_v41  ;;  %v6317_v41 = vld [vmem:[%s8384_s12 + $0x60] sm:$0xff]  ;;  %v6353_v18 = vld [vmem:[%s8384_s12 + $0x30] sm:$0xff] }
0x116a   :  { %v1365_v25 = vsel %vm1362_vm3, %v1364_v21, %v1360_v40  ;;  %v6311_v21 = vld [vmem:[%s8384_s12 + $0x68] sm:$0xff]  ;;  %8986 = vst [vmem:[#allocation26_spill] sm:$0xff] %v6317_v41  ;;  %v6329_v40 = vld [vmem:[%s8384_s12 + $0x50] sm:$0xff] }
0x116b   :  { %v1366_v27 = vmul.f32 %v3785_v9, %v1365_v25  ;;  %8985 = vst [vmem:[#allocation25_spill] sm:$0xff] %v6311_v21  ;;  %v6377_v9 = vld [vmem:[%s8384_s12 + $0x10] sm:$0xff]  ;;  %v6383_v25 = vld [vmem:[%s8384_s12 + $0x8] sm:$0xff] }
0x116c   :  { %8988 = vst [vmem:[#allocation5_spill] sm:$0xff] %v6329_v40 }
0x116d   :  { %v1367_v29 = vmul.f32 %v1366_v27, %v1343_v23  ;;  %v6335_v23 = vld [vmem:[%s8384_s12 + $0x48] sm:$0xff]  ;;  %8992 = vst [vmem:[#allocation9_spill] sm:$0xff] %v6353_v18  ;;  %v6389_v27 = vld [vmem:[%s8384_s12] sm:$0xff] }
0x116e   :  { %8989 = vst [vmem:[#allocation6_spill] sm:$0xff] %v6335_v23 }
0x116f   :  { %1384 = vmatmul.f32.vlgmr.msrb.gmra.mxu0 %v1367_v29  ;;  %8996 = vst [vmem:[#allocation13_spill] sm:$0xff] %v6377_v9 }
0x1170   :  { %1722 = vmatpush.msrb.mxu0 %v6299_v31  ;;  %8997 = vst [vmem:[#allocation14_spill] sm:$0xff] %v6383_v25 }
0x1171   :  { %8998 = vst [vmem:[#allocation15_spill] sm:$0xff] %v6389_v27 }
0x1172   :  { %1723 = vmatpush.msrb.mxu0 %v6305_v35 }
0x1174   :  { %1724 = vmatpush.msrb.mxu0 %v6311_v21 }
0x1176   :  { %1725 = vmatpush.msrb.mxu0 %v6317_v41 }
0x1178   :  { %1726 = vmatpush.msrb.mxu0 %v6323_v54 }
0x117a   :  { %1727 = vmatpush.msrb.mxu0 %v6329_v40  ;;  %v1407_v40 = vstv %s3790_s23  ;;  %s3830_s23 = sld [smem:[#allocation3 + $0x2d]] }
0x117c   :  { %1728 = vmatpush.msrb.mxu0 %v6335_v23  ;;  %v3792_v23 = vld [vmem:[%s8375_s3 + $0x68] sm:$0xff] }
0x117d   :  { %v1408_v35 = vmul.f32 %v3792_v23, %v1407_v40 }
0x117e   :  { %1729 = vmatpush.msrb.mxu0 %v6341_v59  ;;  %v1402_v59 = vstv %s3789_s22  ;;  %s3876_s22 = sld [smem:[#allocation3 + $0x1b]] }
0x117f   :  { %v1403_v21 = vmul.f32 %v1402_v59, %v6129_v38 }
0x1180   :  { %1730 = vmatpush.msrb.mxu0 %v6347_v6 }
0x1182   :  { %1731 = vmatpush.msrb.mxu0 %v6353_v18 }
0x1184   :  { %1732 = vmatpush.msrb.mxu0 %v6359_v2 }
0x1186   :  { %1733 = vmatpush.msrb.mxu0 %v6365_v16  ;;  %v6395_v16 = vld [vmem:[%s8385_s13] ss:$0 sm:$0xff] }
0x1188   :  { %1734 = vmatpush.msrb.mxu0 %v6371_v51  ;;  %v1395_v51 = vstv %s3787_s7  ;;  %s3867_s7 = sld [smem:[#allocation3 + $0x22]] }
0x118a   :  { %1735 = vmatpush.msrb.mxu0 %v6377_v9  ;;  %v1393_v9 = vstv %s3786_s21  ;;  %s3865_s21 = sld [smem:[#allocation3 + $0x20]] }
0x118b   :  { %v1394_v2 = vmul.f32 %v1393_v9, %v6129_v38 }
0x118c   :  { %1736 = vmatpush.msrb.mxu0 %v6383_v25 }
0x118e   :  { %1737 = vmatpush.msrb.mxu0 %v6389_v27  ;;  %v1400_v27 = vstv %s3788_s0  ;;  %s3878_s0 = sld [smem:[#allocation3 + $0x1d]] }
0x11ec   :  { %v1385_v29 = vpop.f32.mrf.mxu0 }
0x11ed   :  { %v1386_v25 = vadd.f32 %v6395_v16, %v1385_v29  ;;  %v8999_v29 = vld [vmem:[#allocation17_spill] sm:$0xff] }
0x11ef   :  { %v1396_v18 = vmul.f32 %v1395_v51, %v1386_v25 }
0x11f1   :  { %v1397_v6 = vsub.f32 %v1394_v2, %v1396_v18 }
0x11f3   :  { %v3791_v54 = vclamps-f32 %v1397_v6, 1.0 }
0x11f5   :  { %v1401_v41 = vmul.f32 %v3791_v54, %v1400_v27 }
0x11f7   :  { %v1404_v31 = vadd.f32 %v1403_v21, %v1401_v41 }
0x11f9   :  { %v6403_v17 = vadd.f32 %v1408_v35, %v1404_v31 }
0x11fb   :  { %1431 = vmatmul.f32.vlgmr.msrb.gmra.mxu1 %v6403_v17 }
0x11fc   :  { %1769 = vmatpush.msrb.mxu1 %v5916_v53  ;;  %v3946_v53 = vld [vmem:[%s8376_s4 + $0xc] ss:$0 sm:$0xff] }
0x11fe   :  { %1770 = vmatpush.msrb.mxu1 %v5922_v37 }
0x1200   :  { %1771 = vmatpush.msrb.mxu1 %v5928_v4 }
0x1202   :  { %1772 = vmatpush.msrb.mxu1 %v5934_v42 }
0x1204   :  { %1773 = vmatpush.msrb.mxu1 %v5940_v30 }
0x1206   :  { %1774 = vmatpush.msrb.mxu1 %v5946_v62 }
0x1208   :  { %1775 = vmatpush.msrb.mxu1 %v8960_v19 }
0x120a   :  { %1776 = vmatpush.msrb.mxu1 %v8961_v57 }
0x120c   :  { %1777 = vmatpush.msrb.mxu1 %v8962_v58 }
0x120e   :  { %1778 = vmatpush.msrb.mxu1 %v8963_v52 }
0x1210   :  { %1779 = vmatpush.msrb.mxu1 %v8964_v56 }
0x1212   :  { %1780 = vmatpush.msrb.mxu1 %v8965_v20 }
0x1214   :  { %1781 = vmatpush.msrb.mxu1 %v8966_v22 }
0x1216   :  { %1782 = vmatpush.msrb.mxu1 %v8967_v60 }
0x1218   :  { %1783 = vmatpush.msrb.mxu1 %v8968_v63 }
0x121a   :  { %1784 = vmatpush.msrb.mxu1 %v8969_v8 }
0x1278   :  { %v1432_v37 = vpop.f32.mrf.mxu1 }
0x1279   :  { %v1433_v4 = vadd.f32 %v3946_v53, %v1432_v37  ;;  %v9000_v53 = vld [vmem:[#allocation18_spill] sm:$0xff]  ;;  %v9001_v37 = vld [vmem:[#allocation19_spill] sm:$0xff] }
0x127b   :  { %v1435_v42 = vadd.f32 %v1433_v4, %v4920_v50  ;;  %v9002_v4 = vld [vmem:[#allocation20_spill] sm:$0xff] }
0x127d   :  { %v1436_v30 = vmin.f32 %v1435_v42, 20.0 }
0x127f   :  { %v1437_v62 = vmul.f32 1.442695, %v1436_v30 }
0x1281   :  { %4043 = vpow2.f32 %v1437_v62  ;;  %v9004_v62 = vld [vmem:[#allocation22_spill] sm:$0xff] }
0x1287   :  { %v4044_v38 = vpop.eup %4043 }
0x1288   :  { %v1439_v19 = vadd.f32 1.0, %v4044_v38 }
0x128a   :  { %v1440_v57 = vmul.f32 %v1439_v19, %v1439_v19 }
0x128c   :  { %v1442_v58 = vadd.f32 1.0, %v1440_v57  ;;  %v3794_v35 = vadd.f32 -1.0, %v1440_v57 }
0x128e   :  { %4045 = vrcp.f32 %v1442_v58  ;;  %v1454_v22 = vand.u32 2147483648, %v1442_v58  ;;  %v1452_v63 = vand.u32 2147483647, %v1442_v58  ;;  %vm1448_vm5 = vweird.f32 %v1442_v58 }
0x1290   :  { %v1455_v31 = vor.u32 1.1754944e-38, %v1454_v22  ;;  %vm1453_vm7 = vcmp.eq.f32.partialorder %v1452_v63, 8.507059e+37 }
0x1294   :  { %v4046_v52 = vpop.eup %4045 }
0x1295   :  { %v1444_v56 = vmul.f32 %v4046_v52, %v1442_v58  ;;  %vm1449_vm4 = vweird.f32 %v4046_v52 }
0x1296   :  { %vm1450_vm6 = vmor %vm1448_vm5, %vm1449_vm4 }
0x1297   :  { %v1445_v20 = vsub.f32 1.0, %v1444_v56 }
0x1299   :  { %v1446_v60 = vmul.f32 %v4046_v52, %v1445_v20 }
0x129b   :  { %v1447_v8 = vadd.f32 %v4046_v52, %v1446_v60 }
0x129d   :  { %v1451_v21 = vsel %vm1450_vm6, %v4046_v52, %v1447_v8 }
0x129e   :  { %v1456_v41 = vsel %vm1453_vm7, %v1455_v31, %v1451_v21 }
0x129f   :  { %v1457_v54 = vmul.f32 %v3794_v35, %v1456_v41 }
0x12a1   :  { %v1458_v40 = vmul.f32 %v1457_v54, %v1435_v42  ;;  %v9003_v42 = vld [vmem:[#allocation21_spill] sm:$0xff] }
0x12a3   :  { %1475 = vmatmul.f32.vlgmr.msrb.gmra.mxu2 %v1458_v40 }
0x12a4   :  { %1813 = vmatpush.msrb.mxu2 %v6016_v36 }
0x12a6   :  { %1814 = vmatpush.msrb.mxu2 %v6022_v5 }
0x12a8   :  { %1815 = vmatpush.msrb.mxu2 %v6028_v49 }
0x12aa   :  { %1816 = vmatpush.msrb.mxu2 %v6034_v3 }
0x12ac   :  { %1817 = vmatpush.msrb.mxu2 %v6040_v44 }
0x12ae   :  { %1818 = vmatpush.msrb.mxu2 %v8970_v43 }
0x12b0   :  { %1819 = vmatpush.msrb.mxu2 %v8971_v39 }
0x12b2   :  { %1820 = vmatpush.msrb.mxu2 %v8972_v48 }
0x12b4   :  { %1821 = vmatpush.msrb.mxu2 %v8973_v33 }
0x12b6   :  { %1822 = vmatpush.msrb.mxu2 %v8974_v26 }
0x12b8   :  { %1823 = vmatpush.msrb.mxu2 %v8975_v28 }
0x12ba   :  { %1824 = vmatpush.msrb.mxu2 %v8976_v55 }
0x12bc   :  { %1825 = vmatpush.msrb.mxu2 %v6167_v61 }
0x12be   :  { %1826 = vmatpush.msrb.mxu2 %v6173_v10 }
0x12c0   :  { %1827 = vmatpush.msrb.mxu2 %v6179_v12 }
0x12c2   :  { %1828 = vmatpush.msrb.mxu2 %v6185_v14 }
0x1326   :  { %v1476_v36 = vpop.f32.mrf.mxu2 }
0x1327   :  { %v1477_v5 = vadd.f32 %v6191_v11, %v1476_v36 }
0x1329   :  { %v1479_v49 = vmin.f32 %v1477_v5, 20.0 }
0x132b   :  { %v1480_v3 = vmul.f32 1.442695, %v1479_v49 }
0x132d   :  { %4047 = vpow2.f32 %v1480_v3  ;;  %v9005_v3 = vld [vmem:[#allocation23_spill] sm:$0xff] }
0x1333   :  { %v4048_v44 = vpop.eup %4047 }
0x1334   :  { %v1482_v43 = vadd.f32 1.0, %v4048_v44  ;;  %v9006_v44 = vld [vmem:[#allocation24_spill] sm:$0xff] }
0x1336   :  { %v1483_v39 = vmul.f32 %v1482_v43, %v1482_v43  ;;  %v9007_v43 = vld [vmem:[#allocation25_spill] sm:$0xff] }
0x1338   :  { %v1485_v48 = vadd.f32 1.0, %v1483_v39  ;;  %v3795_v2 = vadd.f32 -1.0, %v1483_v39  ;;  %v9008_v39 = vld [vmem:[#allocation26_spill] sm:$0xff] }
0x133a   :  { %4049 = vrcp.f32 %v1485_v48  ;;  %v1497_v55 = vand.u32 2147483648, %v1485_v48  ;;  %v1495_v59 = vand.u32 2147483647, %v1485_v48  ;;  %vm1491_vm9 = vweird.f32 %v1485_v48 }
0x133c   :  { %v1498_v18 = vor.u32 1.1754944e-38, %v1497_v55  ;;  %vm1496_vm11 = vcmp.eq.f32.partialorder %v1495_v59, 8.507059e+37  ;;  %v9013_v55 = vld [vmem:[#allocation8_spill] sm:$0xff]  ;;  %v9015_v59 = vld [vmem:[#allocation10_spill] sm:$0xff] }
0x1340   :  { %v4050_v33 = vpop.eup %4049 }
0x1341   :  { %v1487_v26 = vmul.f32 %v4050_v33, %v1485_v48  ;;  %vm1492_vm8 = vweird.f32 %v4050_v33  ;;  %v9009_v48 = vld [vmem:[#allocation16_spill] sm:$0xff] }
0x1342   :  { %vm1493_vm10 = vmor %vm1491_vm9, %vm1492_vm8 }
0x1343   :  { %v1488_v28 = vsub.f32 1.0, %v1487_v26  ;;  %v9011_v26 = vld [vmem:[#allocation6_spill] sm:$0xff] }
0x1345   :  { %v1489_v23 = vmul.f32 %v4050_v33, %v1488_v28  ;;  %v9012_v28 = vld [vmem:[#allocation7_spill] sm:$0xff] }
0x1347   :  { %v1490_v6 = vadd.f32 %v4050_v33, %v1489_v23  ;;  %v9014_v23 = vld [vmem:[#allocation9_spill] sm:$0xff] }
0x1349   :  { %v1494_v51 = vsel %vm1493_vm10, %v4050_v33, %v1490_v6  ;;  %v9010_v33 = vld [vmem:[#allocation5_spill] sm:$0xff]  ;;  %v9016_v6 = vld [vmem:[#allocation11_spill] sm:$0xff] }
0x134a   :  { %v1499_v9 = vsel %vm1496_vm11, %v1498_v18, %v1494_v51  ;;  %v9017_v18 = vld [vmem:[#allocation12_spill] sm:$0xff]  ;;  %v9019_v51 = vld [vmem:[#allocation14_spill] sm:$0xff] }
0x134b   :  { %v1500_v25 = vmul.f32 %v3795_v2, %v1499_v9  ;;  %v9018_v2 = vld [vmem:[#allocation13_spill] sm:$0xff]  ;;  %v9020_v9 = vld [vmem:[#allocation15_spill] sm:$0xff] }
0x134d   :  { %v1501_v27 = vmul.f32 %v1500_v25, %v1477_v5 }
0x134f   :  { %1518 = vmatmul.f32.vlgmr.msrb.gmra.mxu3 %v1501_v27  ;;  %v1570_v27 = vstv %s3797_s30  ;;  %s3856_s30 = sld [smem:[#allocation3 + $0x27]] }
0x1350   :  { %1856 = vmatpush.msrb.mxu3 %v6197_v7 }
0x1352   :  { %1857 = vmatpush.msrb.mxu3 %v6203_v46 }
0x1354   :  { %1858 = vmatpush.msrb.mxu3 %v6209_v47 }
0x1356   :  { %1859 = vmatpush.msrb.mxu3 %v6215_v0 }
0x1358   :  { %1860 = vmatpush.msrb.mxu3 %v6221_v32 }
0x135a   :  { %1861 = vmatpush.msrb.mxu3 %v6227_v45 }
0x135c   :  { %1862 = vmatpush.msrb.mxu3 %v6233_v34 }
0x135e   :  { %1863 = vmatpush.msrb.mxu3 %v6239_v24 }
0x1360   :  { %1864 = vmatpush.msrb.mxu3 %v6245_v1 }
0x1362   :  { %1865 = vmatpush.msrb.mxu3 %v6251_v13 }
0x1364   :  { %1866 = vmatpush.msrb.mxu3 %v6257_v15 }
0x1366   :  { %1867 = vmatpush.msrb.mxu3 %v8999_v29 }
0x1368   :  { %1868 = vmatpush.msrb.mxu3 %v9000_v53 }
0x136a   :  { %1869 = vmatpush.msrb.mxu3 %v9001_v37 }
0x136c   :  { %1870 = vmatpush.msrb.mxu3 %v9002_v4 }
0x136e   :  { %1871 = vmatpush.msrb.mxu3 %v9003_v42 }
0x13d2   :  { %v1519_v30 = vpop.f32.mrf.mxu3 }
0x13d3   :  { %v1520_v38 = vadd.f32 %v9004_v62, %v1519_v30  ;;  %v1572_v30 = vstv %s3798_s15  ;;  %s3920_s15 = sld [smem:[#allocation3 + $0x7]] }
0x13d5   :  { %v1522_v19 = vmin.f32 %v1520_v38, 20.0 }
0x13d7   :  { %v1523_v57 = vmul.f32 1.442695, %v1522_v19  ;;  %v1571_v19 = vmul.f32 %v1570_v27, %v6403_v17  ;;  %v6536_v27 = vld [vmem:[%s8377_s5 + $0x38] sm:$0xff] }
0x13d8   :  { %9023 = vst [vmem:[#allocation19_spill] sm:$0xff] %v6536_v27 }
0x13d9   :  { %4051 = vpow2.f32 %v1523_v57 }
0x13df   :  { %v4052_v58 = vpop.eup %4051 }
0x13e0   :  { %v1525_v52 = vadd.f32 1.0, %v4052_v58 }
0x13e2   :  { %v1526_v56 = vmul.f32 %v1525_v52, %v1525_v52  ;;  %v1577_v52 = vstv %s3799_s1  ;;  %s3809_s1 = sld [smem:[#allocation3 + $0x38]] }
0x13e4   :  { %v1528_v20 = vadd.f32 1.0, %v1526_v56  ;;  %v3796_v54 = vadd.f32 -1.0, %v1526_v56  ;;  %v1579_v56 = vstv %s3800_s16  ;;  %s3808_s16 = sld [smem:[#allocation3 + $0x37]] }
0x13e6   :  { %4053 = vrcp.f32 %v1528_v20  ;;  %v1540_v8 = vand.u32 2147483648, %v1528_v20  ;;  %v1538_v35 = vand.u32 2147483647, %v1528_v20  ;;  %vm1534_vm13 = vweird.f32 %v1528_v20 }
0x13e8   :  { %v1541_v41 = vor.u32 1.1754944e-38, %v1540_v8  ;;  %vm1539_vm15 = vcmp.eq.f32.partialorder %v1538_v35, 8.507059e+37  ;;  %v1580_v8 = vmul.f32 %v1579_v56, %v6403_v17  ;;  %v6500_v17 = vld [vmem:[%s8377_s5 + $0x68] sm:$0xff]  ;;  %v6578_v56 = vld [vmem:[%s8377_s5] sm:$0xff] }
0x13e9   :  { %9030 = vst [vmem:[#allocation26_spill] sm:$0xff] %v6578_v56 }
0x13ec   :  { %v4054_v22 = vpop.eup %4053 }
0x13ed   :  { %v1530_v60 = vmul.f32 %v4054_v22, %v1528_v20  ;;  %vm1535_vm12 = vweird.f32 %v4054_v22  ;;  %v3803_v20 = vld [vmem:[%s8375_s3 + $0x60] sm:$0xff] }
0x13ee   :  { %vm1536_vm14 = vmor %vm1534_vm13, %vm1535_vm12 }
0x13ef   :  { %v1531_v63 = vsub.f32 1.0, %v1530_v60 }
0x13f1   :  { %v1532_v31 = vmul.f32 %v4054_v22, %v1531_v63 }
0x13f3   :  { %v1533_v21 = vadd.f32 %v4054_v22, %v1532_v31 }
0x13f5   :  { %v1537_v40 = vsel %vm1536_vm14, %v4054_v22, %v1533_v21  ;;  %v1584_v22 = vstv %s3801_s2  ;;  %s3811_s2 = sld [smem:[#allocation3 + $0x3a]] }
0x13f6   :  { %v1542_v36 = vsel %vm1539_vm15, %v1541_v41, %v1537_v40  ;;  %v1585_v31 = vmul.f32 %v3803_v20, %v1584_v22  ;;  %v6488_v41 = vld [vmem:[%s8377_s5 + $0x78] sm:$0xff]  ;;  %v6506_v40 = vld [vmem:[%s8377_s5 + $0x60] sm:$0xff]  ;;  %v3947_v20 = vld [vmem:[%s8376_s4 + $0xb] ss:$0 sm:$0xff] }
0x13f7   :  { %v1543_v5 = vmul.f32 %v3796_v54, %v1542_v36  ;;  %v6494_v54 = vld [vmem:[%s8377_s5 + $0x70] sm:$0xff]  ;;  %v6512_v36 = vld [vmem:[%s8377_s5 + $0x58] sm:$0xff] }
0x13f9   :  { %v1544_v49 = vmul.f32 %v1543_v5, %v1520_v38  ;;  %v6518_v5 = vld [vmem:[%s8377_s5 + $0x50] sm:$0xff] }
0x13fb   :  { %1561 = vmatmul.f32.vlgmr.msra.gmra.mxu0 %v1544_v49  ;;  %v6524_v49 = vld [vmem:[%s8377_s5 + $0x48] sm:$0xff] }
0x13fc   :  { %1899 = vmatpush.msra.mxu0 %v9005_v3  ;;  %9021 = vst [vmem:[#allocation17_spill] sm:$0xff] %v6524_v49 }
0x13fe   :  { %1900 = vmatpush.msra.mxu0 %v9006_v44 }
0x1400   :  { %1901 = vmatpush.msra.mxu0 %v9007_v43 }
0x1402   :  { %1902 = vmatpush.msra.mxu0 %v9008_v39 }
0x1404   :  { %1903 = vmatpush.msra.mxu0 %v9009_v48 }
0x1406   :  { %1904 = vmatpush.msra.mxu0 %v9010_v33 }
0x1408   :  { %1905 = vmatpush.msra.mxu0 %v9011_v26 }
0x140a   :  { %1906 = vmatpush.msra.mxu0 %v9012_v28 }
0x140c   :  { %1907 = vmatpush.msra.mxu0 %v9013_v55 }
0x140e   :  { %1908 = vmatpush.msra.mxu0 %v9014_v23 }
0x1410   :  { %1909 = vmatpush.msra.mxu0 %v9015_v59 }
0x1412   :  { %1910 = vmatpush.msra.mxu0 %v9016_v6 }
0x1414   :  { %1911 = vmatpush.msra.mxu0 %v9017_v18 }
0x1416   :  { %1912 = vmatpush.msra.mxu0 %v9018_v2 }
0x1418   :  { %1913 = vmatpush.msra.mxu0 %v9019_v51 }
0x141a   :  { %1914 = vmatpush.msra.mxu0 %v9020_v9 }
0x1478   :  { %v1562_v25 = vpop.f32.mrf.mxu0 }
0x1479   :  { %v1563_v38 = vadd.f32 %v6395_v16, %v1562_v25  ;;  %v6530_v25 = vld [vmem:[%s8377_s5 + $0x40] sm:$0xff] }
0x147a   :  { %9022 = vst [vmem:[#allocation18_spill] sm:$0xff] %v6530_v25 }
0x147b   :  { %v1573_v57 = vmul.f32 %v1572_v30, %v1563_v38  ;;  %v6542_v30 = vld [vmem:[%s8377_s5 + $0x30] sm:$0xff]  ;;  %v6548_v38 = vld [vmem:[%s8377_s5 + $0x28] sm:$0xff] }
0x147c   :  { %9024 = vst [vmem:[#allocation20_spill] sm:$0xff] %v6542_v30 }
0x147d   :  { %v1574_v58 = vsub.f32 %v1571_v19, %v1573_v57  ;;  %9025 = vst [vmem:[#allocation21_spill] sm:$0xff] %v6548_v38  ;;  %v6554_v19 = vld [vmem:[%s8377_s5 + $0x20] sm:$0xff]  ;;  %v6560_v57 = vld [vmem:[%s8377_s5 + $0x18] sm:$0xff] }
0x147e   :  { %9026 = vst [vmem:[#allocation22_spill] sm:$0xff] %v6554_v19 }
0x147f   :  { %v3802_v60 = vclamps-f32 %v1574_v58, 1.0  ;;  %9027 = vst [vmem:[#allocation23_spill] sm:$0xff] %v6560_v57  ;;  %v6566_v58 = vld [vmem:[%s8377_s5 + $0x10] sm:$0xff] }
0x1480   :  { %9028 = vst [vmem:[#allocation24_spill] sm:$0xff] %v6566_v58 }
0x1481   :  { %v1578_v63 = vmul.f32 %v3802_v60, %v1577_v52  ;;  %v6572_v52 = vld [vmem:[%s8377_s5 + $0x8] sm:$0xff] }
0x1482   :  { %9029 = vst [vmem:[#allocation25_spill] sm:$0xff] %v6572_v52 }
0x1483   :  { %v1581_v35 = vadd.f32 %v1580_v8, %v1578_v63 }
0x1485   :  { %v6482_v21 = vadd.f32 %v1585_v31, %v1581_v35 }
0x1487   :  { %1608 = vmatmul.f32.vlgmr.msra.gmra.mxu1 %v6482_v21 }
0x1488   :  { %1946 = vmatpush.msra.mxu1 %v6488_v41 }
0x148a   :  { %1947 = vmatpush.msra.mxu1 %v6494_v54 }
0x148c   :  { %1948 = vmatpush.msra.mxu1 %v6500_v17 }
0x148e   :  { %1949 = vmatpush.msra.mxu1 %v6506_v40 }
0x1490   :  { %1950 = vmatpush.msra.mxu1 %v6512_v36 }
0x1492   :  { %1951 = vmatpush.msra.mxu1 %v6518_v5 }
0x1494   :  { %1952 = vmatpush.msra.mxu1 %v6524_v49 }
0x1496   :  { %1953 = vmatpush.msra.mxu1 %v6530_v25 }
0x1498   :  { %1954 = vmatpush.msra.mxu1 %v6536_v27 }
0x149a   :  { %1955 = vmatpush.msra.mxu1 %v6542_v30 }
0x149c   :  { %1956 = vmatpush.msra.mxu1 %v6548_v38 }
0x149e   :  { %1957 = vmatpush.msra.mxu1 %v6554_v19 }
0x14a0   :  { %1958 = vmatpush.msra.mxu1 %v6560_v57 }
0x14a2   :  { %1959 = vmatpush.msra.mxu1 %v6566_v58 }
0x14a4   :  { %1960 = vmatpush.msra.mxu1 %v6572_v52 }
0x14a6   :  { %1961 = vmatpush.msra.mxu1 %v6578_v56 }
0x1504   :  { %v1609_v22 = vpop.f32.mrf.mxu1 }
0x1505   :  { %v1610_v60 = vadd.f32 %v3947_v20, %v1609_v22 }
0x1507   :  { %v1612_v63 = vadd.f32 %v1610_v60, %v4920_v50 }
0x1509   :  { %v1613_v8 = vmin.f32 %v1612_v63, 20.0 }
0x150b   :  { %v1614_v31 = vmul.f32 1.442695, %v1613_v8 }
0x150d   :  { %4055 = vpow2.f32 %v1614_v31 }
0x1513   :  { %v4056_v35 = vpop.eup %4055 }
0x1514   :  { %v1616_v52 = vadd.f32 1.0, %v4056_v35 }
0x1516   :  { %v1617_v58 = vmul.f32 %v1616_v52, %v1616_v52  ;;  %v6588_v52 = vld [vmem:[%s8380_s8 + $0x78] sm:$0xff] }
0x1518   :  { %v1619_v57 = vadd.f32 1.0, %v1617_v58  ;;  %v3805_v22 = vadd.f32 -1.0, %v1617_v58  ;;  %v6636_v58 = vld [vmem:[%s8380_s8 + $0x38] sm:$0xff] }
0x1519   :  { %9034 = vst [vmem:[#allocation7_spill] sm:$0xff] %v6636_v58 }
0x151a   :  { %4057 = vrcp.f32 %v1619_v57  ;;  %v1631_v56 = vand.u32 2147483648, %v1619_v57  ;;  %v1629_v25 = vand.u32 2147483647, %v1619_v57  ;;  %vm1625_vm1 = vweird.f32 %v1619_v57 }
0x151c   :  { %v1632_v20 = vor.u32 1.1754944e-38, %v1631_v56  ;;  %vm1630_vm3 = vcmp.eq.f32.partialorder %v1629_v25, 8.507059e+37  ;;  %v6606_v25 = vld [vmem:[%s8380_s8 + $0x60] sm:$0xff]  ;;  %v6642_v56 = vld [vmem:[%s8380_s8 + $0x30] sm:$0xff] }
0x151d   :  { %9035 = vst [vmem:[#allocation8_spill] sm:$0xff] %v6642_v56 }
0x1520   :  { %v4058_v19 = vpop.eup %4057 }
0x1521   :  { %v1621_v38 = vmul.f32 %v4058_v19, %v1619_v57  ;;  %vm1626_vm0 = vweird.f32 %v4058_v19  ;;  %v6630_v57 = vld [vmem:[%s8380_s8 + $0x40] sm:$0xff] }
0x1522   :  { %vm1627_vm2 = vmor %vm1625_vm1, %vm1626_vm0  ;;  %9033 = vst [vmem:[#allocation6_spill] sm:$0xff] %v6630_v57 }
0x1523   :  { %v1622_v30 = vsub.f32 1.0, %v1621_v38  ;;  %v6618_v38 = vld [vmem:[%s8380_s8 + $0x50] sm:$0xff] }
0x1524   :  { %9031 = vst [vmem:[#allocation16_spill] sm:$0xff] %v6618_v38 }
0x1525   :  { %v1623_v27 = vmul.f32 %v4058_v19, %v1622_v30  ;;  %v6612_v30 = vld [vmem:[%s8380_s8 + $0x58] sm:$0xff] }
0x1527   :  { %v1624_v49 = vadd.f32 %v4058_v19, %v1623_v27  ;;  %v6594_v27 = vld [vmem:[%s8380_s8 + $0x70] sm:$0xff] }
0x1529   :  { %v1628_v60 = vsel %vm1627_vm2, %v4058_v19, %v1624_v49  ;;  %v6600_v49 = vld [vmem:[%s8380_s8 + $0x68] sm:$0xff] }
0x152a   :  { %v1633_v8 = vsel %vm1630_vm3, %v1632_v20, %v1628_v60  ;;  %v6624_v19 = vld [vmem:[%s8380_s8 + $0x48] sm:$0xff]  ;;  %v6654_v20 = vld [vmem:[%s8380_s8 + $0x20] sm:$0xff] }
0x152b   :  { %v1634_v31 = vmul.f32 %v3805_v22, %v1633_v8  ;;  %9032 = vst [vmem:[#allocation5_spill] sm:$0xff] %v6624_v19 }
0x152c   :  { %9037 = vst [vmem:[#allocation10_spill] sm:$0xff] %v6654_v20 }
0x152d   :  { %v1635_v35 = vmul.f32 %v1634_v31, %v1612_v63  ;;  %v6648_v63 = vld [vmem:[%s8380_s8 + $0x28] sm:$0xff] }
0x152e   :  { %9036 = vst [vmem:[#allocation9_spill] sm:$0xff] %v6648_v63 }
0x152f   :  { %1652 = vmatmul.f32.vlgmr.msra.gmra.mxu2 %v1635_v35 }
0x1530   :  { %1990 = vmatpush.msra.mxu2 %v6588_v52 }
0x1532   :  { %1991 = vmatpush.msra.mxu2 %v6594_v27 }
0x1534   :  { %1992 = vmatpush.msra.mxu2 %v6600_v49 }
0x1536   :  { %1993 = vmatpush.msra.mxu2 %v6606_v25 }
0x1538   :  { %1994 = vmatpush.msra.mxu2 %v6612_v30 }
0x153a   :  { %1995 = vmatpush.msra.mxu2 %v6618_v38 }
0x153c   :  { %1996 = vmatpush.msra.mxu2 %v6624_v19 }
0x153e   :  { %1997 = vmatpush.msra.mxu2 %v6630_v57 }
0x1540   :  { %1998 = vmatpush.msra.mxu2 %v6636_v58 }
0x1542   :  { %1999 = vmatpush.msra.mxu2 %v6642_v56 }
0x1544   :  { %2000 = vmatpush.msra.mxu2 %v6648_v63 }
0x1546   :  { %2001 = vmatpush.msra.mxu2 %v6654_v20 }
0x1548   :  { %2002 = vmatpush.msra.mxu2 %v6167_v61 }
0x154a   :  { %2003 = vmatpush.msra.mxu2 %v6173_v10 }
0x154c   :  { %2004 = vmatpush.msra.mxu2 %v6179_v12 }
0x154e   :  { %2005 = vmatpush.msra.mxu2 %v6185_v14 }
0x15b2   :  { %v1653_v22 = vpop.f32.mrf.mxu2 }
0x15b3   :  { %v1654_v60 = vadd.f32 %v6191_v11, %v1653_v22 }
0x15b5   :  { %v1656_v8 = vmin.f32 %v1654_v60, 20.0 }
0x15b7   :  { %v1657_v31 = vmul.f32 1.442695, %v1656_v8 }
0x15b9   :  { %4059 = vpow2.f32 %v1657_v31 }
0x15bf   :  { %v4060_v35 = vpop.eup %4059 }
0x15c0   :  { %v1659_v63 = vadd.f32 1.0, %v4060_v35 }
0x15c2   :  { %v1660_v56 = vmul.f32 %v1659_v63, %v1659_v63  ;;  %v9040_v63 = vld [vmem:[#allocation19_spill] sm:$0xff] }
0x15c4   :  { %v1662_v58 = vadd.f32 1.0, %v1660_v56  ;;  %v3806_v11 = vadd.f32 -1.0, %v1660_v56 }
0x15c6   :  { %4061 = vrcp.f32 %v1662_v58  ;;  %v1674_v19 = vand.u32 2147483648, %v1662_v58  ;;  %v1672_v12 = vand.u32 2147483647, %v1662_v58  ;;  %vm1668_vm5 = vweird.f32 %v1662_v58 }
0x15c8   :  { %v1675_v14 = vor.u32 1.1754944e-38, %v1674_v19  ;;  %vm1673_vm7 = vcmp.eq.f32.partialorder %v1672_v12, 8.507059e+37  ;;  %v9045_v12 = vld [vmem:[#allocation24_spill] sm:$0xff] }
0x15cc   :  { %v4062_v20 = vpop.eup %4061 }
0x15cd   :  { %v1664_v57 = vmul.f32 %v4062_v20, %v1662_v58  ;;  %vm1669_vm4 = vweird.f32 %v4062_v20 }
0x15ce   :  { %vm1670_vm6 = vmor %vm1668_vm5, %vm1669_vm4 }
0x15cf   :  { %v1665_v61 = vsub.f32 1.0, %v1664_v57 }
0x15d1   :  { %v1666_v10 = vmul.f32 %v4062_v20, %v1665_v61  ;;  %v9043_v61 = vld [vmem:[#allocation22_spill] sm:$0xff] }
0x15d3   :  { %v1667_v38 = vadd.f32 %v4062_v20, %v1666_v10  ;;  %v9044_v10 = vld [vmem:[#allocation23_spill] sm:$0xff] }
0x15d5   :  { %v1671_v22 = vsel %vm1670_vm6, %v4062_v20, %v1667_v38  ;;  %v9041_v20 = vld [vmem:[#allocation20_spill] sm:$0xff] }
0x15d6   :  { %v1676_v8 = vsel %vm1673_vm7, %v1675_v14, %v1671_v22  ;;  %v9046_v14 = vld [vmem:[#allocation25_spill] sm:$0xff]  ;;  %v3948_v22 = vld [vmem:[%s8376_s4 + $0xa] ss:$0 sm:$0xff] }
0x15d7   :  { %v1677_v31 = vmul.f32 %v3806_v11, %v1676_v8  ;;  %v9047_v11 = vld [vmem:[#allocation26_spill] sm:$0xff] }
0x15d9   :  { %v1678_v35 = vmul.f32 %v1677_v31, %v1654_v60  ;;  %v9042_v60 = vld [vmem:[#allocation21_spill] sm:$0xff] }
0x15db   :  { %1695 = vmatmul.f32.vlgmr.msra.gmra.mxu3 %v1678_v35 }
0x15dc   :  { %2033 = vmatpush.msra.mxu3 %v6197_v7 }
0x15de   :  { %2034 = vmatpush.msra.mxu3 %v6203_v46 }
0x15e0   :  { %2035 = vmatpush.msra.mxu3 %v6209_v47 }
0x15e2   :  { %2036 = vmatpush.msra.mxu3 %v6215_v0 }
0x15e4   :  { %2037 = vmatpush.msra.mxu3 %v6221_v32 }
0x15e6   :  { %2038 = vmatpush.msra.mxu3 %v6227_v45 }
0x15e8   :  { %2039 = vmatpush.msra.mxu3 %v6233_v34 }
0x15ea   :  { %2040 = vmatpush.msra.mxu3 %v6239_v24 }
0x15ec   :  { %2041 = vmatpush.msra.mxu3 %v6245_v1 }
0x15ee   :  { %2042 = vmatpush.msra.mxu3 %v6251_v13 }
0x15f0   :  { %2043 = vmatpush.msra.mxu3 %v6257_v15 }
0x15f2   :  { %2044 = vmatpush.msra.mxu3 %v8999_v29 }
0x15f4   :  { %2045 = vmatpush.msra.mxu3 %v9000_v53 }
0x15f6   :  { %2046 = vmatpush.msra.mxu3 %v9001_v37 }
0x15f8   :  { %2047 = vmatpush.msra.mxu3 %v9002_v4 }
0x15fa   :  { %2048 = vmatpush.msra.mxu3 %v9003_v42 }
0x165e   :  { %v1696_v7 = vpop.f32.mrf.mxu3 }
0x165f   :  { %v1697_v46 = vadd.f32 %v9004_v62, %v1696_v7 }
0x1661   :  { %v1699_v47 = vmin.f32 %v1697_v46, 20.0 }
0x1663   :  { %v1700_v0 = vmul.f32 1.442695, %v1699_v47 }
0x1665   :  { %4063 = vpow2.f32 %v1700_v0 }
0x166b   :  { %v4064_v32 = vpop.eup %4063 }
0x166c   :  { %v1702_v45 = vadd.f32 1.0, %v4064_v32 }
0x166e   :  { %v1703_v34 = vmul.f32 %v1702_v45, %v1702_v45 }
0x1670   :  { %v1705_v24 = vadd.f32 1.0, %v1703_v34  ;;  %v3807_v62 = vadd.f32 -1.0, %v1703_v34 }
0x1672   :  { %4065 = vrcp.f32 %v1705_v24  ;;  %v1717_v29 = vand.u32 2147483648, %v1705_v24  ;;  %v1715_v37 = vand.u32 2147483647, %v1705_v24  ;;  %vm1711_vm9 = vweird.f32 %v1705_v24 }
0x1674   :  { %v1718_v42 = vor.u32 1.1754944e-38, %v1717_v29  ;;  %vm1716_vm11 = vcmp.eq.f32.partialorder %v1715_v37, 8.507059e+37 }
0x1678   :  { %v4066_v1 = vpop.eup %4065 }
0x1679   :  { %v1707_v13 = vmul.f32 %v4066_v1, %v1705_v24  ;;  %vm1712_vm8 = vweird.f32 %v4066_v1 }
0x167a   :  { %vm1713_vm10 = vmor %vm1711_vm9, %vm1712_vm8 }
0x167b   :  { %v1708_v15 = vsub.f32 1.0, %v1707_v13 }
0x167d   :  { %v1709_v53 = vmul.f32 %v4066_v1, %v1708_v15 }
0x167f   :  { %v1710_v4 = vadd.f32 %v4066_v1, %v1709_v53 }
0x1681   :  { %v1714_v38 = vsel %vm1713_vm10, %v4066_v1, %v1710_v4 }
0x1682   :  { %v1719_v19 = vsel %vm1716_vm11, %v1718_v42, %v1714_v38 }
0x1683   :  { %v1720_v57 = vmul.f32 %v3807_v62, %v1719_v19 }
0x1685   :  { %v1721_v58 = vmul.f32 %v1720_v57, %v1697_v46  ;;  %v9048_v57 = vld [vmem:[#allocation16_spill] sm:$0xff] }
0x1687   :  { %1738 = vmatmul.f32.vlgmr.msrb.gmra.mxu0 %v1721_v58  ;;  %v9049_v58 = vld [vmem:[#allocation5_spill] sm:$0xff] }
0x1688   :  { %2076 = vmatpush.msrb.mxu0 %v9005_v3 }
0x168a   :  { %2077 = vmatpush.msrb.mxu0 %v9006_v44  ;;  %v1747_v44 = vstv %s3808_s16  ;;  %s3922_s16 = sld [smem:[#allocation3 + $0x9]] }
0x168c   :  { %2078 = vmatpush.msrb.mxu0 %v9007_v43  ;;  %v1749_v43 = vstv %s3809_s1  ;;  %s3819_s1 = sld [smem:[#allocation3 + $0x32]] }
0x168e   :  { %2079 = vmatpush.msrb.mxu0 %v9008_v39 }
0x1690   :  { %2080 = vmatpush.msrb.mxu0 %v9009_v48  ;;  %v1748_v48 = vmul.f32 %v1747_v44, %v6482_v21  ;;  %v9051_v44 = vld [vmem:[#allocation7_spill] sm:$0xff] }
0x1692   :  { %2081 = vmatpush.msrb.mxu0 %v9010_v33 }
0x1694   :  { %2082 = vmatpush.msrb.mxu0 %v9011_v26 }
0x1696   :  { %2083 = vmatpush.msrb.mxu0 %v9012_v28  ;;  %v1754_v28 = vstv %s3810_s6  ;;  %s3822_s6 = sld [smem:[#allocation3 + $0x35]] }
0x1698   :  { %2084 = vmatpush.msrb.mxu0 %v9013_v55  ;;  %v1756_v55 = vstv %s3811_s2  ;;  %s3820_s2 = sld [smem:[#allocation3 + $0x33]] }
0x169a   :  { %2085 = vmatpush.msrb.mxu0 %v9014_v23  ;;  %v3814_v23 = vld [vmem:[%s8375_s3 + $0x58] sm:$0xff] }
0x169c   :  { %2086 = vmatpush.msrb.mxu0 %v9015_v59  ;;  %v1761_v59 = vstv %s3812_s17  ;;  %s3821_s17 = sld [smem:[#allocation3 + $0x34]] }
0x169e   :  { %2087 = vmatpush.msrb.mxu0 %v9016_v6 }
0x16a0   :  { %2088 = vmatpush.msrb.mxu0 %v9017_v18 }
0x16a2   :  { %2089 = vmatpush.msrb.mxu0 %v9018_v2  ;;  %v1757_v2 = vmul.f32 %v1756_v55, %v6482_v21  ;;  %v9039_v21 = vld [vmem:[#allocation18_spill] sm:$0xff]  ;;  %v6757_v55 = vld [vmem:[%s8380_s8] sm:$0xff] }
0x16a4   :  { %2090 = vmatpush.msrb.mxu0 %v9019_v51  ;;  %v1762_v51 = vmul.f32 %v3814_v23, %v1761_v59  ;;  %v6763_v59 = vld [vmem:[%s8381_s9] ss:$0 sm:$0xff] }
0x16a6   :  { %2091 = vmatpush.msrb.mxu0 %v9020_v9 }
0x1704   :  { %v1739_v3 = vpop.f32.mrf.mxu0 }
0x1705   :  { %v1740_v39 = vadd.f32 %v6395_v16, %v1739_v3  ;;  %v9038_v16 = vld [vmem:[#allocation17_spill] sm:$0xff]  ;;  %v9050_v3 = vld [vmem:[#allocation6_spill] sm:$0xff] }
0x1707   :  { %v1750_v33 = vmul.f32 %v1749_v43, %v1740_v39  ;;  %v9052_v43 = vld [vmem:[#allocation8_spill] sm:$0xff]  ;;  %v9053_v39 = vld [vmem:[#allocation9_spill] sm:$0xff] }
0x1709   :  { %v1751_v26 = vsub.f32 %v1748_v48, %v1750_v33  ;;  %v9054_v48 = vld [vmem:[#allocation10_spill] sm:$0xff]  ;;  %v6739_v33 = vld [vmem:[%s8380_s8 + $0x18] sm:$0xff] }
0x170b   :  { %v3813_v6 = vclamps-f32 %v1751_v26, 1.0  ;;  %v6745_v26 = vld [vmem:[%s8380_s8 + $0x10] sm:$0xff] }
0x170d   :  { %v1755_v18 = vmul.f32 %v3813_v6, %v1754_v28  ;;  %v6751_v28 = vld [vmem:[%s8380_s8 + $0x8] sm:$0xff] }
0x170f   :  { %v1758_v9 = vadd.f32 %v1757_v2, %v1755_v18 }
0x1711   :  { %v6701_v56 = vadd.f32 %v1762_v51, %v1758_v9 }
0x1713   :  { %1785 = vmatmul.f32.vlgmr.msrb.gmra.mxu1 %v6701_v56 }
0x1714   :  { %2123 = vmatpush.msrb.mxu1 %v6488_v41 }
0x1716   :  { %2124 = vmatpush.msrb.mxu1 %v6494_v54 }
0x1718   :  { %2125 = vmatpush.msrb.mxu1 %v6500_v17 }
0x171a   :  { %2126 = vmatpush.msrb.mxu1 %v6506_v40 }
0x171c   :  { %2127 = vmatpush.msrb.mxu1 %v6512_v36 }
0x171e   :  { %2128 = vmatpush.msrb.mxu1 %v6518_v5 }
0x1720   :  { %2129 = vmatpush.msrb.mxu1 %v9038_v16 }
0x1722   :  { %2130 = vmatpush.msrb.mxu1 %v9039_v21 }
0x1724   :  { %2131 = vmatpush.msrb.mxu1 %v9040_v63 }
0x1726   :  { %2132 = vmatpush.msrb.mxu1 %v9041_v20 }
0x1728   :  { %2133 = vmatpush.msrb.mxu1 %v9042_v60 }
0x172a   :  { %2134 = vmatpush.msrb.mxu1 %v9043_v61 }
0x172c   :  { %2135 = vmatpush.msrb.mxu1 %v9044_v10 }
0x172e   :  { %2136 = vmatpush.msrb.mxu1 %v9045_v12 }
0x1730   :  { %2137 = vmatpush.msrb.mxu1 %v9046_v14 }
0x1732   :  { %2138 = vmatpush.msrb.mxu1 %v9047_v11 }
0x1790   :  { %v1786_v8 = vpop.f32.mrf.mxu1 }
0x1791   :  { %v1787_v31 = vadd.f32 %v3948_v22, %v1786_v8 }
0x1793   :  { %v1789_v35 = vadd.f32 %v1787_v31, %v4920_v50 }
0x1795   :  { %v1790_v7 = vmin.f32 %v1789_v35, 20.0 }
0x1797   :  { %v1791_v46 = vmul.f32 1.442695, %v1790_v7 }
0x1799   :  { %4067 = vpow2.f32 %v1791_v46 }
0x179f   :  { %v4068_v47 = vpop.eup %4067 }
0x17a0   :  { %v1793_v0 = vadd.f32 1.0, %v4068_v47 }
0x17a2   :  { %v1794_v32 = vmul.f32 %v1793_v0, %v1793_v0 }
0x17a4   :  { %v1796_v45 = vadd.f32 1.0, %v1794_v32  ;;  %v3816_v4 = vadd.f32 -1.0, %v1794_v32 }
0x17a6   :  { %4069 = vrcp.f32 %v1796_v45  ;;  %v1808_v13 = vand.u32 2147483648, %v1796_v45  ;;  %v1806_v29 = vand.u32 2147483647, %v1796_v45  ;;  %vm1802_vm13 = vweird.f32 %v1796_v45 }
0x17a8   :  { %v1809_v37 = vor.u32 1.1754944e-38, %v1808_v13  ;;  %vm1807_vm15 = vcmp.eq.f32.partialorder %v1806_v29, 8.507059e+37  ;;  %v6769_v29 = vld [vmem:[%s8382_s10 + $0x78] sm:$0xff] }
0x17ac   :  { %v4070_v34 = vpop.eup %4069 }
0x17ad   :  { %v1798_v24 = vmul.f32 %v4070_v34, %v1796_v45  ;;  %vm1803_vm12 = vweird.f32 %v4070_v34 }
0x17ae   :  { %vm1804_vm14 = vmor %vm1802_vm13, %vm1803_vm12 }
0x17af   :  { %v1799_v1 = vsub.f32 1.0, %v1798_v24 }
0x17b1   :  { %v1800_v15 = vmul.f32 %v4070_v34, %v1799_v1 }
0x17b3   :  { %v1801_v53 = vadd.f32 %v4070_v34, %v1800_v15 }
0x17b5   :  { %v1805_v42 = vsel %vm1804_vm14, %v4070_v34, %v1801_v53  ;;  %v6775_v53 = vld [vmem:[%s8382_s10 + $0x70] sm:$0xff] }
0x17b6   :  { %v1810_v62 = vsel %vm1807_vm15, %v1809_v37, %v1805_v42  ;;  %v6781_v37 = vld [vmem:[%s8382_s10 + $0x68] sm:$0xff]  ;;  %v6793_v42 = vld [vmem:[%s8382_s10 + $0x58] sm:$0xff] }
0x17b7   :  { %v1811_v38 = vmul.f32 %v3816_v4, %v1810_v62  ;;  %v6787_v4 = vld [vmem:[%s8382_s10 + $0x60] sm:$0xff]  ;;  %v6799_v62 = vld [vmem:[%s8382_s10 + $0x50] sm:$0xff] }
0x17b9   :  { %v1812_v19 = vmul.f32 %v1811_v38, %v1789_v35  ;;  %v6805_v38 = vld [vmem:[%s8382_s10 + $0x48] sm:$0xff] }
0x17bb   :  { %1829 = vmatmul.f32.vlgmr.msrb.gmra.mxu2 %v1812_v19  ;;  %v6811_v19 = vld [vmem:[%s8382_s10 + $0x40] sm:$0xff] }
0x17bc   :  { %2167 = vmatpush.msrb.mxu2 %v6588_v52 }
0x17be   :  { %2168 = vmatpush.msrb.mxu2 %v6594_v27 }
0x17c0   :  { %2169 = vmatpush.msrb.mxu2 %v6600_v49 }
0x17c2   :  { %2170 = vmatpush.msrb.mxu2 %v6606_v25 }
0x17c4   :  { %2171 = vmatpush.msrb.mxu2 %v6612_v30 }
0x17c6   :  { %2172 = vmatpush.msrb.mxu2 %v9048_v57 }
0x17c8   :  { %2173 = vmatpush.msrb.mxu2 %v9049_v58 }
0x17ca   :  { %2174 = vmatpush.msrb.mxu2 %v9050_v3 }
0x17cc   :  { %2175 = vmatpush.msrb.mxu2 %v9051_v44 }
0x17ce   :  { %2176 = vmatpush.msrb.mxu2 %v9052_v43 }
0x17d0   :  { %2177 = vmatpush.msrb.mxu2 %v9053_v39 }
0x17d2   :  { %2178 = vmatpush.msrb.mxu2 %v9054_v48 }
0x17d4   :  { %2179 = vmatpush.msrb.mxu2 %v6739_v33 }
0x17d6   :  { %2180 = vmatpush.msrb.mxu2 %v6745_v26 }
0x17d8   :  { %2181 = vmatpush.msrb.mxu2 %v6751_v28 }
0x17da   :  { %2182 = vmatpush.msrb.mxu2 %v6757_v55 }
0x183e   :  { %v1830_v23 = vpop.f32.mrf.mxu2 }
0x183f   :  { %v1831_v6 = vadd.f32 %v6763_v59, %v1830_v23  ;;  %v6817_v23 = vld [vmem:[%s8382_s10 + $0x38] sm:$0xff] }
0x1841   :  { %v1833_v18 = vmin.f32 %v1831_v6, 20.0 }
0x1843   :  { %v1834_v2 = vmul.f32 1.442695, %v1833_v18  ;;  %v6829_v18 = vld [vmem:[%s8382_s10 + $0x28] sm:$0xff] }
0x1845   :  { %4071 = vpow2.f32 %v1834_v2  ;;  %v6835_v2 = vld [vmem:[%s8382_s10 + $0x20] sm:$0xff] }
0x1846   :  { %9055 = vst [vmem:[#allocation11_spill] sm:$0xff] %v6835_v2 }
0x184b   :  { %v4072_v51 = vpop.eup %4071 }
0x184c   :  { %v1836_v9 = vadd.f32 1.0, %v4072_v51  ;;  %v6841_v51 = vld [vmem:[%s8382_s10 + $0x18] sm:$0xff] }
0x184d   :  { %9056 = vst [vmem:[#allocation12_spill] sm:$0xff] %v6841_v51 }
0x184e   :  { %v1837_v22 = vmul.f32 %v1836_v9, %v1836_v9  ;;  %v6847_v9 = vld [vmem:[%s8382_s10 + $0x10] sm:$0xff] }
0x184f   :  { %9057 = vst [vmem:[#allocation13_spill] sm:$0xff] %v6847_v9 }
0x1850   :  { %v1839_v8 = vadd.f32 1.0, %v1837_v22  ;;  %v3817_v34 = vadd.f32 -1.0, %v1837_v22  ;;  %v6853_v22 = vld [vmem:[%s8382_s10 + $0x8] sm:$0xff] }
0x1851   :  { %9058 = vst [vmem:[#allocation14_spill] sm:$0xff] %v6853_v22 }
0x1852   :  { %4073 = vrcp.f32 %v1839_v8  ;;  %v1851_v46 = vand.u32 2147483648, %v1839_v8  ;;  %v1849_v0 = vand.u32 2147483647, %v1839_v8  ;;  %vm1845_vm1 = vweird.f32 %v1839_v8 }
0x1854   :  { %v1852_v45 = vor.u32 1.1754944e-38, %v1851_v46  ;;  %vm1850_vm3 = vcmp.eq.f32.partialorder %v1849_v0, 8.507059e+37 }
0x1858   :  { %v4074_v31 = vpop.eup %4073 }
0x1859   :  { %v1841_v35 = vmul.f32 %v4074_v31, %v1839_v8  ;;  %vm1846_vm0 = vweird.f32 %v4074_v31  ;;  %v6859_v8 = vld [vmem:[%s8382_s10] sm:$0xff] }
0x185a   :  { %vm1847_vm2 = vmor %vm1845_vm1, %vm1846_vm0  ;;  %9059 = vst [vmem:[#allocation15_spill] sm:$0xff] %v6859_v8 }
0x185b   :  { %v1842_v7 = vsub.f32 1.0, %v1841_v35  ;;  %v6865_v35 = vld [vmem:[%s8383_s11] ss:$0 sm:$0xff] }
0x185c   :  { %9060 = vst [vmem:[#allocation17_spill] sm:$0xff] %v6865_v35 }
0x185d   :  { %v1843_v47 = vmul.f32 %v4074_v31, %v1842_v7 }
0x185f   :  { %v1844_v32 = vadd.f32 %v4074_v31, %v1843_v47 }
0x1861   :  { %v1848_v24 = vsel %vm1847_vm2, %v4074_v31, %v1844_v32 }
0x1862   :  { %v1853_v1 = vsel %vm1850_vm3, %v1852_v45, %v1848_v24 }
0x1863   :  { %v1854_v13 = vmul.f32 %v3817_v34, %v1853_v1 }
0x1865   :  { %v1855_v15 = vmul.f32 %v1854_v13, %v1831_v6  ;;  %v6823_v6 = vld [vmem:[%s8382_s10 + $0x30] sm:$0xff] }
0x1867   :  { %1872 = vmatmul.f32.vlgmr.msrb.gmra.mxu3 %v1855_v15 }
0x1868   :  { %2210 = vmatpush.msrb.mxu3 %v6769_v29 }
0x186a   :  { %2211 = vmatpush.msrb.mxu3 %v6775_v53 }
0x186c   :  { %2212 = vmatpush.msrb.mxu3 %v6781_v37 }
0x186e   :  { %2213 = vmatpush.msrb.mxu3 %v6787_v4 }
0x1870   :  { %2214 = vmatpush.msrb.mxu3 %v6793_v42 }
0x1872   :  { %2215 = vmatpush.msrb.mxu3 %v6799_v62 }
0x1874   :  { %2216 = vmatpush.msrb.mxu3 %v6805_v38 }
0x1876   :  { %2217 = vmatpush.msrb.mxu3 %v6811_v19 }
0x1878   :  { %2218 = vmatpush.msrb.mxu3 %v6817_v23 }
0x187a   :  { %2219 = vmatpush.msrb.mxu3 %v6823_v6 }
0x187c   :  { %2220 = vmatpush.msrb.mxu3 %v6829_v18 }
0x187e   :  { %2221 = vmatpush.msrb.mxu3 %v6835_v2 }
0x1880   :  { %2222 = vmatpush.msrb.mxu3 %v6841_v51 }
0x1882   :  { %2223 = vmatpush.msrb.mxu3 %v6847_v9 }
0x1884   :  { %2224 = vmatpush.msrb.mxu3 %v6853_v22 }
0x1886   :  { %2225 = vmatpush.msrb.mxu3 %v6859_v8 }
0x18ea   :  { %v1873_v31 = vpop.f32.mrf.mxu3 }
0x18eb   :  { %v1874_v7 = vadd.f32 %v6865_v35, %v1873_v31 }
0x18ed   :  { %v1876_v46 = vmin.f32 %v1874_v7, 20.0 }
0x18ef   :  { %v1877_v47 = vmul.f32 1.442695, %v1876_v46 }
0x18f1   :  { %4075 = vpow2.f32 %v1877_v47 }
0x18f7   :  { %v4076_v0 = vpop.eup %4075 }
0x18f8   :  { %v1879_v32 = vadd.f32 1.0, %v4076_v0 }
0x18fa   :  { %v1880_v45 = vmul.f32 %v1879_v32, %v1879_v32  ;;  %v6871_v32 = vld [vmem:[%s8384_s12 + $0x78] sm:$0xff] }
0x18fb   :  { %9061 = vst [vmem:[#allocation18_spill] sm:$0xff] %v6871_v32 }
0x18fc   :  { %v1882_v34 = vadd.f32 1.0, %v1880_v45  ;;  %v3818_v31 = vadd.f32 -1.0, %v1880_v45  ;;  %v6913_v45 = vld [vmem:[%s8384_s12 + $0x40] sm:$0xff] }
0x18fd   :  { %9068 = vst [vmem:[#allocation25_spill] sm:$0xff] %v6913_v45 }
0x18fe   :  { %4077 = vrcp.f32 %v1882_v34  ;;  %v1894_v15 = vand.u32 2147483648, %v1882_v34  ;;  %v1892_v22 = vand.u32 2147483647, %v1882_v34  ;;  %vm1888_vm5 = vweird.f32 %v1882_v34 }
0x1900   :  { %v1895_v51 = vor.u32 1.1754944e-38, %v1894_v15  ;;  %vm1893_vm7 = vcmp.eq.f32.partialorder %v1892_v22, 8.507059e+37  ;;  %v6895_v22 = vld [vmem:[%s8384_s12 + $0x58] sm:$0xff] }
0x1901   :  { %9065 = vst [vmem:[#allocation22_spill] sm:$0xff] %v6895_v22  ;;  %v6943_v15 = vld [vmem:[%s8384_s12 + $0x18] sm:$0xff] }
0x1902   :  { %9073 = vst [vmem:[#allocation7_spill] sm:$0xff] %v6943_v15 }
0x1904   :  { %v4078_v24 = vpop.eup %4077 }
0x1905   :  { %v1884_v1 = vmul.f32 %v4078_v24, %v1882_v34  ;;  %vm1889_vm4 = vweird.f32 %v4078_v24  ;;  %v6919_v34 = vld [vmem:[%s8384_s12 + $0x38] sm:$0xff] }
0x1906   :  { %vm1890_vm6 = vmor %vm1888_vm5, %vm1889_vm4  ;;  %9069 = vst [vmem:[#allocation26_spill] sm:$0xff] %v6919_v34 }
0x1907   :  { %v1885_v13 = vsub.f32 1.0, %v1884_v1  ;;  %v6931_v1 = vld [vmem:[%s8384_s12 + $0x28] sm:$0xff] }
0x1908   :  { %9071 = vst [vmem:[#allocation5_spill] sm:$0xff] %v6931_v1 }
0x1909   :  { %v1886_v8 = vmul.f32 %v4078_v24, %v1885_v13  ;;  %v6937_v13 = vld [vmem:[%s8384_s12 + $0x20] sm:$0xff] }
0x190a   :  { %9072 = vst [vmem:[#allocation6_spill] sm:$0xff] %v6937_v13 }
0x190b   :  { %v1887_v9 = vadd.f32 %v4078_v24, %v1886_v8  ;;  %v6877_v8 = vld [vmem:[%s8384_s12 + $0x70] sm:$0xff] }
0x190c   :  { %9062 = vst [vmem:[#allocation19_spill] sm:$0xff] %v6877_v8 }
0x190d   :  { %v1891_v35 = vsel %vm1890_vm6, %v4078_v24, %v1887_v9  ;;  %v6889_v9 = vld [vmem:[%s8384_s12 + $0x60] sm:$0xff]  ;;  %v6925_v24 = vld [vmem:[%s8384_s12 + $0x30] sm:$0xff] }
0x190e   :  { %v1896_v46 = vsel %vm1893_vm7, %v1895_v51, %v1891_v35  ;;  %v6883_v51 = vld [vmem:[%s8384_s12 + $0x68] sm:$0xff]  ;;  %9064 = vst [vmem:[#allocation21_spill] sm:$0xff] %v6889_v9  ;;  %v6901_v35 = vld [vmem:[%s8384_s12 + $0x50] sm:$0xff] }
0x190f   :  { %v1897_v47 = vmul.f32 %v3818_v31, %v1896_v46  ;;  %9063 = vst [vmem:[#allocation20_spill] sm:$0xff] %v6883_v51  ;;  %v6949_v31 = vld [vmem:[%s8384_s12 + $0x10] sm:$0xff]  ;;  %v6955_v46 = vld [vmem:[%s8384_s12 + $0x8] sm:$0xff] }
0x1910   :  { %9066 = vst [vmem:[#allocation23_spill] sm:$0xff] %v6901_v35 }
0x1911   :  { %v1898_v0 = vmul.f32 %v1897_v47, %v1874_v7  ;;  %v6907_v7 = vld [vmem:[%s8384_s12 + $0x48] sm:$0xff]  ;;  %9070 = vst [vmem:[#allocation16_spill] sm:$0xff] %v6925_v24  ;;  %v6961_v47 = vld [vmem:[%s8384_s12] sm:$0xff] }
0x1912   :  { %9067 = vst [vmem:[#allocation24_spill] sm:$0xff] %v6907_v7 }
0x1913   :  { %1915 = vmatmul.f32.vlgmr.msra.gmra.mxu0 %v1898_v0  ;;  %9074 = vst [vmem:[#allocation8_spill] sm:$0xff] %v6949_v31 }
0x1914   :  { %2253 = vmatpush.msra.mxu0 %v6871_v32  ;;  %9075 = vst [vmem:[#allocation9_spill] sm:$0xff] %v6955_v46 }
0x1915   :  { %9076 = vst [vmem:[#allocation10_spill] sm:$0xff] %v6961_v47 }
0x1916   :  { %2254 = vmatpush.msra.mxu0 %v6877_v8 }
0x1918   :  { %2255 = vmatpush.msra.mxu0 %v6883_v51 }
0x191a   :  { %2256 = vmatpush.msra.mxu0 %v6889_v9 }
0x191c   :  { %2257 = vmatpush.msra.mxu0 %v6895_v22 }
0x191e   :  { %2258 = vmatpush.msra.mxu0 %v6901_v35  ;;  %v1938_v35 = vstv %s3823_s18  ;;  %s3863_s18 = sld [smem:[#allocation3 + $0x1e]] }
0x1920   :  { %2259 = vmatpush.msra.mxu0 %v6907_v7  ;;  %v3825_v7 = vld [vmem:[%s8375_s3 + $0x50] sm:$0xff] }
0x1921   :  { %v1939_v8 = vmul.f32 %v3825_v7, %v1938_v35 }
0x1922   :  { %2260 = vmatpush.msra.mxu0 %v6913_v45  ;;  %v1933_v45 = vstv %s3822_s6 }
0x1923   :  { %v1934_v51 = vmul.f32 %v1933_v45, %v6701_v56 }
0x1924   :  { %2261 = vmatpush.msra.mxu0 %v6919_v34 }
0x1926   :  { %2262 = vmatpush.msra.mxu0 %v6925_v24 }
0x1928   :  { %2263 = vmatpush.msra.mxu0 %v6931_v1 }
0x192a   :  { %2264 = vmatpush.msra.mxu0 %v6937_v13  ;;  %v6967_v13 = vld [vmem:[%s8385_s13] ss:$0 sm:$0xff] }
0x192c   :  { %2265 = vmatpush.msra.mxu0 %v6943_v15  ;;  %v1926_v15 = vstv %s3820_s2 }
0x192e   :  { %2266 = vmatpush.msra.mxu0 %v6949_v31  ;;  %v1924_v31 = vstv %s3819_s1 }
0x192f   :  { %v1925_v1 = vmul.f32 %v1924_v31, %v6701_v56 }
0x1930   :  { %2267 = vmatpush.msra.mxu0 %v6955_v46 }
0x1932   :  { %2268 = vmatpush.msra.mxu0 %v6961_v47  ;;  %v1931_v47 = vstv %s3821_s17 }
0x1990   :  { %v1916_v0 = vpop.f32.mrf.mxu0 }
0x1991   :  { %v1917_v46 = vadd.f32 %v6967_v13, %v1916_v0  ;;  %v9077_v0 = vld [vmem:[#allocation11_spill] sm:$0xff] }
0x1993   :  { %v1927_v24 = vmul.f32 %v1926_v15, %v1917_v46 }
0x1995   :  { %v1928_v34 = vsub.f32 %v1925_v1, %v1927_v24 }
0x1997   :  { %v3824_v22 = vclamps-f32 %v1928_v34, 1.0 }
0x1999   :  { %v1932_v9 = vmul.f32 %v3824_v22, %v1931_v47 }
0x199b   :  { %v1935_v32 = vadd.f32 %v1934_v51, %v1932_v9 }
0x199d   :  { %v6975_v2 = vadd.f32 %v1939_v8, %v1935_v32 }
0x199f   :  { %1962 = vmatmul.f32.vlgmr.msra.gmra.mxu1 %v6975_v2 }
0x19a0   :  { %2300 = vmatpush.msra.mxu1 %v6488_v41  ;;  %v3949_v41 = vld [vmem:[%s8376_s4 + $0x9] ss:$0 sm:$0xff] }
0x19a2   :  { %2301 = vmatpush.msra.mxu1 %v6494_v54 }
0x19a4   :  { %2302 = vmatpush.msra.mxu1 %v6500_v17 }
0x19a6   :  { %2303 = vmatpush.msra.mxu1 %v6506_v40 }
0x19a8   :  { %2304 = vmatpush.msra.mxu1 %v6512_v36 }
0x19aa   :  { %2305 = vmatpush.msra.mxu1 %v6518_v5 }
0x19ac   :  { %2306 = vmatpush.msra.mxu1 %v9038_v16 }
0x19ae   :  { %2307 = vmatpush.msra.mxu1 %v9039_v21 }
0x19b0   :  { %2308 = vmatpush.msra.mxu1 %v9040_v63 }
0x19b2   :  { %2309 = vmatpush.msra.mxu1 %v9041_v20 }
0x19b4   :  { %2310 = vmatpush.msra.mxu1 %v9042_v60 }
0x19b6   :  { %2311 = vmatpush.msra.mxu1 %v9043_v61 }
0x19b8   :  { %2312 = vmatpush.msra.mxu1 %v9044_v10 }
0x19ba   :  { %2313 = vmatpush.msra.mxu1 %v9045_v12 }
0x19bc   :  { %2314 = vmatpush.msra.mxu1 %v9046_v14 }
0x19be   :  { %2315 = vmatpush.msra.mxu1 %v9047_v11 }
0x1a1c   :  { %v1963_v54 = vpop.f32.mrf.mxu1 }
0x1a1d   :  { %v1964_v17 = vadd.f32 %v3949_v41, %v1963_v54  ;;  %v9078_v41 = vld [vmem:[#allocation12_spill] sm:$0xff]  ;;  %v9079_v54 = vld [vmem:[#allocation13_spill] sm:$0xff] }
0x1a1f   :  { %v1966_v40 = vadd.f32 %v1964_v17, %v4920_v50  ;;  %v9080_v17 = vld [vmem:[#allocation14_spill] sm:$0xff] }
0x1a21   :  { %v1967_v36 = vmin.f32 %v1966_v40, 20.0 }
0x1a23   :  { %v1968_v5 = vmul.f32 1.442695, %v1967_v36 }
0x1a25   :  { %4079 = vpow2.f32 %v1968_v5  ;;  %v9082_v5 = vld [vmem:[#allocation17_spill] sm:$0xff] }
0x1a2b   :  { %v4080_v56 = vpop.eup %4079 }
0x1a2c   :  { %v1970_v16 = vadd.f32 1.0, %v4080_v56 }
0x1a2e   :  { %v1971_v21 = vmul.f32 %v1970_v16, %v1970_v16 }
0x1a30   :  { %v1973_v63 = vadd.f32 1.0, %v1971_v21  ;;  %v3827_v8 = vadd.f32 -1.0, %v1971_v21 }
0x1a32   :  { %4081 = vrcp.f32 %v1973_v63  ;;  %v1985_v10 = vand.u32 2147483648, %v1973_v63  ;;  %v1983_v14 = vand.u32 2147483647, %v1973_v63  ;;  %vm1979_vm9 = vweird.f32 %v1973_v63 }
0x1a34   :  { %v1986_v32 = vor.u32 1.1754944e-38, %v1985_v10  ;;  %vm1984_vm11 = vcmp.eq.f32.partialorder %v1983_v14, 8.507059e+37 }
0x1a38   :  { %v4082_v20 = vpop.eup %4081 }
0x1a39   :  { %v1975_v60 = vmul.f32 %v4082_v20, %v1973_v63  ;;  %vm1980_vm8 = vweird.f32 %v4082_v20 }
0x1a3a   :  { %vm1981_vm10 = vmor %vm1979_vm9, %vm1980_vm8 }
0x1a3b   :  { %v1976_v61 = vsub.f32 1.0, %v1975_v60 }
0x1a3d   :  { %v1977_v12 = vmul.f32 %v4082_v20, %v1976_v61 }
0x1a3f   :  { %v1978_v11 = vadd.f32 %v4082_v20, %v1977_v12 }
0x1a41   :  { %v1982_v51 = vsel %vm1981_vm10, %v4082_v20, %v1978_v11 }
0x1a42   :  { %v1987_v9 = vsel %vm1984_vm11, %v1986_v32, %v1982_v51 }
0x1a43   :  { %v1988_v22 = vmul.f32 %v3827_v8, %v1987_v9 }
0x1a45   :  { %v1989_v35 = vmul.f32 %v1988_v22, %v1966_v40  ;;  %v9081_v40 = vld [vmem:[#allocation15_spill] sm:$0xff] }
0x1a47   :  { %2006 = vmatmul.f32.vlgmr.msra.gmra.mxu2 %v1989_v35 }
0x1a48   :  { %2344 = vmatpush.msra.mxu2 %v6588_v52 }
0x1a4a   :  { %2345 = vmatpush.msra.mxu2 %v6594_v27 }
0x1a4c   :  { %2346 = vmatpush.msra.mxu2 %v6600_v49 }
0x1a4e   :  { %2347 = vmatpush.msra.mxu2 %v6606_v25 }
0x1a50   :  { %2348 = vmatpush.msra.mxu2 %v6612_v30 }
0x1a52   :  { %2349 = vmatpush.msra.mxu2 %v9048_v57 }
0x1a54   :  { %2350 = vmatpush.msra.mxu2 %v9049_v58 }
0x1a56   :  { %2351 = vmatpush.msra.mxu2 %v9050_v3 }
0x1a58   :  { %2352 = vmatpush.msra.mxu2 %v9051_v44 }
0x1a5a   :  { %2353 = vmatpush.msra.mxu2 %v9052_v43 }
0x1a5c   :  { %2354 = vmatpush.msra.mxu2 %v9053_v39 }
0x1a5e   :  { %2355 = vmatpush.msra.mxu2 %v9054_v48 }
0x1a60   :  { %2356 = vmatpush.msra.mxu2 %v6739_v33 }
0x1a62   :  { %2357 = vmatpush.msra.mxu2 %v6745_v26 }
0x1a64   :  { %2358 = vmatpush.msra.mxu2 %v6751_v28 }
0x1a66   :  { %2359 = vmatpush.msra.mxu2 %v6757_v55 }
0x1aca   :  { %v2007_v52 = vpop.f32.mrf.mxu2 }
0x1acb   :  { %v2008_v27 = vadd.f32 %v6763_v59, %v2007_v52 }
0x1acd   :  { %v2010_v49 = vmin.f32 %v2008_v27, 20.0 }
0x1acf   :  { %v2011_v25 = vmul.f32 1.442695, %v2010_v49 }
0x1ad1   :  { %4083 = vpow2.f32 %v2011_v25  ;;  %v9083_v25 = vld [vmem:[#allocation18_spill] sm:$0xff] }
0x1ad7   :  { %v4084_v30 = vpop.eup %4083 }
0x1ad8   :  { %v2013_v57 = vadd.f32 1.0, %v4084_v30  ;;  %v9084_v30 = vld [vmem:[#allocation19_spill] sm:$0xff] }
0x1ada   :  { %v2014_v58 = vmul.f32 %v2013_v57, %v2013_v57  ;;  %v9085_v57 = vld [vmem:[#allocation20_spill] sm:$0xff] }
0x1adc   :  { %v2016_v3 = vadd.f32 1.0, %v2014_v58  ;;  %v3828_v1 = vadd.f32 -1.0, %v2014_v58  ;;  %v9086_v58 = vld [vmem:[#allocation21_spill] sm:$0xff] }
0x1ade   :  { %4085 = vrcp.f32 %v2016_v3  ;;  %v2028_v48 = vand.u32 2147483648, %v2016_v3  ;;  %v2026_v45 = vand.u32 2147483647, %v2016_v3  ;;  %vm2022_vm13 = vweird.f32 %v2016_v3 }
0x1ae0   :  { %v2029_v24 = vor.u32 1.1754944e-38, %v2028_v48  ;;  %vm2027_vm15 = vcmp.eq.f32.partialorder %v2026_v45, 8.507059e+37  ;;  %v9091_v48 = vld [vmem:[#allocation26_spill] sm:$0xff]  ;;  %v9093_v45 = vld [vmem:[#allocation5_spill] sm:$0xff] }
0x1ae4   :  { %v4086_v44 = vpop.eup %4085 }
0x1ae5   :  { %v2018_v43 = vmul.f32 %v4086_v44, %v2016_v3  ;;  %vm2023_vm12 = vweird.f32 %v4086_v44  ;;  %v9087_v3 = vld [vmem:[#allocation22_spill] sm:$0xff] }
0x1ae6   :  { %vm2024_vm14 = vmor %vm2022_vm13, %vm2023_vm12 }
0x1ae7   :  { %v2019_v39 = vsub.f32 1.0, %v2018_v43  ;;  %v9089_v43 = vld [vmem:[#allocation24_spill] sm:$0xff] }
0x1ae9   :  { %v2020_v7 = vmul.f32 %v4086_v44, %v2019_v39  ;;  %v9090_v39 = vld [vmem:[#allocation25_spill] sm:$0xff] }
0x1aeb   :  { %v2021_v34 = vadd.f32 %v4086_v44, %v2020_v7  ;;  %v9092_v7 = vld [vmem:[#allocation16_spill] sm:$0xff] }
0x1aed   :  { %v2025_v15 = vsel %vm2024_vm14, %v4086_v44, %v2021_v34  ;;  %v9088_v44 = vld [vmem:[#allocation23_spill] sm:$0xff]  ;;  %v9094_v34 = vld [vmem:[#allocation6_spill] sm:$0xff] }
0x1aee   :  { %v2030_v31 = vsel %vm2027_vm15, %v2029_v24, %v2025_v15  ;;  %v9095_v24 = vld [vmem:[#allocation7_spill] sm:$0xff]  ;;  %v9097_v15 = vld [vmem:[#allocation9_spill] sm:$0xff] }
0x1aef   :  { %v2031_v46 = vmul.f32 %v3828_v1, %v2030_v31  ;;  %v9096_v1 = vld [vmem:[#allocation8_spill] sm:$0xff]  ;;  %v9098_v31 = vld [vmem:[#allocation10_spill] sm:$0xff] }
0x1af1   :  { %v2032_v47 = vmul.f32 %v2031_v46, %v2008_v27 }
0x1af3   :  { %2049 = vmatmul.f32.vlgmr.msra.gmra.mxu3 %v2032_v47  ;;  %v2101_v47 = vstv %s3830_s23  ;;  %s3910_s23 = sld [smem:[#allocation3 + $0xd]] }
0x1af4   :  { %2387 = vmatpush.msra.mxu3 %v6769_v29 }
0x1af6   :  { %2388 = vmatpush.msra.mxu3 %v6775_v53 }
0x1af8   :  { %2389 = vmatpush.msra.mxu3 %v6781_v37 }
0x1afa   :  { %2390 = vmatpush.msra.mxu3 %v6787_v4 }
0x1afc   :  { %2391 = vmatpush.msra.mxu3 %v6793_v42 }
0x1afe   :  { %2392 = vmatpush.msra.mxu3 %v6799_v62 }
0x1b00   :  { %2393 = vmatpush.msra.mxu3 %v6805_v38 }
0x1b02   :  { %2394 = vmatpush.msra.mxu3 %v6811_v19 }
0x1b04   :  { %2395 = vmatpush.msra.mxu3 %v6817_v23 }
0x1b06   :  { %2396 = vmatpush.msra.mxu3 %v6823_v6 }
0x1b08   :  { %2397 = vmatpush.msra.mxu3 %v6829_v18 }
0x1b0a   :  { %2398 = vmatpush.msra.mxu3 %v9077_v0 }
0x1b0c   :  { %2399 = vmatpush.msra.mxu3 %v9078_v41 }
0x1b0e   :  { %2400 = vmatpush.msra.mxu3 %v9079_v54 }
0x1b10   :  { %2401 = vmatpush.msra.mxu3 %v9080_v17 }
0x1b12   :  { %2402 = vmatpush.msra.mxu3 %v9081_v40 }
0x1b76   :  { %v2050_v36 = vpop.f32.mrf.mxu3 }
0x1b77   :  { %v2051_v56 = vadd.f32 %v9082_v5, %v2050_v36  ;;  %v2103_v36 = vstv %s3831_s24  ;;  %s3911_s24 = sld [smem:[#allocation3 + $0xe]] }
0x1b79   :  { %v2053_v16 = vmin.f32 %v2051_v56, 20.0 }
0x1b7b   :  { %v2054_v21 = vmul.f32 1.442695, %v2053_v16  ;;  %v2102_v16 = vmul.f32 %v2101_v47, %v6975_v2  ;;  %v7108_v47 = vld [vmem:[%s8377_s5 + $0x38] sm:$0xff] }
0x1b7c   :  { %9101 = vst [vmem:[#allocation13_spill] sm:$0xff] %v7108_v47 }
0x1b7d   :  { %4087 = vpow2.f32 %v2054_v21 }
0x1b83   :  { %v4088_v63 = vpop.eup %4087 }
0x1b84   :  { %v2056_v20 = vadd.f32 1.0, %v4088_v63 }
0x1b86   :  { %v2057_v60 = vmul.f32 %v2056_v20, %v2056_v20  ;;  %v2108_v20 = vstv %s3832_s26  ;;  %s3842_s26 = sld [smem:[#allocation3 + $0x29]] }
0x1b88   :  { %v2059_v61 = vadd.f32 1.0, %v2057_v60  ;;  %v3829_v22 = vadd.f32 -1.0, %v2057_v60  ;;  %v2110_v60 = vstv %s3833_s25  ;;  %s3841_s25 = sld [smem:[#allocation3 + $0x28]] }
0x1b8a   :  { %4089 = vrcp.f32 %v2059_v61  ;;  %v2071_v11 = vand.u32 2147483648, %v2059_v61  ;;  %v2069_v8 = vand.u32 2147483647, %v2059_v61  ;;  %vm2065_vm1 = vweird.f32 %v2059_v61 }
0x1b8c   :  { %v2072_v9 = vor.u32 1.1754944e-38, %v2071_v11  ;;  %vm2070_vm3 = vcmp.eq.f32.partialorder %v2069_v8, 8.507059e+37  ;;  %v2111_v11 = vmul.f32 %v2110_v60, %v6975_v2  ;;  %v7072_v2 = vld [vmem:[%s8377_s5 + $0x68] sm:$0xff]  ;;  %v7150_v60 = vld [vmem:[%s8377_s5] sm:$0xff] }
0x1b8d   :  { %9108 = vst [vmem:[#allocation21_spill] sm:$0xff] %v7150_v60 }
0x1b90   :  { %v4090_v10 = vpop.eup %4089 }
0x1b91   :  { %v2061_v12 = vmul.f32 %v4090_v10, %v2059_v61  ;;  %vm2066_vm0 = vweird.f32 %v4090_v10  ;;  %v3836_v61 = vld [vmem:[%s8375_s3 + $0x48] sm:$0xff] }
0x1b92   :  { %vm2067_vm2 = vmor %vm2065_vm1, %vm2066_vm0 }
0x1b93   :  { %v2062_v14 = vsub.f32 1.0, %v2061_v12 }
0x1b95   :  { %v2063_v32 = vmul.f32 %v4090_v10, %v2062_v14 }
0x1b97   :  { %v2064_v51 = vadd.f32 %v4090_v10, %v2063_v32 }
0x1b99   :  { %v2068_v35 = vsel %vm2067_vm2, %v4090_v10, %v2064_v51  ;;  %v2115_v10 = vstv %s3834_s27  ;;  %s3844_s27 = sld [smem:[#allocation3 + $0x2b]] }
0x1b9a   :  { %v2073_v52 = vsel %vm2070_vm3, %v2072_v9, %v2068_v35  ;;  %v2116_v32 = vmul.f32 %v3836_v61, %v2115_v10  ;;  %v7060_v9 = vld [vmem:[%s8377_s5 + $0x78] sm:$0xff]  ;;  %v7078_v35 = vld [vmem:[%s8377_s5 + $0x60] sm:$0xff]  ;;  %v3950_v61 = vld [vmem:[%s8376_s4 + $0x8] ss:$0 sm:$0xff] }
0x1b9b   :  { %v2074_v27 = vmul.f32 %v3829_v22, %v2073_v52  ;;  %v7066_v22 = vld [vmem:[%s8377_s5 + $0x70] sm:$0xff]  ;;  %v7084_v52 = vld [vmem:[%s8377_s5 + $0x58] sm:$0xff] }
0x1b9d   :  { %v2075_v49 = vmul.f32 %v2074_v27, %v2051_v56  ;;  %v7090_v27 = vld [vmem:[%s8377_s5 + $0x50] sm:$0xff] }
0x1b9f   :  { %2092 = vmatmul.f32.vlgmr.msrb.gmra.mxu0 %v2075_v49  ;;  %v7096_v49 = vld [vmem:[%s8377_s5 + $0x48] sm:$0xff] }
0x1ba0   :  { %2430 = vmatpush.msrb.mxu0 %v9083_v25  ;;  %9099 = vst [vmem:[#allocation11_spill] sm:$0xff] %v7096_v49 }
0x1ba2   :  { %2431 = vmatpush.msrb.mxu0 %v9084_v30 }
0x1ba4   :  { %2432 = vmatpush.msrb.mxu0 %v9085_v57 }
0x1ba6   :  { %2433 = vmatpush.msrb.mxu0 %v9086_v58 }
0x1ba8   :  { %2434 = vmatpush.msrb.mxu0 %v9087_v3 }
0x1baa   :  { %2435 = vmatpush.msrb.mxu0 %v9088_v44 }
0x1bac   :  { %2436 = vmatpush.msrb.mxu0 %v9089_v43 }
0x1bae   :  { %2437 = vmatpush.msrb.mxu0 %v9090_v39 }
0x1bb0   :  { %2438 = vmatpush.msrb.mxu0 %v9091_v48 }
0x1bb2   :  { %2439 = vmatpush.msrb.mxu0 %v9092_v7 }
0x1bb4   :  { %2440 = vmatpush.msrb.mxu0 %v9093_v45 }
0x1bb6   :  { %2441 = vmatpush.msrb.mxu0 %v9094_v34 }
0x1bb8   :  { %2442 = vmatpush.msrb.mxu0 %v9095_v24 }
0x1bba   :  { %2443 = vmatpush.msrb.mxu0 %v9096_v1 }
0x1bbc   :  { %2444 = vmatpush.msrb.mxu0 %v9097_v15 }
0x1bbe   :  { %2445 = vmatpush.msrb.mxu0 %v9098_v31 }
0x1c1c   :  { %v2093_v46 = vpop.f32.mrf.mxu0 }
0x1c1d   :  { %v2094_v56 = vadd.f32 %v6967_v13, %v2093_v46  ;;  %v7102_v46 = vld [vmem:[%s8377_s5 + $0x40] sm:$0xff] }
0x1c1e   :  { %9100 = vst [vmem:[#allocation12_spill] sm:$0xff] %v7102_v46 }
0x1c1f   :  { %v2104_v21 = vmul.f32 %v2103_v36, %v2094_v56  ;;  %v7114_v36 = vld [vmem:[%s8377_s5 + $0x30] sm:$0xff]  ;;  %v7120_v56 = vld [vmem:[%s8377_s5 + $0x28] sm:$0xff] }
0x1c20   :  { %9102 = vst [vmem:[#allocation14_spill] sm:$0xff] %v7114_v36 }
0x1c21   :  { %v2105_v63 = vsub.f32 %v2102_v16, %v2104_v21  ;;  %9103 = vst [vmem:[#allocation15_spill] sm:$0xff] %v7120_v56  ;;  %v7126_v16 = vld [vmem:[%s8377_s5 + $0x20] sm:$0xff]  ;;  %v7132_v21 = vld [vmem:[%s8377_s5 + $0x18] sm:$0xff] }
0x1c22   :  { %9104 = vst [vmem:[#allocation17_spill] sm:$0xff] %v7126_v16 }
0x1c23   :  { %v3835_v12 = vclamps-f32 %v2105_v63, 1.0  ;;  %9105 = vst [vmem:[#allocation18_spill] sm:$0xff] %v7132_v21  ;;  %v7138_v63 = vld [vmem:[%s8377_s5 + $0x10] sm:$0xff] }
0x1c24   :  { %9106 = vst [vmem:[#allocation19_spill] sm:$0xff] %v7138_v63 }
0x1c25   :  { %v2109_v14 = vmul.f32 %v3835_v12, %v2108_v20  ;;  %v7144_v20 = vld [vmem:[%s8377_s5 + $0x8] sm:$0xff] }
0x1c26   :  { %9107 = vst [vmem:[#allocation20_spill] sm:$0xff] %v7144_v20 }
0x1c27   :  { %v2112_v8 = vadd.f32 %v2111_v11, %v2109_v14 }
0x1c29   :  { %v7054_v51 = vadd.f32 %v2116_v32, %v2112_v8 }
0x1c2b   :  { %2139 = vmatmul.f32.vlgmr.msrb.gmra.mxu1 %v7054_v51 }
0x1c2c   :  { %2477 = vmatpush.msrb.mxu1 %v7060_v9 }
0x1c2e   :  { %2478 = vmatpush.msrb.mxu1 %v7066_v22 }
0x1c30   :  { %2479 = vmatpush.msrb.mxu1 %v7072_v2 }
0x1c32   :  { %2480 = vmatpush.msrb.mxu1 %v7078_v35 }
0x1c34   :  { %2481 = vmatpush.msrb.mxu1 %v7084_v52 }
0x1c36   :  { %2482 = vmatpush.msrb.mxu1 %v7090_v27 }
0x1c38   :  { %2483 = vmatpush.msrb.mxu1 %v7096_v49 }
0x1c3a   :  { %2484 = vmatpush.msrb.mxu1 %v7102_v46 }
0x1c3c   :  { %2485 = vmatpush.msrb.mxu1 %v7108_v47 }
0x1c3e   :  { %2486 = vmatpush.msrb.mxu1 %v7114_v36 }
0x1c40   :  { %2487 = vmatpush.msrb.mxu1 %v7120_v56 }
0x1c42   :  { %2488 = vmatpush.msrb.mxu1 %v7126_v16 }
0x1c44   :  { %2489 = vmatpush.msrb.mxu1 %v7132_v21 }
0x1c46   :  { %2490 = vmatpush.msrb.mxu1 %v7138_v63 }
0x1c48   :  { %2491 = vmatpush.msrb.mxu1 %v7144_v20 }
0x1c4a   :  { %2492 = vmatpush.msrb.mxu1 %v7150_v60 }
0x1ca8   :  { %v2140_v10 = vpop.f32.mrf.mxu1 }
0x1ca9   :  { %v2141_v12 = vadd.f32 %v3950_v61, %v2140_v10 }
0x1cab   :  { %v2143_v14 = vadd.f32 %v2141_v12, %v4920_v50 }
0x1cad   :  { %v2144_v11 = vmin.f32 %v2143_v14, 20.0 }
0x1caf   :  { %v2145_v32 = vmul.f32 1.442695, %v2144_v11 }
0x1cb1   :  { %4091 = vpow2.f32 %v2145_v32 }
0x1cb7   :  { %v4092_v8 = vpop.eup %4091 }
0x1cb8   :  { %v2147_v20 = vadd.f32 1.0, %v4092_v8 }
0x1cba   :  { %v2148_v63 = vmul.f32 %v2147_v20, %v2147_v20  ;;  %v7160_v20 = vld [vmem:[%s8380_s8 + $0x78] sm:$0xff] }
0x1cbc   :  { %v2150_v21 = vadd.f32 1.0, %v2148_v63  ;;  %v3838_v10 = vadd.f32 -1.0, %v2148_v63  ;;  %v7208_v63 = vld [vmem:[%s8380_s8 + $0x38] sm:$0xff] }
0x1cbd   :  { %9112 = vst [vmem:[#allocation25_spill] sm:$0xff] %v7208_v63 }
0x1cbe   :  { %4093 = vrcp.f32 %v2150_v21  ;;  %v2162_v60 = vand.u32 2147483648, %v2150_v21  ;;  %v2160_v46 = vand.u32 2147483647, %v2150_v21  ;;  %vm2156_vm5 = vweird.f32 %v2150_v21 }
0x1cc0   :  { %v2163_v61 = vor.u32 1.1754944e-38, %v2162_v60  ;;  %vm2161_vm7 = vcmp.eq.f32.partialorder %v2160_v46, 8.507059e+37  ;;  %v7178_v46 = vld [vmem:[%s8380_s8 + $0x60] sm:$0xff]  ;;  %v7214_v60 = vld [vmem:[%s8380_s8 + $0x30] sm:$0xff] }
0x1cc1   :  { %9113 = vst [vmem:[#allocation26_spill] sm:$0xff] %v7214_v60 }
0x1cc4   :  { %v4094_v16 = vpop.eup %4093 }
0x1cc5   :  { %v2152_v56 = vmul.f32 %v4094_v16, %v2150_v21  ;;  %vm2157_vm4 = vweird.f32 %v4094_v16  ;;  %v7202_v21 = vld [vmem:[%s8380_s8 + $0x40] sm:$0xff] }
0x1cc6   :  { %vm2158_vm6 = vmor %vm2156_vm5, %vm2157_vm4  ;;  %9111 = vst [vmem:[#allocation24_spill] sm:$0xff] %v7202_v21 }
0x1cc7   :  { %v2153_v36 = vsub.f32 1.0, %v2152_v56  ;;  %v7190_v56 = vld [vmem:[%s8380_s8 + $0x50] sm:$0xff] }
0x1cc8   :  { %9109 = vst [vmem:[#allocation22_spill] sm:$0xff] %v7190_v56 }
0x1cc9   :  { %v2154_v47 = vmul.f32 %v4094_v16, %v2153_v36  ;;  %v7184_v36 = vld [vmem:[%s8380_s8 + $0x58] sm:$0xff] }
0x1ccb   :  { %v2155_v49 = vadd.f32 %v4094_v16, %v2154_v47  ;;  %v7166_v47 = vld [vmem:[%s8380_s8 + $0x70] sm:$0xff] }
0x1ccd   :  { %v2159_v12 = vsel %vm2158_vm6, %v4094_v16, %v2155_v49  ;;  %v7172_v49 = vld [vmem:[%s8380_s8 + $0x68] sm:$0xff] }
0x1cce   :  { %v2164_v11 = vsel %vm2161_vm7, %v2163_v61, %v2159_v12  ;;  %v7196_v16 = vld [vmem:[%s8380_s8 + $0x48] sm:$0xff]  ;;  %v7226_v61 = vld [vmem:[%s8380_s8 + $0x20] sm:$0xff] }
0x1ccf   :  { %v2165_v32 = vmul.f32 %v3838_v10, %v2164_v11  ;;  %9110 = vst [vmem:[#allocation23_spill] sm:$0xff] %v7196_v16 }
0x1cd0   :  { %9115 = vst [vmem:[#allocation5_spill] sm:$0xff] %v7226_v61 }
0x1cd1   :  { %v2166_v8 = vmul.f32 %v2165_v32, %v2143_v14  ;;  %v7220_v14 = vld [vmem:[%s8380_s8 + $0x28] sm:$0xff] }
0x1cd2   :  { %9114 = vst [vmem:[#allocation16_spill] sm:$0xff] %v7220_v14 }
0x1cd3   :  { %2183 = vmatmul.f32.vlgmr.msrb.gmra.mxu2 %v2166_v8 }
0x1cd4   :  { %2521 = vmatpush.msrb.mxu2 %v7160_v20 }
0x1cd6   :  { %2522 = vmatpush.msrb.mxu2 %v7166_v47 }
0x1cd8   :  { %2523 = vmatpush.msrb.mxu2 %v7172_v49 }
0x1cda   :  { %2524 = vmatpush.msrb.mxu2 %v7178_v46 }
0x1cdc   :  { %2525 = vmatpush.msrb.mxu2 %v7184_v36 }
0x1cde   :  { %2526 = vmatpush.msrb.mxu2 %v7190_v56 }
0x1ce0   :  { %2527 = vmatpush.msrb.mxu2 %v7196_v16 }
0x1ce2   :  { %2528 = vmatpush.msrb.mxu2 %v7202_v21 }
0x1ce4   :  { %2529 = vmatpush.msrb.mxu2 %v7208_v63 }
0x1ce6   :  { %2530 = vmatpush.msrb.mxu2 %v7214_v60 }
0x1ce8   :  { %2531 = vmatpush.msrb.mxu2 %v7220_v14 }
0x1cea   :  { %2532 = vmatpush.msrb.mxu2 %v7226_v61 }
0x1cec   :  { %2533 = vmatpush.msrb.mxu2 %v6739_v33 }
0x1cee   :  { %2534 = vmatpush.msrb.mxu2 %v6745_v26 }
0x1cf0   :  { %2535 = vmatpush.msrb.mxu2 %v6751_v28 }
0x1cf2   :  { %2536 = vmatpush.msrb.mxu2 %v6757_v55 }
0x1d56   :  { %v2184_v10 = vpop.f32.mrf.mxu2 }
0x1d57   :  { %v2185_v12 = vadd.f32 %v6763_v59, %v2184_v10 }
0x1d59   :  { %v2187_v11 = vmin.f32 %v2185_v12, 20.0 }
0x1d5b   :  { %v2188_v32 = vmul.f32 1.442695, %v2187_v11 }
0x1d5d   :  { %4095 = vpow2.f32 %v2188_v32 }
0x1d63   :  { %v4096_v8 = vpop.eup %4095 }
0x1d64   :  { %v2190_v14 = vadd.f32 1.0, %v4096_v8 }
0x1d66   :  { %v2191_v60 = vmul.f32 %v2190_v14, %v2190_v14  ;;  %v9118_v14 = vld [vmem:[#allocation13_spill] sm:$0xff] }
0x1d68   :  { %v2193_v63 = vadd.f32 1.0, %v2191_v60  ;;  %v3839_v59 = vadd.f32 -1.0, %v2191_v60 }
0x1d6a   :  { %4097 = vrcp.f32 %v2193_v63  ;;  %v2205_v16 = vand.u32 2147483648, %v2193_v63  ;;  %v2203_v28 = vand.u32 2147483647, %v2193_v63  ;;  %vm2199_vm9 = vweird.f32 %v2193_v63 }
0x1d6c   :  { %v2206_v55 = vor.u32 1.1754944e-38, %v2205_v16  ;;  %vm2204_vm11 = vcmp.eq.f32.partialorder %v2203_v28, 8.507059e+37  ;;  %v9123_v28 = vld [vmem:[#allocation19_spill] sm:$0xff] }
0x1d70   :  { %v4098_v61 = vpop.eup %4097 }
0x1d71   :  { %v2195_v21 = vmul.f32 %v4098_v61, %v2193_v63  ;;  %vm2200_vm8 = vweird.f32 %v4098_v61 }
0x1d72   :  { %vm2201_vm10 = vmor %vm2199_vm9, %vm2200_vm8 }
0x1d73   :  { %v2196_v33 = vsub.f32 1.0, %v2195_v21 }
0x1d75   :  { %v2197_v26 = vmul.f32 %v4098_v61, %v2196_v33  ;;  %v9121_v33 = vld [vmem:[#allocation17_spill] sm:$0xff] }
0x1d77   :  { %v2198_v56 = vadd.f32 %v4098_v61, %v2197_v26  ;;  %v9122_v26 = vld [vmem:[#allocation18_spill] sm:$0xff] }
0x1d79   :  { %v2202_v10 = vsel %vm2201_vm10, %v4098_v61, %v2198_v56  ;;  %v9119_v61 = vld [vmem:[#allocation14_spill] sm:$0xff] }
0x1d7a   :  { %v2207_v11 = vsel %vm2204_vm11, %v2206_v55, %v2202_v10  ;;  %v9124_v55 = vld [vmem:[#allocation20_spill] sm:$0xff]  ;;  %v3951_v10 = vld [vmem:[%s8376_s4 + $0x7] ss:$0 sm:$0xff] }
0x1d7b   :  { %v2208_v32 = vmul.f32 %v3839_v59, %v2207_v11  ;;  %v9125_v59 = vld [vmem:[#allocation21_spill] sm:$0xff] }
0x1d7d   :  { %v2209_v8 = vmul.f32 %v2208_v32, %v2185_v12  ;;  %v9120_v12 = vld [vmem:[#allocation15_spill] sm:$0xff] }
0x1d7f   :  { %2226 = vmatmul.f32.vlgmr.msrb.gmra.mxu3 %v2209_v8 }
0x1d80   :  { %2564 = vmatpush.msrb.mxu3 %v6769_v29 }
0x1d82   :  { %2565 = vmatpush.msrb.mxu3 %v6775_v53 }
0x1d84   :  { %2566 = vmatpush.msrb.mxu3 %v6781_v37 }
0x1d86   :  { %2567 = vmatpush.msrb.mxu3 %v6787_v4 }
0x1d88   :  { %2568 = vmatpush.msrb.mxu3 %v6793_v42 }
0x1d8a   :  { %2569 = vmatpush.msrb.mxu3 %v6799_v62 }
0x1d8c   :  { %2570 = vmatpush.msrb.mxu3 %v6805_v38 }
0x1d8e   :  { %2571 = vmatpush.msrb.mxu3 %v6811_v19 }
0x1d90   :  { %2572 = vmatpush.msrb.mxu3 %v6817_v23 }
0x1d92   :  { %2573 = vmatpush.msrb.mxu3 %v6823_v6 }
0x1d94   :  { %2574 = vmatpush.msrb.mxu3 %v6829_v18 }
0x1d96   :  { %2575 = vmatpush.msrb.mxu3 %v9077_v0 }
0x1d98   :  { %2576 = vmatpush.msrb.mxu3 %v9078_v41 }
0x1d9a   :  { %2577 = vmatpush.msrb.mxu3 %v9079_v54 }
0x1d9c   :  { %2578 = vmatpush.msrb.mxu3 %v9080_v17 }
0x1d9e   :  { %2579 = vmatpush.msrb.mxu3 %v9081_v40 }
0x1e02   :  { %v2227_v29 = vpop.f32.mrf.mxu3 }
0x1e03   :  { %v2228_v53 = vadd.f32 %v9082_v5, %v2227_v29 }
0x1e05   :  { %v2230_v37 = vmin.f32 %v2228_v53, 20.0 }
0x1e07   :  { %v2231_v4 = vmul.f32 1.442695, %v2230_v37 }
0x1e09   :  { %4099 = vpow2.f32 %v2231_v4 }
0x1e0f   :  { %v4100_v42 = vpop.eup %4099 }
0x1e10   :  { %v2233_v62 = vadd.f32 1.0, %v4100_v42 }
0x1e12   :  { %v2234_v38 = vmul.f32 %v2233_v62, %v2233_v62 }
0x1e14   :  { %v2236_v19 = vadd.f32 1.0, %v2234_v38  ;;  %v3840_v5 = vadd.f32 -1.0, %v2234_v38 }
0x1e16   :  { %4101 = vrcp.f32 %v2236_v19  ;;  %v2248_v0 = vand.u32 2147483648, %v2236_v19  ;;  %v2246_v54 = vand.u32 2147483647, %v2236_v19  ;;  %vm2242_vm13 = vweird.f32 %v2236_v19 }
0x1e18   :  { %v2249_v40 = vor.u32 1.1754944e-38, %v2248_v0  ;;  %vm2247_vm15 = vcmp.eq.f32.partialorder %v2246_v54, 8.507059e+37 }
0x1e1c   :  { %v4102_v23 = vpop.eup %4101 }
0x1e1d   :  { %v2238_v6 = vmul.f32 %v4102_v23, %v2236_v19  ;;  %vm2243_vm12 = vweird.f32 %v4102_v23 }
0x1e1e   :  { %vm2244_vm14 = vmor %vm2242_vm13, %vm2243_vm12 }
0x1e1f   :  { %v2239_v18 = vsub.f32 1.0, %v2238_v6 }
0x1e21   :  { %v2240_v41 = vmul.f32 %v4102_v23, %v2239_v18 }
0x1e23   :  { %v2241_v17 = vadd.f32 %v4102_v23, %v2240_v41 }
0x1e25   :  { %v2245_v56 = vsel %vm2244_vm14, %v4102_v23, %v2241_v17 }
0x1e26   :  { %v2250_v16 = vsel %vm2247_vm15, %v2249_v40, %v2245_v56 }
0x1e27   :  { %v2251_v21 = vmul.f32 %v3840_v5, %v2250_v16 }
0x1e29   :  { %v2252_v63 = vmul.f32 %v2251_v21, %v2228_v53  ;;  %v9126_v21 = vld [vmem:[#allocation22_spill] sm:$0xff] }
0x1e2b   :  { %2269 = vmatmul.f32.vlgmr.msra.gmra.mxu0 %v2252_v63  ;;  %v9127_v63 = vld [vmem:[#allocation23_spill] sm:$0xff] }
0x1e2c   :  { %2607 = vmatpush.msra.mxu0 %v9083_v25 }
0x1e2e   :  { %2608 = vmatpush.msra.mxu0 %v9084_v30  ;;  %v2278_v30 = vstv %s3841_s25 }
0x1e30   :  { %2609 = vmatpush.msra.mxu0 %v9085_v57  ;;  %v2280_v57 = vstv %s3842_s26  ;;  %s3852_s26 = sld [smem:[#allocation3 + $0x23]] }
0x1e32   :  { %2610 = vmatpush.msra.mxu0 %v9086_v58 }
0x1e34   :  { %2611 = vmatpush.msra.mxu0 %v9087_v3  ;;  %v2279_v3 = vmul.f32 %v2278_v30, %v7054_v51  ;;  %v9129_v30 = vld [vmem:[#allocation25_spill] sm:$0xff] }
0x1e36   :  { %2612 = vmatpush.msra.mxu0 %v9088_v44 }
0x1e38   :  { %2613 = vmatpush.msra.mxu0 %v9089_v43 }
0x1e3a   :  { %2614 = vmatpush.msra.mxu0 %v9090_v39  ;;  %v2285_v39 = vstv %s3843_s28  ;;  %s3855_s28 = sld [smem:[#allocation3 + $0x26]] }
0x1e3c   :  { %2615 = vmatpush.msra.mxu0 %v9091_v48  ;;  %v2287_v48 = vstv %s3844_s27  ;;  %s3853_s27 = sld [smem:[#allocation3 + $0x24]] }
0x1e3e   :  { %2616 = vmatpush.msra.mxu0 %v9092_v7  ;;  %v3847_v7 = vld [vmem:[%s8375_s3 + $0x40] sm:$0xff] }
0x1e40   :  { %2617 = vmatpush.msra.mxu0 %v9093_v45  ;;  %v2292_v45 = vstv %s3845_s29  ;;  %s3854_s29 = sld [smem:[#allocation3 + $0x25]] }
0x1e42   :  { %2618 = vmatpush.msra.mxu0 %v9094_v34 }
0x1e44   :  { %2619 = vmatpush.msra.mxu0 %v9095_v24 }
0x1e46   :  { %2620 = vmatpush.msra.mxu0 %v9096_v1  ;;  %v2288_v1 = vmul.f32 %v2287_v48, %v7054_v51  ;;  %v9117_v51 = vld [vmem:[#allocation12_spill] sm:$0xff]  ;;  %v7329_v48 = vld [vmem:[%s8380_s8] sm:$0xff] }
0x1e48   :  { %2621 = vmatpush.msra.mxu0 %v9097_v15  ;;  %v2293_v15 = vmul.f32 %v3847_v7, %v2292_v45  ;;  %v7335_v45 = vld [vmem:[%s8381_s9] ss:$0 sm:$0xff] }
0x1e4a   :  { %2622 = vmatpush.msra.mxu0 %v9098_v31 }
0x1ea8   :  { %v2270_v25 = vpop.f32.mrf.mxu0 }
0x1ea9   :  { %v2271_v58 = vadd.f32 %v6967_v13, %v2270_v25  ;;  %v9116_v13 = vld [vmem:[#allocation11_spill] sm:$0xff]  ;;  %v9128_v25 = vld [vmem:[#allocation24_spill] sm:$0xff] }
0x1eab   :  { %v2281_v44 = vmul.f32 %v2280_v57, %v2271_v58  ;;  %v9130_v57 = vld [vmem:[#allocation26_spill] sm:$0xff]  ;;  %v9131_v58 = vld [vmem:[#allocation16_spill] sm:$0xff] }
0x1ead   :  { %v2282_v43 = vsub.f32 %v2279_v3, %v2281_v44  ;;  %v9132_v3 = vld [vmem:[#allocation5_spill] sm:$0xff]  ;;  %v7311_v44 = vld [vmem:[%s8380_s8 + $0x18] sm:$0xff] }
0x1eaf   :  { %v3846_v34 = vclamps-f32 %v2282_v43, 1.0  ;;  %v7317_v43 = vld [vmem:[%s8380_s8 + $0x10] sm:$0xff] }
0x1eb1   :  { %v2286_v24 = vmul.f32 %v3846_v34, %v2285_v39  ;;  %v7323_v39 = vld [vmem:[%s8380_s8 + $0x8] sm:$0xff] }
0x1eb3   :  { %v2289_v31 = vadd.f32 %v2288_v1, %v2286_v24 }
0x1eb5   :  { %v7273_v60 = vadd.f32 %v2293_v15, %v2289_v31 }
0x1eb7   :  { %2316 = vmatmul.f32.vlgmr.msra.gmra.mxu1 %v7273_v60 }
0x1eb8   :  { %2654 = vmatpush.msra.mxu1 %v7060_v9 }
0x1eba   :  { %2655 = vmatpush.msra.mxu1 %v7066_v22 }
0x1ebc   :  { %2656 = vmatpush.msra.mxu1 %v7072_v2 }
0x1ebe   :  { %2657 = vmatpush.msra.mxu1 %v7078_v35 }
0x1ec0   :  { %2658 = vmatpush.msra.mxu1 %v7084_v52 }
0x1ec2   :  { %2659 = vmatpush.msra.mxu1 %v7090_v27 }
0x1ec4   :  { %2660 = vmatpush.msra.mxu1 %v9116_v13 }
0x1ec6   :  { %2661 = vmatpush.msra.mxu1 %v9117_v51 }
0x1ec8   :  { %2662 = vmatpush.msra.mxu1 %v9118_v14 }
0x1eca   :  { %2663 = vmatpush.msra.mxu1 %v9119_v61 }
0x1ecc   :  { %2664 = vmatpush.msra.mxu1 %v9120_v12 }
0x1ece   :  { %2665 = vmatpush.msra.mxu1 %v9121_v33 }
0x1ed0   :  { %2666 = vmatpush.msra.mxu1 %v9122_v26 }
0x1ed2   :  { %2667 = vmatpush.msra.mxu1 %v9123_v28 }
0x1ed4   :  { %2668 = vmatpush.msra.mxu1 %v9124_v55 }
0x1ed6   :  { %2669 = vmatpush.msra.mxu1 %v9125_v59 }
0x1f34   :  { %v2317_v11 = vpop.f32.mrf.mxu1 }
0x1f35   :  { %v2318_v32 = vadd.f32 %v3951_v10, %v2317_v11 }
0x1f37   :  { %v2320_v8 = vadd.f32 %v2318_v32, %v4920_v50 }
0x1f39   :  { %v2321_v29 = vmin.f32 %v2320_v8, 20.0 }
0x1f3b   :  { %v2322_v53 = vmul.f32 1.442695, %v2321_v29 }
0x1f3d   :  { %4103 = vpow2.f32 %v2322_v53 }
0x1f43   :  { %v4104_v37 = vpop.eup %4103 }
0x1f44   :  { %v2324_v4 = vadd.f32 1.0, %v4104_v37 }
0x1f46   :  { %v2325_v42 = vmul.f32 %v2324_v4, %v2324_v4 }
0x1f48   :  { %v2327_v62 = vadd.f32 1.0, %v2325_v42  ;;  %v3849_v17 = vadd.f32 -1.0, %v2325_v42 }
0x1f4a   :  { %4105 = vrcp.f32 %v2327_v62  ;;  %v2339_v6 = vand.u32 2147483648, %v2327_v62  ;;  %v2337_v0 = vand.u32 2147483647, %v2327_v62  ;;  %vm2333_vm1 = vweird.f32 %v2327_v62 }
0x1f4c   :  { %v2340_v54 = vor.u32 1.1754944e-38, %v2339_v6  ;;  %vm2338_vm3 = vcmp.eq.f32.partialorder %v2337_v0, 8.507059e+37  ;;  %v7341_v0 = vld [vmem:[%s8382_s10 + $0x78] sm:$0xff] }
0x1f50   :  { %v4106_v38 = vpop.eup %4105 }
0x1f51   :  { %v2329_v19 = vmul.f32 %v4106_v38, %v2327_v62  ;;  %vm2334_vm0 = vweird.f32 %v4106_v38 }
0x1f52   :  { %vm2335_vm2 = vmor %vm2333_vm1, %vm2334_vm0 }
0x1f53   :  { %v2330_v23 = vsub.f32 1.0, %v2329_v19 }
0x1f55   :  { %v2331_v18 = vmul.f32 %v4106_v38, %v2330_v23 }
0x1f57   :  { %v2332_v41 = vadd.f32 %v4106_v38, %v2331_v18 }
0x1f59   :  { %v2336_v40 = vsel %vm2335_vm2, %v4106_v38, %v2332_v41  ;;  %v7347_v41 = vld [vmem:[%s8382_s10 + $0x70] sm:$0xff] }
0x1f5a   :  { %v2341_v5 = vsel %vm2338_vm3, %v2340_v54, %v2336_v40  ;;  %v7353_v54 = vld [vmem:[%s8382_s10 + $0x68] sm:$0xff]  ;;  %v7365_v40 = vld [vmem:[%s8382_s10 + $0x58] sm:$0xff] }
0x1f5b   :  { %v2342_v56 = vmul.f32 %v3849_v17, %v2341_v5  ;;  %v7359_v17 = vld [vmem:[%s8382_s10 + $0x60] sm:$0xff]  ;;  %v7371_v5 = vld [vmem:[%s8382_s10 + $0x50] sm:$0xff] }
0x1f5d   :  { %v2343_v16 = vmul.f32 %v2342_v56, %v2320_v8  ;;  %v7377_v56 = vld [vmem:[%s8382_s10 + $0x48] sm:$0xff] }
0x1f5f   :  { %2360 = vmatmul.f32.vlgmr.msra.gmra.mxu2 %v2343_v16  ;;  %v7383_v16 = vld [vmem:[%s8382_s10 + $0x40] sm:$0xff] }
0x1f60   :  { %2698 = vmatpush.msra.mxu2 %v7160_v20 }
0x1f62   :  { %2699 = vmatpush.msra.mxu2 %v7166_v47 }
0x1f64   :  { %2700 = vmatpush.msra.mxu2 %v7172_v49 }
0x1f66   :  { %2701 = vmatpush.msra.mxu2 %v7178_v46 }
0x1f68   :  { %2702 = vmatpush.msra.mxu2 %v7184_v36 }
0x1f6a   :  { %2703 = vmatpush.msra.mxu2 %v9126_v21 }
0x1f6c   :  { %2704 = vmatpush.msra.mxu2 %v9127_v63 }
0x1f6e   :  { %2705 = vmatpush.msra.mxu2 %v9128_v25 }
0x1f70   :  { %2706 = vmatpush.msra.mxu2 %v9129_v30 }
0x1f72   :  { %2707 = vmatpush.msra.mxu2 %v9130_v57 }
0x1f74   :  { %2708 = vmatpush.msra.mxu2 %v9131_v58 }
0x1f76   :  { %2709 = vmatpush.msra.mxu2 %v9132_v3 }
0x1f78   :  { %2710 = vmatpush.msra.mxu2 %v7311_v44 }
0x1f7a   :  { %2711 = vmatpush.msra.mxu2 %v7317_v43 }
0x1f7c   :  { %2712 = vmatpush.msra.mxu2 %v7323_v39 }
0x1f7e   :  { %2713 = vmatpush.msra.mxu2 %v7329_v48 }
0x1fe2   :  { %v2361_v7 = vpop.f32.mrf.mxu2 }
0x1fe3   :  { %v2362_v34 = vadd.f32 %v7335_v45, %v2361_v7  ;;  %v7389_v7 = vld [vmem:[%s8382_s10 + $0x38] sm:$0xff] }
0x1fe5   :  { %v2364_v24 = vmin.f32 %v2362_v34, 20.0 }
0x1fe7   :  { %v2365_v1 = vmul.f32 1.442695, %v2364_v24  ;;  %v7401_v24 = vld [vmem:[%s8382_s10 + $0x28] sm:$0xff] }
0x1fe9   :  { %4107 = vpow2.f32 %v2365_v1  ;;  %v7407_v1 = vld [vmem:[%s8382_s10 + $0x20] sm:$0xff] }
0x1fea   :  { %9133 = vst [vmem:[#allocation6_spill] sm:$0xff] %v7407_v1 }
0x1fef   :  { %v4108_v15 = vpop.eup %4107 }
0x1ff0   :  { %v2367_v31 = vadd.f32 1.0, %v4108_v15  ;;  %v7413_v15 = vld [vmem:[%s8382_s10 + $0x18] sm:$0xff] }
0x1ff1   :  { %9134 = vst [vmem:[#allocation7_spill] sm:$0xff] %v7413_v15 }
0x1ff2   :  { %v2368_v10 = vmul.f32 %v2367_v31, %v2367_v31  ;;  %v7419_v31 = vld [vmem:[%s8382_s10 + $0x10] sm:$0xff] }
0x1ff3   :  { %9135 = vst [vmem:[#allocation8_spill] sm:$0xff] %v7419_v31 }
0x1ff4   :  { %v2370_v11 = vadd.f32 1.0, %v2368_v10  ;;  %v3850_v38 = vadd.f32 -1.0, %v2368_v10  ;;  %v7425_v10 = vld [vmem:[%s8382_s10 + $0x8] sm:$0xff] }
0x1ff5   :  { %9136 = vst [vmem:[#allocation9_spill] sm:$0xff] %v7425_v10 }
0x1ff6   :  { %4109 = vrcp.f32 %v2370_v11  ;;  %v2382_v53 = vand.u32 2147483648, %v2370_v11  ;;  %v2380_v4 = vand.u32 2147483647, %v2370_v11  ;;  %vm2376_vm5 = vweird.f32 %v2370_v11 }
0x1ff8   :  { %v2383_v62 = vor.u32 1.1754944e-38, %v2382_v53  ;;  %vm2381_vm7 = vcmp.eq.f32.partialorder %v2380_v4, 8.507059e+37 }
0x1ffc   :  { %v4110_v32 = vpop.eup %4109 }
0x1ffd   :  { %v2372_v8 = vmul.f32 %v4110_v32, %v2370_v11  ;;  %vm2377_vm4 = vweird.f32 %v4110_v32  ;;  %v7431_v11 = vld [vmem:[%s8382_s10] sm:$0xff] }
0x1ffe   :  { %vm2378_vm6 = vmor %vm2376_vm5, %vm2377_vm4  ;;  %9137 = vst [vmem:[#allocation10_spill] sm:$0xff] %v7431_v11 }
0x1fff   :  { %v2373_v29 = vsub.f32 1.0, %v2372_v8  ;;  %v7437_v8 = vld [vmem:[%s8383_s11] ss:$0 sm:$0xff] }
0x2000   :  { %9138 = vst [vmem:[#allocation11_spill] sm:$0xff] %v7437_v8 }
0x2001   :  { %v2374_v37 = vmul.f32 %v4110_v32, %v2373_v29 }
0x2003   :  { %v2375_v42 = vadd.f32 %v4110_v32, %v2374_v37 }
0x2005   :  { %v2379_v19 = vsel %vm2378_vm6, %v4110_v32, %v2375_v42 }
0x2006   :  { %v2384_v23 = vsel %vm2381_vm7, %v2383_v62, %v2379_v19 }
0x2007   :  { %v2385_v6 = vmul.f32 %v3850_v38, %v2384_v23 }
0x2009   :  { %v2386_v18 = vmul.f32 %v2385_v6, %v2362_v34  ;;  %v7395_v34 = vld [vmem:[%s8382_s10 + $0x30] sm:$0xff] }
0x200b   :  { %2403 = vmatmul.f32.vlgmr.msra.gmra.mxu3 %v2386_v18 }
0x200c   :  { %2741 = vmatpush.msra.mxu3 %v7341_v0 }
0x200e   :  { %2742 = vmatpush.msra.mxu3 %v7347_v41 }
0x2010   :  { %2743 = vmatpush.msra.mxu3 %v7353_v54 }
0x2012   :  { %2744 = vmatpush.msra.mxu3 %v7359_v17 }
0x2014   :  { %2745 = vmatpush.msra.mxu3 %v7365_v40 }
0x2016   :  { %2746 = vmatpush.msra.mxu3 %v7371_v5 }
0x2018   :  { %2747 = vmatpush.msra.mxu3 %v7377_v56 }
0x201a   :  { %2748 = vmatpush.msra.mxu3 %v7383_v16 }
0x201c   :  { %2749 = vmatpush.msra.mxu3 %v7389_v7 }
0x201e   :  { %2750 = vmatpush.msra.mxu3 %v7395_v34 }
0x2020   :  { %2751 = vmatpush.msra.mxu3 %v7401_v24 }
0x2022   :  { %2752 = vmatpush.msra.mxu3 %v7407_v1 }
0x2024   :  { %2753 = vmatpush.msra.mxu3 %v7413_v15 }
0x2026   :  { %2754 = vmatpush.msra.mxu3 %v7419_v31 }
0x2028   :  { %2755 = vmatpush.msra.mxu3 %v7425_v10 }
0x202a   :  { %2756 = vmatpush.msra.mxu3 %v7431_v11 }
0x208e   :  { %v2404_v32 = vpop.f32.mrf.mxu3 }
0x208f   :  { %v2405_v29 = vadd.f32 %v7437_v8, %v2404_v32 }
0x2091   :  { %v2407_v53 = vmin.f32 %v2405_v29, 20.0 }
0x2093   :  { %v2408_v37 = vmul.f32 1.442695, %v2407_v53 }
0x2095   :  { %4111 = vpow2.f32 %v2408_v37 }
0x209b   :  { %v4112_v4 = vpop.eup %4111 }
0x209c   :  { %v2410_v42 = vadd.f32 1.0, %v4112_v4 }
0x209e   :  { %v2411_v62 = vmul.f32 %v2410_v42, %v2410_v42  ;;  %v7443_v42 = vld [vmem:[%s8384_s12 + $0x78] sm:$0xff] }
0x209f   :  { %9139 = vst [vmem:[#allocation12_spill] sm:$0xff] %v7443_v42 }
0x20a0   :  { %v2413_v38 = vadd.f32 1.0, %v2411_v62  ;;  %v3851_v32 = vadd.f32 -1.0, %v2411_v62  ;;  %v7485_v62 = vld [vmem:[%s8384_s12 + $0x40] sm:$0xff] }
0x20a1   :  { %9146 = vst [vmem:[#allocation20_spill] sm:$0xff] %v7485_v62 }
0x20a2   :  { %4113 = vrcp.f32 %v2413_v38  ;;  %v2425_v18 = vand.u32 2147483648, %v2413_v38  ;;  %v2423_v10 = vand.u32 2147483647, %v2413_v38  ;;  %vm2419_vm9 = vweird.f32 %v2413_v38 }
0x20a4   :  { %v2426_v15 = vor.u32 1.1754944e-38, %v2425_v18  ;;  %vm2424_vm11 = vcmp.eq.f32.partialorder %v2423_v10, 8.507059e+37  ;;  %v7467_v10 = vld [vmem:[%s8384_s12 + $0x58] sm:$0xff] }
0x20a5   :  { %9143 = vst [vmem:[#allocation17_spill] sm:$0xff] %v7467_v10  ;;  %v7515_v18 = vld [vmem:[%s8384_s12 + $0x18] sm:$0xff] }
0x20a6   :  { %9151 = vst [vmem:[#allocation25_spill] sm:$0xff] %v7515_v18 }
0x20a8   :  { %v4114_v19 = vpop.eup %4113 }
0x20a9   :  { %v2415_v23 = vmul.f32 %v4114_v19, %v2413_v38  ;;  %vm2420_vm8 = vweird.f32 %v4114_v19  ;;  %v7491_v38 = vld [vmem:[%s8384_s12 + $0x38] sm:$0xff] }
0x20aa   :  { %vm2421_vm10 = vmor %vm2419_vm9, %vm2420_vm8  ;;  %9147 = vst [vmem:[#allocation21_spill] sm:$0xff] %v7491_v38 }
0x20ab   :  { %v2416_v6 = vsub.f32 1.0, %v2415_v23  ;;  %v7503_v23 = vld [vmem:[%s8384_s12 + $0x28] sm:$0xff] }
0x20ac   :  { %9149 = vst [vmem:[#allocation23_spill] sm:$0xff] %v7503_v23 }
0x20ad   :  { %v2417_v11 = vmul.f32 %v4114_v19, %v2416_v6  ;;  %v7509_v6 = vld [vmem:[%s8384_s12 + $0x20] sm:$0xff] }
0x20ae   :  { %9150 = vst [vmem:[#allocation24_spill] sm:$0xff] %v7509_v6 }
0x20af   :  { %v2418_v31 = vadd.f32 %v4114_v19, %v2417_v11  ;;  %v7449_v11 = vld [vmem:[%s8384_s12 + $0x70] sm:$0xff] }
0x20b0   :  { %9140 = vst [vmem:[#allocation13_spill] sm:$0xff] %v7449_v11 }
0x20b1   :  { %v2422_v8 = vsel %vm2421_vm10, %v4114_v19, %v2418_v31  ;;  %v7461_v31 = vld [vmem:[%s8384_s12 + $0x60] sm:$0xff]  ;;  %v7497_v19 = vld [vmem:[%s8384_s12 + $0x30] sm:$0xff] }
0x20b2   :  { %v2427_v53 = vsel %vm2424_vm11, %v2426_v15, %v2422_v8  ;;  %v7455_v15 = vld [vmem:[%s8384_s12 + $0x68] sm:$0xff]  ;;  %9142 = vst [vmem:[#allocation15_spill] sm:$0xff] %v7461_v31  ;;  %v7473_v8 = vld [vmem:[%s8384_s12 + $0x50] sm:$0xff] }
0x20b3   :  { %v2428_v37 = vmul.f32 %v3851_v32, %v2427_v53  ;;  %9141 = vst [vmem:[#allocation14_spill] sm:$0xff] %v7455_v15  ;;  %v7521_v32 = vld [vmem:[%s8384_s12 + $0x10] sm:$0xff]  ;;  %v7527_v53 = vld [vmem:[%s8384_s12 + $0x8] sm:$0xff] }
0x20b4   :  { %9144 = vst [vmem:[#allocation18_spill] sm:$0xff] %v7473_v8 }
0x20b5   :  { %v2429_v4 = vmul.f32 %v2428_v37, %v2405_v29  ;;  %v7479_v29 = vld [vmem:[%s8384_s12 + $0x48] sm:$0xff]  ;;  %9148 = vst [vmem:[#allocation22_spill] sm:$0xff] %v7497_v19  ;;  %v7533_v37 = vld [vmem:[%s8384_s12] sm:$0xff] }
0x20b6   :  { %9145 = vst [vmem:[#allocation19_spill] sm:$0xff] %v7479_v29 }
0x20b7   :  { %2446 = vmatmul.f32.vlgmr.msrb.gmra.mxu0 %v2429_v4  ;;  %9152 = vst [vmem:[#allocation26_spill] sm:$0xff] %v7521_v32 }
0x20b8   :  { %2784 = vmatpush.msrb.mxu0 %v7443_v42  ;;  %9153 = vst [vmem:[#allocation16_spill] sm:$0xff] %v7527_v53 }
0x20b9   :  { %9154 = vst [vmem:[#allocation5_spill] sm:$0xff] %v7533_v37 }
0x20ba   :  { %2785 = vmatpush.msrb.mxu0 %v7449_v11 }
0x20bc   :  { %2786 = vmatpush.msrb.mxu0 %v7455_v15 }
0x20be   :  { %2787 = vmatpush.msrb.mxu0 %v7461_v31 }
0x20c0   :  { %2788 = vmatpush.msrb.mxu0 %v7467_v10 }
0x20c2   :  { %2789 = vmatpush.msrb.mxu0 %v7473_v8  ;;  %v2469_v8 = vstv %s3856_s30  ;;  %s3900_s30 = sld [smem:[#allocation3 + $0x13]] }
0x20c4   :  { %2790 = vmatpush.msrb.mxu0 %v7479_v29  ;;  %v3858_v29 = vld [vmem:[%s8375_s3 + $0x38] sm:$0xff] }
0x20c5   :  { %v2470_v11 = vmul.f32 %v3858_v29, %v2469_v8 }
0x20c6   :  { %2791 = vmatpush.msrb.mxu0 %v7485_v62  ;;  %v2464_v62 = vstv %s3855_s28  ;;  %s3897_s28 = sld [smem:[#allocation3 + $0x10]] }
0x20c7   :  { %v2465_v15 = vmul.f32 %v2464_v62, %v7273_v60 }
0x20c8   :  { %2792 = vmatpush.msrb.mxu0 %v7491_v38 }
0x20ca   :  { %2793 = vmatpush.msrb.mxu0 %v7497_v19 }
0x20cc   :  { %2794 = vmatpush.msrb.mxu0 %v7503_v23 }
0x20ce   :  { %2795 = vmatpush.msrb.mxu0 %v7509_v6  ;;  %v7539_v6 = vld [vmem:[%s8385_s13] ss:$0 sm:$0xff] }
0x20d0   :  { %2796 = vmatpush.msrb.mxu0 %v7515_v18  ;;  %v2457_v18 = vstv %s3853_s27  ;;  %s3896_s27 = sld [smem:[#allocation3 + $0xf]] }
0x20d2   :  { %2797 = vmatpush.msrb.mxu0 %v7521_v32  ;;  %v2455_v32 = vstv %s3852_s26 }
0x20d3   :  { %v2456_v23 = vmul.f32 %v2455_v32, %v7273_v60 }
0x20d4   :  { %2798 = vmatpush.msrb.mxu0 %v7527_v53 }
0x20d6   :  { %2799 = vmatpush.msrb.mxu0 %v7533_v37  ;;  %v2462_v37 = vstv %s3854_s29  ;;  %s3898_s29 = sld [smem:[#allocation3 + $0x11]] }
0x2134   :  { %v2447_v4 = vpop.f32.mrf.mxu0 }
0x2135   :  { %v2448_v53 = vadd.f32 %v7539_v6, %v2447_v4  ;;  %v9155_v4 = vld [vmem:[#allocation6_spill] sm:$0xff] }
0x2137   :  { %v2458_v19 = vmul.f32 %v2457_v18, %v2448_v53 }
0x2139   :  { %v2459_v38 = vsub.f32 %v2456_v23, %v2458_v19 }
0x213b   :  { %v3857_v10 = vclamps-f32 %v2459_v38, 1.0 }
0x213d   :  { %v2463_v31 = vmul.f32 %v3857_v10, %v2462_v37 }
0x213f   :  { %v2466_v42 = vadd.f32 %v2465_v15, %v2463_v31 }
0x2141   :  { %v7547_v1 = vadd.f32 %v2470_v11, %v2466_v42 }
0x2143   :  { %2493 = vmatmul.f32.vlgmr.msrb.gmra.mxu1 %v7547_v1 }
0x2144   :  { %2831 = vmatpush.msrb.mxu1 %v7060_v9  ;;  %v3952_v9 = vld [vmem:[%s8376_s4 + $0x6] ss:$0 sm:$0xff] }
0x2146   :  { %2832 = vmatpush.msrb.mxu1 %v7066_v22 }
0x2148   :  { %2833 = vmatpush.msrb.mxu1 %v7072_v2 }
0x214a   :  { %2834 = vmatpush.msrb.mxu1 %v7078_v35 }
0x214c   :  { %2835 = vmatpush.msrb.mxu1 %v7084_v52 }
0x214e   :  { %2836 = vmatpush.msrb.mxu1 %v7090_v27 }
0x2150   :  { %2837 = vmatpush.msrb.mxu1 %v9116_v13 }
0x2152   :  { %2838 = vmatpush.msrb.mxu1 %v9117_v51 }
0x2154   :  { %2839 = vmatpush.msrb.mxu1 %v9118_v14 }
0x2156   :  { %2840 = vmatpush.msrb.mxu1 %v9119_v61 }
0x2158   :  { %2841 = vmatpush.msrb.mxu1 %v9120_v12 }
0x215a   :  { %2842 = vmatpush.msrb.mxu1 %v9121_v33 }
0x215c   :  { %2843 = vmatpush.msrb.mxu1 %v9122_v26 }
0x215e   :  { %2844 = vmatpush.msrb.mxu1 %v9123_v28 }
0x2160   :  { %2845 = vmatpush.msrb.mxu1 %v9124_v55 }
0x2162   :  { %2846 = vmatpush.msrb.mxu1 %v9125_v59 }
0x21c0   :  { %v2494_v22 = vpop.f32.mrf.mxu1 }
0x21c1   :  { %v2495_v2 = vadd.f32 %v3952_v9, %v2494_v22  ;;  %v9156_v9 = vld [vmem:[#allocation7_spill] sm:$0xff]  ;;  %v9157_v22 = vld [vmem:[#allocation8_spill] sm:$0xff] }
0x21c3   :  { %v2497_v35 = vadd.f32 %v2495_v2, %v4920_v50  ;;  %v9158_v2 = vld [vmem:[#allocation9_spill] sm:$0xff] }
0x21c5   :  { %v2498_v52 = vmin.f32 %v2497_v35, 20.0 }
0x21c7   :  { %v2499_v27 = vmul.f32 1.442695, %v2498_v52 }
0x21c9   :  { %4115 = vpow2.f32 %v2499_v27  ;;  %v9160_v27 = vld [vmem:[#allocation11_spill] sm:$0xff] }
0x21cf   :  { %v4116_v60 = vpop.eup %4115 }
0x21d0   :  { %v2501_v13 = vadd.f32 1.0, %v4116_v60 }
0x21d2   :  { %v2502_v51 = vmul.f32 %v2501_v13, %v2501_v13 }
0x21d4   :  { %v2504_v14 = vadd.f32 1.0, %v2502_v51  ;;  %v3860_v11 = vadd.f32 -1.0, %v2502_v51 }
0x21d6   :  { %4117 = vrcp.f32 %v2504_v14  ;;  %v2516_v26 = vand.u32 2147483648, %v2504_v14  ;;  %v2514_v55 = vand.u32 2147483647, %v2504_v14  ;;  %vm2510_vm13 = vweird.f32 %v2504_v14 }
0x21d8   :  { %v2517_v42 = vor.u32 1.1754944e-38, %v2516_v26  ;;  %vm2515_vm15 = vcmp.eq.f32.partialorder %v2514_v55, 8.507059e+37 }
0x21dc   :  { %v4118_v61 = vpop.eup %4117 }
0x21dd   :  { %v2506_v12 = vmul.f32 %v4118_v61, %v2504_v14  ;;  %vm2511_vm12 = vweird.f32 %v4118_v61 }
0x21de   :  { %vm2512_vm14 = vmor %vm2510_vm13, %vm2511_vm12 }
0x21df   :  { %v2507_v33 = vsub.f32 1.0, %v2506_v12 }
0x21e1   :  { %v2508_v28 = vmul.f32 %v4118_v61, %v2507_v33 }
0x21e3   :  { %v2509_v59 = vadd.f32 %v4118_v61, %v2508_v28 }
0x21e5   :  { %v2513_v15 = vsel %vm2512_vm14, %v4118_v61, %v2509_v59 }
0x21e6   :  { %v2518_v31 = vsel %vm2515_vm15, %v2517_v42, %v2513_v15 }
0x21e7   :  { %v2519_v10 = vmul.f32 %v3860_v11, %v2518_v31 }
0x21e9   :  { %v2520_v8 = vmul.f32 %v2519_v10, %v2497_v35  ;;  %v9159_v35 = vld [vmem:[#allocation10_spill] sm:$0xff] }
0x21eb   :  { %2537 = vmatmul.f32.vlgmr.msrb.gmra.mxu2 %v2520_v8 }
0x21ec   :  { %2875 = vmatpush.msrb.mxu2 %v7160_v20 }
0x21ee   :  { %2876 = vmatpush.msrb.mxu2 %v7166_v47 }
0x21f0   :  { %2877 = vmatpush.msrb.mxu2 %v7172_v49 }
0x21f2   :  { %2878 = vmatpush.msrb.mxu2 %v7178_v46 }
0x21f4   :  { %2879 = vmatpush.msrb.mxu2 %v7184_v36 }
0x21f6   :  { %2880 = vmatpush.msrb.mxu2 %v9126_v21 }
0x21f8   :  { %2881 = vmatpush.msrb.mxu2 %v9127_v63 }
0x21fa   :  { %2882 = vmatpush.msrb.mxu2 %v9128_v25 }
0x21fc   :  { %2883 = vmatpush.msrb.mxu2 %v9129_v30 }
0x21fe   :  { %2884 = vmatpush.msrb.mxu2 %v9130_v57 }
0x2200   :  { %2885 = vmatpush.msrb.mxu2 %v9131_v58 }
0x2202   :  { %2886 = vmatpush.msrb.mxu2 %v9132_v3 }
0x2204   :  { %2887 = vmatpush.msrb.mxu2 %v7311_v44 }
0x2206   :  { %2888 = vmatpush.msrb.mxu2 %v7317_v43 }
0x2208   :  { %2889 = vmatpush.msrb.mxu2 %v7323_v39 }
0x220a   :  { %2890 = vmatpush.msrb.mxu2 %v7329_v48 }
0x226e   :  { %v2538_v20 = vpop.f32.mrf.mxu2 }
0x226f   :  { %v2539_v47 = vadd.f32 %v7335_v45, %v2538_v20 }
0x2271   :  { %v2541_v49 = vmin.f32 %v2539_v47, 20.0 }
0x2273   :  { %v2542_v46 = vmul.f32 1.442695, %v2541_v49 }
0x2275   :  { %4119 = vpow2.f32 %v2542_v46  ;;  %v9161_v46 = vld [vmem:[#allocation12_spill] sm:$0xff] }
0x227b   :  { %v4120_v36 = vpop.eup %4119 }
0x227c   :  { %v2544_v21 = vadd.f32 1.0, %v4120_v36  ;;  %v9162_v36 = vld [vmem:[#allocation13_spill] sm:$0xff] }
0x227e   :  { %v2545_v63 = vmul.f32 %v2544_v21, %v2544_v21  ;;  %v9163_v21 = vld [vmem:[#allocation14_spill] sm:$0xff] }
0x2280   :  { %v2547_v25 = vadd.f32 1.0, %v2545_v63  ;;  %v3861_v23 = vadd.f32 -1.0, %v2545_v63  ;;  %v9164_v63 = vld [vmem:[#allocation15_spill] sm:$0xff] }
0x2282   :  { %4121 = vrcp.f32 %v2547_v25  ;;  %v2559_v3 = vand.u32 2147483648, %v2547_v25  ;;  %v2557_v62 = vand.u32 2147483647, %v2547_v25  ;;  %vm2553_vm1 = vweird.f32 %v2547_v25 }
0x2284   :  { %v2560_v19 = vor.u32 1.1754944e-38, %v2559_v3  ;;  %vm2558_vm3 = vcmp.eq.f32.partialorder %v2557_v62, 8.507059e+37  ;;  %v9169_v3 = vld [vmem:[#allocation21_spill] sm:$0xff]  ;;  %v9171_v62 = vld [vmem:[#allocation23_spill] sm:$0xff] }
0x2288   :  { %v4122_v30 = vpop.eup %4121 }
0x2289   :  { %v2549_v57 = vmul.f32 %v4122_v30, %v2547_v25  ;;  %vm2554_vm0 = vweird.f32 %v4122_v30  ;;  %v9165_v25 = vld [vmem:[#allocation17_spill] sm:$0xff] }
0x228a   :  { %vm2555_vm2 = vmor %vm2553_vm1, %vm2554_vm0 }
0x228b   :  { %v2550_v58 = vsub.f32 1.0, %v2549_v57  ;;  %v9167_v57 = vld [vmem:[#allocation19_spill] sm:$0xff] }
0x228d   :  { %v2551_v29 = vmul.f32 %v4122_v30, %v2550_v58  ;;  %v9168_v58 = vld [vmem:[#allocation20_spill] sm:$0xff] }
0x228f   :  { %v2552_v38 = vadd.f32 %v4122_v30, %v2551_v29  ;;  %v9170_v29 = vld [vmem:[#allocation22_spill] sm:$0xff] }
0x2291   :  { %v2556_v18 = vsel %vm2555_vm2, %v4122_v30, %v2552_v38  ;;  %v9166_v30 = vld [vmem:[#allocation18_spill] sm:$0xff]  ;;  %v9172_v38 = vld [vmem:[#allocation24_spill] sm:$0xff] }
0x2292   :  { %v2561_v32 = vsel %vm2558_vm3, %v2560_v19, %v2556_v18  ;;  %v9173_v19 = vld [vmem:[#allocation25_spill] sm:$0xff]  ;;  %v9175_v18 = vld [vmem:[#allocation16_spill] sm:$0xff] }
0x2293   :  { %v2562_v53 = vmul.f32 %v3861_v23, %v2561_v32  ;;  %v9174_v23 = vld [vmem:[#allocation26_spill] sm:$0xff]  ;;  %v9176_v32 = vld [vmem:[#allocation5_spill] sm:$0xff] }
0x2295   :  { %v2563_v37 = vmul.f32 %v2562_v53, %v2539_v47 }
0x2297   :  { %2580 = vmatmul.f32.vlgmr.msrb.gmra.mxu3 %v2563_v37  ;;  %v2632_v37 = vstv %s3863_s18 }
0x2298   :  { %2918 = vmatpush.msrb.mxu3 %v7341_v0 }
0x229a   :  { %2919 = vmatpush.msrb.mxu3 %v7347_v41 }
0x229c   :  { %2920 = vmatpush.msrb.mxu3 %v7353_v54 }
0x229e   :  { %2921 = vmatpush.msrb.mxu3 %v7359_v17 }
0x22a0   :  { %2922 = vmatpush.msrb.mxu3 %v7365_v40 }
0x22a2   :  { %2923 = vmatpush.msrb.mxu3 %v7371_v5 }
0x22a4   :  { %2924 = vmatpush.msrb.mxu3 %v7377_v56 }
0x22a6   :  { %2925 = vmatpush.msrb.mxu3 %v7383_v16 }
0x22a8   :  { %2926 = vmatpush.msrb.mxu3 %v7389_v7 }
0x22aa   :  { %2927 = vmatpush.msrb.mxu3 %v7395_v34 }
0x22ac   :  { %2928 = vmatpush.msrb.mxu3 %v7401_v24 }
0x22ae   :  { %2929 = vmatpush.msrb.mxu3 %v9155_v4 }
0x22b0   :  { %2930 = vmatpush.msrb.mxu3 %v9156_v9 }
0x22b2   :  { %2931 = vmatpush.msrb.mxu3 %v9157_v22 }
0x22b4   :  { %2932 = vmatpush.msrb.mxu3 %v9158_v2 }
0x22b6   :  { %2933 = vmatpush.msrb.mxu3 %v9159_v35 }
0x231a   :  { %v2581_v52 = vpop.f32.mrf.mxu3 }
0x231b   :  { %v2582_v60 = vadd.f32 %v9160_v27, %v2581_v52  ;;  %v2634_v52 = vstv %s3864_s19  ;;  %s3885_s19 = sld [smem:[#allocation3 + $0x14]] }
0x231d   :  { %v2584_v13 = vmin.f32 %v2582_v60, 20.0 }
0x231f   :  { %v2585_v51 = vmul.f32 1.442695, %v2584_v13  ;;  %v2633_v13 = vmul.f32 %v2632_v37, %v7547_v1  ;;  %v7680_v37 = vld [vmem:[%s8377_s5 + $0x38] sm:$0xff] }
0x2320   :  { %9179 = vst [vmem:[#allocation8_spill] sm:$0xff] %v7680_v37 }
0x2321   :  { %4123 = vpow2.f32 %v2585_v51 }
0x2327   :  { %v4124_v14 = vpop.eup %4123 }
0x2328   :  { %v2587_v61 = vadd.f32 1.0, %v4124_v14 }
0x232a   :  { %v2588_v12 = vmul.f32 %v2587_v61, %v2587_v61  ;;  %v2639_v61 = vstv %s3865_s21  ;;  %s3875_s21 = sld [smem:[#allocation3 + $0x1a]] }
0x232c   :  { %v2590_v33 = vadd.f32 1.0, %v2588_v12  ;;  %v3862_v10 = vadd.f32 -1.0, %v2588_v12  ;;  %v2641_v12 = vstv %s3866_s20  ;;  %s3874_s20 = sld [smem:[#allocation3 + $0x19]] }
0x232e   :  { %4125 = vrcp.f32 %v2590_v33  ;;  %v2602_v59 = vand.u32 2147483648, %v2590_v33  ;;  %v2600_v11 = vand.u32 2147483647, %v2590_v33  ;;  %vm2596_vm5 = vweird.f32 %v2590_v33 }
0x2330   :  { %v2603_v31 = vor.u32 1.1754944e-38, %v2602_v59  ;;  %vm2601_vm7 = vcmp.eq.f32.partialorder %v2600_v11, 8.507059e+37  ;;  %v2642_v59 = vmul.f32 %v2641_v12, %v7547_v1  ;;  %v7644_v1 = vld [vmem:[%s8377_s5 + $0x68] sm:$0xff]  ;;  %v7722_v12 = vld [vmem:[%s8377_s5] sm:$0xff] }
0x2331   :  { %9186 = vst [vmem:[#allocation15_spill] sm:$0xff] %v7722_v12 }
0x2334   :  { %v4126_v26 = vpop.eup %4125 }
0x2335   :  { %v2592_v28 = vmul.f32 %v4126_v26, %v2590_v33  ;;  %vm2597_vm4 = vweird.f32 %v4126_v26  ;;  %v3869_v33 = vld [vmem:[%s8375_s3 + $0x30] sm:$0xff] }
0x2336   :  { %vm2598_vm6 = vmor %vm2596_vm5, %vm2597_vm4 }
0x2337   :  { %v2593_v55 = vsub.f32 1.0, %v2592_v28 }
0x2339   :  { %v2594_v42 = vmul.f32 %v4126_v26, %v2593_v55 }
0x233b   :  { %v2595_v15 = vadd.f32 %v4126_v26, %v2594_v42 }
0x233d   :  { %v2599_v8 = vsel %vm2598_vm6, %v4126_v26, %v2595_v15  ;;  %v2646_v26 = vstv %s3867_s7  ;;  %s3877_s7 = sld [smem:[#allocation3 + $0x1c]] }
0x233e   :  { %v2604_v20 = vsel %vm2601_vm7, %v2603_v31, %v2599_v8  ;;  %v2647_v42 = vmul.f32 %v3869_v33, %v2646_v26  ;;  %v7632_v31 = vld [vmem:[%s8377_s5 + $0x78] sm:$0xff]  ;;  %v7650_v8 = vld [vmem:[%s8377_s5 + $0x60] sm:$0xff] }
0x233f   :  { %v2605_v47 = vmul.f32 %v3862_v10, %v2604_v20  ;;  %v7638_v10 = vld [vmem:[%s8377_s5 + $0x70] sm:$0xff]  ;;  %v7656_v20 = vld [vmem:[%s8377_s5 + $0x58] sm:$0xff]  ;;  %v3953_v33 = vld [vmem:[%s8376_s4 + $0x5] ss:$0 sm:$0xff] }
0x2341   :  { %v2606_v49 = vmul.f32 %v2605_v47, %v2582_v60  ;;  %v7662_v47 = vld [vmem:[%s8377_s5 + $0x50] sm:$0xff] }
0x2343   :  { %2623 = vmatmul.f32.vlgmr.msra.gmra.mxu0 %v2606_v49  ;;  %v7668_v49 = vld [vmem:[%s8377_s5 + $0x48] sm:$0xff] }
0x2344   :  { %2961 = vmatpush.msra.mxu0 %v9161_v46  ;;  %9177 = vst [vmem:[#allocation6_spill] sm:$0xff] %v7668_v49 }
0x2346   :  { %2962 = vmatpush.msra.mxu0 %v9162_v36 }
0x2348   :  { %2963 = vmatpush.msra.mxu0 %v9163_v21 }
0x234a   :  { %2964 = vmatpush.msra.mxu0 %v9164_v63 }
0x234c   :  { %2965 = vmatpush.msra.mxu0 %v9165_v25 }
0x234e   :  { %2966 = vmatpush.msra.mxu0 %v9166_v30 }
0x2350   :  { %2967 = vmatpush.msra.mxu0 %v9167_v57 }
0x2352   :  { %2968 = vmatpush.msra.mxu0 %v9168_v58 }
0x2354   :  { %2969 = vmatpush.msra.mxu0 %v9169_v3 }
0x2356   :  { %2970 = vmatpush.msra.mxu0 %v9170_v29 }
0x2358   :  { %2971 = vmatpush.msra.mxu0 %v9171_v62 }
0x235a   :  { %2972 = vmatpush.msra.mxu0 %v9172_v38 }
0x235c   :  { %2973 = vmatpush.msra.mxu0 %v9173_v19 }
0x235e   :  { %2974 = vmatpush.msra.mxu0 %v9174_v23 }
0x2360   :  { %2975 = vmatpush.msra.mxu0 %v9175_v18 }
0x2362   :  { %2976 = vmatpush.msra.mxu0 %v9176_v32 }
0x23c0   :  { %v2624_v53 = vpop.f32.mrf.mxu0 }
0x23c1   :  { %v2625_v60 = vadd.f32 %v7539_v6, %v2624_v53  ;;  %v7674_v53 = vld [vmem:[%s8377_s5 + $0x40] sm:$0xff] }
0x23c2   :  { %9178 = vst [vmem:[#allocation7_spill] sm:$0xff] %v7674_v53 }
0x23c3   :  { %v2635_v51 = vmul.f32 %v2634_v52, %v2625_v60  ;;  %v7686_v52 = vld [vmem:[%s8377_s5 + $0x30] sm:$0xff]  ;;  %v7692_v60 = vld [vmem:[%s8377_s5 + $0x28] sm:$0xff] }
0x23c4   :  { %9180 = vst [vmem:[#allocation9_spill] sm:$0xff] %v7686_v52 }
0x23c5   :  { %v2636_v14 = vsub.f32 %v2633_v13, %v2635_v51  ;;  %9181 = vst [vmem:[#allocation10_spill] sm:$0xff] %v7692_v60  ;;  %v7698_v13 = vld [vmem:[%s8377_s5 + $0x20] sm:$0xff]  ;;  %v7704_v51 = vld [vmem:[%s8377_s5 + $0x18] sm:$0xff] }
0x23c6   :  { %9182 = vst [vmem:[#allocation11_spill] sm:$0xff] %v7698_v13 }
0x23c7   :  { %v3868_v28 = vclamps-f32 %v2636_v14, 1.0  ;;  %9183 = vst [vmem:[#allocation12_spill] sm:$0xff] %v7704_v51  ;;  %v7710_v14 = vld [vmem:[%s8377_s5 + $0x10] sm:$0xff] }
0x23c8   :  { %9184 = vst [vmem:[#allocation13_spill] sm:$0xff] %v7710_v14 }
0x23c9   :  { %v2640_v55 = vmul.f32 %v3868_v28, %v2639_v61  ;;  %v7716_v61 = vld [vmem:[%s8377_s5 + $0x8] sm:$0xff] }
0x23ca   :  { %9185 = vst [vmem:[#allocation14_spill] sm:$0xff] %v7716_v61 }
0x23cb   :  { %v2643_v11 = vadd.f32 %v2642_v59, %v2640_v55 }
0x23cd   :  { %v7626_v15 = vadd.f32 %v2647_v42, %v2643_v11 }
0x23cf   :  { %2670 = vmatmul.f32.vlgmr.msra.gmra.mxu1 %v7626_v15 }
0x23d0   :  { %3008 = vmatpush.msra.mxu1 %v7632_v31 }
0x23d2   :  { %3009 = vmatpush.msra.mxu1 %v7638_v10 }
0x23d4   :  { %3010 = vmatpush.msra.mxu1 %v7644_v1 }
0x23d6   :  { %3011 = vmatpush.msra.mxu1 %v7650_v8 }
0x23d8   :  { %3012 = vmatpush.msra.mxu1 %v7656_v20 }
0x23da   :  { %3013 = vmatpush.msra.mxu1 %v7662_v47 }
0x23dc   :  { %3014 = vmatpush.msra.mxu1 %v7668_v49 }
0x23de   :  { %3015 = vmatpush.msra.mxu1 %v7674_v53 }
0x23e0   :  { %3016 = vmatpush.msra.mxu1 %v7680_v37 }
0x23e2   :  { %3017 = vmatpush.msra.mxu1 %v7686_v52 }
0x23e4   :  { %3018 = vmatpush.msra.mxu1 %v7692_v60 }
0x23e6   :  { %3019 = vmatpush.msra.mxu1 %v7698_v13 }
0x23e8   :  { %3020 = vmatpush.msra.mxu1 %v7704_v51 }
0x23ea   :  { %3021 = vmatpush.msra.mxu1 %v7710_v14 }
0x23ec   :  { %3022 = vmatpush.msra.mxu1 %v7716_v61 }
0x23ee   :  { %3023 = vmatpush.msra.mxu1 %v7722_v12 }
0x244c   :  { %v2671_v26 = vpop.f32.mrf.mxu1 }
0x244d   :  { %v2672_v28 = vadd.f32 %v3953_v33, %v2671_v26 }
0x244f   :  { %v2674_v55 = vadd.f32 %v2672_v28, %v4920_v50 }
0x2451   :  { %v2675_v59 = vmin.f32 %v2674_v55, 20.0 }
0x2453   :  { %v2676_v42 = vmul.f32 1.442695, %v2675_v59 }
0x2455   :  { %4127 = vpow2.f32 %v2676_v42 }
0x245b   :  { %v4128_v11 = vpop.eup %4127 }
0x245c   :  { %v2678_v61 = vadd.f32 1.0, %v4128_v11 }
0x245e   :  { %v2679_v14 = vmul.f32 %v2678_v61, %v2678_v61  ;;  %v7732_v61 = vld [vmem:[%s8380_s8 + $0x78] sm:$0xff] }
0x2460   :  { %v2681_v51 = vadd.f32 1.0, %v2679_v14  ;;  %v3871_v26 = vadd.f32 -1.0, %v2679_v14  ;;  %v7780_v14 = vld [vmem:[%s8380_s8 + $0x38] sm:$0xff] }
0x2461   :  { %9190 = vst [vmem:[#allocation20_spill] sm:$0xff] %v7780_v14 }
0x2462   :  { %4129 = vrcp.f32 %v2681_v51  ;;  %v2693_v12 = vand.u32 2147483648, %v2681_v51  ;;  %v2691_v53 = vand.u32 2147483647, %v2681_v51  ;;  %vm2687_vm9 = vweird.f32 %v2681_v51 }
0x2464   :  { %v2694_v33 = vor.u32 1.1754944e-38, %v2693_v12  ;;  %vm2692_vm11 = vcmp.eq.f32.partialorder %v2691_v53, 8.507059e+37  ;;  %v7750_v53 = vld [vmem:[%s8380_s8 + $0x60] sm:$0xff]  ;;  %v7786_v12 = vld [vmem:[%s8380_s8 + $0x30] sm:$0xff] }
0x2465   :  { %9191 = vst [vmem:[#allocation21_spill] sm:$0xff] %v7786_v12 }
0x2468   :  { %v4130_v13 = vpop.eup %4129 }
0x2469   :  { %v2683_v60 = vmul.f32 %v4130_v13, %v2681_v51  ;;  %vm2688_vm8 = vweird.f32 %v4130_v13  ;;  %v7774_v51 = vld [vmem:[%s8380_s8 + $0x40] sm:$0xff] }
0x246a   :  { %vm2689_vm10 = vmor %vm2687_vm9, %vm2688_vm8  ;;  %9189 = vst [vmem:[#allocation19_spill] sm:$0xff] %v7774_v51 }
0x246b   :  { %v2684_v52 = vsub.f32 1.0, %v2683_v60  ;;  %v7762_v60 = vld [vmem:[%s8380_s8 + $0x50] sm:$0xff] }
0x246c   :  { %9187 = vst [vmem:[#allocation17_spill] sm:$0xff] %v7762_v60 }
0x246d   :  { %v2685_v37 = vmul.f32 %v4130_v13, %v2684_v52  ;;  %v7756_v52 = vld [vmem:[%s8380_s8 + $0x58] sm:$0xff] }
0x246f   :  { %v2686_v49 = vadd.f32 %v4130_v13, %v2685_v37  ;;  %v7738_v37 = vld [vmem:[%s8380_s8 + $0x70] sm:$0xff] }
0x2471   :  { %v2690_v28 = vsel %vm2689_vm10, %v4130_v13, %v2686_v49  ;;  %v7744_v49 = vld [vmem:[%s8380_s8 + $0x68] sm:$0xff] }
0x2472   :  { %v2695_v59 = vsel %vm2692_vm11, %v2694_v33, %v2690_v28  ;;  %v7768_v13 = vld [vmem:[%s8380_s8 + $0x48] sm:$0xff]  ;;  %v7798_v33 = vld [vmem:[%s8380_s8 + $0x20] sm:$0xff] }
0x2473   :  { %v2696_v42 = vmul.f32 %v3871_v26, %v2695_v59  ;;  %9188 = vst [vmem:[#allocation18_spill] sm:$0xff] %v7768_v13 }
0x2474   :  { %9193 = vst [vmem:[#allocation23_spill] sm:$0xff] %v7798_v33 }
0x2475   :  { %v2697_v11 = vmul.f32 %v2696_v42, %v2674_v55  ;;  %v7792_v55 = vld [vmem:[%s8380_s8 + $0x28] sm:$0xff] }
0x2476   :  { %9192 = vst [vmem:[#allocation22_spill] sm:$0xff] %v7792_v55 }
0x2477   :  { %2714 = vmatmul.f32.vlgmr.msra.gmra.mxu2 %v2697_v11 }
0x2478   :  { %3052 = vmatpush.msra.mxu2 %v7732_v61 }
0x247a   :  { %3053 = vmatpush.msra.mxu2 %v7738_v37 }
0x247c   :  { %3054 = vmatpush.msra.mxu2 %v7744_v49 }
0x247e   :  { %3055 = vmatpush.msra.mxu2 %v7750_v53 }
0x2480   :  { %3056 = vmatpush.msra.mxu2 %v7756_v52 }
0x2482   :  { %3057 = vmatpush.msra.mxu2 %v7762_v60 }
0x2484   :  { %3058 = vmatpush.msra.mxu2 %v7768_v13 }
0x2486   :  { %3059 = vmatpush.msra.mxu2 %v7774_v51 }
0x2488   :  { %3060 = vmatpush.msra.mxu2 %v7780_v14 }
0x248a   :  { %3061 = vmatpush.msra.mxu2 %v7786_v12 }
0x248c   :  { %3062 = vmatpush.msra.mxu2 %v7792_v55 }
0x248e   :  { %3063 = vmatpush.msra.mxu2 %v7798_v33 }
0x2490   :  { %3064 = vmatpush.msra.mxu2 %v7311_v44 }
0x2492   :  { %3065 = vmatpush.msra.mxu2 %v7317_v43 }
0x2494   :  { %3066 = vmatpush.msra.mxu2 %v7323_v39 }
0x2496   :  { %3067 = vmatpush.msra.mxu2 %v7329_v48 }
0x24fa   :  { %v2715_v26 = vpop.f32.mrf.mxu2 }
0x24fb   :  { %v2716_v28 = vadd.f32 %v7335_v45, %v2715_v26 }
0x24fd   :  { %v2718_v59 = vmin.f32 %v2716_v28, 20.0 }
0x24ff   :  { %v2719_v42 = vmul.f32 1.442695, %v2718_v59 }
0x2501   :  { %4131 = vpow2.f32 %v2719_v42 }
0x2507   :  { %v4132_v11 = vpop.eup %4131 }
0x2508   :  { %v2721_v55 = vadd.f32 1.0, %v4132_v11 }
0x250a   :  { %v2722_v12 = vmul.f32 %v2721_v55, %v2721_v55  ;;  %v9196_v55 = vld [vmem:[#allocation8_spill] sm:$0xff] }
0x250c   :  { %v2724_v14 = vadd.f32 1.0, %v2722_v12  ;;  %v3872_v45 = vadd.f32 -1.0, %v2722_v12 }
0x250e   :  { %4133 = vrcp.f32 %v2724_v14  ;;  %v2736_v13 = vand.u32 2147483648, %v2724_v14  ;;  %v2734_v39 = vand.u32 2147483647, %v2724_v14  ;;  %vm2730_vm13 = vweird.f32 %v2724_v14 }
0x2510   :  { %v2737_v48 = vor.u32 1.1754944e-38, %v2736_v13  ;;  %vm2735_vm15 = vcmp.eq.f32.partialorder %v2734_v39, 8.507059e+37  ;;  %v9201_v39 = vld [vmem:[#allocation13_spill] sm:$0xff] }
0x2514   :  { %v4134_v33 = vpop.eup %4133 }
0x2515   :  { %v2726_v51 = vmul.f32 %v4134_v33, %v2724_v14  ;;  %vm2731_vm12 = vweird.f32 %v4134_v33 }
0x2516   :  { %vm2732_vm14 = vmor %vm2730_vm13, %vm2731_vm12 }
0x2517   :  { %v2727_v44 = vsub.f32 1.0, %v2726_v51 }
0x2519   :  { %v2728_v43 = vmul.f32 %v4134_v33, %v2727_v44  ;;  %v9199_v44 = vld [vmem:[#allocation11_spill] sm:$0xff] }
0x251b   :  { %v2729_v60 = vadd.f32 %v4134_v33, %v2728_v43  ;;  %v9200_v43 = vld [vmem:[#allocation12_spill] sm:$0xff] }
0x251d   :  { %v2733_v26 = vsel %vm2732_vm14, %v4134_v33, %v2729_v60  ;;  %v9197_v33 = vld [vmem:[#allocation9_spill] sm:$0xff] }
0x251e   :  { %v2738_v59 = vsel %vm2735_vm15, %v2737_v48, %v2733_v26  ;;  %v9202_v48 = vld [vmem:[#allocation14_spill] sm:$0xff]  ;;  %v3954_v26 = vld [vmem:[%s8376_s4 + $0x4] ss:$0 sm:$0xff] }
0x251f   :  { %v2739_v42 = vmul.f32 %v3872_v45, %v2738_v59  ;;  %v9203_v45 = vld [vmem:[#allocation15_spill] sm:$0xff] }
0x2521   :  { %v2740_v11 = vmul.f32 %v2739_v42, %v2716_v28  ;;  %v9198_v28 = vld [vmem:[#allocation10_spill] sm:$0xff] }
0x2523   :  { %2757 = vmatmul.f32.vlgmr.msra.gmra.mxu3 %v2740_v11 }
0x2524   :  { %3095 = vmatpush.msra.mxu3 %v7341_v0 }
0x2526   :  { %3096 = vmatpush.msra.mxu3 %v7347_v41 }
0x2528   :  { %3097 = vmatpush.msra.mxu3 %v7353_v54 }
0x252a   :  { %3098 = vmatpush.msra.mxu3 %v7359_v17 }
0x252c   :  { %3099 = vmatpush.msra.mxu3 %v7365_v40 }
0x252e   :  { %3100 = vmatpush.msra.mxu3 %v7371_v5 }
0x2530   :  { %3101 = vmatpush.msra.mxu3 %v7377_v56 }
0x2532   :  { %3102 = vmatpush.msra.mxu3 %v7383_v16 }
0x2534   :  { %3103 = vmatpush.msra.mxu3 %v7389_v7 }
0x2536   :  { %3104 = vmatpush.msra.mxu3 %v7395_v34 }
0x2538   :  { %3105 = vmatpush.msra.mxu3 %v7401_v24 }
0x253a   :  { %3106 = vmatpush.msra.mxu3 %v9155_v4 }
0x253c   :  { %3107 = vmatpush.msra.mxu3 %v9156_v9 }
0x253e   :  { %3108 = vmatpush.msra.mxu3 %v9157_v22 }
0x2540   :  { %3109 = vmatpush.msra.mxu3 %v9158_v2 }
0x2542   :  { %3110 = vmatpush.msra.mxu3 %v9159_v35 }
0x25a6   :  { %v2758_v0 = vpop.f32.mrf.mxu3 }
0x25a7   :  { %v2759_v41 = vadd.f32 %v9160_v27, %v2758_v0 }
0x25a9   :  { %v2761_v54 = vmin.f32 %v2759_v41, 20.0 }
0x25ab   :  { %v2762_v17 = vmul.f32 1.442695, %v2761_v54 }
0x25ad   :  { %4135 = vpow2.f32 %v2762_v17 }
0x25b3   :  { %v4136_v40 = vpop.eup %4135 }
0x25b4   :  { %v2764_v5 = vadd.f32 1.0, %v4136_v40 }
0x25b6   :  { %v2765_v56 = vmul.f32 %v2764_v5, %v2764_v5 }
0x25b8   :  { %v2767_v16 = vadd.f32 1.0, %v2765_v56  ;;  %v3873_v27 = vadd.f32 -1.0, %v2765_v56 }
0x25ba   :  { %4137 = vrcp.f32 %v2767_v16  ;;  %v2779_v4 = vand.u32 2147483648, %v2767_v16  ;;  %v2777_v22 = vand.u32 2147483647, %v2767_v16  ;;  %vm2773_vm1 = vweird.f32 %v2767_v16 }
0x25bc   :  { %v2780_v35 = vor.u32 1.1754944e-38, %v2779_v4  ;;  %vm2778_vm3 = vcmp.eq.f32.partialorder %v2777_v22, 8.507059e+37 }
0x25c0   :  { %v4138_v7 = vpop.eup %4137 }
0x25c1   :  { %v2769_v34 = vmul.f32 %v4138_v7, %v2767_v16  ;;  %vm2774_vm0 = vweird.f32 %v4138_v7 }
0x25c2   :  { %vm2775_vm2 = vmor %vm2773_vm1, %vm2774_vm0 }
0x25c3   :  { %v2770_v24 = vsub.f32 1.0, %v2769_v34 }
0x25c5   :  { %v2771_v9 = vmul.f32 %v4138_v7, %v2770_v24 }
0x25c7   :  { %v2772_v2 = vadd.f32 %v4138_v7, %v2771_v9 }
0x25c9   :  { %v2776_v60 = vsel %vm2775_vm2, %v4138_v7, %v2772_v2 }
0x25ca   :  { %v2781_v13 = vsel %vm2778_vm3, %v2780_v35, %v2776_v60 }
0x25cb   :  { %v2782_v51 = vmul.f32 %v3873_v27, %v2781_v13 }
0x25cd   :  { %v2783_v14 = vmul.f32 %v2782_v51, %v2759_v41  ;;  %v9204_v51 = vld [vmem:[#allocation17_spill] sm:$0xff] }
0x25cf   :  { %2800 = vmatmul.f32.vlgmr.msrb.gmra.mxu0 %v2783_v14  ;;  %v9205_v14 = vld [vmem:[#allocation18_spill] sm:$0xff] }
0x25d0   :  { %3138 = vmatpush.msrb.mxu0 %v9161_v46 }
0x25d2   :  { %3139 = vmatpush.msrb.mxu0 %v9162_v36  ;;  %v2809_v36 = vstv %s3874_s20  ;;  %s3886_s20 = sld [smem:[#allocation3 + $0x15]] }
0x25d4   :  { %3140 = vmatpush.msrb.mxu0 %v9163_v21  ;;  %v2811_v21 = vstv %s3875_s21  ;;  %s3888_s21 = sld [smem:[#allocation3 + $0x17]] }
0x25d6   :  { %3141 = vmatpush.msrb.mxu0 %v9164_v63 }
0x25d8   :  { %3142 = vmatpush.msrb.mxu0 %v9165_v25  ;;  %v2810_v25 = vmul.f32 %v2809_v36, %v7626_v15  ;;  %v9207_v36 = vld [vmem:[#allocation20_spill] sm:$0xff] }
0x25da   :  { %3143 = vmatpush.msrb.mxu0 %v9166_v30 }
0x25dc   :  { %3144 = vmatpush.msrb.mxu0 %v9167_v57 }
0x25de   :  { %3145 = vmatpush.msrb.mxu0 %v9168_v58  ;;  %v2816_v58 = vstv %s3876_s22  ;;  %s3889_s22 = sld [smem:[#allocation3 + $0x18]] }
0x25e0   :  { %3146 = vmatpush.msrb.mxu0 %v9169_v3  ;;  %v2818_v3 = vstv %s3877_s7  ;;  %s3887_s7 = sld [smem:[#allocation3 + $0x16]] }
0x25e2   :  { %3147 = vmatpush.msrb.mxu0 %v9170_v29  ;;  %v3880_v29 = vld [vmem:[%s8375_s3 + $0x28] sm:$0xff] }
0x25e4   :  { %3148 = vmatpush.msrb.mxu0 %v9171_v62  ;;  %v2823_v62 = vstv %s3878_s0 }
0x25e6   :  { %3149 = vmatpush.msrb.mxu0 %v9172_v38 }
0x25e8   :  { %3150 = vmatpush.msrb.mxu0 %v9173_v19 }
0x25ea   :  { %3151 = vmatpush.msrb.mxu0 %v9174_v23  ;;  %v2819_v23 = vmul.f32 %v2818_v3, %v7626_v15  ;;  %v9195_v15 = vld [vmem:[#allocation7_spill] sm:$0xff]  ;;  %v7901_v3 = vld [vmem:[%s8380_s8] sm:$0xff] }
0x25ec   :  { %3152 = vmatpush.msrb.mxu0 %v9175_v18  ;;  %v2824_v18 = vmul.f32 %v3880_v29, %v2823_v62  ;;  %v7907_v62 = vld [vmem:[%s8381_s9] ss:$0 sm:$0xff] }
0x25ee   :  { %3153 = vmatpush.msrb.mxu0 %v9176_v32 }
0x264c   :  { %v2801_v46 = vpop.f32.mrf.mxu0 }
0x264d   :  { %v2802_v63 = vadd.f32 %v7539_v6, %v2801_v46  ;;  %v9194_v6 = vld [vmem:[#allocation6_spill] sm:$0xff]  ;;  %v9206_v46 = vld [vmem:[#allocation19_spill] sm:$0xff] }
0x264f   :  { %v2812_v30 = vmul.f32 %v2811_v21, %v2802_v63  ;;  %v9208_v21 = vld [vmem:[#allocation21_spill] sm:$0xff]  ;;  %v9209_v63 = vld [vmem:[#allocation22_spill] sm:$0xff] }
0x2651   :  { %v2813_v57 = vsub.f32 %v2810_v25, %v2812_v30  ;;  %v9210_v25 = vld [vmem:[#allocation23_spill] sm:$0xff]  ;;  %v7883_v30 = vld [vmem:[%s8380_s8 + $0x18] sm:$0xff] }
0x2653   :  { %v3879_v38 = vclamps-f32 %v2813_v57, 1.0  ;;  %v7889_v57 = vld [vmem:[%s8380_s8 + $0x10] sm:$0xff] }
0x2655   :  { %v2817_v19 = vmul.f32 %v3879_v38, %v2816_v58  ;;  %v7895_v58 = vld [vmem:[%s8380_s8 + $0x8] sm:$0xff] }
0x2657   :  { %v2820_v32 = vadd.f32 %v2819_v23, %v2817_v19 }
0x2659   :  { %v7845_v12 = vadd.f32 %v2824_v18, %v2820_v32 }
0x265b   :  { %2847 = vmatmul.f32.vlgmr.msrb.gmra.mxu1 %v7845_v12 }
0x265c   :  { %3185 = vmatpush.msrb.mxu1 %v7632_v31 }
0x265e   :  { %3186 = vmatpush.msrb.mxu1 %v7638_v10 }
0x2660   :  { %3187 = vmatpush.msrb.mxu1 %v7644_v1 }
0x2662   :  { %3188 = vmatpush.msrb.mxu1 %v7650_v8 }
0x2664   :  { %3189 = vmatpush.msrb.mxu1 %v7656_v20 }
0x2666   :  { %3190 = vmatpush.msrb.mxu1 %v7662_v47 }
0x2668   :  { %3191 = vmatpush.msrb.mxu1 %v9194_v6 }
0x266a   :  { %3192 = vmatpush.msrb.mxu1 %v9195_v15 }
0x266c   :  { %3193 = vmatpush.msrb.mxu1 %v9196_v55 }
0x266e   :  { %3194 = vmatpush.msrb.mxu1 %v9197_v33 }
0x2670   :  { %3195 = vmatpush.msrb.mxu1 %v9198_v28 }
0x2672   :  { %3196 = vmatpush.msrb.mxu1 %v9199_v44 }
0x2674   :  { %3197 = vmatpush.msrb.mxu1 %v9200_v43 }
0x2676   :  { %3198 = vmatpush.msrb.mxu1 %v9201_v39 }
0x2678   :  { %3199 = vmatpush.msrb.mxu1 %v9202_v48 }
0x267a   :  { %3200 = vmatpush.msrb.mxu1 %v9203_v45 }
0x26d8   :  { %v2848_v59 = vpop.f32.mrf.mxu1 }
0x26d9   :  { %v2849_v42 = vadd.f32 %v3954_v26, %v2848_v59 }
0x26db   :  { %v2851_v11 = vadd.f32 %v2849_v42, %v4920_v50 }
0x26dd   :  { %v2852_v0 = vmin.f32 %v2851_v11, 20.0 }
0x26df   :  { %v2853_v41 = vmul.f32 1.442695, %v2852_v0 }
0x26e1   :  { %4139 = vpow2.f32 %v2853_v41 }
0x26e7   :  { %v4140_v54 = vpop.eup %4139 }
0x26e8   :  { %v2855_v17 = vadd.f32 1.0, %v4140_v54 }
0x26ea   :  { %v2856_v40 = vmul.f32 %v2855_v17, %v2855_v17 }
0x26ec   :  { %v2858_v5 = vadd.f32 1.0, %v2856_v40  ;;  %v3882_v2 = vadd.f32 -1.0, %v2856_v40 }
0x26ee   :  { %4141 = vrcp.f32 %v2858_v5  ;;  %v2870_v34 = vand.u32 2147483648, %v2858_v5  ;;  %v2868_v4 = vand.u32 2147483647, %v2858_v5  ;;  %vm2864_vm5 = vweird.f32 %v2858_v5 }
0x26f0   :  { %v2871_v22 = vor.u32 1.1754944e-38, %v2870_v34  ;;  %vm2869_vm7 = vcmp.eq.f32.partialorder %v2868_v4, 8.507059e+37  ;;  %v7913_v4 = vld [vmem:[%s8382_s10 + $0x78] sm:$0xff] }
0x26f4   :  { %v4142_v56 = vpop.eup %4141 }
0x26f5   :  { %v2860_v16 = vmul.f32 %v4142_v56, %v2858_v5  ;;  %vm2865_vm4 = vweird.f32 %v4142_v56 }
0x26f6   :  { %vm2866_vm6 = vmor %vm2864_vm5, %vm2865_vm4 }
0x26f7   :  { %v2861_v7 = vsub.f32 1.0, %v2860_v16 }
0x26f9   :  { %v2862_v24 = vmul.f32 %v4142_v56, %v2861_v7 }
0x26fb   :  { %v2863_v9 = vadd.f32 %v4142_v56, %v2862_v24 }
0x26fd   :  { %v2867_v35 = vsel %vm2866_vm6, %v4142_v56, %v2863_v9  ;;  %v7919_v9 = vld [vmem:[%s8382_s10 + $0x70] sm:$0xff] }
0x26fe   :  { %v2872_v27 = vsel %vm2869_vm7, %v2871_v22, %v2867_v35  ;;  %v7925_v22 = vld [vmem:[%s8382_s10 + $0x68] sm:$0xff]  ;;  %v7937_v35 = vld [vmem:[%s8382_s10 + $0x58] sm:$0xff] }
0x26ff   :  { %v2873_v60 = vmul.f32 %v3882_v2, %v2872_v27  ;;  %v7931_v2 = vld [vmem:[%s8382_s10 + $0x60] sm:$0xff]  ;;  %v7943_v27 = vld [vmem:[%s8382_s10 + $0x50] sm:$0xff] }
0x2701   :  { %v2874_v13 = vmul.f32 %v2873_v60, %v2851_v11  ;;  %v7949_v60 = vld [vmem:[%s8382_s10 + $0x48] sm:$0xff] }
0x2703   :  { %2891 = vmatmul.f32.vlgmr.msrb.gmra.mxu2 %v2874_v13  ;;  %v7955_v13 = vld [vmem:[%s8382_s10 + $0x40] sm:$0xff] }
0x2704   :  { %3229 = vmatpush.msrb.mxu2 %v7732_v61 }
0x2706   :  { %3230 = vmatpush.msrb.mxu2 %v7738_v37 }
0x2708   :  { %3231 = vmatpush.msrb.mxu2 %v7744_v49 }
0x270a   :  { %3232 = vmatpush.msrb.mxu2 %v7750_v53 }
0x270c   :  { %3233 = vmatpush.msrb.mxu2 %v7756_v52 }
0x270e   :  { %3234 = vmatpush.msrb.mxu2 %v9204_v51 }
0x2710   :  { %3235 = vmatpush.msrb.mxu2 %v9205_v14 }
0x2712   :  { %3236 = vmatpush.msrb.mxu2 %v9206_v46 }
0x2714   :  { %3237 = vmatpush.msrb.mxu2 %v9207_v36 }
0x2716   :  { %3238 = vmatpush.msrb.mxu2 %v9208_v21 }
0x2718   :  { %3239 = vmatpush.msrb.mxu2 %v9209_v63 }
0x271a   :  { %3240 = vmatpush.msrb.mxu2 %v9210_v25 }
0x271c   :  { %3241 = vmatpush.msrb.mxu2 %v7883_v30 }
0x271e   :  { %3242 = vmatpush.msrb.mxu2 %v7889_v57 }
0x2720   :  { %3243 = vmatpush.msrb.mxu2 %v7895_v58 }
0x2722   :  { %3244 = vmatpush.msrb.mxu2 %v7901_v3 }
0x2786   :  { %v2892_v29 = vpop.f32.mrf.mxu2 }
0x2787   :  { %v2893_v38 = vadd.f32 %v7907_v62, %v2892_v29  ;;  %v7961_v29 = vld [vmem:[%s8382_s10 + $0x38] sm:$0xff] }
0x2789   :  { %v2895_v19 = vmin.f32 %v2893_v38, 20.0 }
0x278b   :  { %v2896_v23 = vmul.f32 1.442695, %v2895_v19  ;;  %v7973_v19 = vld [vmem:[%s8382_s10 + $0x28] sm:$0xff] }
0x278d   :  { %4143 = vpow2.f32 %v2896_v23  ;;  %v7979_v23 = vld [vmem:[%s8382_s10 + $0x20] sm:$0xff] }
0x278e   :  { %9211 = vst [vmem:[#allocation24_spill] sm:$0xff] %v7979_v23 }
0x2793   :  { %v4144_v18 = vpop.eup %4143 }
0x2794   :  { %v2898_v32 = vadd.f32 1.0, %v4144_v18  ;;  %v7985_v18 = vld [vmem:[%s8382_s10 + $0x18] sm:$0xff] }
0x2795   :  { %9212 = vst [vmem:[#allocation25_spill] sm:$0xff] %v7985_v18 }
0x2796   :  { %v2899_v26 = vmul.f32 %v2898_v32, %v2898_v32  ;;  %v7991_v32 = vld [vmem:[%s8382_s10 + $0x10] sm:$0xff] }
0x2797   :  { %9213 = vst [vmem:[#allocation26_spill] sm:$0xff] %v7991_v32 }
0x2798   :  { %v2901_v59 = vadd.f32 1.0, %v2899_v26  ;;  %v3883_v56 = vadd.f32 -1.0, %v2899_v26  ;;  %v7997_v26 = vld [vmem:[%s8382_s10 + $0x8] sm:$0xff] }
0x2799   :  { %9214 = vst [vmem:[#allocation16_spill] sm:$0xff] %v7997_v26 }
0x279a   :  { %4145 = vrcp.f32 %v2901_v59  ;;  %v2913_v41 = vand.u32 2147483648, %v2901_v59  ;;  %v2911_v17 = vand.u32 2147483647, %v2901_v59  ;;  %vm2907_vm9 = vweird.f32 %v2901_v59 }
0x279c   :  { %v2914_v5 = vor.u32 1.1754944e-38, %v2913_v41  ;;  %vm2912_vm11 = vcmp.eq.f32.partialorder %v2911_v17, 8.507059e+37 }
0x27a0   :  { %v4146_v42 = vpop.eup %4145 }
0x27a1   :  { %v2903_v11 = vmul.f32 %v4146_v42, %v2901_v59  ;;  %vm2908_vm8 = vweird.f32 %v4146_v42  ;;  %v8003_v59 = vld [vmem:[%s8382_s10] sm:$0xff] }
0x27a2   :  { %vm2909_vm10 = vmor %vm2907_vm9, %vm2908_vm8  ;;  %9215 = vst [vmem:[#allocation5_spill] sm:$0xff] %v8003_v59 }
0x27a3   :  { %v2904_v0 = vsub.f32 1.0, %v2903_v11  ;;  %v8009_v11 = vld [vmem:[%s8383_s11] ss:$0 sm:$0xff] }
0x27a4   :  { %9216 = vst [vmem:[#allocation6_spill] sm:$0xff] %v8009_v11 }
0x27a5   :  { %v2905_v54 = vmul.f32 %v4146_v42, %v2904_v0 }
0x27a7   :  { %v2906_v40 = vadd.f32 %v4146_v42, %v2905_v54 }
0x27a9   :  { %v2910_v16 = vsel %vm2909_vm10, %v4146_v42, %v2906_v40 }
0x27aa   :  { %v2915_v7 = vsel %vm2912_vm11, %v2914_v5, %v2910_v16 }
0x27ab   :  { %v2916_v34 = vmul.f32 %v3883_v56, %v2915_v7 }
0x27ad   :  { %v2917_v24 = vmul.f32 %v2916_v34, %v2893_v38  ;;  %v7967_v38 = vld [vmem:[%s8382_s10 + $0x30] sm:$0xff]  ;;  %s3899_s10 = sld [smem:[#allocation3 + $0x12]] }
0x27af   :  { %2934 = vmatmul.f32.vlgmr.msrb.gmra.mxu3 %v2917_v24 }
0x27b0   :  { %3272 = vmatpush.msrb.mxu3 %v7913_v4 }
0x27b2   :  { %3273 = vmatpush.msrb.mxu3 %v7919_v9 }
0x27b4   :  { %3274 = vmatpush.msrb.mxu3 %v7925_v22 }
0x27b6   :  { %3275 = vmatpush.msrb.mxu3 %v7931_v2 }
0x27b8   :  { %3276 = vmatpush.msrb.mxu3 %v7937_v35 }
0x27ba   :  { %3277 = vmatpush.msrb.mxu3 %v7943_v27 }
0x27bc   :  { %3278 = vmatpush.msrb.mxu3 %v7949_v60 }
0x27be   :  { %3279 = vmatpush.msrb.mxu3 %v7955_v13 }
0x27c0   :  { %3280 = vmatpush.msrb.mxu3 %v7961_v29 }
0x27c2   :  { %3281 = vmatpush.msrb.mxu3 %v7967_v38 }
0x27c4   :  { %3282 = vmatpush.msrb.mxu3 %v7973_v19 }
0x27c6   :  { %3283 = vmatpush.msrb.mxu3 %v7979_v23 }
0x27c8   :  { %3284 = vmatpush.msrb.mxu3 %v7985_v18 }
0x27ca   :  { %3285 = vmatpush.msrb.mxu3 %v7991_v32 }
0x27cc   :  { %3286 = vmatpush.msrb.mxu3 %v7997_v26 }
0x27ce   :  { %3287 = vmatpush.msrb.mxu3 %v8003_v59 }
0x2832   :  { %v2935_v42 = vpop.f32.mrf.mxu3 }
0x2833   :  { %v2936_v0 = vadd.f32 %v8009_v11, %v2935_v42 }
0x2835   :  { %v2938_v41 = vmin.f32 %v2936_v0, 20.0 }
0x2837   :  { %v2939_v54 = vmul.f32 1.442695, %v2938_v41 }
0x2839   :  { %4147 = vpow2.f32 %v2939_v54 }
0x283f   :  { %v4148_v17 = vpop.eup %4147 }
0x2840   :  { %v2941_v40 = vadd.f32 1.0, %v4148_v17 }
0x2842   :  { %v2942_v5 = vmul.f32 %v2941_v40, %v2941_v40  ;;  %v8015_v40 = vld [vmem:[%s8384_s12 + $0x78] sm:$0xff] }
0x2843   :  { %9217 = vst [vmem:[#allocation7_spill] sm:$0xff] %v8015_v40 }
0x2844   :  { %v2944_v56 = vadd.f32 1.0, %v2942_v5  ;;  %v3884_v42 = vadd.f32 -1.0, %v2942_v5  ;;  %v8057_v5 = vld [vmem:[%s8384_s12 + $0x40] sm:$0xff] }
0x2845   :  { %9224 = vst [vmem:[#allocation14_spill] sm:$0xff] %v8057_v5 }
0x2846   :  { %4149 = vrcp.f32 %v2944_v56  ;;  %v2956_v24 = vand.u32 2147483648, %v2944_v56  ;;  %v2954_v26 = vand.u32 2147483647, %v2944_v56  ;;  %vm2950_vm13 = vweird.f32 %v2944_v56 }
0x2848   :  { %v2957_v18 = vor.u32 1.1754944e-38, %v2956_v24  ;;  %vm2955_vm15 = vcmp.eq.f32.partialorder %v2954_v26, 8.507059e+37  ;;  %v8039_v26 = vld [vmem:[%s8384_s12 + $0x58] sm:$0xff] }
0x2849   :  { %9221 = vst [vmem:[#allocation11_spill] sm:$0xff] %v8039_v26  ;;  %v8087_v24 = vld [vmem:[%s8384_s12 + $0x18] sm:$0xff] }
0x284a   :  { %9229 = vst [vmem:[#allocation20_spill] sm:$0xff] %v8087_v24 }
0x284c   :  { %v4150_v16 = vpop.eup %4149 }
0x284d   :  { %v2946_v7 = vmul.f32 %v4150_v16, %v2944_v56  ;;  %vm2951_vm12 = vweird.f32 %v4150_v16  ;;  %v8063_v56 = vld [vmem:[%s8384_s12 + $0x38] sm:$0xff] }
0x284e   :  { %vm2952_vm14 = vmor %vm2950_vm13, %vm2951_vm12  ;;  %9225 = vst [vmem:[#allocation15_spill] sm:$0xff] %v8063_v56 }
0x284f   :  { %v2947_v34 = vsub.f32 1.0, %v2946_v7  ;;  %v8075_v7 = vld [vmem:[%s8384_s12 + $0x28] sm:$0xff] }
0x2850   :  { %9227 = vst [vmem:[#allocation18_spill] sm:$0xff] %v8075_v7 }
0x2851   :  { %v2948_v59 = vmul.f32 %v4150_v16, %v2947_v34  ;;  %v8081_v34 = vld [vmem:[%s8384_s12 + $0x20] sm:$0xff] }
0x2852   :  { %9228 = vst [vmem:[#allocation19_spill] sm:$0xff] %v8081_v34 }
0x2853   :  { %v2949_v32 = vadd.f32 %v4150_v16, %v2948_v59  ;;  %v8021_v59 = vld [vmem:[%s8384_s12 + $0x70] sm:$0xff] }
0x2854   :  { %9218 = vst [vmem:[#allocation8_spill] sm:$0xff] %v8021_v59 }
0x2855   :  { %v2953_v11 = vsel %vm2952_vm14, %v4150_v16, %v2949_v32  ;;  %v8033_v32 = vld [vmem:[%s8384_s12 + $0x60] sm:$0xff]  ;;  %v8069_v16 = vld [vmem:[%s8384_s12 + $0x30] sm:$0xff] }
0x2856   :  { %v2958_v41 = vsel %vm2955_vm15, %v2957_v18, %v2953_v11  ;;  %v8027_v18 = vld [vmem:[%s8384_s12 + $0x68] sm:$0xff]  ;;  %9220 = vst [vmem:[#allocation10_spill] sm:$0xff] %v8033_v32  ;;  %v8045_v11 = vld [vmem:[%s8384_s12 + $0x50] sm:$0xff] }
0x2857   :  { %v2959_v54 = vmul.f32 %v3884_v42, %v2958_v41  ;;  %9219 = vst [vmem:[#allocation9_spill] sm:$0xff] %v8027_v18  ;;  %v8093_v42 = vld [vmem:[%s8384_s12 + $0x10] sm:$0xff]  ;;  %v8099_v41 = vld [vmem:[%s8384_s12 + $0x8] sm:$0xff] }
0x2858   :  { %9222 = vst [vmem:[#allocation12_spill] sm:$0xff] %v8045_v11 }
0x2859   :  { %v2960_v17 = vmul.f32 %v2959_v54, %v2936_v0  ;;  %v8051_v0 = vld [vmem:[%s8384_s12 + $0x48] sm:$0xff]  ;;  %9226 = vst [vmem:[#allocation17_spill] sm:$0xff] %v8069_v16  ;;  %v8105_v54 = vld [vmem:[%s8384_s12] sm:$0xff]  ;;  %s3909_s12 = sld [smem:[#allocation3 + $0xc]] }
0x285a   :  { %9223 = vst [vmem:[#allocation13_spill] sm:$0xff] %v8051_v0 }
0x285b   :  { %2977 = vmatmul.f32.vlgmr.msra.gmra.mxu0 %v2960_v17  ;;  %9230 = vst [vmem:[#allocation21_spill] sm:$0xff] %v8093_v42 }
0x285c   :  { %3315 = vmatpush.msra.mxu0 %v8015_v40  ;;  %9231 = vst [vmem:[#allocation22_spill] sm:$0xff] %v8099_v41 }
0x285d   :  { %9232 = vst [vmem:[#allocation23_spill] sm:$0xff] %v8105_v54 }
0x285e   :  { %3316 = vmatpush.msra.mxu0 %v8021_v59 }
0x2860   :  { %3317 = vmatpush.msra.mxu0 %v8027_v18 }
0x2862   :  { %3318 = vmatpush.msra.mxu0 %v8033_v32 }
0x2864   :  { %3319 = vmatpush.msra.mxu0 %v8039_v26 }
0x2866   :  { %3320 = vmatpush.msra.mxu0 %v8045_v11  ;;  %v3000_v11 = vstv %s3889_s22  ;;  %s3931_s22 = sld [smem:[#allocation3 + $0x4]] }
0x2868   :  { %3321 = vmatpush.msra.mxu0 %v8051_v0  ;;  %v3891_v0 = vld [vmem:[%s8375_s3 + $0x20] sm:$0xff] }
0x2869   :  { %v3001_v59 = vmul.f32 %v3891_v0, %v3000_v11 }
0x286a   :  { %3322 = vmatpush.msra.mxu0 %v8057_v5  ;;  %v2995_v5 = vstv %s3888_s21  ;;  %s3930_s21 = sld [smem:[#allocation3 + $0x3]] }
0x286b   :  { %v2996_v18 = vmul.f32 %v2995_v5, %v7845_v12 }
0x286c   :  { %3323 = vmatpush.msra.mxu0 %v8063_v56 }
0x286e   :  { %3324 = vmatpush.msra.mxu0 %v8069_v16 }
0x2870   :  { %3325 = vmatpush.msra.mxu0 %v8075_v7 }
0x2872   :  { %3326 = vmatpush.msra.mxu0 %v8081_v34  ;;  %v8111_v34 = vld [vmem:[%s8385_s13] ss:$0 sm:$0xff] }
0x2874   :  { %3327 = vmatpush.msra.mxu0 %v8087_v24  ;;  %v2988_v24 = vstv %s3886_s20  ;;  %s3928_s20 = sld [smem:[#allocation3 + $0x1]] }
0x2876   :  { %3328 = vmatpush.msra.mxu0 %v8093_v42  ;;  %v2986_v42 = vstv %s3885_s19 }
0x2877   :  { %v2987_v7 = vmul.f32 %v2986_v42, %v7845_v12 }
0x2878   :  { %3329 = vmatpush.msra.mxu0 %v8099_v41 }
0x287a   :  { %3330 = vmatpush.msra.mxu0 %v8105_v54  ;;  %v2993_v54 = vstv %s3887_s7  ;;  %s3929_s7 = sld [smem:[#allocation3 + $0x2]] }
0x28d8   :  { %v2978_v17 = vpop.f32.mrf.mxu0 }
0x28d9   :  { %v2979_v41 = vadd.f32 %v8111_v34, %v2978_v17  ;;  %v9233_v17 = vld [vmem:[#allocation24_spill] sm:$0xff] }
0x28db   :  { %v2989_v16 = vmul.f32 %v2988_v24, %v2979_v41 }
0x28dd   :  { %v2990_v56 = vsub.f32 %v2987_v7, %v2989_v16 }
0x28df   :  { %v3890_v26 = vclamps-f32 %v2990_v56, 1.0 }
0x28e1   :  { %v2994_v32 = vmul.f32 %v3890_v26, %v2993_v54 }
0x28e3   :  { %v2997_v40 = vadd.f32 %v2996_v18, %v2994_v32 }
0x28e5   :  { %v8119_v23 = vadd.f32 %v3001_v59, %v2997_v40 }
0x28e7   :  { %3024 = vmatmul.f32.vlgmr.msra.gmra.mxu1 %v8119_v23 }
0x28e8   :  { %3362 = vmatpush.msra.mxu1 %v7632_v31  ;;  %v3955_v31 = vld [vmem:[%s8376_s4 + $0x3] ss:$0 sm:$0xff] }
0x28ea   :  { %3363 = vmatpush.msra.mxu1 %v7638_v10 }
0x28ec   :  { %3364 = vmatpush.msra.mxu1 %v7644_v1 }
0x28ee   :  { %3365 = vmatpush.msra.mxu1 %v7650_v8 }
0x28f0   :  { %3366 = vmatpush.msra.mxu1 %v7656_v20 }
0x28f2   :  { %3367 = vmatpush.msra.mxu1 %v7662_v47 }
0x28f4   :  { %3368 = vmatpush.msra.mxu1 %v9194_v6 }
0x28f6   :  { %3369 = vmatpush.msra.mxu1 %v9195_v15 }
0x28f8   :  { %3370 = vmatpush.msra.mxu1 %v9196_v55 }
0x28fa   :  { %3371 = vmatpush.msra.mxu1 %v9197_v33 }
0x28fc   :  { %3372 = vmatpush.msra.mxu1 %v9198_v28 }
0x28fe   :  { %3373 = vmatpush.msra.mxu1 %v9199_v44 }
0x2900   :  { %3374 = vmatpush.msra.mxu1 %v9200_v43 }
0x2902   :  { %3375 = vmatpush.msra.mxu1 %v9201_v39 }
0x2904   :  { %3376 = vmatpush.msra.mxu1 %v9202_v48 }
0x2906   :  { %3377 = vmatpush.msra.mxu1 %v9203_v45 }
0x2964   :  { %v3025_v10 = vpop.f32.mrf.mxu1 }
0x2965   :  { %v3026_v1 = vadd.f32 %v3955_v31, %v3025_v10  ;;  %v9234_v31 = vld [vmem:[#allocation25_spill] sm:$0xff]  ;;  %v9235_v10 = vld [vmem:[#allocation26_spill] sm:$0xff] }
0x2967   :  { %v3028_v8 = vadd.f32 %v3026_v1, %v4920_v50  ;;  %v9236_v1 = vld [vmem:[#allocation16_spill] sm:$0xff] }
0x2969   :  { %v3029_v20 = vmin.f32 %v3028_v8, 20.0 }
0x296b   :  { %v3030_v47 = vmul.f32 1.442695, %v3029_v20 }
0x296d   :  { %4151 = vpow2.f32 %v3030_v47  ;;  %v9238_v47 = vld [vmem:[#allocation6_spill] sm:$0xff] }
0x2973   :  { %v4152_v12 = vpop.eup %4151 }
0x2974   :  { %v3032_v6 = vadd.f32 1.0, %v4152_v12 }
0x2976   :  { %v3033_v15 = vmul.f32 %v3032_v6, %v3032_v6 }
0x2978   :  { %v3035_v55 = vadd.f32 1.0, %v3033_v15  ;;  %v3893_v59 = vadd.f32 -1.0, %v3033_v15 }
0x297a   :  { %4153 = vrcp.f32 %v3035_v55  ;;  %v3047_v43 = vand.u32 2147483648, %v3035_v55  ;;  %v3045_v48 = vand.u32 2147483647, %v3035_v55  ;;  %vm3041_vm1 = vweird.f32 %v3035_v55 }
0x297c   :  { %v3048_v40 = vor.u32 1.1754944e-38, %v3047_v43  ;;  %vm3046_vm3 = vcmp.eq.f32.partialorder %v3045_v48, 8.507059e+37 }
0x2980   :  { %v4154_v33 = vpop.eup %4153 }
0x2981   :  { %v3037_v28 = vmul.f32 %v4154_v33, %v3035_v55  ;;  %vm3042_vm0 = vweird.f32 %v4154_v33 }
0x2982   :  { %vm3043_vm2 = vmor %vm3041_vm1, %vm3042_vm0 }
0x2983   :  { %v3038_v44 = vsub.f32 1.0, %v3037_v28 }
0x2985   :  { %v3039_v39 = vmul.f32 %v4154_v33, %v3038_v44 }
0x2987   :  { %v3040_v45 = vadd.f32 %v4154_v33, %v3039_v39 }
0x2989   :  { %v3044_v18 = vsel %vm3043_vm2, %v4154_v33, %v3040_v45 }
0x298a   :  { %v3049_v32 = vsel %vm3046_vm3, %v3048_v40, %v3044_v18 }
0x298b   :  { %v3050_v26 = vmul.f32 %v3893_v59, %v3049_v32 }
0x298d   :  { %v3051_v11 = vmul.f32 %v3050_v26, %v3028_v8  ;;  %v9237_v8 = vld [vmem:[#allocation5_spill] sm:$0xff] }
0x298f   :  { %3068 = vmatmul.f32.vlgmr.msra.gmra.mxu2 %v3051_v11 }
0x2990   :  { %3406 = vmatpush.msra.mxu2 %v7732_v61 }
0x2992   :  { %3407 = vmatpush.msra.mxu2 %v7738_v37 }
0x2994   :  { %3408 = vmatpush.msra.mxu2 %v7744_v49 }
0x2996   :  { %3409 = vmatpush.msra.mxu2 %v7750_v53 }
0x2998   :  { %3410 = vmatpush.msra.mxu2 %v7756_v52 }
0x299a   :  { %3411 = vmatpush.msra.mxu2 %v9204_v51 }
0x299c   :  { %3412 = vmatpush.msra.mxu2 %v9205_v14 }
0x299e   :  { %3413 = vmatpush.msra.mxu2 %v9206_v46 }
0x29a0   :  { %3414 = vmatpush.msra.mxu2 %v9207_v36 }
0x29a2   :  { %3415 = vmatpush.msra.mxu2 %v9208_v21 }
0x29a4   :  { %3416 = vmatpush.msra.mxu2 %v9209_v63 }
0x29a6   :  { %3417 = vmatpush.msra.mxu2 %v9210_v25 }
0x29a8   :  { %3418 = vmatpush.msra.mxu2 %v7883_v30 }
0x29aa   :  { %3419 = vmatpush.msra.mxu2 %v7889_v57 }
0x29ac   :  { %3420 = vmatpush.msra.mxu2 %v7895_v58 }
0x29ae   :  { %3421 = vmatpush.msra.mxu2 %v7901_v3 }
0x2a12   :  { %v3069_v61 = vpop.f32.mrf.mxu2 }
0x2a13   :  { %v3070_v37 = vadd.f32 %v7907_v62, %v3069_v61 }
0x2a15   :  { %v3072_v49 = vmin.f32 %v3070_v37, 20.0 }
0x2a17   :  { %v3073_v53 = vmul.f32 1.442695, %v3072_v49 }
0x2a19   :  { %4155 = vpow2.f32 %v3073_v53  ;;  %v9239_v53 = vld [vmem:[#allocation7_spill] sm:$0xff] }
0x2a1f   :  { %v4156_v52 = vpop.eup %4155 }
0x2a20   :  { %v3075_v51 = vadd.f32 1.0, %v4156_v52  ;;  %v9240_v52 = vld [vmem:[#allocation8_spill] sm:$0xff] }
0x2a22   :  { %v3076_v14 = vmul.f32 %v3075_v51, %v3075_v51  ;;  %v9241_v51 = vld [vmem:[#allocation9_spill] sm:$0xff] }
0x2a24   :  { %v3078_v46 = vadd.f32 1.0, %v3076_v14  ;;  %v3894_v7 = vadd.f32 -1.0, %v3076_v14  ;;  %v9242_v14 = vld [vmem:[#allocation10_spill] sm:$0xff] }
0x2a26   :  { %4157 = vrcp.f32 %v3078_v46  ;;  %v3090_v25 = vand.u32 2147483648, %v3078_v46  ;;  %v3088_v5 = vand.u32 2147483647, %v3078_v46  ;;  %vm3084_vm5 = vweird.f32 %v3078_v46 }
0x2a28   :  { %v3091_v16 = vor.u32 1.1754944e-38, %v3090_v25  ;;  %vm3089_vm7 = vcmp.eq.f32.partialorder %v3088_v5, 8.507059e+37  ;;  %v9247_v25 = vld [vmem:[#allocation15_spill] sm:$0xff]  ;;  %v9249_v5 = vld [vmem:[#allocation18_spill] sm:$0xff] }
0x2a2c   :  { %v4158_v36 = vpop.eup %4157 }
0x2a2d   :  { %v3080_v21 = vmul.f32 %v4158_v36, %v3078_v46  ;;  %vm3085_vm4 = vweird.f32 %v4158_v36  ;;  %v9243_v46 = vld [vmem:[#allocation11_spill] sm:$0xff] }
0x2a2e   :  { %vm3086_vm6 = vmor %vm3084_vm5, %vm3085_vm4 }
0x2a2f   :  { %v3081_v63 = vsub.f32 1.0, %v3080_v21  ;;  %v9245_v21 = vld [vmem:[#allocation13_spill] sm:$0xff] }
0x2a31   :  { %v3082_v0 = vmul.f32 %v4158_v36, %v3081_v63  ;;  %v9246_v63 = vld [vmem:[#allocation14_spill] sm:$0xff] }
0x2a33   :  { %v3083_v56 = vadd.f32 %v4158_v36, %v3082_v0  ;;  %v9248_v0 = vld [vmem:[#allocation17_spill] sm:$0xff] }
0x2a35   :  { %v3087_v24 = vsel %vm3086_vm6, %v4158_v36, %v3083_v56  ;;  %v9244_v36 = vld [vmem:[#allocation12_spill] sm:$0xff]  ;;  %v9250_v56 = vld [vmem:[#allocation19_spill] sm:$0xff] }
0x2a36   :  { %v3092_v42 = vsel %vm3089_vm7, %v3091_v16, %v3087_v24  ;;  %v9251_v16 = vld [vmem:[#allocation20_spill] sm:$0xff]  ;;  %v9253_v24 = vld [vmem:[#allocation22_spill] sm:$0xff] }
0x2a37   :  { %v3093_v41 = vmul.f32 %v3894_v7, %v3092_v42  ;;  %v9252_v7 = vld [vmem:[#allocation21_spill] sm:$0xff]  ;;  %v9254_v42 = vld [vmem:[#allocation23_spill] sm:$0xff] }
0x2a39   :  { %v3094_v54 = vmul.f32 %v3093_v41, %v3070_v37 }
0x2a3b   :  { %3111 = vmatmul.f32.vlgmr.msra.gmra.mxu3 %v3094_v54  ;;  %v3163_v54 = vstv %s3896_s27 }
0x2a3c   :  { %3449 = vmatpush.msra.mxu3 %v7913_v4 }
0x2a3e   :  { %3450 = vmatpush.msra.mxu3 %v7919_v9 }
0x2a40   :  { %3451 = vmatpush.msra.mxu3 %v7925_v22 }
0x2a42   :  { %3452 = vmatpush.msra.mxu3 %v7931_v2 }
0x2a44   :  { %3453 = vmatpush.msra.mxu3 %v7937_v35 }
0x2a46   :  { %3454 = vmatpush.msra.mxu3 %v7943_v27 }
0x2a48   :  { %3455 = vmatpush.msra.mxu3 %v7949_v60 }
0x2a4a   :  { %3456 = vmatpush.msra.mxu3 %v7955_v13 }
0x2a4c   :  { %3457 = vmatpush.msra.mxu3 %v7961_v29 }
0x2a4e   :  { %3458 = vmatpush.msra.mxu3 %v7967_v38 }
0x2a50   :  { %3459 = vmatpush.msra.mxu3 %v7973_v19 }
0x2a52   :  { %3460 = vmatpush.msra.mxu3 %v9233_v17 }
0x2a54   :  { %3461 = vmatpush.msra.mxu3 %v9234_v31 }
0x2a56   :  { %3462 = vmatpush.msra.mxu3 %v9235_v10 }
0x2a58   :  { %3463 = vmatpush.msra.mxu3 %v9236_v1 }
0x2a5a   :  { %3464 = vmatpush.msra.mxu3 %v9237_v8 }
0x2abe   :  { %v3112_v20 = vpop.f32.mrf.mxu3 }
0x2abf   :  { %v3113_v12 = vadd.f32 %v9238_v47, %v3112_v20  ;;  %v3165_v20 = vstv %s3897_s28 }
0x2ac1   :  { %v3115_v6 = vmin.f32 %v3113_v12, 20.0 }
0x2ac3   :  { %v3116_v15 = vmul.f32 1.442695, %v3115_v6  ;;  %v3164_v6 = vmul.f32 %v3163_v54, %v8119_v23  ;;  %v4542_v54 = vld [vmem:[%s8377_s5 + $0x38] sm:$0xff] }
0x2ac5   :  { %4159 = vpow2.f32 %v3116_v15 }
0x2acb   :  { %v4160_v55 = vpop.eup %4159 }
0x2acc   :  { %v3118_v33 = vadd.f32 1.0, %v4160_v55 }
0x2ace   :  { %v3119_v28 = vmul.f32 %v3118_v33, %v3118_v33  ;;  %v3170_v33 = vstv %s3898_s29  ;;  %s3919_s29 = sld [smem:[#allocation3 + $0x6]] }
0x2ad0   :  { %v3121_v44 = vadd.f32 1.0, %v3119_v28  ;;  %v3895_v26 = vadd.f32 -1.0, %v3119_v28  ;;  %v3172_v28 = vstv %s3899_s10  ;;  %s3918_s10 = sld [smem:[#allocation3 + $0x5]] }
0x2ad2   :  { %4161 = vrcp.f32 %v3121_v44  ;;  %v3133_v45 = vand.u32 2147483648, %v3121_v44  ;;  %v3131_v59 = vand.u32 2147483647, %v3121_v44  ;;  %vm3127_vm9 = vweird.f32 %v3121_v44 }
0x2ad4   :  { %v3134_v32 = vor.u32 1.1754944e-38, %v3133_v45  ;;  %vm3132_vm11 = vcmp.eq.f32.partialorder %v3131_v59, 8.507059e+37  ;;  %v3173_v45 = vmul.f32 %v3172_v28, %v8119_v23  ;;  %v4536_v23 = vld [vmem:[%s8377_s5 + $0x68] sm:$0xff]  ;;  %v4549_v28 = vld [vmem:[%s8377_s5] sm:$0xff] }
0x2ad8   :  { %v4162_v43 = vpop.eup %4161 }
0x2ad9   :  { %v3123_v39 = vmul.f32 %v4162_v43, %v3121_v44  ;;  %vm3128_vm8 = vweird.f32 %v4162_v43  ;;  %v3902_v44 = vld [vmem:[%s8375_s3 + $0x18] sm:$0xff] }
0x2ada   :  { %vm3129_vm10 = vmor %vm3127_vm9, %vm3128_vm8 }
0x2adb   :  { %v3124_v48 = vsub.f32 1.0, %v3123_v39 }
0x2add   :  { %v3125_v40 = vmul.f32 %v4162_v43, %v3124_v48 }
0x2adf   :  { %v3126_v18 = vadd.f32 %v4162_v43, %v3125_v40 }
0x2ae1   :  { %v3130_v11 = vsel %vm3129_vm10, %v4162_v43, %v3126_v18  ;;  %v3177_v43 = vstv %s3900_s30  ;;  %s3921_s30 = sld [smem:[#allocation3 + $0x8]] }
0x2ae2   :  { %v3135_v61 = vsel %vm3132_vm11, %v3134_v32, %v3130_v11  ;;  %v3178_v40 = vmul.f32 %v3902_v44, %v3177_v43  ;;  %v4534_v32 = vld [vmem:[%s8377_s5 + $0x78] sm:$0xff]  ;;  %v4537_v11 = vld [vmem:[%s8377_s5 + $0x60] sm:$0xff] }
0x2ae3   :  { %v3136_v37 = vmul.f32 %v3895_v26, %v3135_v61  ;;  %v4535_v26 = vld [vmem:[%s8377_s5 + $0x70] sm:$0xff]  ;;  %v4538_v61 = vld [vmem:[%s8377_s5 + $0x58] sm:$0xff]  ;;  %v3956_v44 = vld [vmem:[%s8376_s4 + $0x2] ss:$0 sm:$0xff] }
0x2ae5   :  { %v3137_v49 = vmul.f32 %v3136_v37, %v3113_v12  ;;  %v4539_v37 = vld [vmem:[%s8377_s5 + $0x50] sm:$0xff] }
0x2ae7   :  { %3154 = vmatmul.f32.vlgmr.msrb.gmra.mxu0 %v3137_v49  ;;  %v4540_v49 = vld [vmem:[%s8377_s5 + $0x48] sm:$0xff] }
0x2ae8   :  { %3492 = vmatpush.msrb.mxu0 %v9239_v53 }
0x2aea   :  { %3493 = vmatpush.msrb.mxu0 %v9240_v52 }
0x2aec   :  { %3494 = vmatpush.msrb.mxu0 %v9241_v51 }
0x2aee   :  { %3495 = vmatpush.msrb.mxu0 %v9242_v14 }
0x2af0   :  { %3496 = vmatpush.msrb.mxu0 %v9243_v46 }
0x2af2   :  { %3497 = vmatpush.msrb.mxu0 %v9244_v36 }
0x2af4   :  { %3498 = vmatpush.msrb.mxu0 %v9245_v21 }
0x2af6   :  { %3499 = vmatpush.msrb.mxu0 %v9246_v63 }
0x2af8   :  { %3500 = vmatpush.msrb.mxu0 %v9247_v25 }
0x2afa   :  { %3501 = vmatpush.msrb.mxu0 %v9248_v0 }
0x2afc   :  { %3502 = vmatpush.msrb.mxu0 %v9249_v5 }
0x2afe   :  { %3503 = vmatpush.msrb.mxu0 %v9250_v56 }
0x2b00   :  { %3504 = vmatpush.msrb.mxu0 %v9251_v16 }
0x2b02   :  { %3505 = vmatpush.msrb.mxu0 %v9252_v7 }
0x2b04   :  { %3506 = vmatpush.msrb.mxu0 %v9253_v24 }
0x2b06   :  { %3507 = vmatpush.msrb.mxu0 %v9254_v42 }
0x2b64   :  { %v3155_v41 = vpop.f32.mrf.mxu0 }
0x2b65   :  { %v3156_v12 = vadd.f32 %v8111_v34, %v3155_v41  ;;  %v4541_v41 = vld [vmem:[%s8377_s5 + $0x40] sm:$0xff] }
0x2b67   :  { %v3166_v15 = vmul.f32 %v3165_v20, %v3156_v12  ;;  %v4543_v20 = vld [vmem:[%s8377_s5 + $0x30] sm:$0xff]  ;;  %v4544_v12 = vld [vmem:[%s8377_s5 + $0x28] sm:$0xff] }
0x2b69   :  { %v3167_v55 = vsub.f32 %v3164_v6, %v3166_v15  ;;  %v4545_v6 = vld [vmem:[%s8377_s5 + $0x20] sm:$0xff]  ;;  %v4546_v15 = vld [vmem:[%s8377_s5 + $0x18] sm:$0xff] }
0x2b6b   :  { %v3901_v39 = vclamps-f32 %v3167_v55, 1.0  ;;  %v4547_v55 = vld [vmem:[%s8377_s5 + $0x10] sm:$0xff] }
0x2b6d   :  { %v3171_v48 = vmul.f32 %v3901_v39, %v3170_v33  ;;  %v4548_v33 = vld [vmem:[%s8377_s5 + $0x8] sm:$0xff]  ;;  %s3908_s5 = sld [smem:[#allocation3 + $0xb]] }
0x2b6f   :  { %v3174_v59 = vadd.f32 %v3173_v45, %v3171_v48 }
0x2b71   :  { %v8198_v18 = vadd.f32 %v3178_v40, %v3174_v59 }
0x2b73   :  { %3201 = vmatmul.f32.vlgmr.msrb.gmra.mxu1 %v8198_v18 }
0x2b74   :  { %3538 = vmatpush.msrb.mxu1 %v4534_v32 }
0x2b76   :  { %3539 = vmatpush.msrb.mxu1 %v4535_v26 }
0x2b78   :  { %3540 = vmatpush.msrb.mxu1 %v4536_v23 }
0x2b7a   :  { %3541 = vmatpush.msrb.mxu1 %v4537_v11 }
0x2b7c   :  { %3542 = vmatpush.msrb.mxu1 %v4538_v61 }
0x2b7e   :  { %3543 = vmatpush.msrb.mxu1 %v4539_v37 }
0x2b80   :  { %3544 = vmatpush.msrb.mxu1 %v4540_v49 }
0x2b82   :  { %3545 = vmatpush.msrb.mxu1 %v4541_v41 }
0x2b84   :  { %3546 = vmatpush.msrb.mxu1 %v4542_v54 }
0x2b86   :  { %3547 = vmatpush.msrb.mxu1 %v4543_v20 }
0x2b88   :  { %3548 = vmatpush.msrb.mxu1 %v4544_v12 }
0x2b8a   :  { %3549 = vmatpush.msrb.mxu1 %v4545_v6 }
0x2b8c   :  { %3550 = vmatpush.msrb.mxu1 %v4546_v15 }
0x2b8e   :  { %3551 = vmatpush.msrb.mxu1 %v4547_v55 }
0x2b90   :  { %3552 = vmatpush.msrb.mxu1 %v4548_v33 }
0x2b92   :  { %3553 = vmatpush.msrb.mxu1 %v4549_v28 }
0x2bf0   :  { %v3202_v43 = vpop.f32.mrf.mxu1 }
0x2bf1   :  { %v3203_v39 = vadd.f32 %v3956_v44, %v3202_v43  ;;  %v4550_v44 = vld [vmem:[%s8380_s8 + $0x78] sm:$0xff]  ;;  %v4551_v43 = vld [vmem:[%s8380_s8 + $0x70] sm:$0xff] }
0x2bf3   :  { %v3205_v48 = vadd.f32 %v3203_v39, %v4920_v50  ;;  %v4552_v39 = vld [vmem:[%s8380_s8 + $0x68] sm:$0xff] }
0x2bf5   :  { %v3206_v45 = vmin.f32 %v3205_v48, 20.0 }
0x2bf7   :  { %v3207_v40 = vmul.f32 1.442695, %v3206_v45  ;;  %v4554_v45 = vld [vmem:[%s8380_s8 + $0x58] sm:$0xff] }
0x2bf9   :  { %4163 = vpow2.f32 %v3207_v40  ;;  %v4555_v40 = vld [vmem:[%s8380_s8 + $0x50] sm:$0xff] }
0x2bff   :  { %v4164_v59 = vpop.eup %4163 }
0x2c00   :  { %v3209_v32 = vadd.f32 1.0, %v4164_v59  ;;  %v4556_v59 = vld [vmem:[%s8380_s8 + $0x48] sm:$0xff] }
0x2c02   :  { %v3210_v26 = vmul.f32 %v3209_v32, %v3209_v32  ;;  %v4557_v32 = vld [vmem:[%s8380_s8 + $0x40] sm:$0xff] }
0x2c04   :  { %v3212_v23 = vadd.f32 1.0, %v3210_v26  ;;  %v3904_v6 = vadd.f32 -1.0, %v3210_v26  ;;  %v4558_v26 = vld [vmem:[%s8380_s8 + $0x38] sm:$0xff] }
0x2c06   :  { %4165 = vrcp.f32 %v3212_v23  ;;  %v3224_v49 = vand.u32 2147483648, %v3212_v23  ;;  %v3222_v54 = vand.u32 2147483647, %v3212_v23  ;;  %vm3218_vm13 = vweird.f32 %v3212_v23 }
0x2c08   :  { %v3225_v12 = vor.u32 1.1754944e-38, %v3224_v49  ;;  %vm3223_vm15 = vcmp.eq.f32.partialorder %v3222_v54, 8.507059e+37 }
0x2c0c   :  { %v4166_v11 = vpop.eup %4165 }
0x2c0d   :  { %v3214_v61 = vmul.f32 %v4166_v11, %v3212_v23  ;;  %vm3219_vm12 = vweird.f32 %v4166_v11  ;;  %v4559_v23 = vld [vmem:[%s8380_s8 + $0x30] sm:$0xff] }
0x2c0e   :  { %vm3220_vm14 = vmor %vm3218_vm13, %vm3219_vm12 }
0x2c0f   :  { %v3215_v37 = vsub.f32 1.0, %v3214_v61  ;;  %v4561_v61 = vld [vmem:[%s8380_s8 + $0x20] sm:$0xff] }
0x2c11   :  { %v3216_v41 = vmul.f32 %v4166_v11, %v3215_v37 }
0x2c13   :  { %v3217_v20 = vadd.f32 %v4166_v11, %v3216_v41 }
0x2c15   :  { %v3221_v15 = vsel %vm3220_vm14, %v4166_v11, %v3217_v20  ;;  %v4560_v11 = vld [vmem:[%s8380_s8 + $0x28] sm:$0xff] }
0x2c16   :  { %v3226_v55 = vsel %vm3223_vm15, %v3225_v12, %v3221_v15 }
0x2c17   :  { %v3227_v33 = vmul.f32 %v3904_v6, %v3226_v55 }
0x2c19   :  { %v3228_v28 = vmul.f32 %v3227_v33, %v3205_v48  ;;  %v4553_v48 = vld [vmem:[%s8380_s8 + $0x60] sm:$0xff]  ;;  %s3907_s8 = sld [smem:[#allocation3 + $0xa]] }
0x2c1b   :  { %3245 = vmatmul.f32.vlgmr.msrb.gmra.mxu2 %v3228_v28 }
0x2c1c   :  { %3582 = vmatpush.msrb.mxu2 %v4550_v44 }
0x2c1e   :  { %3583 = vmatpush.msrb.mxu2 %v4551_v43 }
0x2c20   :  { %3584 = vmatpush.msrb.mxu2 %v4552_v39 }
0x2c22   :  { %3585 = vmatpush.msrb.mxu2 %v4553_v48 }
0x2c24   :  { %3586 = vmatpush.msrb.mxu2 %v4554_v45 }
0x2c26   :  { %3587 = vmatpush.msrb.mxu2 %v4555_v40 }
0x2c28   :  { %3588 = vmatpush.msrb.mxu2 %v4556_v59 }
0x2c2a   :  { %3589 = vmatpush.msrb.mxu2 %v4557_v32 }
0x2c2c   :  { %3590 = vmatpush.msrb.mxu2 %v4558_v26 }
0x2c2e   :  { %3591 = vmatpush.msrb.mxu2 %v4559_v23 }
0x2c30   :  { %3592 = vmatpush.msrb.mxu2 %v4560_v11 }
0x2c32   :  { %3593 = vmatpush.msrb.mxu2 %v4561_v61 }
0x2c34   :  { %3594 = vmatpush.msrb.mxu2 %v7883_v30 }
0x2c36   :  { %3595 = vmatpush.msrb.mxu2 %v7889_v57 }
0x2c38   :  { %3596 = vmatpush.msrb.mxu2 %v7895_v58 }
0x2c3a   :  { %3597 = vmatpush.msrb.mxu2 %v7901_v3 }
0x2c9e   :  { %v3246_v37 = vpop.f32.mrf.mxu2 }
0x2c9f   :  { %v3247_v49 = vadd.f32 %v7907_v62, %v3246_v37  ;;  %v3957_v37 = vld [vmem:[%s8376_s4 + $0x1] ss:$0 sm:$0xff] }
0x2ca1   :  { %v3249_v41 = vmin.f32 %v3247_v49, 20.0 }
0x2ca3   :  { %v3250_v54 = vmul.f32 1.442695, %v3249_v41 }
0x2ca5   :  { %4167 = vpow2.f32 %v3250_v54 }
0x2cab   :  { %v4168_v20 = vpop.eup %4167 }
0x2cac   :  { %v3252_v12 = vadd.f32 1.0, %v4168_v20 }
0x2cae   :  { %v3253_v6 = vmul.f32 %v3252_v12, %v3252_v12 }
0x2cb0   :  { %v3255_v15 = vadd.f32 1.0, %v3253_v6  ;;  %v3905_v43 = vadd.f32 -1.0, %v3253_v6 }
0x2cb2   :  { %4169 = vrcp.f32 %v3255_v15  ;;  %v3267_v28 = vand.u32 2147483648, %v3255_v15  ;;  %v3265_v58 = vand.u32 2147483647, %v3255_v15  ;;  %vm3261_vm1 = vweird.f32 %v3255_v15 }
0x2cb4   :  { %v3268_v3 = vor.u32 1.1754944e-38, %v3267_v28  ;;  %vm3266_vm3 = vcmp.eq.f32.partialorder %v3265_v58, 8.507059e+37 }
0x2cb8   :  { %v4170_v55 = vpop.eup %4169 }
0x2cb9   :  { %v3257_v33 = vmul.f32 %v4170_v55, %v3255_v15  ;;  %vm3262_vm0 = vweird.f32 %v4170_v55 }
0x2cba   :  { %vm3263_vm2 = vmor %vm3261_vm1, %vm3262_vm0 }
0x2cbb   :  { %v3258_v30 = vsub.f32 1.0, %v3257_v33 }
0x2cbd   :  { %v3259_v57 = vmul.f32 %v4170_v55, %v3258_v30 }
0x2cbf   :  { %v3260_v44 = vadd.f32 %v4170_v55, %v3259_v57 }
0x2cc1   :  { %v3264_v39 = vsel %vm3263_vm2, %v4170_v55, %v3260_v44 }
0x2cc2   :  { %v3269_v48 = vsel %vm3266_vm3, %v3268_v3, %v3264_v39 }
0x2cc3   :  { %v3270_v45 = vmul.f32 %v3905_v43, %v3269_v48 }
0x2cc5   :  { %v3271_v40 = vmul.f32 %v3270_v45, %v3247_v49 }
0x2cc7   :  { %3288 = vmatmul.f32.vlgmr.msrb.gmra.mxu3 %v3271_v40 }
0x2cc8   :  { %3625 = vmatpush.msrb.mxu3 %v7913_v4 }
0x2cca   :  { %3626 = vmatpush.msrb.mxu3 %v7919_v9 }
0x2ccc   :  { %3627 = vmatpush.msrb.mxu3 %v7925_v22 }
0x2cce   :  { %3628 = vmatpush.msrb.mxu3 %v7931_v2 }
0x2cd0   :  { %3629 = vmatpush.msrb.mxu3 %v7937_v35 }
0x2cd2   :  { %3630 = vmatpush.msrb.mxu3 %v7943_v27 }
0x2cd4   :  { %3631 = vmatpush.msrb.mxu3 %v7949_v60 }
0x2cd6   :  { %3632 = vmatpush.msrb.mxu3 %v7955_v13 }
0x2cd8   :  { %3633 = vmatpush.msrb.mxu3 %v7961_v29 }
0x2cda   :  { %3634 = vmatpush.msrb.mxu3 %v7967_v38 }
0x2cdc   :  { %3635 = vmatpush.msrb.mxu3 %v7973_v19 }
0x2cde   :  { %3636 = vmatpush.msrb.mxu3 %v9233_v17 }
0x2ce0   :  { %3637 = vmatpush.msrb.mxu3 %v9234_v31 }
0x2ce2   :  { %3638 = vmatpush.msrb.mxu3 %v9235_v10 }
0x2ce4   :  { %3639 = vmatpush.msrb.mxu3 %v9236_v1 }
0x2ce6   :  { %3640 = vmatpush.msrb.mxu3 %v9237_v8 }
0x2d4a   :  { %v3289_v4 = vpop.f32.mrf.mxu3 }
0x2d4b   :  { %v3290_v9 = vadd.f32 %v9238_v47, %v3289_v4 }
0x2d4d   :  { %v3292_v22 = vmin.f32 %v3290_v9, 20.0 }
0x2d4f   :  { %v3293_v2 = vmul.f32 1.442695, %v3292_v22 }
0x2d51   :  { %4171 = vpow2.f32 %v3293_v2 }
0x2d57   :  { %v4172_v35 = vpop.eup %4171 }
0x2d58   :  { %v3295_v27 = vadd.f32 1.0, %v4172_v35 }
0x2d5a   :  { %v3296_v60 = vmul.f32 %v3295_v27, %v3295_v27 }
0x2d5c   :  { %v3298_v13 = vadd.f32 1.0, %v3296_v60  ;;  %v3906_v59 = vadd.f32 -1.0, %v3296_v60 }
0x2d5e   :  { %4173 = vrcp.f32 %v3298_v13  ;;  %v3310_v17 = vand.u32 2147483648, %v3298_v13  ;;  %v3308_v10 = vand.u32 2147483647, %v3298_v13  ;;  %vm3304_vm5 = vweird.f32 %v3298_v13 }
0x2d60   :  { %v3311_v8 = vor.u32 1.1754944e-38, %v3310_v17  ;;  %vm3309_vm7 = vcmp.eq.f32.partialorder %v3308_v10, 8.507059e+37 }
0x2d64   :  { %v4174_v29 = vpop.eup %4173 }
0x2d65   :  { %v3300_v38 = vmul.f32 %v4174_v29, %v3298_v13  ;;  %vm3305_vm4 = vweird.f32 %v4174_v29 }
0x2d66   :  { %vm3306_vm6 = vmor %vm3304_vm5, %vm3305_vm4 }
0x2d67   :  { %v3301_v19 = vsub.f32 1.0, %v3300_v38 }
0x2d69   :  { %v3302_v31 = vmul.f32 %v4174_v29, %v3301_v19 }
0x2d6b   :  { %v3303_v1 = vadd.f32 %v4174_v29, %v3302_v31 }
0x2d6d   :  { %v3307_v32 = vsel %vm3306_vm6, %v4174_v29, %v3303_v1 }
0x2d6e   :  { %v3312_v26 = vsel %vm3309_vm7, %v3311_v8, %v3307_v32 }
0x2d6f   :  { %v3313_v23 = vmul.f32 %v3906_v59, %v3312_v26 }
0x2d71   :  { %v3314_v11 = vmul.f32 %v3313_v23, %v3290_v9 }
0x2d73   :  { %3331 = vmatmul.f32.vlgmr.msra.gmra.mxu0 %v3314_v11 }
0x2d74   :  { %3668 = vmatpush.msra.mxu0 %v9239_v53 }
0x2d76   :  { %3669 = vmatpush.msra.mxu0 %v9240_v52  ;;  %v3340_v52 = vstv %s3907_s8 }
0x2d78   :  { %3670 = vmatpush.msra.mxu0 %v9241_v51  ;;  %v3342_v51 = vstv %s3908_s5 }
0x2d7a   :  { %3671 = vmatpush.msra.mxu0 %v9242_v14 }
0x2d7c   :  { %3672 = vmatpush.msra.mxu0 %v9243_v46  ;;  %v3341_v46 = vmul.f32 %v3340_v52, %v8198_v18 }
0x2d7e   :  { %3673 = vmatpush.msra.mxu0 %v9244_v36 }
0x2d80   :  { %3674 = vmatpush.msra.mxu0 %v9245_v21 }
0x2d82   :  { %3675 = vmatpush.msra.mxu0 %v9246_v63  ;;  %v3347_v63 = vstv %s3909_s12 }
0x2d84   :  { %3676 = vmatpush.msra.mxu0 %v9247_v25  ;;  %v3349_v25 = vstv %s3910_s23 }
0x2d86   :  { %3677 = vmatpush.msra.mxu0 %v9248_v0  ;;  %v3913_v0 = vld [vmem:[%s8375_s3 + $0x10] sm:$0xff] }
0x2d88   :  { %3678 = vmatpush.msra.mxu0 %v9249_v5  ;;  %v3354_v5 = vstv %s3911_s24 }
0x2d8a   :  { %3679 = vmatpush.msra.mxu0 %v9250_v56 }
0x2d8c   :  { %3680 = vmatpush.msra.mxu0 %v9251_v16 }
0x2d8e   :  { %3681 = vmatpush.msra.mxu0 %v9252_v7  ;;  %v3350_v7 = vmul.f32 %v3349_v25, %v8198_v18 }
0x2d90   :  { %3682 = vmatpush.msra.mxu0 %v9253_v24  ;;  %v3355_v24 = vmul.f32 %v3913_v0, %v3354_v5 }
0x2d92   :  { %3683 = vmatpush.msra.mxu0 %v9254_v42 }
0x2df0   :  { %v3332_v53 = vpop.f32.mrf.mxu0 }
0x2df1   :  { %v3333_v14 = vadd.f32 %v8111_v34, %v3332_v53 }
0x2df3   :  { %v3343_v36 = vmul.f32 %v3342_v51, %v3333_v14 }
0x2df5   :  { %v3344_v21 = vsub.f32 %v3341_v46, %v3343_v36 }
0x2df7   :  { %v3912_v56 = vclamps-f32 %v3344_v21, 1.0 }
0x2df9   :  { %v3348_v16 = vmul.f32 %v3912_v56, %v3347_v63 }
0x2dfb   :  { %v3351_v42 = vadd.f32 %v3350_v7, %v3348_v16 }
0x2dfd   :  { %v8333_v61 = vadd.f32 %v3355_v24, %v3351_v42 }
0x2dff   :  { %3378 = vmatmul.f32.vlgmr.msra.gmra.mxu1 %v8333_v61 }
0x2e7c   :  { %v3379_v49 = vpop.f32.mrf.mxu1 }
0x2e7d   :  { %v3380_v41 = vadd.f32 %v3957_v37, %v3379_v49 }
0x2e7f   :  { %v3382_v54 = vadd.f32 %v3380_v41, %v4920_v50 }
0x2e81   :  { %v3383_v20 = vmin.f32 %v3382_v54, 20.0 }
0x2e83   :  { %v3384_v12 = vmul.f32 1.442695, %v3383_v20 }
0x2e85   :  { %4175 = vpow2.f32 %v3384_v12  ;;  %v3517_v12 = vstv %s3918_s10 }
0x2e8b   :  { %v4176_v6 = vpop.eup %4175 }
0x2e8c   :  { %v3386_v15 = vadd.f32 1.0, %v4176_v6  ;;  %v3519_v6 = vstv %s3919_s29 }
0x2e8e   :  { %v3387_v18 = vmul.f32 %v3386_v15, %v3386_v15 }
0x2e90   :  { %v3389_v55 = vadd.f32 1.0, %v3387_v18  ;;  %v3915_v39 = vadd.f32 -1.0, %v3387_v18  ;;  %v3518_v18 = vmul.f32 %v3517_v12, %v8333_v61 }
0x2e92   :  { %4177 = vrcp.f32 %v3389_v55  ;;  %v3401_v57 = vand.u32 2147483648, %v3389_v55  ;;  %v3399_v44 = vand.u32 2147483647, %v3389_v55  ;;  %vm3395_vm9 = vweird.f32 %v3389_v55 }
0x2e94   :  { %v3402_v43 = vor.u32 1.1754944e-38, %v3401_v57  ;;  %vm3400_vm11 = vcmp.eq.f32.partialorder %v3399_v44, 8.507059e+37  ;;  %v3924_v57 = vld [vmem:[%s8375_s3 + $0x8] sm:$0xff] }
0x2e98   :  { %v4178_v33 = vpop.eup %4177 }
0x2e99   :  { %v3391_v30 = vmul.f32 %v4178_v33, %v3389_v55  ;;  %vm3396_vm8 = vweird.f32 %v4178_v33 }
0x2e9a   :  { %vm3397_vm10 = vmor %vm3395_vm9, %vm3396_vm8 }
0x2e9b   :  { %v3392_v28 = vsub.f32 1.0, %v3391_v30  ;;  %v3524_v30 = vstv %s3920_s15 }
0x2e9d   :  { %v3393_v58 = vmul.f32 %v4178_v33, %v3392_v28  ;;  %v3526_v28 = vstv %s3921_s30 }
0x2e9f   :  { %v3394_v3 = vadd.f32 %v4178_v33, %v3393_v58  ;;  %v3531_v58 = vstv %s3922_s16 }
0x2ea1   :  { %v3398_v48 = vsel %vm3397_vm10, %v4178_v33, %v3394_v3 }
0x2ea2   :  { %v3403_v45 = vsel %vm3400_vm11, %v3402_v43, %v3398_v48  ;;  %v3527_v43 = vmul.f32 %v3526_v28, %v8333_v61 }
0x2ea3   :  { %v3404_v40 = vmul.f32 %v3915_v39, %v3403_v45  ;;  %v3532_v39 = vmul.f32 %v3924_v57, %v3531_v58 }
0x2ea5   :  { %v3405_v4 = vmul.f32 %v3404_v40, %v3382_v54 }
0x2ea7   :  { %3422 = vmatmul.f32.vlgmr.msra.gmra.mxu2 %v3405_v4 }
0x2f2a   :  { %v3423_v9 = vpop.f32.mrf.mxu2 }
0x2f2b   :  { %v3424_v22 = vadd.f32 %v7907_v62, %v3423_v9 }
0x2f2d   :  { %v3426_v2 = vmin.f32 %v3424_v22, 20.0 }
0x2f2f   :  { %v3427_v35 = vmul.f32 1.442695, %v3426_v2 }
0x2f31   :  { %4179 = vpow2.f32 %v3427_v35 }
0x2f37   :  { %v4180_v27 = vpop.eup %4179 }
0x2f38   :  { %v3429_v60 = vadd.f32 1.0, %v4180_v27 }
0x2f3a   :  { %v3430_v13 = vmul.f32 %v3429_v60, %v3429_v60 }
0x2f3c   :  { %v3432_v29 = vadd.f32 1.0, %v3430_v13  ;;  %v3916_v62 = vadd.f32 -1.0, %v3430_v13 }
0x2f3e   :  { %4181 = vrcp.f32 %v3432_v29  ;;  %v3444_v31 = vand.u32 2147483648, %v3432_v29  ;;  %v3442_v1 = vand.u32 2147483647, %v3432_v29  ;;  %vm3438_vm13 = vweird.f32 %v3432_v29 }
0x2f40   :  { %v3445_v59 = vor.u32 1.1754944e-38, %v3444_v31  ;;  %vm3443_vm15 = vcmp.eq.f32.partialorder %v3442_v1, 8.507059e+37 }
0x2f44   :  { %v4182_v38 = vpop.eup %4181 }
0x2f45   :  { %v3434_v19 = vmul.f32 %v4182_v38, %v3432_v29  ;;  %vm3439_vm12 = vweird.f32 %v4182_v38 }
0x2f46   :  { %vm3440_vm14 = vmor %vm3438_vm13, %vm3439_vm12 }
0x2f47   :  { %v3435_v17 = vsub.f32 1.0, %v3434_v19 }
0x2f49   :  { %v3436_v10 = vmul.f32 %v4182_v38, %v3435_v17 }
0x2f4b   :  { %v3437_v8 = vadd.f32 %v4182_v38, %v3436_v10 }
0x2f4d   :  { %v3441_v32 = vsel %vm3440_vm14, %v4182_v38, %v3437_v8 }
0x2f4e   :  { %v3446_v26 = vsel %vm3443_vm15, %v3445_v59, %v3441_v32 }
0x2f4f   :  { %v3447_v23 = vmul.f32 %v3916_v62, %v3446_v26 }
0x2f51   :  { %v3448_v11 = vmul.f32 %v3447_v23, %v3424_v22  ;;  %v4562_v23 = vld [vmem:[%s8381_s9] ss:$0 sm:$0xff] }
0x2f53   :  { %3465 = vmatmul.f32.vlgmr.msra.gmra.mxu3 %v3448_v11 }
0x2fd6   :  { %v3466_v53 = vpop.f32.mrf.mxu3 }
0x2fd7   :  { %v3467_v52 = vadd.f32 %v9238_v47, %v3466_v53 }
0x2fd9   :  { %v3469_v51 = vmin.f32 %v3467_v52, 20.0 }
0x2fdb   :  { %v3470_v14 = vmul.f32 1.442695, %v3469_v51 }
0x2fdd   :  { %4183 = vpow2.f32 %v3470_v14 }
0x2fe3   :  { %v4184_v46 = vpop.eup %4183 }
0x2fe4   :  { %v3472_v36 = vadd.f32 1.0, %v4184_v46 }
0x2fe6   :  { %v3473_v21 = vmul.f32 %v3472_v36, %v3472_v36 }
0x2fe8   :  { %v3475_v63 = vadd.f32 1.0, %v3473_v21  ;;  %v3917_v47 = vadd.f32 -1.0, %v3473_v21 }
0x2fea   :  { %4185 = vrcp.f32 %v3475_v63  ;;  %v3487_v56 = vand.u32 2147483648, %v3475_v63  ;;  %v3485_v7 = vand.u32 2147483647, %v3475_v63  ;;  %vm3481_vm1 = vweird.f32 %v3475_v63 }
0x2fec   :  { %v3488_v42 = vor.u32 1.1754944e-38, %v3487_v56  ;;  %vm3486_vm3 = vcmp.eq.f32.partialorder %v3485_v7, 8.507059e+37 }
0x2ff0   :  { %v4186_v25 = vpop.eup %4185 }
0x2ff1   :  { %v3477_v0 = vmul.f32 %v4186_v25, %v3475_v63  ;;  %vm3482_vm0 = vweird.f32 %v4186_v25 }
0x2ff2   :  { %vm3483_vm2 = vmor %vm3481_vm1, %vm3482_vm0 }
0x2ff3   :  { %v3478_v5 = vsub.f32 1.0, %v3477_v0 }
0x2ff5   :  { %v3479_v16 = vmul.f32 %v4186_v25, %v3478_v5 }
0x2ff7   :  { %v3480_v24 = vadd.f32 %v4186_v25, %v3479_v16 }
0x2ff9   :  { %v3484_v37 = vsel %vm3483_vm2, %v4186_v25, %v3480_v24 }
0x2ffa   :  { %v3489_v49 = vsel %vm3486_vm3, %v3488_v42, %v3484_v37 }
0x2ffb   :  { %v3490_v41 = vmul.f32 %v3917_v47, %v3489_v49 }
0x2ffd   :  { %v3491_v54 = vmul.f32 %v3490_v41, %v3467_v52 }
0x2fff   :  { %3508 = vmatmul.f32.vlgmr.msrb.gmra.mxu0 %v3491_v54  ;;  %v4563_v54 = vld [vmem:[%s8383_s11] ss:$0 sm:$0xff]  ;;  %s3688_s11 = sld [smem:[#allocation3]] }
0x307c   :  { %v3509_v20 = vpop.f32.mrf.mxu0 }
0x307d   :  { %v3510_v15 = vadd.f32 %v8111_v34, %v3509_v20  ;;  %v3958_v34 = vld [vmem:[%s8376_s4] ss:$0 sm:$0xff] }
0x307f   :  { %v3520_v55 = vmul.f32 %v3519_v6, %v3510_v15 }
0x3081   :  { %v3521_v33 = vsub.f32 %v3518_v18, %v3520_v55 }
0x3083   :  { %v3923_v44 = vclamps-f32 %v3521_v33, 1.0 }
0x3085   :  { %v3525_v3 = vmul.f32 %v3923_v44, %v3524_v30 }
0x3087   :  { %v3528_v48 = vadd.f32 %v3527_v43, %v3525_v3 }
0x3089   :  { %v8348_v45 = vadd.f32 %v3532_v39, %v3528_v48 }
0x308b   :  { %3554 = vmatmul.f32.vlgmr.msrb.gmra.mxu1 %v8348_v45 }
0x3108   :  { %v3555_v40 = vpop.f32.mrf.mxu1 }
0x3109   :  { %v3556_v4 = vadd.f32 %v3958_v34, %v3555_v40 }
0x310b   :  { %v3558_v9 = vadd.f32 %v3556_v4, %v4920_v50 }
0x310d   :  { %v3559_v22 = vmin.f32 %v3558_v9, 20.0 }
0x310f   :  { %v3560_v2 = vmul.f32 1.442695, %v3559_v22 }
0x3111   :  { %4187 = vpow2.f32 %v3560_v2  ;;  %v3693_v2 = vstv %s3688_s11 }
0x3117   :  { %v4188_v35 = vpop.eup %4187 }
0x3118   :  { %v3562_v27 = vadd.f32 1.0, %v4188_v35  ;;  %v3695_v35 = vstv %s3928_s20 }
0x311a   :  { %v3563_v61 = vmul.f32 %v3562_v27, %v3562_v27  ;;  %v4564_v27 = vld [vmem:[%s8385_s13] ss:$0 sm:$0xff] }
0x311c   :  { %v3565_v60 = vadd.f32 1.0, %v3563_v61  ;;  %v3925_v50 = vadd.f32 -1.0, %v3563_v61 }
0x311e   :  { %4189 = vrcp.f32 %v3565_v60  ;;  %v3577_v19 = vand.u32 2147483648, %v3565_v60  ;;  %v3575_v31 = vand.u32 2147483647, %v3565_v60  ;;  %vm3571_vm5 = vweird.f32 %v3565_v60 }
0x3120   :  { %v3578_v1 = vor.u32 1.1754944e-38, %v3577_v19  ;;  %vm3576_vm7 = vcmp.eq.f32.partialorder %v3575_v31, 8.507059e+37  ;;  %v3702_v19 = vstv %s3930_s21  ;;  %v3706_v31 = vstv %s3931_s22 }
0x3124   :  { %v4190_v13 = vpop.eup %4189 }
0x3125   :  { %v3567_v29 = vmul.f32 %v4190_v13, %v3565_v60  ;;  %vm3572_vm4 = vweird.f32 %v4190_v13  ;;  %v3694_v60 = vmul.f32 %v3693_v2, %v8348_v45 }
0x3126   :  { %vm3573_vm6 = vmor %vm3571_vm5, %vm3572_vm4 }
0x3127   :  { %v3568_v38 = vsub.f32 1.0, %v3567_v29 }
0x3129   :  { %v3569_v17 = vmul.f32 %v4190_v13, %v3568_v38  ;;  %v3700_v38 = vstv %s3929_s7 }
0x312b   :  { %v3570_v10 = vadd.f32 %v4190_v13, %v3569_v17  ;;  %v3705_v17 = vld [vmem:[%s8375_s3] sm:$0xff] }
0x312d   :  { %v3574_v8 = vsel %vm3573_vm6, %v4190_v13, %v3570_v10 }
0x312e   :  { %v3579_v59 = vsel %vm3576_vm7, %v3578_v1, %v3574_v8  ;;  %v3707_v8 = vmul.f32 %v3706_v31, %v3705_v17 }
0x312f   :  { %v3580_v62 = vmul.f32 %v3925_v50, %v3579_v59  ;;  %v3703_v50 = vmul.f32 %v3702_v19, %v8348_v45 }
0x3131   :  { %v3581_v32 = vmul.f32 %v3580_v62, %v3558_v9 }
0x3133   :  { %3598 = vmatmul.f32.vlgmr.msrb.gmra.mxu2 %v3581_v32 }
0x31b6   :  { %v3599_v26 = vpop.f32.mrf.mxu2 }
0x31b7   :  { %v3600_v11 = vadd.f32 %v4562_v23, %v3599_v26 }
0x31b9   :  { %v3602_v53 = vmin.f32 %v3600_v11, 20.0 }
0x31bb   :  { %v3603_v52 = vmul.f32 1.442695, %v3602_v53 }
0x31bd   :  { %4191 = vpow2.f32 %v3603_v52 }
0x31c3   :  { %v4192_v51 = vpop.eup %4191 }
0x31c4   :  { %v3605_v14 = vadd.f32 1.0, %v4192_v51 }
0x31c6   :  { %v3606_v46 = vmul.f32 %v3605_v14, %v3605_v14 }
0x31c8   :  { %v3608_v36 = vadd.f32 1.0, %v3606_v46  ;;  %v3926_v24 = vadd.f32 -1.0, %v3606_v46 }
0x31ca   :  { %4193 = vrcp.f32 %v3608_v36  ;;  %v3620_v0 = vand.u32 2147483648, %v3608_v36  ;;  %v3618_v56 = vand.u32 2147483647, %v3608_v36  ;;  %vm3614_vm9 = vweird.f32 %v3608_v36 }
0x31cc   :  { %v3621_v7 = vor.u32 1.1754944e-38, %v3620_v0  ;;  %vm3619_vm11 = vcmp.eq.f32.partialorder %v3618_v56, 8.507059e+37 }
0x31d0   :  { %v4194_v21 = vpop.eup %4193 }
0x31d1   :  { %v3610_v63 = vmul.f32 %v4194_v21, %v3608_v36  ;;  %vm3615_vm8 = vweird.f32 %v4194_v21 }
0x31d2   :  { %vm3616_vm10 = vmor %vm3614_vm9, %vm3615_vm8 }
0x31d3   :  { %v3611_v25 = vsub.f32 1.0, %v3610_v63 }
0x31d5   :  { %v3612_v5 = vmul.f32 %v4194_v21, %v3611_v25 }
0x31d7   :  { %v3613_v16 = vadd.f32 %v4194_v21, %v3612_v5 }
0x31d9   :  { %v3617_v42 = vsel %vm3616_vm10, %v4194_v21, %v3613_v16 }
0x31da   :  { %v3622_v47 = vsel %vm3619_vm11, %v3621_v7, %v3617_v42 }
0x31db   :  { %v3623_v37 = vmul.f32 %v3926_v24, %v3622_v47 }
0x31dd   :  { %v3624_v49 = vmul.f32 %v3623_v37, %v3600_v11 }
0x31df   :  { %3641 = vmatmul.f32.vlgmr.msrb.gmra.mxu3 %v3624_v49 }
0x3262   :  { %v3642_v41 = vpop.f32.mrf.mxu3 }
0x3263   :  { %v3643_v20 = vadd.f32 %v4563_v54, %v3642_v41 }
0x3265   :  { %v3645_v12 = vmin.f32 %v3643_v20, 20.0 }
0x3267   :  { %v3646_v6 = vmul.f32 1.442695, %v3645_v12 }
0x3269   :  { %4195 = vpow2.f32 %v3646_v6 }
0x326f   :  { %v4196_v15 = vpop.eup %4195 }
0x3270   :  { %v3648_v18 = vadd.f32 1.0, %v4196_v15 }
0x3272   :  { %v3649_v55 = vmul.f32 %v3648_v18, %v3648_v18 }
0x3274   :  { %v3651_v33 = vadd.f32 1.0, %v3649_v55  ;;  %v3927_v48 = vadd.f32 -1.0, %v3649_v55 }
0x3276   :  { %4197 = vrcp.f32 %v3651_v33  ;;  %v3663_v58 = vand.u32 2147483648, %v3651_v33  ;;  %v3661_v3 = vand.u32 2147483647, %v3651_v33  ;;  %vm3657_vm13 = vweird.f32 %v3651_v33 }
0x3278   :  { %v3664_v39 = vor.u32 1.1754944e-38, %v3663_v58  ;;  %vm3662_vm15 = vcmp.eq.f32.partialorder %v3661_v3, 8.507059e+37 }
0x327c   :  { %v4198_v30 = vpop.eup %4197 }
0x327d   :  { %v3653_v28 = vmul.f32 %v4198_v30, %v3651_v33  ;;  %vm3658_vm12 = vweird.f32 %v4198_v30 }
0x327e   :  { %vm3659_vm14 = vmor %vm3657_vm13, %vm3658_vm12 }
0x327f   :  { %v3654_v57 = vsub.f32 1.0, %v3653_v28 }
0x3281   :  { %v3655_v44 = vmul.f32 %v4198_v30, %v3654_v57 }
0x3283   :  { %v3656_v43 = vadd.f32 %v4198_v30, %v3655_v44 }
0x3285   :  { %v3660_v34 = vsel %vm3659_vm14, %v4198_v30, %v3656_v43 }
0x3286   :  { %v3665_v40 = vsel %vm3662_vm15, %v3664_v39, %v3660_v34 }
0x3287   :  { %v3666_v4 = vmul.f32 %v3927_v48, %v3665_v40 }
0x3289   :  { %v3667_v9 = vmul.f32 %v3666_v4, %v3643_v20 }
0x328b   :  { %3684 = vmatmul.f32.vlgmr.msra.gmra.mxu0 %v3667_v9 }
0x3308   :  { %v3685_v22 = vpop.f32.mrf.mxu0 }
0x3309   :  { %v3686_v61 = vadd.f32 %v4564_v27, %v3685_v22 }
0x330b   :  { %v3696_v13 = vmul.f32 %v3695_v35, %v3686_v61 }
0x330d   :  { %v3697_v29 = vsub.f32 %v3694_v60, %v3696_v13 }
0x330f   :  { %v3932_v10 = vclamps-f32 %v3697_v29, 1.0 }
0x3311   :  { %v3701_v1 = vmul.f32 %v3932_v10, %v3700_v38 }
0x3313   :  { %v3704_v59 = vadd.f32 %v3703_v50, %v3701_v1 }
0x3315   :  { %v3708_v62 = vadd.f32 %v3707_v8, %v3704_v59 }
0x3317   :  { %v3933_v32 = vclamps-f32 %v3708_v62, 1.0 }
0x3319   :  { %3711 = vst [vmem:[%s8386_s14] sm:$0xff] %v3933_v32 }

</bundles_post_ra>
